<compile_context>
chip_gen: v5e
topology: v5e:2x2
jax: 0.10.0
libtpu: 0.0.40
codegen_flags: <defaults>
</compile_context>

<pallas_src>
import jax
import jax.numpy as jnp
from jax.experimental import pallas as pl
from jax.experimental.pallas import tpu as pltpu

# ----------------------------- module hyper-params --------------------------
IN_CHANNELS = 4                 # small synthetic channel count
CLIP_SIZE = 1
ATTN_SIZE = 9
DEFORM_GROUPS = 1
MAX_RESIDUE_MAGNITUDE = 0.01
HIDDEN = 64
NUM_IN = IN_CHANNELS * (1 + CLIP_SIZE) + CLIP_SIZE * 2        # 2C + 2 = 10
OUT_CH = CLIP_SIZE * DEFORM_GROUPS * ATTN_SIZE * 2            # 18
OUT_LANES = 32                                                # lane-padded head width
NEG_SLOPE = 0.1
_CONV_HALO = 4                  # receptive-field halo of four stacked 3x3 convs


def _leaky_relu(x):
    return jnp.where(x >= 0, x, NEG_SLOPE * x)


# ----------------------------- Pallas kernel --------------------------------
def gda_conv_offset_kernel(x_ref, w0_ref, b0_ref, w3_ref, b3_ref, w5_ref, b5_ref,
                           out_ref, res_ref):
    """One (batch, row-tile) grid step of the conv_offset stack.

    x_ref   : (1, THp, W, NUM_IN)   bf16  halo'd input strip (THp = TH + 2*halo)
    w0_ref  : (NUM_IN, 64)          bf16  1x1 conv
    b0_ref  : (1, 64)               f32
    w3_ref  : (4, 192, 192)         bf16  3x3 convs; K = kx*64 + cin, N = ky*64 + cout
    b3_ref  : (4, 64)               f32
    w5_ref  : (64, 32)              bf16  final 1x1 conv, zero-padded 18 -> 32
    b5_ref  : (1, 32)               f32
    out_ref : (1, TH, W, 32)        f32   0.01 * tanh(conv stack); lanes 18..31 are 0
    res_ref : ((THp + 2) * W, 192)  f32   row-padded per-layer ky partial results
    """
    _, THp, W, cin = x_ref.shape
    _, TH, _, out_lanes = out_ref.shape
    halo = (THp - TH) // 2
    HWs = THp * W
    C = HIDDEN
    f32 = jnp.float32
    bf16 = jnp.bfloat16

    # x +-1 validity masks on the flattened (row-major) pixel axis, pre-broadcast once
    # to (HWs, C) so the four conv layers don't re-materialize the broadcast.
    col = jax.lax.broadcasted_iota(jnp.int32, (HWs, C), 0) % W
    mask_l = col > 0            # x-1 is in bounds
    mask_r = col < (W - 1)      # x+1 is in bounds

    # The two halo row-blocks of the result scratch are never written -> zero them once.
    res_ref[0:W, :] = jnp.zeros((W, 3 * C), f32)
    res_ref[(THp + 1) * W:(THp + 2) * W, :] = jnp.zeros((W, 3 * C), f32)

    # ---- layer 0: 1x1 conv (NUM_IN -> 64) + LeakyReLU (single MXU matmul) ------------
    x = x_ref[0].reshape(HWs, cin)                                  # already bf16
    h32 = _leaky_relu(jnp.dot(x, w0_ref[...], preferred_element_type=f32) + b0_ref[...])

    # ---- layers 1..4: 3x3 conv (64 -> 64), zero padding 1, + LeakyReLU ----------------
    # kx fused into K (=192) and ky fused into N (=192): one bf16 MXU matmul per layer.
    # The three ky partial results are combined via the row-padded f32 scratch with
    # free 8-aligned row offsets:
    #   conv(y) = res(y-1)[:, 0:64] + res(y)[:, 64:128] + res(y+1)[:, 128:192]
    for layer in range(4):
        h_bf = h32.astype(bf16)
        # left / right x-neighbours via XLU sublane rolls; wrapped rows are masked off.
        h_l = jnp.where(mask_l, pltpu.roll(h32, 1, 0).astype(bf16), 0)
        h_r = jnp.where(mask_r, pltpu.roll(h32, HWs - 1, 0).astype(bf16), 0)  # roll by -1
        row_block = jnp.concatenate([h_l, h_bf, h_r], axis=-1)                # (HWs, 192)

        res_ref[W:W + HWs, :] = jnp.dot(row_block, w3_ref[layer],
                                        preferred_element_type=f32)
        acc = (res_ref[0:HWs, 0:C]                          # ky = 0  (rows y-1)
               + res_ref[W:W + HWs, C:2 * C]                # ky = 1  (rows y)
               + res_ref[2 * W:2 * W + HWs, 2 * C:3 * C])   # ky = 2  (rows y+1)
        h32 = _leaky_relu(acc + b3_ref[layer:layer + 1, :])

    # ---- layer 5: 1x1 conv (64 -> 32 lane-padded head), bounded residue ---------------
    # Only the TH non-halo rows are fed to the head and written back.
    h_c = h32[halo * W:(halo + TH) * W, :].astype(bf16)
    out = jnp.dot(h_c, w5_ref[...], preferred_element_type=f32) + b5_ref[...]
    out_ref[0] = (MAX_RESIDUE_MAGNITUDE * jnp.tanh(out)).reshape(TH, W, out_lanes)


# ----------------------------- wrapper helpers -------------------------------
def _pick_tile_rows(H, W):
    """Largest row tile (from a small candidate set) that divides H and keeps the
    per-tile working set comfortably inside v7x's 64 MiB VMEM (target <= ~12 MiB)."""
    candidates = [c for c in (64, 32, 16, 8) if c < H and H % c == 0]
    if not candidates:
        return H, 0                              # single strip, no halo needed
    budget = 12 * 1024 * 1024
    for th in candidates:                        # biggest first
        thp = th + 2 * _CONV_HALO
        hws = thp * W
        foot = ((hws + 2 * W) * 256 * 4          # f32 ky-result scratch (192 -> 256 lanes)
                + 2 * hws * 128 * 2              # bf16 input block, lane-padded to 128
                + 2 * th * W * 128 * 4           # f32 output block, lane-padded to 128
                + 12 * hws * HIDDEN * 4)         # live activation temporaries
        if foot <= budget:
            return th, _CONV_HALO
    return candidates[-1], _CONV_HALO


def _tile_rows_with_halo(x, th, halo):
    """(B, H, W, C) -> (B * n_tiles, th + 2*halo, W, C) with zero-padded row halos."""
    B, H, W, C = x.shape
    n_tiles = H // th
    if halo == 0:
        return x.reshape(B * n_tiles, th, W, C)
    xp = jnp.pad(x, ((0, 0), (halo, halo), (0, 0), (0, 0)))
    tiles = [xp[:, t * th:t * th + th + 2 * halo] for t in range(n_tiles)]
    return jnp.stack(tiles, axis=1).reshape(B * n_tiles, th + 2 * halo, W, C)


def _vmem_limit_bytes(THp, TH, W):
    HWs = THp * W
    weight_bytes = (16 * 128 * 2 + 8 * 128 * 4          # w0 / b0 (padded)
                    + 4 * 192 * 256 * 2 + 8 * 128 * 4   # w3 / b3
                    + 64 * 128 * 2 + 8 * 128 * 4)       # w5 / b5
    vmem_est = (2 * HWs * 128 * 2          # double-buffered bf16 input block (10 -> 128 lanes)
                + 2 * TH * W * 128 * 4     # double-buffered f32 output block (32 -> 128 lanes)
                + (HWs + 2 * W) * 256 * 4  # f32 ky-result scratch (192 -> 256 lanes)
                + 2 * weight_bytes         # resident weights
                + 14 * HWs * HIDDEN * 4)   # live activation temporaries
    try:
        cap = int(pltpu.get_tpu_info().vmem_capacity_bytes)
        budget = int(cap * 0.80)           # ~51 MiB on v7x, ~102 MiB on v5e/v6e
    except Exception:
        budget = 48 * 1024 * 1024          # conservative default, safe on v7x's 64 MiB
    return int(min(budget, max(int(1.5 * vmem_est), 32 * 1024 * 1024)))


def gda_conv_offset(x_nhwc, params):
    B, H, W, cin = x_nhwc.shape
    assert cin == NUM_IN
    # W % 8 keeps the (row, channel) flattening and scratch row offsets sublane-aligned
    # for f32; W % 16 is preferred so bf16 tiles stay aligned too.
    assert W % 8 == 0, "W must be a multiple of 8"
    w0, b0, w3, b3, w5, b5 = params

    th, halo = _pick_tile_rows(H, W)
    n_tiles = H // th
    THp = th + 2 * halo

    # Kernel-format weights: bf16 MXU operands; 3x3 weights packed with kx on the K axis
    # (K = kx*64 + cin) and ky on the N axis (N = ky*64 + cout); the 18-channel head is
    # padded to 32 lanes (zero weights/bias => padded lanes are exactly 0.01*tanh(0)=0).
    w0b = w0.astype(jnp.bfloat16)
    w3r = w3.reshape(4, 3, 3, HIDDEN, HIDDEN)                     # (layer, ky, kx, cin, cout)
    w3n = jnp.transpose(w3r, (0, 2, 3, 1, 4)).reshape(4, 3 * HIDDEN, 3 * HIDDEN)
    w3n = w3n.astype(jnp.bfloat16)
    w5p = jnp.zeros((HIDDEN, OUT_LANES), jnp.float32).at[:, :OUT_CH].set(w5)
    w5p = w5p.astype(jnp.bfloat16)
    b5p = jnp.zeros((1, OUT_LANES), jnp.float32).at[:, :OUT_CH].set(b5)

    # bf16 input halves the HBM->VMEM DMA (it is a bf16 matmul operand anyway); each row
    # tile carries a 4-row recompute halo, zero-padded at the image edges.
    # TODO(synk): the wrapper-side halo duplication costs an extra HBM copy of the tiny
    #             10-channel input; a pl.ANY input + manual halo DMA would avoid it.
    x_t = _tile_rows_with_halo(x_nhwc.astype(jnp.bfloat16), th, halo)  # (B*T, THp, W, 10)

    out = pl.pallas_call(
        gda_conv_offset_kernel,
        out_shape=jax.ShapeDtypeStruct((B * n_tiles, th, W, OUT_LANES), jnp.float32),
        grid_spec=pltpu.PrefetchScalarGridSpec(
            num_scalar_prefetch=0,
            grid=(B * n_tiles,),
            in_specs=[
                pl.BlockSpec((1, THp, W, NUM_IN), lambda g: (g, 0, 0, 0)),
                pl.BlockSpec((NUM_IN, HIDDEN), lambda g: (0, 0)),
                pl.BlockSpec((1, HIDDEN), lambda g: (0, 0)),
                pl.BlockSpec((4, 3 * HIDDEN, 3 * HIDDEN), lambda g: (0, 0, 0)),
                pl.BlockSpec((4, HIDDEN), lambda g: (0, 0)),
                pl.BlockSpec((HIDDEN, OUT_LANES), lambda g: (0, 0)),
                pl.BlockSpec((1, OUT_LANES), lambda g: (0, 0)),
            ],
            out_specs=pl.BlockSpec((1, th, W, OUT_LANES), lambda g: (g, 0, 0, 0)),
            scratch_shapes=[pltpu.VMEM(((THp + 2) * W, 3 * HIDDEN), jnp.float32)],
        ),
        compiler_params=pltpu.CompilerParams(
            dimension_semantics=("parallel",),
            vmem_limit_bytes=_vmem_limit_bytes(THp, th, W)),
    )(x_t, w0b, b0, w3n, b3, w5p, b5p)

    out = out.reshape(B, n_tiles * th, W, OUT_LANES)
    return out[..., :OUT_CH]


# ----------------------------- plain-JAX glue --------------------------------
def flow_warp(x, flow):
    """Bilinear warp == F.grid_sample(..., 'bilinear', 'zeros', align_corners=True).

    x: (n, c, h, w), flow: (n, 2, h, w) with flow[:,0]=dx (width), flow[:,1]=dy (height).
    """
    n, c, h, w = x.shape
    gy, gx = jnp.meshgrid(jnp.arange(h, dtype=x.dtype),
                          jnp.arange(w, dtype=x.dtype), indexing='ij')
    vx = gx[None] + flow[:, 0]
    vy = gy[None] + flow[:, 1]

    x0 = jnp.floor(vx)
    y0 = jnp.floor(vy)
    x1 = x0 + 1.0
    y1 = y0 + 1.0
    wx1 = vx - x0
    wx0 = 1.0 - wx1
    wy1 = vy - y0
    wy0 = 1.0 - wy1

    def corner(xb, xi, yi):
        valid = ((xi >= 0) & (xi <= w - 1) & (yi >= 0) & (yi <= h - 1)).astype(xb.dtype)
        xc = jnp.clip(xi, 0, w - 1).astype(jnp.int32)
        yc = jnp.clip(yi, 0, h - 1).astype(jnp.int32)
        return xb[:, yc, xc] * valid[None]

    def warp_one(xb, x0b, x1b, y0b, y1b, wx0b, wx1b, wy0b, wy1b):
        out = (wy0b * wx0b)[None] * corner(xb, x0b, y0b)
        out = out + (wy0b * wx1b)[None] * corner(xb, x1b, y0b)
        out = out + (wy1b * wx0b)[None] * corner(xb, x0b, y1b)
        out = out + (wy1b * wx1b)[None] * corner(xb, x1b, y1b)
        return out

    return jax.vmap(warp_one)(x, x0, x1, y0, y1, wx0, wx1, wy0, wy1)


def gda_forward(frame0, frame1, flow, params):
    """frame0, frame1: (B, C, H, W) float32; flow: (B, 1, 2, H, W) float32.

    Returns (dists_k, flows_k) with shapes (B, 1, H, W, K) and (B, 1, H, W, K, 2),
    matching the PyTorch module exactly.
    """
    warped = flow_warp(frame0, flow[:, 0])
    to_nhwc = lambda t: jnp.transpose(t, (0, 2, 3, 1))
    x_nhwc = jnp.concatenate(
        [to_nhwc(frame1), to_nhwc(warped), to_nhwc(flow[:, 0])], axis=-1)
    residue = gda_conv_offset(x_nhwc, params)                 # (B, H, W, 18)
    B, H, W, _ = residue.shape
    residue = residue.reshape(B, H, W, ATTN_SIZE, 2)          # channel = k*2 + tw
    flow_hw = to_nhwc(flow[:, 0])[:, :, :, None, :]           # (B, H, W, 1, 2)
    flows_k = (residue + flow_hw)[:, None]                    # (B, 1, H, W, K, 2)
    dists_k = jnp.zeros(flows_k.shape[:-1], flows_k.dtype)    # (B, 1, H, W, K)
    return dists_k, flows_k


# ----------------------------- pure-JAX reference ----------------------------
def _reference_conv_offset(x_nchw, params):
    w0, b0, w3, b3, w5, b5 = params

    def conv(x, w_hwio, b, pad):
        w_oihw = jnp.transpose(w_hwio, (3, 2, 0, 1))
        y = jax.lax.conv_general_dilated(
            x, w_oihw, window_strides=(1, 1),
            padding=[(pad, pad), (pad, pad)],
            dimension_numbers=('NCHW', 'OIHW', 'NCHW'))
        return y + b.reshape(1, -1, 1, 1)

    h = _leaky_relu(conv(x_nchw, w0.reshape(1, 1, NUM_IN, HIDDEN), b0.reshape(-1), 0))
    for layer in range(4):
        h = _leaky_relu(conv(h, w3[layer].reshape(3, 3, HIDDEN, HIDDEN), b3[layer], 1))
    out = conv(h, w5.reshape(1, 1, HIDDEN, OUT_CH), b5.reshape(-1), 0)
    return MAX_RESIDUE_MAGNITUDE * jnp.tanh(out)              # (B, 18, H, W)


def reference_forward(frame0, frame1, flow, params):
    warped = flow_warp(frame0, flow[:, 0])
    x = jnp.concatenate([frame1, warped, flow[:, 0]], axis=1)  # (B, 2C+2, H, W)
    flows_k = _reference_conv_offset(x, params)
    B, _, H, W = flows_k.shape
    flows_k = flows_k.reshape(B, ATTN_SIZE, 2, H, W)           # b (k tw) h w -> b k tw h w
    flows_k = flows_k + flow                                   # + flow (B,1,2,H,W)
    flows_k = jnp.transpose(flows_k, (0, 3, 4, 1, 2))[:, None]  # b 1 h w k tw
    dists_k = jnp.zeros(flows_k.shape[:-1], flows_k.dtype)
    return dists_k, flows_k


# ----------------------------- parameters ------------------------------------
def init_params(key):
    ks = jax.random.split(key, 6)

    def u(k, shape, fan_in):
        bound = 1.0 / jnp.sqrt(jnp.float32(fan_in))
        return jax.random.uniform(k, shape, jnp.float32, -bound, bound)

    w0 = u(ks[0], (NUM_IN, HIDDEN), NUM_IN)
    b0 = u(ks[1], (1, HIDDEN), NUM_IN)
    w3 = u(ks[2], (4, 9, HIDDEN, HIDDEN), 9 * HIDDEN)
    b3 = u(ks[3], (4, HIDDEN), 9 * HIDDEN)
    w5 = u(ks[4], (HIDDEN, OUT_CH), HIDDEN)
    b5 = u(ks[5], (1, OUT_CH), HIDDEN)
    return (w0, b0, w3, b3, w5, b5)


# ----------------------------- main -------------------------------------------
if __name__ == "__main__":
    key = jax.random.PRNGKey(0)
    k1, k2, k3, k4 = jax.random.split(key, 4)
    B, C, H, W = 2, IN_CHANNELS, 16, 16

    frame0 = jax.random.normal(k1, (B, C, H, W), jnp.float32)
    frame1 = jax.random.normal(k2, (B, C, H, W), jnp.float32)
    flow = 2.0 * jax.random.normal(k3, (B, 1, 2, H, W), jnp.float32)
    params = init_params(k4)

    dists_k, flows_k = jax.block_until_ready(
        jax.jit(gda_forward)(frame0, frame1, flow, params))

    # shape + semantics check against a pure-JAX f32 reference of the same forward pass
    dists_ref, flows_ref = reference_forward(frame0, frame1, flow, params)
    assert dists_k.shape == (B, 1, H, W, ATTN_SIZE)
    assert flows_k.shape == (B, 1, H, W, ATTN_SIZE, 2)
    assert bool(jnp.allclose(dists_k, dists_ref))
    # bf16 matmul operands (f32 accumulation) => small deviation from the f32 reference;
    # the residue itself is bounded by 0.01*tanh so the absolute error is << 1e-3.
    assert bool(jnp.allclose(flows_k, flows_ref, atol=2e-3, rtol=2e-3))

    print("KERNEL_OK")
</pallas_src>

<mosaic_0001>
module attributes {stable_mosaic.version = 11 : i64} {
  func.func @gda_conv_offset_kernel(%arg0: i32, %arg1: memref<1x16x16x10xbf16, #tpu.memory_space<vmem>>, %arg2: memref<10x64xbf16, #tpu.memory_space<vmem>>, %arg3: memref<1x64xf32, #tpu.memory_space<vmem>>, %arg4: memref<4x192x192xbf16, #tpu.memory_space<vmem>>, %arg5: memref<4x64xf32, #tpu.memory_space<vmem>>, %arg6: memref<64x32xbf16, #tpu.memory_space<vmem>>, %arg7: memref<1x32xf32, #tpu.memory_space<vmem>>, %arg8: memref<1x8x16x32xf32, #tpu.memory_space<vmem>>, %arg9: memref<288x192xf32, #tpu.memory_space<vmem>>) attributes {dimension_semantics = [#tpu.dimension_semantics<parallel>], iteration_bounds = array<i64: 4>, scalar_prefetch = 0 : i64, scratch_operands = 1 : i64, tpu.core_type = #tpu.core_type<tc>, window_params = [{transform_indices = @transform_0, window_bounds = array<i64: 1, 16, 16, 10>}, {pipeline_mode = #tpu.pipeline_mode<synchronous>, transform_indices = @transform_1, window_bounds = array<i64: 10, 64>}, {pipeline_mode = #tpu.pipeline_mode<synchronous>, transform_indices = @transform_2, window_bounds = array<i64: 1, 64>}, {pipeline_mode = #tpu.pipeline_mode<synchronous>, transform_indices = @transform_3, window_bounds = array<i64: 4, 192, 192>}, {pipeline_mode = #tpu.pipeline_mode<synchronous>, transform_indices = @transform_4, window_bounds = array<i64: 4, 64>}, {pipeline_mode = #tpu.pipeline_mode<synchronous>, transform_indices = @transform_5, window_bounds = array<i64: 64, 32>}, {pipeline_mode = #tpu.pipeline_mode<synchronous>, transform_indices = @transform_6, window_bounds = array<i64: 1, 32>}, {transform_indices = @transform_7, window_bounds = array<i64: 1, 8, 16, 32>}]} {
    %0 = tpu.iota {dimensions = array<i32: 0>} : vector<256x64xi32>
    %c16_i32 = arith.constant 16 : i32
    %c0_i32 = arith.constant 0 : i32
    %1 = arith.cmpi eq, %c16_i32, %c0_i32 : i32
    %c1_i32 = arith.constant 1 : i32
    %2 = arith.select %1, %c1_i32, %c16_i32 : i32
    %3 = vector.broadcast %2 : i32 to vector<256x64xi32>
    %4 = arith.remsi %0, %3 : vector<256x64xi32>
    %c0_i32_0 = arith.constant 0 : i32
    %5 = vector.broadcast %c0_i32_0 : i32 to vector<256x64xi32>
    %6 = arith.cmpi ne, %4, %5 : vector<256x64xi32>
    %c0_i32_1 = arith.constant 0 : i32
    %7 = vector.broadcast %c0_i32_1 : i32 to vector<256x64xi32>
    %8 = arith.cmpi slt, %4, %7 : vector<256x64xi32>
    %c0_i32_2 = arith.constant 0 : i32
    %9 = arith.cmpi slt, %2, %c0_i32_2 : i32
    %10 = vector.broadcast %9 : i1 to vector<256x64xi1>
    %11 = vector.broadcast %10 : vector<256x64xi1> to vector<256x64xi1>
    %12 = arith.xori %8, %11 : vector<256x64xi1>
    %13 = arith.andi %12, %6 : vector<256x64xi1>
    %14 = vector.broadcast %2 : i32 to vector<256x64xi32>
    %15 = arith.addi %4, %14 : vector<256x64xi32>
    %16 = arith.select %13, %15, %4 : vector<256x64xi1>, vector<256x64xi32>
    %c0_i32_3 = arith.constant 0 : i32
    %17 = vector.broadcast %c0_i32_3 : i32 to vector<256x64xi32>
    %18 = arith.cmpi sgt, %16, %17 : vector<256x64xi32>
    %c15_i32 = arith.constant 15 : i32
    %19 = vector.broadcast %c15_i32 : i32 to vector<256x64xi32>
    %20 = arith.cmpi slt, %16, %19 : vector<256x64xi32>
    %cst = arith.constant 0.000000e+00 : f32
    %21 = vector.broadcast %cst : f32 to vector<16x192xf32>
    %c0 = arith.constant 0 : index
    %c0_4 = arith.constant 0 : index
    %22 = vector.load %arg9[%c0, %c0_4] : memref<288x192xf32, #tpu.memory_space<vmem>>, vector<16x192xf32>
    tpu.vector_store %arg9[%c0, %c0_4], %21 {strides = array<i32>} : memref<288x192xf32, #tpu.memory_space<vmem>>, vector<16x192xf32>,
    %cst_5 = arith.constant 0.000000e+00 : f32
    %23 = vector.broadcast %cst_5 : f32 to vector<16x192xf32>
    %c272 = arith.constant 272 : index
    %c0_6 = arith.constant 0 : index
    %24 = vector.load %arg9[%c272, %c0_6] : memref<288x192xf32, #tpu.memory_space<vmem>>, vector<16x192xf32>
    tpu.vector_store %arg9[%c272, %c0_6], %23 {strides = array<i32>} : memref<288x192xf32, #tpu.memory_space<vmem>>, vector<16x192xf32>,
    %c0_7 = arith.constant 0 : index
    %c0_8 = arith.constant 0 : index
    %c0_9 = arith.constant 0 : index
    %c0_10 = arith.constant 0 : index
    %25 = vector.load %arg1[%c0_7, %c0_8, %c0_9, %c0_10] : memref<1x16x16x10xbf16, #tpu.memory_space<vmem>>, vector<1x16x16x10xbf16>
    %26 = vector.shape_cast %25 : vector<1x16x16x10xbf16> to vector<16x16x10xbf16>
    %27 = vector.shape_cast %26 : vector<16x16x10xbf16> to vector<256x10xbf16>
    %c0_11 = arith.constant 0 : index
    %c0_12 = arith.constant 0 : index
    %28 = vector.load %arg2[%c0_11, %c0_12] : memref<10x64xbf16, #tpu.memory_space<vmem>>, vector<10x64xbf16>
    %cst_13 = arith.constant dense<0.000000e+00> : vector<256x64xf32>
    %29 = tpu.matmul %27, %28, %cst_13 {dimension_numbers = #tpu.dot_dimension_numbers<[1], [0], [0], [1], [0, 0, 1, 1], [], []>} : vector<256x10xbf16>, vector<10x64xbf16>, vector<256x64xf32> -> vector<256x64xf32>
    %c0_14 = arith.constant 0 : index
    %c0_15 = arith.constant 0 : index
    %30 = vector.load %arg3[%c0_14, %c0_15] : memref<1x64xf32, #tpu.memory_space<vmem>>, vector<1x64xf32>
    %31 = vector.broadcast %30 : vector<1x64xf32> to vector<256x64xf32>
    %32 = arith.addf %29, %31 : vector<256x64xf32>
    %cst_16 = arith.constant 0.000000e+00 : f32
    %33 = vector.broadcast %cst_16 : f32 to vector<256x64xf32>
    %34 = arith.cmpf oge, %32, %33 : vector<256x64xf32>
    %cst_17 = arith.constant 1.000000e-01 : f32
    %35 = vector.broadcast %cst_17 : f32 to vector<256x64xf32>
    %36 = arith.mulf %35, %32 : vector<256x64xf32>
    %37 = arith.select %34, %32, %36 : vector<256x64xi1>, vector<256x64xf32>
    %38 = arith.truncf %37 : vector<256x64xf32> to vector<256x64xbf16>
    %c1_i32_18 = arith.constant 1 : i32
    %39 = tpu.dynamic_rotate %37 by %c1_i32_18 dim 0 : vector<256x64xf32>, i32 -> vector<256x64xf32>
    %40 = arith.truncf %39 : vector<256x64xf32> to vector<256x64xbf16>
    %c0_i32_19 = arith.constant 0 : i32
    %41 = arith.sitofp %c0_i32_19 : i32 to bf16
    %42 = vector.broadcast %41 : bf16 to vector<256x64xbf16>
    %43 = arith.select %18, %40, %42 : vector<256x64xi1>, vector<256x64xbf16>
    %c255_i32 = arith.constant 255 : i32
    %44 = tpu.dynamic_rotate %37 by %c255_i32 dim 0 : vector<256x64xf32>, i32 -> vector<256x64xf32>
    %45 = arith.truncf %44 : vector<256x64xf32> to vector<256x64xbf16>
    %c0_i32_20 = arith.constant 0 : i32
    %46 = arith.sitofp %c0_i32_20 : i32 to bf16
    %47 = vector.broadcast %46 : bf16 to vector<256x64xbf16>
    %48 = arith.select %20, %45, %47 : vector<256x64xi1>, vector<256x64xbf16>
    %49 = tpu.concatenate %43, %38, %48 in 1 : vector<256x64xbf16>, vector<256x64xbf16>, vector<256x64xbf16> -> vector<256x192xbf16>
    %c0_21 = arith.constant 0 : index
    %c0_22 = arith.constant 0 : index
    %c0_23 = arith.constant 0 : index
    %50 = vector.load %arg4[%c0_21, %c0_22, %c0_23] : memref<4x192x192xbf16, #tpu.memory_space<vmem>>, vector<1x192x192xbf16>
    %51 = vector.shape_cast %50 : vector<1x192x192xbf16> to vector<192x192xbf16>
    %cst_24 = arith.constant dense<0.000000e+00> : vector<256x192xf32>
    %52 = tpu.matmul %49, %51, %cst_24 {dimension_numbers = #tpu.dot_dimension_numbers<[1], [0], [0], [1], [0, 0, 1, 1], [], []>} : vector<256x192xbf16>, vector<192x192xbf16>, vector<256x192xf32> -> vector<256x192xf32>
    %c16 = arith.constant 16 : index
    %c0_25 = arith.constant 0 : index
    %53 = vector.load %arg9[%c16, %c0_25] : memref<288x192xf32, #tpu.memory_space<vmem>>, vector<256x192xf32>
    tpu.vector_store %arg9[%c16, %c0_25], %52 {strides = array<i32>} : memref<288x192xf32, #tpu.memory_space<vmem>>, vector<256x192xf32>,
    %c0_26 = arith.constant 0 : index
    %c0_27 = arith.constant 0 : index
    %54 = vector.load %arg9[%c0_26, %c0_27] : memref<288x192xf32, #tpu.memory_space<vmem>>, vector<256x64xf32>
    %c16_28 = arith.constant 16 : index
    %c64 = arith.constant 64 : index
    %55 = vector.load %arg9[%c16_28, %c64] : memref<288x192xf32, #tpu.memory_space<vmem>>, vector<256x64xf32>
    %56 = arith.addf %54, %55 : vector<256x64xf32>
    %c32 = arith.constant 32 : index
    %c128 = arith.constant 128 : index
    %57 = vector.load %arg9[%c32, %c128] : memref<288x192xf32, #tpu.memory_space<vmem>>, vector<256x64xf32>
    %58 = arith.addf %56, %57 : vector<256x64xf32>
    %c0_29 = arith.constant 0 : index
    %c0_30 = arith.constant 0 : index
    %59 = vector.load %arg5[%c0_29, %c0_30] : memref<4x64xf32, #tpu.memory_space<vmem>>, vector<1x64xf32>
    %60 = vector.broadcast %59 : vector<1x64xf32> to vector<256x64xf32>
    %61 = arith.addf %58, %60 : vector<256x64xf32>
    %cst_31 = arith.constant 0.000000e+00 : f32
    %62 = vector.broadcast %cst_31 : f32 to vector<256x64xf32>
    %63 = arith.cmpf oge, %61, %62 : vector<256x64xf32>
    %cst_32 = arith.constant 1.000000e-01 : f32
    %64 = vector.broadcast %cst_32 : f32 to vector<256x64xf32>
    %65 = arith.mulf %64, %61 : vector<256x64xf32>
    %66 = arith.select %63, %61, %65 : vector<256x64xi1>, vector<256x64xf32>
    %67 = arith.truncf %66 : vector<256x64xf32> to vector<256x64xbf16>
    %c1_i32_33 = arith.constant 1 : i32
    %68 = tpu.dynamic_rotate %66 by %c1_i32_33 dim 0 : vector<256x64xf32>, i32 -> vector<256x64xf32>
    %69 = arith.truncf %68 : vector<256x64xf32> to vector<256x64xbf16>
    %c0_i32_34 = arith.constant 0 : i32
    %70 = arith.sitofp %c0_i32_34 : i32 to bf16
    %71 = vector.broadcast %70 : bf16 to vector<256x64xbf16>
    %72 = arith.select %18, %69, %71 : vector<256x64xi1>, vector<256x64xbf16>
    %c255_i32_35 = arith.constant 255 : i32
    %73 = tpu.dynamic_rotate %66 by %c255_i32_35 dim 0 : vector<256x64xf32>, i32 -> vector<256x64xf32>
    %74 = arith.truncf %73 : vector<256x64xf32> to vector<256x64xbf16>
    %c0_i32_36 = arith.constant 0 : i32
    %75 = arith.sitofp %c0_i32_36 : i32 to bf16
    %76 = vector.broadcast %75 : bf16 to vector<256x64xbf16>
    %77 = arith.select %20, %74, %76 : vector<256x64xi1>, vector<256x64xbf16>
    %78 = tpu.concatenate %72, %67, %77 in 1 : vector<256x64xbf16>, vector<256x64xbf16>, vector<256x64xbf16> -> vector<256x192xbf16>
    %c1 = arith.constant 1 : index
    %c0_37 = arith.constant 0 : index
    %c0_38 = arith.constant 0 : index
    %79 = vector.load %arg4[%c1, %c0_37, %c0_38] : memref<4x192x192xbf16, #tpu.memory_space<vmem>>, vector<1x192x192xbf16>
    %80 = vector.shape_cast %79 : vector<1x192x192xbf16> to vector<192x192xbf16>
    %cst_39 = arith.constant dense<0.000000e+00> : vector<256x192xf32>
    %81 = tpu.matmul %78, %80, %cst_39 {dimension_numbers = #tpu.dot_dimension_numbers<[1], [0], [0], [1], [0, 0, 1, 1], [], []>} : vector<256x192xbf16>, vector<192x192xbf16>, vector<256x192xf32> -> vector<256x192xf32>
    %c16_40 = arith.constant 16 : index
    %c0_41 = arith.constant 0 : index
    %82 = vector.load %arg9[%c16_40, %c0_41] : memref<288x192xf32, #tpu.memory_space<vmem>>, vector<256x192xf32>
    tpu.vector_store %arg9[%c16_40, %c0_41], %81 {strides = array<i32>} : memref<288x192xf32, #tpu.memory_space<vmem>>, vector<256x192xf32>,
    %c0_42 = arith.constant 0 : index
    %c0_43 = arith.constant 0 : index
    %83 = vector.load %arg9[%c0_42, %c0_43] : memref<288x192xf32, #tpu.memory_space<vmem>>, vector<256x64xf32>
    %c16_44 = arith.constant 16 : index
    %c64_45 = arith.constant 64 : index
    %84 = vector.load %arg9[%c16_44, %c64_45] : memref<288x192xf32, #tpu.memory_space<vmem>>, vector<256x64xf32>
    %85 = arith.addf %83, %84 : vector<256x64xf32>
    %c32_46 = arith.constant 32 : index
    %c128_47 = arith.constant 128 : index
    %86 = vector.load %arg9[%c32_46, %c128_47] : memref<288x192xf32, #tpu.memory_space<vmem>>, vector<256x64xf32>
    %87 = arith.addf %85, %86 : vector<256x64xf32>
    %c1_48 = arith.constant 1 : index
    %c0_49 = arith.constant 0 : index
    %88 = vector.load %arg5[%c1_48, %c0_49] : memref<4x64xf32, #tpu.memory_space<vmem>>, vector<1x64xf32>
    %89 = vector.broadcast %88 : vector<1x64xf32> to vector<256x64xf32>
    %90 = arith.addf %87, %89 : vector<256x64xf32>
    %cst_50 = arith.constant 0.000000e+00 : f32
    %91 = vector.broadcast %cst_50 : f32 to vector<256x64xf32>
    %92 = arith.cmpf oge, %90, %91 : vector<256x64xf32>
    %cst_51 = arith.constant 1.000000e-01 : f32
    %93 = vector.broadcast %cst_51 : f32 to vector<256x64xf32>
    %94 = arith.mulf %93, %90 : vector<256x64xf32>
    %95 = arith.select %92, %90, %94 : vector<256x64xi1>, vector<256x64xf32>
    %96 = arith.truncf %95 : vector<256x64xf32> to vector<256x64xbf16>
    %c1_i32_52 = arith.constant 1 : i32
    %97 = tpu.dynamic_rotate %95 by %c1_i32_52 dim 0 : vector<256x64xf32>, i32 -> vector<256x64xf32>
    %98 = arith.truncf %97 : vector<256x64xf32> to vector<256x64xbf16>
    %c0_i32_53 = arith.constant 0 : i32
    %99 = arith.sitofp %c0_i32_53 : i32 to bf16
    %100 = vector.broadcast %99 : bf16 to vector<256x64xbf16>
    %101 = arith.select %18, %98, %100 : vector<256x64xi1>, vector<256x64xbf16>
    %c255_i32_54 = arith.constant 255 : i32
    %102 = tpu.dynamic_rotate %95 by %c255_i32_54 dim 0 : vector<256x64xf32>, i32 -> vector<256x64xf32>
    %103 = arith.truncf %102 : vector<256x64xf32> to vector<256x64xbf16>
    %c0_i32_55 = arith.constant 0 : i32
    %104 = arith.sitofp %c0_i32_55 : i32 to bf16
    %105 = vector.broadcast %104 : bf16 to vector<256x64xbf16>
    %106 = arith.select %20, %103, %105 : vector<256x64xi1>, vector<256x64xbf16>
    %107 = tpu.concatenate %101, %96, %106 in 1 : vector<256x64xbf16>, vector<256x64xbf16>, vector<256x64xbf16> -> vector<256x192xbf16>
    %c2 = arith.constant 2 : index
    %c0_56 = arith.constant 0 : index
    %c0_57 = arith.constant 0 : index
    %108 = vector.load %arg4[%c2, %c0_56, %c0_57] : memref<4x192x192xbf16, #tpu.memory_space<vmem>>, vector<1x192x192xbf16>
    %109 = vector.shape_cast %108 : vector<1x192x192xbf16> to vector<192x192xbf16>
    %cst_58 = arith.constant dense<0.000000e+00> : vector<256x192xf32>
    %110 = tpu.matmul %107, %109, %cst_58 {dimension_numbers = #tpu.dot_dimension_numbers<[1], [0], [0], [1], [0, 0, 1, 1], [], []>} : vector<256x192xbf16>, vector<192x192xbf16>, vector<256x192xf32> -> vector<256x192xf32>
    %c16_59 = arith.constant 16 : index
    %c0_60 = arith.constant 0 : index
    %111 = vector.load %arg9[%c16_59, %c0_60] : memref<288x192xf32, #tpu.memory_space<vmem>>, vector<256x192xf32>
    tpu.vector_store %arg9[%c16_59, %c0_60], %110 {strides = array<i32>} : memref<288x192xf32, #tpu.memory_space<vmem>>, vector<256x192xf32>,
    %c0_61 = arith.constant 0 : index
    %c0_62 = arith.constant 0 : index
    %112 = vector.load %arg9[%c0_61, %c0_62] : memref<288x192xf32, #tpu.memory_space<vmem>>, vector<256x64xf32>
    %c16_63 = arith.constant 16 : index
    %c64_64 = arith.constant 64 : index
    %113 = vector.load %arg9[%c16_63, %c64_64] : memref<288x192xf32, #tpu.memory_space<vmem>>, vector<256x64xf32>
    %114 = arith.addf %112, %113 : vector<256x64xf32>
    %c32_65 = arith.constant 32 : index
    %c128_66 = arith.constant 128 : index
    %115 = vector.load %arg9[%c32_65, %c128_66] : memref<288x192xf32, #tpu.memory_space<vmem>>, vector<256x64xf32>
    %116 = arith.addf %114, %115 : vector<256x64xf32>
    %c2_67 = arith.constant 2 : index
    %c0_68 = arith.constant 0 : index
    %117 = vector.load %arg5[%c2_67, %c0_68] : memref<4x64xf32, #tpu.memory_space<vmem>>, vector<1x64xf32>
    %118 = vector.broadcast %117 : vector<1x64xf32> to vector<256x64xf32>
    %119 = arith.addf %116, %118 : vector<256x64xf32>
    %cst_69 = arith.constant 0.000000e+00 : f32
    %120 = vector.broadcast %cst_69 : f32 to vector<256x64xf32>
    %121 = arith.cmpf oge, %119, %120 : vector<256x64xf32>
    %cst_70 = arith.constant 1.000000e-01 : f32
    %122 = vector.broadcast %cst_70 : f32 to vector<256x64xf32>
    %123 = arith.mulf %122, %119 : vector<256x64xf32>
    %124 = arith.select %121, %119, %123 : vector<256x64xi1>, vector<256x64xf32>
    %125 = arith.truncf %124 : vector<256x64xf32> to vector<256x64xbf16>
    %c1_i32_71 = arith.constant 1 : i32
    %126 = tpu.dynamic_rotate %124 by %c1_i32_71 dim 0 : vector<256x64xf32>, i32 -> vector<256x64xf32>
    %127 = arith.truncf %126 : vector<256x64xf32> to vector<256x64xbf16>
    %c0_i32_72 = arith.constant 0 : i32
    %128 = arith.sitofp %c0_i32_72 : i32 to bf16
    %129 = vector.broadcast %128 : bf16 to vector<256x64xbf16>
    %130 = arith.select %18, %127, %129 : vector<256x64xi1>, vector<256x64xbf16>
    %c255_i32_73 = arith.constant 255 : i32
    %131 = tpu.dynamic_rotate %124 by %c255_i32_73 dim 0 : vector<256x64xf32>, i32 -> vector<256x64xf32>
    %132 = arith.truncf %131 : vector<256x64xf32> to vector<256x64xbf16>
    %c0_i32_74 = arith.constant 0 : i32
    %133 = arith.sitofp %c0_i32_74 : i32 to bf16
    %134 = vector.broadcast %133 : bf16 to vector<256x64xbf16>
    %135 = arith.select %20, %132, %134 : vector<256x64xi1>, vector<256x64xbf16>
    %136 = tpu.concatenate %130, %125, %135 in 1 : vector<256x64xbf16>, vector<256x64xbf16>, vector<256x64xbf16> -> vector<256x192xbf16>
    %c3 = arith.constant 3 : index
    %c0_75 = arith.constant 0 : index
    %c0_76 = arith.constant 0 : index
    %137 = vector.load %arg4[%c3, %c0_75, %c0_76] : memref<4x192x192xbf16, #tpu.memory_space<vmem>>, vector<1x192x192xbf16>
    %138 = vector.shape_cast %137 : vector<1x192x192xbf16> to vector<192x192xbf16>
    %cst_77 = arith.constant dense<0.000000e+00> : vector<256x192xf32>
    %139 = tpu.matmul %136, %138, %cst_77 {dimension_numbers = #tpu.dot_dimension_numbers<[1], [0], [0], [1], [0, 0, 1, 1], [], []>} : vector<256x192xbf16>, vector<192x192xbf16>, vector<256x192xf32> -> vector<256x192xf32>
    %c16_78 = arith.constant 16 : index
    %c0_79 = arith.constant 0 : index
    %140 = vector.load %arg9[%c16_78, %c0_79] : memref<288x192xf32, #tpu.memory_space<vmem>>, vector<256x192xf32>
    tpu.vector_store %arg9[%c16_78, %c0_79], %139 {strides = array<i32>} : memref<288x192xf32, #tpu.memory_space<vmem>>, vector<256x192xf32>,
    %c0_80 = arith.constant 0 : index
    %c0_81 = arith.constant 0 : index
    %141 = vector.load %arg9[%c0_80, %c0_81] : memref<288x192xf32, #tpu.memory_space<vmem>>, vector<256x64xf32>
    %c16_82 = arith.constant 16 : index
    %c64_83 = arith.constant 64 : index
    %142 = vector.load %arg9[%c16_82, %c64_83] : memref<288x192xf32, #tpu.memory_space<vmem>>, vector<256x64xf32>
    %143 = arith.addf %141, %142 : vector<256x64xf32>
    %c32_84 = arith.constant 32 : index
    %c128_85 = arith.constant 128 : index
    %144 = vector.load %arg9[%c32_84, %c128_85] : memref<288x192xf32, #tpu.memory_space<vmem>>, vector<256x64xf32>
    %145 = arith.addf %143, %144 : vector<256x64xf32>
    %c3_86 = arith.constant 3 : index
    %c0_87 = arith.constant 0 : index
    %146 = vector.load %arg5[%c3_86, %c0_87] : memref<4x64xf32, #tpu.memory_space<vmem>>, vector<1x64xf32>
    %147 = vector.broadcast %146 : vector<1x64xf32> to vector<256x64xf32>
    %148 = arith.addf %145, %147 : vector<256x64xf32>
    %cst_88 = arith.constant 0.000000e+00 : f32
    %149 = vector.broadcast %cst_88 : f32 to vector<256x64xf32>
    %150 = arith.cmpf oge, %148, %149 : vector<256x64xf32>
    %cst_89 = arith.constant 1.000000e-01 : f32
    %151 = vector.broadcast %cst_89 : f32 to vector<256x64xf32>
    %152 = arith.mulf %151, %148 : vector<256x64xf32>
    %153 = arith.select %150, %148, %152 : vector<256x64xi1>, vector<256x64xf32>
    %154 = vector.extract_strided_slice %153 {offsets = [64, 0], sizes = [128, 64], strides = [1, 1]} : vector<256x64xf32> to vector<128x64xf32>
    %155 = arith.truncf %154 : vector<128x64xf32> to vector<128x64xbf16>
    %c0_90 = arith.constant 0 : index
    %c0_91 = arith.constant 0 : index
    %156 = vector.load %arg6[%c0_90, %c0_91] : memref<64x32xbf16, #tpu.memory_space<vmem>>, vector<64x32xbf16>
    %cst_92 = arith.constant dense<0.000000e+00> : vector<128x32xf32>
    %157 = tpu.matmul %155, %156, %cst_92 {dimension_numbers = #tpu.dot_dimension_numbers<[1], [0], [0], [1], [0, 0, 1, 1], [], []>} : vector<128x64xbf16>, vector<64x32xbf16>, vector<128x32xf32> -> vector<128x32xf32>
    %c0_93 = arith.constant 0 : index
    %c0_94 = arith.constant 0 : index
    %158 = vector.load %arg7[%c0_93, %c0_94] : memref<1x32xf32, #tpu.memory_space<vmem>>, vector<1x32xf32>
    %159 = vector.broadcast %158 : vector<1x32xf32> to vector<128x32xf32>
    %160 = arith.addf %157, %159 : vector<128x32xf32>
    %161 = math.tanh %160 : vector<128x32xf32>
    %cst_95 = arith.constant 0.00999999977 : f32
    %162 = vector.broadcast %cst_95 : f32 to vector<128x32xf32>
    %163 = arith.mulf %162, %161 : vector<128x32xf32>
    %164 = vector.shape_cast %163 : vector<128x32xf32> to vector<8x16x32xf32>
    %c0_96 = arith.constant 0 : index
    %c0_97 = arith.constant 0 : index
    %c0_98 = arith.constant 0 : index
    %c0_99 = arith.constant 0 : index
    %165 = vector.load %arg8[%c0_96, %c0_97, %c0_98, %c0_99] : memref<1x8x16x32xf32, #tpu.memory_space<vmem>>, vector<1x8x16x32xf32>
    %166 = vector.shape_cast %165 : vector<1x8x16x32xf32> to vector<8x16x32xf32>
    %167 = vector.shape_cast %164 : vector<8x16x32xf32> to vector<1x8x16x32xf32>
    tpu.vector_store %arg8[%c0_96, %c0_97, %c0_98, %c0_99], %167 {strides = array<i32>} : memref<1x8x16x32xf32, #tpu.memory_space<vmem>>, vector<1x8x16x32xf32>,
    return
  }
  func.func @transform_0(%arg0: i32) -> (i32, i32, i32, i32) {
    %c0_i32 = arith.constant 0 : i32
    %c0_i32_0 = arith.constant 0 : i32
    %c0_i32_1 = arith.constant 0 : i32
    %c0_i32_2 = arith.constant 0 : i32
    return %arg0, %c0_i32, %c0_i32_0, %c0_i32_1 : i32, i32, i32, i32
  }
  func.func @transform_1(%arg0: i32) -> (i32, i32) {
    %c0_i32 = arith.constant 0 : i32
    %c0_i32_0 = arith.constant 0 : i32
    %c0_i32_1 = arith.constant 0 : i32
    return %c0_i32, %c0_i32_0 : i32, i32
  }
  func.func @transform_2(%arg0: i32) -> (i32, i32) {
    %c0_i32 = arith.constant 0 : i32
    %c0_i32_0 = arith.constant 0 : i32
    %c0_i32_1 = arith.constant 0 : i32
    return %c0_i32, %c0_i32_0 : i32, i32
  }
  func.func @transform_3(%arg0: i32) -> (i32, i32, i32) {
    %c0_i32 = arith.constant 0 : i32
    %c0_i32_0 = arith.constant 0 : i32
    %c0_i32_1 = arith.constant 0 : i32
    %c0_i32_2 = arith.constant 0 : i32
    return %c0_i32, %c0_i32_0, %c0_i32_1 : i32, i32, i32
  }
  func.func @transform_4(%arg0: i32) -> (i32, i32) {
    %c0_i32 = arith.constant 0 : i32
    %c0_i32_0 = arith.constant 0 : i32
    %c0_i32_1 = arith.constant 0 : i32
    return %c0_i32, %c0_i32_0 : i32, i32
  }
  func.func @transform_5(%arg0: i32) -> (i32, i32) {
    %c0_i32 = arith.constant 0 : i32
    %c0_i32_0 = arith.constant 0 : i32
    %c0_i32_1 = arith.constant 0 : i32
    return %c0_i32, %c0_i32_0 : i32, i32
  }
  func.func @transform_6(%arg0: i32) -> (i32, i32) {
    %c0_i32 = arith.constant 0 : i32
    %c0_i32_0 = arith.constant 0 : i32
    %c0_i32_1 = arith.constant 0 : i32
    return %c0_i32, %c0_i32_0 : i32, i32
  }
  func.func @transform_7(%arg0: i32) -> (i32, i32, i32, i32) {
    %c0_i32 = arith.constant 0 : i32
    %c0_i32_0 = arith.constant 0 : i32
    %c0_i32_1 = arith.constant 0 : i32
    %c0_i32_2 = arith.constant 0 : i32
    return %arg0, %c0_i32, %c0_i32_0, %c0_i32_1 : i32, i32, i32, i32
  }
}

</mosaic_0001>

<bundles_post_ra>
// kernel: gda_forward.1
= control target key start
LH: loop header
LB: loop body
LE: loop exit
PB: predicated region body
PF: predicated region fallthrough
CT: control target
= control target key end

     0   :  { %s8659_s24 = smov 0   ;;  %s13725_s0 = inlined_call_operand.vmem [shape: bf16[4,16,16,10], index: 0, kind: input, shape index: {}]   ;;  %s13726_s1 = inlined_call_operand.vmem [shape: bf16[10,64], index: 1, kind: input, shape index: {}]   ;;  %s13727_s2 = inlined_call_operand.vmem [shape: f32[1,64], index: 2, kind: input, shape index: {}]   ;;  %s13728_s3 = inlined_call_operand.vmem [shape: bf16[4,192,192], index: 3, kind: input, shape index: {}]   ;;  %s13729_s4 = inlined_call_operand.vmem [shape: f32[4,64], index: 4, kind: input, shape index: {}]   ;;  %s13730_s5 = inlined_call_operand.vmem [shape: bf16[64,32], index: 5, kind: input, shape index: {}]   ;;  %s13731_s6 = inlined_call_operand.vmem [shape: f32[1,32], index: 6, kind: input, shape index: {}]   ;;  %s13732_s7 = inlined_call_operand.vmem [shape: f32[4,8,16,32], index: 7, kind: output, shape index: {}]  }
   0x1 LB: > { %s7725_s25 = sadd.s32 4294967295, %s8614_s24   ;;  %p7729_p0 = scmp.ge.s32.totalorder %s8614_s24, 1  ;;  %s8614_s24 = sphi %s8659_s24, %s17_s24  }
   0x2   : > { %p237_p1 = scmp.lt.s32.totalorder %s8614_s24, 5 }
   0x4   : > { %p238_p2 = pnand %p7729_p0, %p237_p1 }
   0x6   : > { %241 = sbr.rel (%p238_p2) target bundleno = 2580 (0xa14), region = 48 }
   0xb   : > { %v7800_v0 = vld [vmem:[%s13726_s1] sm:$0xf]  ;;  %v8446_v1 = vld [vmem:[%s13726_s1] sm:$0x10]  ;;  %vm942_vm0 = vcmask 1044480   ;;  %p269_p3 = scmp.lt.s32.totalorder %s7725_s25, 3  ;;  %v280_v37 = vlaneseq }
   0xc   : > { %v7801_v2 = vor.u32 %v8446_v1, %v7800_v0  ;;  %vm893_vm1 = vcmask 80896   ;;  %v8469_v20 = vld [vmem:[%s13728_s3 + $0xb4] sm:$0xf]  ;;  %v7910_v21 = vld [vmem:[%s13728_s3 + $0xb8] sm:$0xf0]  ;;  %s8616_s13 = smov 64  }
   0xd   : > { %s14843_s25 = smov (!%p269_p3, %s7725_s25), 3  ;;  %v7913_v22 = vor.u32 %v8469_v20, %v7910_v21  ;;  %v8467_v23 = vld [vmem:[%s13728_s3 + $0xa4] sm:$0xf]  ;;  %v7902_v24 = vld [vmem:[%s13728_s3 + $0xa8] sm:$0xf0]  ;;  %v8748_v43 = vshrl.u32 %v280_v37, 7 }
   0xe   : > { %v944_v3 = vsel %vm942_vm0, %v7801_v2, 0  ;;  %s8428_s30 = sshll.u32 %s14843_s25, 7  ;;  %v7905_v25 = vor.u32 %v8467_v23, %v7902_v24  ;;  %v8465_v26 = vld [vmem:[%s13728_s3 + $0x94] sm:$0xf]  ;;  %v7894_v27 = vld [vmem:[%s13728_s3 + $0x98] sm:$0xf0] }
   0xf   : > { %953 = vmatpush.bf16.msra.mxu0 %v944_v3  ;;  %8547 = vmatpush.bf16.msra.mxu1 %v944_v3  ;;  %s8681_s10 = scalar_lea.vmem %s13725_s0, %s8428_s30  ;;  %v7897_v28 = vor.u32 %v8465_v26, %v7894_v27  ;;  %v8463_v29 = vld [vmem:[%s13728_s3 + $0x84] sm:$0xf]  ;;  %v7886_v30 = vld [vmem:[%s13728_s3 + $0x88] sm:$0xf0]  ;;  %v8742_v32 = vld [vmem:[%s13727_s2] ss:$0 sm:$0xff]  ;;  %s13673_s27 = scalar_lea.vmem %s13732_s7, %s8428_s30 }
  0x10   : > { %8548 = vmatpush.bf16.msra.mxu3 %v944_v3  ;;  %v8430_v4 = vld [vmem:[%s8681_s10] sm:$0xff]  ;;  %v8437_v5 = vld [vmem:[%s8681_s10 + $0x38] sm:$0xff]  ;;  %v8439_v6 = vld [vmem:[%s8681_s10 + $0x48] sm:$0xff]  ;;  %v7889_v31 = vor.u32 %v8463_v29, %v7886_v30  ;;  %13924 = vst [vmem:[#allocation3_spill] sm:$0xff] %v8748_v43  ;;  %v282_v45 = vadd.s32 8, %v8748_v43  ;;  %vm13781_vm4 = vcmp.lt.s32.totalorder %v8748_v43, 1 }
  0x11   : > { %v8431_v7 = vld [vmem:[%s8681_s10 + $0x8] sm:$0xff]  ;;  %v8438_v8 = vld [vmem:[%s8681_s10 + $0x40] sm:$0xff]  ;;  %v8440_v9 = vld [vmem:[%s8681_s10 + $0x50] sm:$0xff]  ;;  %vm13783_vm5 = vcmp.lt.s32.totalorder %v8748_v43, 7  ;;  %v8764_v55 = vadd.s32 16, %v8748_v43  ;;  %vm13782_vm11 = vcmask 523264  }
  0x12   : > { %7802 = vmatmul.msk.bf16.vlgmr.msra.gmra.mxu0 %vm893_vm1, %v8430_v4  ;;  %7809 = vmatmul.msk.bf16.vlgmr.msra.gmra.mxu1 %vm893_vm1, %v8437_v5  ;;  %v8432_v10 = vld [vmem:[%s8681_s10 + $0x10] sm:$0xff]  ;;  %v8441_v11 = vld [vmem:[%s8681_s10 + $0x58] sm:$0xff]  ;;  %v8442_v13 = vld [vmem:[%s8681_s10 + $0x60] sm:$0xff]  ;;  %v324_v54 = vand.u32 15, %v282_v45  ;;  %vm8617_vm12 = vmmov 1   ;;  %v13928_v29 = vmov 0 }
  0x13   : > { %7811 = vmatmul.msk.bf16.vlgmr.msra.gmra.mxu3 %vm893_vm1, %v8439_v6  ;;  %v8433_v12 = vld [vmem:[%s8681_s10 + $0x18] sm:$0xff]  ;;  %v8434_v14 = vld [vmem:[%s8681_s10 + $0x20] sm:$0xff]  ;;  %v8443_v15 = vld [vmem:[%s8681_s10 + $0x68] sm:$0xff]  ;;  %2284 = vmatpush.bf16.msrb.mxu0 %v7913_v22  ;;  %v13932_v37 = vmov 0 }
  0x14   : > { %v8435_v16 = vld [vmem:[%s8681_s10 + $0x28] sm:$0xff]  ;;  %v8444_v17 = vld [vmem:[%s8681_s10 + $0x70] sm:$0xff]  ;;  %v8445_v19 = vld [vmem:[%s8681_s10 + $0x78] sm:$0xff]  ;;  %vm8786_vm9 = vcmp.lt.s32.totalorder %v324_v54, 15 }
  0x15   : > { %v8436_v18 = vld [vmem:[%s8681_s10 + $0x30] sm:$0xff]  ;;  %v8470_v2 = vld [vmem:[%s13728_s3 + $0xb4] sm:$0xf0]  ;;  %vm8819_vm13 = vmpackc.low %vm8617_vm12, %vm8617_vm12 }
  0x16   : > { %v7908_v1 = vld [vmem:[%s13728_s3 + $0xb0] sm:$0xf]  ;;  %v13929_v29 = vsel %vm8819_vm13, 4294967295, %v13928_v29  ;;  %vm8836_vm14 = vmpackc.low %vm8786_vm9, %vm8786_vm9 }
  0x17   : > { %2285 = vmatpush.bf16.msrb.mxu0 %v7905_v25  ;;  %13930 = vst [vmem:[#allocation5_spill] sm:$0xff] %v13929_v29  ;;  %v13933_v37 = vsel %vm8836_vm14, 4294967295, %v13932_v37 }
  0x18   : > { %13934 = vst [vmem:[#allocation7_spill] sm:$0xff] %v13933_v37 }
  0x1b   : > { %2286 = vmatpush.bf16.msrb.mxu0 %v7897_v28 }
  0x1f   : > { %2287 = vmatpush.bf16.msrb.mxu0 %v7889_v31 }
  0x22   : > { %7803 = vmatmul.msk.bf16.gmra.mxu0 %vm893_vm1, %v8431_v7  ;;  %7810 = vmatmul.msk.bf16.gmra.mxu1 %vm893_vm1, %v8438_v8  ;;  %v284_v7 = vadd.s32 24, %v8748_v43 }
  0x23   : > { %7812 = vmatmul.msk.bf16.gmra.mxu3 %vm893_vm1, %v8440_v9 }
  0x24   : > { %v338_v24 = vand.u32 15, %v284_v7 }
  0x32   : > { %7804 = vmatmul.msk.bf16.gmra.mxu0 %vm893_vm1, %v8432_v10  ;;  %v8794_v10 = vor.u32 %v8470_v2, %v7908_v1 }
  0x33   : > { %7813 = vmatmul.msk.bf16.gmra.mxu3 %vm893_vm1, %v8441_v11  ;;  %v331_v11 = vand.u32 15, %v8764_v55 }
  0x34   : > { %8549 = vmatpush.bf16.msra.mxu2 %v8794_v10 }
  0x42   : > { %7805 = vmatmul.msk.bf16.gmra.mxu0 %vm893_vm1, %v8433_v12 }
  0x43   : > { %7814 = vmatmul.msk.bf16.gmra.mxu3 %vm893_vm1, %v8442_v13 }
  0x52   : > { %7806 = vmatmul.msk.bf16.gmra.mxu0 %vm893_vm1, %v8434_v14 }
  0x53   : > { %7815 = vmatmul.msk.bf16.gmra.mxu3 %vm893_vm1, %v8443_v15 }
  0x62   : > { %7807 = vmatmul.msk.bf16.gmra.mxu0 %vm893_vm1, %v8435_v16  ;;  %v7900_v16 = vld [vmem:[%s13728_s3 + $0xa0] sm:$0xf] }
  0x63   : > { %7816 = vmatmul.msk.bf16.gmra.mxu3 %vm893_vm1, %v8444_v17  ;;  %v8468_v17 = vld [vmem:[%s13728_s3 + $0xa4] sm:$0xf0] }
  0x64   : > { %v8815_v25 = vor.u32 %v8468_v17, %v7900_v16 }
  0x66   : > { %8550 = vmatpush.bf16.msra.mxu2 %v8815_v25 }
  0x72   : > { %7808 = vmatmul.msk.bf16.gmra.mxu0 %vm893_vm1, %v8436_v18 }
  0x73   : > { %7817 = vmatmul.msk.bf16.gmra.mxu3 %vm893_vm1, %v8445_v19 }
  0x8f   : > { %v955_v33 = vpop.f32.mrf.mxu0  ;;  %v990_v34 = vpop.f32.mrf.mxu1 }
  0x90   : > { %v956_v35 = vadd.f32 %v8742_v32, %v955_v33  ;;  %v991_v50 = vadd.f32 %v8742_v32, %v990_v34 }
  0x92   : > { %v1067_v36 = vmul.f32 0.1, %v956_v35  ;;  %vm1035_vm2 = vcmp.ge.f32.partialorder %v956_v35, 0.0  ;;  %v1081_v4 = vmul.f32 0.1, %v991_v50  ;;  %vm1049_vm7 = vcmp.ge.f32.partialorder %v991_v50, 0.0 }
  0x94   : > { %v8745_v41 = vsel %vm1035_vm2, %v956_v35, %v1067_v36  ;;  %v8809_v18 = vsel %vm1049_vm7, %v991_v50, %v1081_v4  ;;  %vm8864_vm2 = vcmp.lt.s32.totalorder %v338_v24, 15 }
  0x95   : > { %v1131_v46 = vpack.c.bf16 %v8745_v41, %v8745_v41  ;;  %v13734_v49 = vrot.slane %v8745_v41, 7  ;;  %v13733_v3 = vrot.slane %v8745_v41, 1 }
  0x96   : > { %v1000_v38 = vpop.f32.mrf.mxu3 }
  0x97   : > { %v957_v39 = vpop.f32.mrf.mxu0  ;;  %v992_v40 = vpop.f32.mrf.mxu1  ;;  %v1001_v47 = vadd.f32 %v8742_v32, %v1000_v38  ;;  %v1597_v59 = vunpack.c.l.b16 %v1131_v46  ;;  %v7892_v38 = vld [vmem:[%s13728_s3 + $0x90] sm:$0xf] }
  0x98   : > { %v958_v42 = vadd.f32 %v8742_v32, %v957_v39  ;;  %v993_v63 = vadd.f32 %v8742_v32, %v992_v40  ;;  %v8466_v39 = vld [vmem:[%s13728_s3 + $0x94] sm:$0xf0] }
  0x99   : > { %v1085_v62 = vmul.f32 0.1, %v1001_v47  ;;  %vm1053_vm6 = vcmp.ge.f32.partialorder %v1001_v47, 0.0  ;;  %v8848_v45 = vor.u32 %v8466_v39, %v7892_v38 }
  0x9a   : > { %vm1036_vm3 = vcmp.ge.f32.partialorder %v958_v42, 0.0  ;;  %v1068_v44 = vmul.f32 0.1, %v958_v42  ;;  %v1082_v13 = vmul.f32 0.1, %v993_v63  ;;  %vm1050_vm10 = vcmp.ge.f32.partialorder %v993_v63, 0.0 }
  0x9b   : > { %v8797_v12 = vsel %vm1053_vm6, %v1001_v47, %v1085_v62  ;;  %v8464_v62 = vld [vmem:[%s13728_s3 + $0x84] sm:$0xf0]  ;;  %8551 = vmatpush.bf16.msra.mxu2 %v8848_v45  ;;  %vm8894_vm6 = vcmp.gt.s32.totalorder %v331_v11, 0 }
  0x9c   : > { %v8754_v48 = vsel %vm1036_vm3, %v958_v42, %v1068_v44  ;;  %13927 = vst [vmem:[#allocation4_spill] sm:$0xff] %v8797_v12  ;;  %v13736_v27 = vrot.slane %v8797_v12, 1  ;;  %v1149_v31 = vpack.c.bf16 %v8797_v12, %v8797_v12  ;;  %v8830_v33 = vsel %vm1050_vm10, %v993_v63, %v1082_v13  ;;  %vm8941_vm10 = vmpackc.low %vm8864_vm2, %vm8864_vm2 }
  0x9d   : > { %v1132_v51 = vpack.c.bf16 %v8754_v48, %v8754_v48  ;;  %v1164_v52 = vrot.slane %v8754_v48, 7  ;;  %v1325_v58 = vrot.slane %v8754_v48, 1  ;;  %13931 = vst [vmem:[#allocation6_spill] sm:$0xff] %v8830_v33 }
  0x9e   : > { %v1002_v53 = vpop.f32.mrf.mxu3  ;;  %v8857_v54 = vunpack.c.l.b16 %v1149_v31 }
  0x9f   : > { %v960_v56 = vpop.f32.mrf.mxu0  ;;  %v995_v57 = vpop.f32.mrf.mxu1  ;;  %v1598_v60 = vunpack.c.l.b16 %v1132_v51  ;;  %v8773_v61 = vsel %vm13781_vm4, %v13734_v49, %v1164_v52  ;;  %v1387_v9 = vsel %vm13783_vm5, %v13733_v3, %v1325_v58  ;;  %v1003_v14 = vadd.f32 %v8742_v32, %v1002_v53 }
  0xa0   : > { %v961_v0 = vadd.f32 %v8742_v32, %v960_v56  ;;  %v996_v20 = vadd.f32 %v8742_v32, %v995_v57  ;;  %v1389_v23 = vpack.c.bf16 %v1387_v9, %v1387_v9  ;;  %v1229_v63 = vpack.c.bf16 %v8773_v61, %v8773_v61 }
  0xa1   : > { %v1629_v5 = vpack.c.b16 %v1598_v60, %v1597_v59  ;;  %v1086_v34 = vmul.f32 0.1, %v1003_v14  ;;  %vm1054_vm15 = vcmp.ge.f32.partialorder %v1003_v14, 0.0  ;;  %v7884_v60 = vld [vmem:[%s13728_s3 + $0x80] sm:$0xf] }
  0xa2   : > { %vm1037_vm8 = vcmp.ge.f32.partialorder %v961_v0, 0.0  ;;  %v1069_v6 = vmul.f32 0.1, %v961_v0  ;;  %v1083_v42 = vmul.f32 0.1, %v996_v20  ;;  %vm1051_vm0 = vcmp.ge.f32.partialorder %v996_v20, 0.0 }
  0xa3   : > { %1645 = vrot.lane.b32.xlu0 %v1629_v5, %s8616_s13  ;;  %v1453_v47 = vsel %vm8819_vm13, %v1389_v23, 0  ;;  %v8859_v56 = vsel %vm1054_vm15, %v1003_v14, %v1086_v34  ;;  %v8885_v9 = vor.u32 %v8464_v62, %v7884_v60  ;;  %v8931_v48 = vsel %vm8819_vm13, %v1229_v63, 0  ;;  %vm8966_vm15 = vmpackc.low %vm8894_vm6, %vm8894_vm6 }
  0xa4   : > { %v8800_v15 = vsel %vm1037_vm8, %v961_v0, %v1069_v6  ;;  %v8878_v1 = vsel %vm1051_vm0, %v996_v20, %v1083_v42  ;;  %v1709_v4 = vunpack.c.l.b16 %v1453_v47  ;;  %v1150_v16 = vpack.c.bf16 %v8859_v56, %v8859_v56 }
  0xa5   : > { %v1326_v19 = vrot.slane %v8800_v15, 1  ;;  %v1133_v53 = vpack.c.bf16 %v8800_v15, %v8800_v15  ;;  %v1165_v0 = vrot.slane %v8800_v15, 7  ;;  %13937 = vst [vmem:[#allocation8_spill] sm:$0xff] %v8878_v1  ;;  %8552 = vmatpush.bf16.msra.mxu2 %v8885_v9  ;;  %v13735_v42 = vrot.slane %v8878_v1, 1 }
  0xa6   : > { %v1005_v22 = vpop.f32.mrf.mxu3 }
  0xa7   : > { %v962_v28 = vpop.f32.mrf.mxu0  ;;  %v1386_v30 = vsel %vm13783_vm5, %v1325_v58, %v1326_v19  ;;  %v997_v44 = vpop.f32.mrf.mxu1  ;;  %v1006_v50 = vadd.f32 %v8742_v32, %v1005_v22  ;;  %v1599_v14 = vunpack.c.l.b16 %v1133_v53  ;;  %v1225_v39 = vsel %vm13781_vm4, %v1164_v52, %v1165_v0 }
  0xa8   : > { %v963_v35 = vadd.f32 %v8742_v32, %v962_v28  ;;  %v1390_v36 = vpack.c.bf16 %v1386_v30, %v1386_v30  ;;  %v998_v58 = vadd.f32 %v8742_v32, %v997_v44  ;;  %v286_v30 = vadd.s32 40, %v8748_v43 }
  0xa9   : > { %vm1055_vm3 = vcmp.ge.f32.partialorder %v1006_v50, 0.0  ;;  %v1087_v61 = vmul.f32 0.1, %v1006_v50 }
  0xaa   : > { %vm1038_vm1 = vcmp.ge.f32.partialorder %v963_v35, 0.0  ;;  %v1070_v46 = vmul.f32 0.1, %v963_v35  ;;  %v1454_v51 = vsel %vm8836_vm14, %v1390_v36, 0  ;;  %v1084_v17 = vmul.f32 0.1, %v998_v58 }
  0xab   : > { %v1710_v7 = vunpack.c.l.b16 %v1454_v51  ;;  %vm1052_vm7 = vcmp.ge.f32.partialorder %v998_v58, 0.0  ;;  %v8914_v38 = vsel %vm1055_vm3, %v1006_v50, %v1087_v61 }
  0xac   : > { %v8861_v57 = vsel %vm1038_vm1, %v963_v35, %v1070_v46  ;;  %13941 = vst [vmem:[#allocation10_spill] sm:$0xff] %v8914_v38  ;;  %v8921_v44 = vsel %vm1052_vm7, %v998_v58, %v1084_v17  ;;  %v352_v58 = vand.u32 15, %v286_v30  ;;  %v1151_v63 = vpack.c.bf16 %v8914_v38, %v8914_v38 }
  0xad   : > { %v1166_v2 = vrot.slane %v8861_v57, 7  ;;  %v1327_v5 = vrot.slane %v8861_v57, 1  ;;  %v1134_v8 = vpack.c.bf16 %v8861_v57, %v8861_v57  ;;  %v8890_v22 = vpack.c.b16 %v1710_v7, %v1709_v4  ;;  %13942 = vst [vmem:[#allocation11_spill] sm:$0xff] %v8921_v44 }
  0xae   : > { %v1007_v6 = vpop.f32.mrf.mxu3  ;;  %v13943_v4 = vmov 0  ;;  %v1341_v7 = vrot.slane %v8921_v44, 1  ;;  %vm8975_vm0 = vcmp.lt.s32.totalorder %v352_v58, 15  ;;  %v1146_v58 = vpack.c.bf16 %v8830_v33, %v8830_v33 }
  0xaf   : > { %v965_v13 = vpop.f32.mrf.mxu0  ;;  %13938 = vst [vmem:[#allocation9_spill] sm:$0xff] %v8890_v22  ;;  %v1600_v23 = vunpack.c.l.b16 %v1134_v8  ;;  %v1008_v28 = vadd.f32 %v8742_v32, %v1007_v6  ;;  %v1224_v31 = vsel %vm13781_vm4, %v1165_v0, %v1166_v2  ;;  %7930 = vmatmul.msk.bf16.vlgmr.msrb.gmra.mxu0 %vm13782_vm11, %v8890_v22  ;;  %v1385_v11 = vsel %vm13783_vm5, %v1326_v19, %v1327_v5  ;;  %vm9041_vm6 = vmpackc.low %vm8975_vm0, %vm8975_vm0 }
  0xb0   : > { %v966_v20 = vadd.f32 %v8742_v32, %v965_v13  ;;  %v8926_v19 = vunpack.c.l.b16 %v1150_v16  ;;  %v1391_v50 = vpack.c.bf16 %v1385_v11, %v1385_v11  ;;  %v13944_v4 = vsel %vm8941_vm10, 4294967295, %v13943_v4 }
  0xb1   : > { %v1630_v55 = vpack.c.b16 %v1600_v23, %v1599_v14  ;;  %v1088_v46 = vmul.f32 0.1, %v1008_v28  ;;  %vm1056_vm9 = vcmp.ge.f32.partialorder %v1008_v28, 0.0  ;;  %13945 = vst [vmem:[#allocation12_spill] sm:$0xff] %v13944_v4  ;;  %v1231_v6 = vpack.c.bf16 %v1224_v31, %v1224_v31 }
  0xb2   : > { %vm1039_vm8 = vcmp.ge.f32.partialorder %v966_v20, 0.0  ;;  %v1071_v34 = vmul.f32 0.1, %v966_v20  ;;  %v1455_v59 = vsel %vm8819_vm13, %v1391_v50, 0  ;;  %v1230_v23 = vpack.c.bf16 %v1225_v39, %v1225_v39 }
  0xb3   : > { %1647 = vrot.lane.b32.xlu0 %v1630_v55, %s8616_s13  ;;  %v1295_v55 = vsel %vm8819_vm13, %v1231_v6, 0  ;;  %v13956_v13 = vmov 0 }
  0xb4   : > { %v8923_v15 = vsel %vm1039_vm8, %v966_v20, %v1071_v34  ;;  %v8961_v34 = vunpack.c.l.b16 %v1151_v63  ;;  %v1145_v63 = vpack.c.bf16 %v8809_v18, %v8809_v18  ;;  %v13957_v13 = vsel %vm9041_vm6, 4294967295, %v13956_v13 }
  0xb5   : > { %v1328_v47 = vrot.slane %v8923_v15, 1  ;;  %v1135_v14 = vpack.c.bf16 %v8923_v15, %v8923_v15  ;;  %13958 = vst [vmem:[#allocation19_spill] sm:$0xff] %v13957_v13 }
  0xb6   : > { %v1010_v53 = vpop.f32.mrf.mxu3 }
  0xb7   : > { %v967_v62 = vpop.f32.mrf.mxu0  ;;  %v1384_v0 = vsel %vm13783_vm5, %v1327_v5, %v1328_v47  ;;  %v8951_v5 = vsel %vm1056_vm9, %v1008_v28, %v1088_v46  ;;  %v1011_v30 = vadd.f32 %v8742_v32, %v1010_v53  ;;  %v13947_v28 = vmov 0 }
  0xb8   : > { %v968_v8 = vadd.f32 %v8742_v32, %v967_v62  ;;  %v1392_v61 = vpack.c.bf16 %v1384_v0, %v1384_v0  ;;  %13946 = vst [vmem:[#allocation13_spill] sm:$0xff] %v8951_v5  ;;  %v13948_v28 = vsel %vm8966_vm15, 4294967295, %v13947_v28  ;;  %v1711_v46 = vunpack.c.l.b16 %v1455_v59 }
  0xb9   : > { %13949 = vst [vmem:[#allocation14_spill] sm:$0xff] %v13948_v28  ;;  %v1152_v24 = vpack.c.bf16 %v8951_v5, %v8951_v5  ;;  %v1601_v0 = vunpack.c.l.b16 %v1135_v14  ;;  %v1520_v59 = vunpack.c.l.b16 %v1295_v55  ;;  %vm1057_vm1 = vcmp.ge.f32.partialorder %v1011_v30, 0.0 }
  0xba   : > { %vm1040_vm12 = vcmp.ge.f32.partialorder %v968_v8, 0.0  ;;  %v1072_v17 = vmul.f32 0.1, %v968_v8  ;;  %v1456_v20 = vsel %vm8941_vm10, %v1392_v61, 0 }
  0xbb   : > { %v1712_v31 = vunpack.c.l.b16 %v1456_v20 }
  0xbc   : > { %v8973_v50 = vsel %vm1040_vm12, %v968_v8, %v1072_v17  ;;  %v1294_v8 = vsel %vm8966_vm15, %v1230_v23, 0  ;;  %v1089_v17 = vmul.f32 0.1, %v1011_v30  ;;  %v288_v23 = vadd.s32 56, %v8748_v43 }
  0xbd   : > { %v1136_v53 = vpack.c.bf16 %v8973_v50, %v8973_v50  ;;  %v1329_v62 = vrot.slane %v8973_v50, 1  ;;  %v8986_v61 = vpack.c.b16 %v1712_v31, %v1711_v46  ;;  %v1519_v11 = vunpack.c.l.b16 %v1294_v8 }
  0xbe   : > { %v1012_v6 = vpop.f32.mrf.mxu3  ;;  %v8995_v31 = vunpack.c.l.b16 %v1152_v24  ;;  %v9005_v8 = vsel %vm1057_vm1, %v1011_v30, %v1089_v17  ;;  %v9023_v30 = vsel %vm13783_vm5, %v1341_v7, %v13736_v27 }
  0xbf   : > { %13952 = vst [vmem:[#allocation15_spill] sm:$0xff] %v8986_v61  ;;  %v1013_v20 = vadd.f32 %v8742_v32, %v1012_v6  ;;  %v970_v3 = vpop.f32.mrf.mxu0  ;;  %v1602_v52 = vunpack.c.l.b16 %v1136_v53  ;;  %v1383_v26 = vsel %vm13783_vm5, %v1328_v47, %v1329_v62  ;;  %v9000_v55 = vpack.c.b16 %v1520_v59, %v1519_v11  ;;  %7931 = vmatmul.msk.bf16.gmra.mxu0 %vm13782_vm11, %v8986_v61 }
  0xc0   : > { %v971_v60 = vadd.f32 %v8742_v32, %v970_v3  ;;  %v1167_v6 = vrot.slane %v8923_v15, 7  ;;  %v9008_v3 = vunpack.c.l.b16 %v1145_v63  ;;  %v9010_v47 = vunpack.c.l.b16 %v1146_v58  ;;  %13955 = vst [vmem:[#allocation18_spill] sm:$0xff] %v9023_v30 }
  0xc1   : > { %v1631_v46 = vpack.c.b16 %v1602_v52, %v1601_v0  ;;  %13953 = vst [vmem:[#allocation16_spill] sm:$0xff] %v9000_v55  ;;  %v1090_v35 = vmul.f32 0.1, %v1013_v20  ;;  %vm1058_vm3 = vcmp.ge.f32.partialorder %v1013_v20, 0.0  ;;  %v1393_v11 = vpack.c.bf16 %v1383_v26, %v1383_v26 }
  0xc2   : > { %vm1041_vm2 = vcmp.ge.f32.partialorder %v971_v60, 0.0  ;;  %v1073_v53 = vmul.f32 0.1, %v971_v60  ;;  %v9015_v15 = vadd.s32 136, %v8748_v43  ;;  %v366_v0 = vand.u32 15, %v288_v23 }
  0xc3   : > { %1649 = vrot.lane.b32.xlu1 %v1631_v46, %s8616_s13  ;;  %v1153_v26 = vpack.c.bf16 %v9005_v8, %v9005_v8  ;;  %v9032_v59 = vsel %vm1058_vm3, %v1013_v20, %v1090_v35  ;;  %v285_v46 = vadd.s32 32, %v8748_v43  ;;  %v9053_v20 = vsel %vm13783_vm5, %v13735_v42, %v1341_v7 }
  0xc4   : > { %v9012_v52 = vsel %vm1041_vm2, %v971_v60, %v1073_v53  ;;  %13954 = vst [vmem:[#allocation17_spill] sm:$0xff] %v9015_v15  ;;  %v13737_v53 = vrot.slane %v8973_v50, 7  ;;  %v1457_v49 = vsel %vm8819_vm13, %v1393_v11, 0  ;;  %v1154_v21 = vpack.c.bf16 %v9032_v59, %v9032_v59 }
  0xc5   : > { %v1330_v24 = vrot.slane %v9012_v52, 1  ;;  %13959 = vst [vmem:[#allocation20_spill] sm:$0xff] %v9053_v20  ;;  %v9061_v40 = vunpack.c.l.b16 %v1153_v26  ;;  %v345_v14 = vand.u32 15, %v285_v46  ;;  %vm9073_vm9 = vcmp.lt.s32.totalorder %v366_v0, 15  ;;  %v8462_v46 = vld [vmem:[%s13728_s3 + $0x74] sm:$0xf0] }
  0xc6   : > { %v1015_v17 = vpop.f32.mrf.mxu3  ;;  %v9082_v26 = vunpack.c.l.b16 %v1154_v21  ;;  %v1222_v0 = vsel %vm13781_vm4, %v1167_v6, %v13737_v53  ;;  %vm9140_vm3 = vmpackc.low %vm9073_vm9, %vm9073_vm9  ;;  %v7836_v20 = vld [vmem:[%s13728_s3 + $0x20] sm:$0xf] }
  0xc7   : > { %v972_v16 = vpop.f32.mrf.mxu0  ;;  %v1382_v23 = vsel %vm13783_vm5, %v1329_v62, %v1330_v24  ;;  %v1016_v62 = vadd.f32 %v8742_v32, %v1015_v17  ;;  %v1713_v17 = vunpack.c.l.b16 %v1457_v49  ;;  %vm701_vm8 = vcmp.gt.s32.totalorder %v345_v14, 0 }
  0xc8   : > { %v973_v39 = vadd.f32 %v8742_v32, %v972_v16  ;;  %v1394_v60 = vpack.c.bf16 %v1382_v23, %v1382_v23  ;;  %v1137_v16 = vpack.c.bf16 %v9012_v52, %v9012_v52  ;;  %vm9092_vm0 = vmpackc.low %vm701_vm8, %vm701_vm8 }
  0xc9   : > { %v1091_v42 = vmul.f32 0.1, %v1016_v62  ;;  %vm1059_vm12 = vcmp.ge.f32.partialorder %v1016_v62, 0.0 }
  0xca   : > { %vm1042_vm7 = vcmp.ge.f32.partialorder %v973_v39, 0.0  ;;  %v1074_v63 = vmul.f32 0.1, %v973_v39  ;;  %v1458_v7 = vsel %vm9041_vm6, %v1394_v60, 0  ;;  %v1603_v58 = vunpack.c.l.b16 %v1137_v16 }
  0xcb   : > { %v1714_v23 = vunpack.c.l.b16 %v1458_v7  ;;  %v9101_v53 = vsel %vm1059_vm12, %v1016_v62, %v1091_v42 }
  0xcc   : > { %v9071_v27 = vsel %vm1042_vm7, %v973_v39, %v1074_v63  ;;  %v1223_v63 = vsel %vm13781_vm4, %v1166_v2, %v1167_v6  ;;  %v13962_v39 = vmov 0  ;;  %v290_v2 = vadd.s32 72, %v8748_v43 }
  0xcd   : > { %v1331_v49 = vrot.slane %v9071_v27, 1  ;;  %v1743_v7 = vpack.c.b16 %v1714_v23, %v1713_v17  ;;  %v1138_v11 = vpack.c.bf16 %v9071_v27, %v9071_v27  ;;  %v13963_v39 = vsel %vm9092_vm0, 4294967295, %v13962_v39 }
  0xce   : > { %v1017_v14 = vpop.f32.mrf.mxu3  ;;  %13964 = vst [vmem:[#allocation21_spill] sm:$0xff] %v13963_v39  ;;  %v1232_v60 = vpack.c.bf16 %v1223_v63, %v1223_v63  ;;  %v1233_v6 = vpack.c.bf16 %v1222_v0, %v1222_v0 }
  0xcf   : > { %v1018_v17 = vadd.f32 %v8742_v32, %v1017_v14  ;;  %v975_v23 = vpop.f32.mrf.mxu0  ;;  %7916 = vmatmul.msk.bf16.vlgmr.msra.gmra.mxu2 %vm13782_vm11, %v1743_v7  ;;  %v1604_v21 = vunpack.c.l.b16 %v1138_v11  ;;  %v1381_v16 = vsel %vm13783_vm5, %v1330_v24, %v1331_v49  ;;  %7932 = vmatmul.msk.bf16.gmra.mxu0 %vm13782_vm11, %v1743_v7  ;;  %v1155_v24 = vpack.c.bf16 %v9101_v53, %v9101_v53 }
  0xd0   : > { %v976_v57 = vadd.f32 %v8742_v32, %v975_v23  ;;  %v1395_v35 = vpack.c.bf16 %v1381_v16, %v1381_v16  ;;  %v1296_v14 = vsel %vm9092_vm0, %v1232_v60, 0  ;;  %v1297_v42 = vsel %vm8819_vm13, %v1233_v6, 0  ;;  %v7878_v60 = vld [vmem:[%s13728_s3 + $0x78] sm:$0xf0] }
  0xd1   : > { %v1092_v36 = vmul.f32 0.1, %v1018_v17  ;;  %v1632_v51 = vpack.c.b16 %v1604_v21, %v1603_v58  ;;  %vm1060_vm1 = vcmp.ge.f32.partialorder %v1018_v17, 0.0  ;;  %v1521_v62 = vunpack.c.l.b16 %v1296_v14  ;;  %v7876_v14 = vld [vmem:[%s13728_s3 + $0x70] sm:$0xf] }
  0xd2   : > { %vm1043_vm2 = vcmp.ge.f32.partialorder %v976_v57, 0.0  ;;  %v1075_v11 = vmul.f32 0.1, %v976_v57  ;;  %v1522_v0 = vunpack.c.l.b16 %v1297_v42  ;;  %v9114_v58 = vadd.s32 152, %v8748_v43 }
  0xd3   : > { %1651 = vrot.lane.b32.xlu1 %v1632_v51, %s8616_s13  ;;  %v9122_v21 = vsel %vm1060_vm1, %v1018_v17, %v1092_v36  ;;  %v1459_v16 = vsel %vm8819_vm13, %v1395_v35, 0  ;;  %v13966_v35 = vmov 0  ;;  %v9144_v17 = vunpack.c.l.b16 %v1155_v24 }
  0xd4   : > { %v9118_v23 = vsel %vm1043_vm2, %v976_v57, %v1075_v11  ;;  %v9127_v6 = vpack.c.b16 %v1522_v0, %v1521_v62  ;;  %v380_v11 = vand.u32 15, %v290_v2  ;;  %v13967_v35 = vsel %vm9140_vm3, 4294967295, %v13966_v35 }
  0xd5   : > { %v13738_v51 = vrot.slane %v9118_v23, 1  ;;  %13968 = vst [vmem:[#allocation23_spill] sm:$0xff] %v13967_v35  ;;  %v1156_v24 = vpack.c.bf16 %v9122_v21, %v9122_v21  ;;  %v13970_v42 = vpack.c.b16 %v9010_v47, %v9008_v3  ;;  %v8460_v3 = vld [vmem:[%s13728_s3 + $0x64] sm:$0xf0]  ;;  %v1148_v47 = vpack.c.bf16 %v8921_v44, %v8921_v44 }
  0xd6   : > { %13965 = vst [vmem:[#allocation22_spill] sm:$0xff] %v9127_v6  ;;  %v1020_v57 = vpop.f32.mrf.mxu3  ;;  %vm9177_vm9 = vcmp.lt.s32.totalorder %v380_v11, 15 }
  0xd7   : > { %v1021_v63 = vadd.f32 %v8742_v32, %v1020_v57  ;;  %v977_v7 = vpop.f32.mrf.mxu0  ;;  %v1380_v36 = vsel %vm13783_vm5, %v1331_v49, %v13738_v51  ;;  %13969 = vst [vmem:[#allocation24_spill] sm:$0xff] %v9144_v17  ;;  %v1715_v57 = vunpack.c.l.b16 %v1459_v16  ;;  %v8461_v49 = vld [vmem:[%s13728_s3 + $0x74] sm:$0xf]  ;;  %v1139_v16 = vpack.c.bf16 %v9118_v23, %v9118_v23  ;;  %vm9311_vm2 = vmpackc.low %vm9177_vm9, %vm9177_vm9 }
  0xd8   : > { %v978_v2 = vadd.f32 %v8742_v32, %v977_v7  ;;  %v1396_v0 = vpack.c.bf16 %v1380_v36, %v1380_v36  ;;  %v7877_v36 = vor.u32 %v8462_v46, %v7876_v14  ;;  %v7881_v39 = vor.u32 %v8461_v49, %v7878_v60  ;;  %v7868_v60 = vld [vmem:[%s13728_s3 + $0x60] sm:$0xf] }
  0xd9   : > { %v1093_v13 = vmul.f32 0.1, %v1021_v63  ;;  %v1147_v14 = vpack.c.bf16 %v8878_v1, %v8878_v1  ;;  %vm1061_vm8 = vcmp.ge.f32.partialorder %v1021_v63, 0.0  ;;  %v13975_v49 = vrot.slane %v8859_v56, 1 }
  0xda   : > { %vm1044_vm7 = vcmp.ge.f32.partialorder %v978_v2, 0.0  ;;  %v1076_v62 = vmul.f32 0.1, %v978_v2  ;;  %v1460_v51 = vsel %vm9140_vm3, %v1396_v0, 0  ;;  %2013 = vmatpush.bf16.msrb.mxu1 %v7877_v36  ;;  %2191 = vmatpush.bf16.msrb.mxu3 %v7881_v39  ;;  %v8459_v39 = vld [vmem:[%s13728_s3 + $0x64] sm:$0xf]  ;;  %v7869_v36 = vor.u32 %v8460_v3, %v7868_v60 }
  0xdb   : > { %1659 = vrot.lane.b32.xlu1 %v13970_v42, %s8616_s13  ;;  %v1716_v7 = vunpack.c.l.b16 %v1460_v51  ;;  %v9189_v51 = vunpack.c.l.b16 %v1156_v24  ;;  %v13974_v0 = vrot.slane %v8914_v38, 1  ;;  %v9212_v4 = vsel %vm1061_vm8, %v1021_v63, %v1093_v13 }
  0xdc   : > { %v9175_v46 = vsel %vm1044_vm7, %v978_v2, %v1076_v62  ;;  %v7870_v2 = vld [vmem:[%s13728_s3 + $0x68] sm:$0xf0]  ;;  %v9209_v62 = vadd.s32 88, %v8748_v43  ;;  %v9216_v6 = vunpack.c.l.b16 %v1147_v14  ;;  %v13977_v3 = vrot.slane %v9118_v23, 1  ;;  %v7860_v14 = vld [vmem:[%s13728_s3 + $0x50] sm:$0xf] }
  0xdd   : > { %13973 = vst [vmem:[#allocation25_spill] sm:$0xff] %v9189_v51  ;;  %v1744_v42 = vpack.c.b16 %v1716_v7, %v1715_v57  ;;  %v1140_v11 = vpack.c.bf16 %v9175_v46, %v9175_v46  ;;  %v9206_v57 = vsel %vm13783_vm5, %v13975_v49, %v13974_v0  ;;  %v1605_v7 = vunpack.c.l.b16 %v1139_v16  ;;  %v8457_v49 = vld [vmem:[%s13728_s3 + $0x54] sm:$0xf] }
  0xde   : > { %v1022_v24 = vpop.f32.mrf.mxu3  ;;  %v7873_v28 = vor.u32 %v8459_v39, %v7870_v2  ;;  %v1157_v16 = vpack.c.bf16 %v9212_v4, %v9212_v4  ;;  %v13976_v60 = vrot.slane %v9175_v46, 1  ;;  %2014 = vmatpush.bf16.msrb.mxu1 %v7869_v36  ;;  %v9227_v63 = vunpack.c.l.b16 %v1148_v47 }
  0xdf   : > { %v1023_v37 = vadd.f32 %v8742_v32, %v1022_v24  ;;  %v980_v61 = vpop.f32.mrf.mxu0  ;;  %7917 = vmatmul.msk.bf16.gmra.mxu2 %vm13782_vm11, %v1744_v42  ;;  %v1606_v22 = vunpack.c.l.b16 %v1140_v11  ;;  %7933 = vmatmul.msk.bf16.gmra.mxu0 %vm13782_vm11, %v1744_v42  ;;  %v7862_v24 = vld [vmem:[%s13728_s3 + $0x58] sm:$0xf0]  ;;  %v13978_v36 = vrot.slane %v8859_v56, 1  ;;  %v13981_v42 = vpack.c.b16 %v8995_v31, %v8961_v34  ;;  %v8456_v34 = vld [vmem:[%s13728_s3 + $0x44] sm:$0xf0] }
  0xe0   : > { %v981_v0 = vadd.f32 %v8742_v32, %v980_v61  ;;  %v1379_v13 = vsel %vm13783_vm5, %v13977_v3, %v13976_v60  ;;  %2192 = vmatpush.bf16.msrb.mxu3 %v7873_v28  ;;  %v8458_v61 = vld [vmem:[%s13728_s3 + $0x54] sm:$0xf0]  ;;  %v13979_v60 = vrot.slane %v8797_v12, 1 }
  0xe1   : > { %vm1062_vm12 = vcmp.ge.f32.partialorder %v1023_v37, 0.0  ;;  %v1094_v11 = vmul.f32 0.1, %v1023_v37  ;;  %v1633_v39 = vpack.c.b16 %v1606_v22, %v1605_v7  ;;  %v7861_v2 = vor.u32 %v8458_v61, %v7860_v14 }
  0xe2   : > { %vm1045_vm1 = vcmp.ge.f32.partialorder %v981_v0, 0.0  ;;  %v1077_v47 = vmul.f32 0.1, %v981_v0  ;;  %v9249_v22 = vsel %vm13783_vm5, %v13979_v60, %v13978_v36  ;;  %v1397_v14 = vpack.c.bf16 %v1379_v13, %v1379_v13 }
  0xe3   : > { %v9252_v3 = vsel %vm1062_vm12, %v1023_v37, %v1094_v11  ;;  %1653 = vrot.lane.b32.xlu2 %v1633_v39, %s8616_s13  ;;  %1665 = vrot.lane.b32.xlu1 %v13981_v42, %s8616_s13  ;;  %v7865_v61 = vor.u32 %v8457_v49, %v7862_v24  ;;  %v1623_v60 = vunpack.c.l.b16 %v1157_v16  ;;  %v7852_v37 = vld [vmem:[%s13728_s3 + $0x40] sm:$0xf]  ;;  %v8455_v16 = vld [vmem:[%s13728_s3 + $0x44] sm:$0xf]  ;;  %v9280_v39 = vadd.s32 144, %v8748_v43 }
  0xe4   : > { %13980 = vst [vmem:[#allocation26_spill] sm:$0xff] %v9252_v3  ;;  %v9259_v28 = vsel %vm1045_vm1, %v981_v0, %v1077_v47  ;;  %v1158_v36 = vpack.c.bf16 %v9252_v3, %v9252_v3  ;;  %2015 = vmatpush.bf16.msrb.mxu1 %v7861_v2  ;;  %v7853_v13 = vor.u32 %v8456_v34, %v7852_v37  ;;  %v7854_v11 = vld [vmem:[%s13728_s3 + $0x48] sm:$0xf0]  ;;  %v7844_v24 = vld [vmem:[%s13728_s3 + $0x30] sm:$0xf]  ;;  %v13983_v34 = vrot.slane %v8951_v5, 1 }
  0xe5   : > { %13982 = vst [vmem:[#allocation27_spill] sm:$0xff] %v9259_v28  ;;  %v13755_v31 = vrot.slane %v9259_v28, 1  ;;  %2193 = vmatpush.bf16.msrb.mxu3 %v7865_v61  ;;  %v7857_v47 = vor.u32 %v8455_v16, %v7854_v11  ;;  %v8454_v42 = vld [vmem:[%s13728_s3 + $0x34] sm:$0xf0]  ;;  %v8453_v61 = vld [vmem:[%s13728_s3 + $0x34] sm:$0xf]  ;;  %v1141_v35 = vpack.c.bf16 %v9259_v28, %v9259_v28 }
  0xe6   : > { %v1025_v2 = vpop.f32.mrf.mxu3  ;;  %v1624_v49 = vunpack.c.l.b16 %v1158_v36  ;;  %v13984_v36 = vrot.slane %v8914_v38, 1  ;;  %v13985_v7 = vrot.slane %v9175_v46, 1  ;;  %v13986_v37 = vmov 0 }
  0xe7   : > { %v1026_v11 = vadd.f32 %v8742_v32, %v1025_v2  ;;  %v982_v55 = vpop.f32.mrf.mxu0  ;;  %v13987_v37 = vsel %vm9311_vm2, 4294967295, %v13986_v37  ;;  %v7846_v2 = vld [vmem:[%s13728_s3 + $0x38] sm:$0xf0] }
  0xe8   : > { %v9299_v16 = vsel %vm13783_vm5, %v13984_v36, %v13983_v34  ;;  %v1378_v0 = vsel %vm13783_vm5, %v13985_v7, %v13755_v31  ;;  %13988 = vst [vmem:[#allocation28_spill] sm:$0xff] %v13987_v37  ;;  %v1461_v34 = vsel %vm8819_vm13, %v1397_v14, 0  ;;  %v1407_v36 = vpack.c.bf16 %v9249_v22, %v9249_v22  ;;  %2016 = vmatpush.bf16.msrb.mxu1 %v7853_v13  ;;  %v8452_v22 = vld [vmem:[%s13728_s3 + $0x24] sm:$0xf0] }
  0xe9   : > { %v983_v30 = vadd.f32 %v8742_v32, %v982_v55  ;;  %v1398_v7 = vpack.c.bf16 %v1378_v0, %v1378_v0  ;;  %v7845_v31 = vor.u32 %v8454_v42, %v7844_v24  ;;  %vm1063_vm7 = vcmp.ge.f32.partialorder %v1026_v11, 0.0  ;;  %2194 = vmatpush.bf16.msrb.mxu3 %v7857_v47 }
  0xea   : > { %v1095_v14 = vmul.f32 0.1, %v1026_v11  ;;  %v1642_v38 = vpack.c.b16 %v1624_v49, %v1623_v60  ;;  %v7849_v15 = vor.u32 %v8453_v61, %v7846_v2  ;;  %v1717_v13 = vunpack.c.l.b16 %v1461_v34  ;;  %v8451_v60 = vld [vmem:[%s13728_s3 + $0x24] sm:$0xf]  ;;  %v7838_v49 = vld [vmem:[%s13728_s3 + $0x28] sm:$0xf0] }
  0xeb   : > { %vm1046_vm8 = vcmp.ge.f32.partialorder %v983_v30, 0.0  ;;  %v1078_v55 = vmul.f32 0.1, %v983_v30  ;;  %v1462_v0 = vsel %vm9311_vm2, %v1398_v7, 0  ;;  %v13990_v47 = vrot.slane %v9005_v8, 1 }
  0xec   : > { %v9334_v42 = vsel %vm1063_vm7, %v1026_v11, %v1095_v14  ;;  %1671 = vrot.lane.b32.xlu1 %v1642_v38, %s8616_s13  ;;  %v1718_v17 = vunpack.c.l.b16 %v1462_v0  ;;  %v13991_v61 = vrot.slane %v8951_v5, 1  ;;  %v13993_v2 = vand.u32 15, %v9209_v62  ;;  %2017 = vmatpush.bf16.msrb.mxu1 %v7845_v31  ;;  %v8450_v62 = vld [vmem:[%s13728_s3 + $0x14] sm:$0xf0] }
  0xed   : > { %13989 = vst [vmem:[#allocation29_spill] sm:$0xff] %v9334_v42  ;;  %v9352_v38 = vsel %vm1046_vm8, %v983_v30, %v1078_v55  ;;  %v7837_v14 = vor.u32 %v8452_v22, %v7836_v20  ;;  %v294_v0 = vadd.s32 104, %v8748_v43  ;;  %2195 = vmatpush.bf16.msrb.mxu3 %v7849_v15  ;;  %v7828_v30 = vld [vmem:[%s13728_s3 + $0x10] sm:$0xf]  ;;  %v13996_v20 = vand.u32 15, %v9114_v58 }
  0xee   : > { %v9349_v34 = vsel %vm13783_vm5, %v13991_v61, %v13990_v47  ;;  %13992 = vst [vmem:[#allocation30_spill] sm:$0xff] %v9352_v38  ;;  %vm9356_vm9 = vcmp.lt.s32.totalorder %v13993_v2, 15  ;;  %v1335_v24 = vrot.slane %v9352_v38, 1  ;;  %v1745_v37 = vpack.c.b16 %v1718_v17, %v1717_v13  ;;  %v1027_v22 = vpop.f32.mrf.mxu3 }
  0xef   : > { %v1142_v47 = vpack.c.bf16 %v9352_v38, %v9352_v38  ;;  %v1607_v61 = vunpack.c.l.b16 %v1141_v35  ;;  %vm9372_vm12 = vcmp.lt.s32.totalorder %v13996_v20, 15  ;;  %v1159_v15 = vpack.c.bf16 %v9334_v42, %v9334_v42  ;;  %v985_v58 = vpop.f32.mrf.mxu0 }
  0xf0   : > { %v7841_v35 = vor.u32 %v8451_v60, %v7838_v49  ;;  %v9381_v55 = vsel %vm8819_vm13, %v1407_v36, 0  ;;  %v1028_v2 = vadd.f32 %v8742_v32, %v1027_v22  ;;  %7918 = vmatmul.msk.bf16.gmra.mxu2 %vm13782_vm11, %v1745_v37  ;;  %v13999_v11 = vrot.slane %v9259_v28, 1  ;;  %2018 = vmatpush.bf16.msrb.mxu1 %v7837_v14  ;;  %vm9464_vm4 = vmpackc.low %vm9372_vm12, %vm9372_vm12 }
  0xf1   : > { %v1608_v20 = vunpack.c.l.b16 %v1142_v47  ;;  %v986_v42 = vadd.f32 %v8742_v32, %v985_v58  ;;  %v7829_v49 = vor.u32 %v8450_v62, %v7828_v30  ;;  %v408_v36 = vand.u32 15, %v294_v0  ;;  %7934 = vmatmul.msk.bf16.gmra.mxu0 %vm13782_vm11, %v1745_v37  ;;  %v7830_v37 = vld [vmem:[%s13728_s3 + $0x18] sm:$0xf0]  ;;  %v7820_v30 = vld [vmem:[%s13728_s3] sm:$0xf] }
  0xf2   : > { %v1377_v17 = vsel %vm13783_vm5, %v13999_v11, %v1335_v24  ;;  %vm1064_vm1 = vcmp.ge.f32.partialorder %v1028_v2, 0.0  ;;  %v1096_v5 = vmul.f32 0.1, %v1028_v2  ;;  %2196 = vmatpush.bf16.msrb.mxu3 %v7841_v35  ;;  %v296_v22 = vadd.s32 120, %v8748_v43  ;;  %v8449_v11 = vld [vmem:[%s13728_s3 + $0x14] sm:$0xf] }
  0xf3   : > { %v1399_v60 = vpack.c.bf16 %v1377_v17, %v1377_v17  ;;  %v1634_v13 = vpack.c.b16 %v1608_v20, %v1607_v61  ;;  %vm1047_vm7 = vcmp.ge.f32.partialorder %v986_v42, 0.0  ;;  %v1079_v38 = vmul.f32 0.1, %v986_v42  ;;  %v8448_v62 = vld [vmem:[%s13728_s3 + $0x4] sm:$0xf0] }
  0xf4   : > { %v1408_v14 = vpack.c.bf16 %v9206_v57, %v9206_v57  ;;  %v9402_v0 = vsel %vm1064_vm1, %v1028_v2, %v1096_v5  ;;  %v9405_v61 = vunpack.c.l.b16 %v1159_v15  ;;  %v14000_v57 = vrot.slane %v8878_v1, 1  ;;  %2019 = vmatpush.bf16.msrb.mxu1 %v7829_v49  ;;  %v8447_v2 = vld [vmem:[%s13728_s3 + $0x4] sm:$0xf]  ;;  %v7822_v58 = vld [vmem:[%s13728_s3 + $0x8] sm:$0xf0]  ;;  %vm9454_vm1 = vmpackc.low %vm9356_vm9, %vm9356_vm9 }
  0xf5   : > { %v9395_v47 = vsel %vm8819_vm13, %v1399_v60, 0  ;;  %1655 = vrot.lane.b32.xlu2 %v1634_v13, %s8616_s13  ;;  %v14001_v5 = vrot.slane %v8830_v33, 1  ;;  %v9423_v35 = vsel %vm1047_vm7, %v986_v42, %v1079_v38  ;;  %v1160_v13 = vpack.c.bf16 %v9402_v0, %v9402_v0 }
  0xf6   : > { %v317_v20 = vand.u32 15, %v8748_v43  ;;  %v1336_v38 = vrot.slane %v9423_v35, 1  ;;  %v1719_v49 = vunpack.c.l.b16 %v9395_v47  ;;  %vm9442_vm8 = vcmp.lt.s32.totalorder %v408_v36, 15  ;;  %v1030_v1 = vpop.f32.mrf.mxu3 }
  0xf7   : > { %v1372_v17 = vsel %vm13783_vm5, %v14001_v5, %v14000_v57  ;;  %v14002_v60 = vmov %v14001_v5  ;;  %v14003_v57 = vrot.slane %v8809_v18, 1  ;;  %v7833_v15 = vor.u32 %v8449_v11, %v7830_v37  ;;  %v987_v12 = vpop.f32.mrf.mxu0 }
  0xf8   : > { %v1143_v28 = vpack.c.bf16 %v9423_v35, %v9423_v35  ;;  %v7821_v3 = vor.u32 %v8448_v62, %v7820_v30  ;;  %v422_v33 = vand.u32 15, %v296_v22  ;;  %v1404_v51 = vpack.c.bf16 %v1372_v17, %v1372_v17 }
  0xf9   : > { %v1373_v42 = vsel %vm13783_vm5, %v14003_v57, %v14002_v60  ;;  %v1031_v44 = vadd.f32 %v8742_v32, %v1030_v1  ;;  %v1376_v60 = vsel %vm13783_vm5, %v1335_v24, %v1336_v38  ;;  %v14006_v36 = vmov 0  ;;  %2197 = vmatpush.bf16.msrb.mxu3 %v7833_v15 }
  0xfa   : > { %v14007_v36 = vsel %vm9454_vm1, 4294967295, %v14006_v36  ;;  %v7825_v47 = vor.u32 %v8447_v2, %v7822_v58  ;;  %v1403_v11 = vpack.c.bf16 %v1373_v42, %v1373_v42  ;;  %v988_v37 = vadd.f32 %v8742_v32, %v987_v12  ;;  %2020 = vmatpush.bf16.msrb.mxu1 %v7821_v3 }
  0xfb   : > { %14008 = vst [vmem:[#allocation31_spill] sm:$0xff] %v14007_v36  ;;  %v1400_v22 = vpack.c.bf16 %v1376_v60, %v1376_v60  ;;  %v9459_v30 = vunpack.c.l.b16 %v1160_v13  ;;  %vm744_vm7 = vcmp.lt.s32.totalorder %v422_v33, 15  ;;  %v14009_v1 = vmov 0 }
  0xfc   : > { %v14010_v1 = vsel %vm9464_vm4, 4294967295, %v14009_v1  ;;  %v1353_v24 = vrot.slane %v9402_v0, 1  ;;  %v1175_v7 = vrot.slane %v9423_v35, 7  ;;  %vm1065_vm9 = vcmp.ge.f32.partialorder %v1031_v44, 0.0  ;;  %vm9471_vm11 = vmpackc.low %vm744_vm7, %vm744_vm7 }
  0xfd   : > { %14011 = vst [vmem:[#allocation32_spill] sm:$0xff] %v14010_v1  ;;  %v1097_v62 = vmul.f32 0.1, %v1031_v44  ;;  %v14012_v32 = vmov 0  ;;  %vm1048_vm5 = vcmp.ge.f32.partialorder %v988_v37, 0.0  ;;  %v1464_v33 = vsel %vm9454_vm1, %v1400_v22, 0  ;;  %2198 = vmatpush.bf16.msrb.mxu3 %v7825_v47 }
  0xfe   : > { %2106 = vmatpush.bf16.msra.mxu1 %v8794_v10  ;;  %v14013_v32 = vsel %vm9471_vm11, 4294967295, %v14012_v32  ;;  %v1080_v12 = vmul.f32 0.1, %v988_v37  ;;  %v1467_v3 = vsel %vm8819_vm13, %v1403_v11, 0  ;;  %v14015_v17 = vpack.c.b16 %v9227_v63, %v9216_v6  ;;  %v8602_v11 = vld [vmem:[%s13727_s2] ss:$0 sm:$0xff] }
  0xff   : > { %14014 = vst [vmem:[#allocation33_spill] sm:$0xff] %v14013_v32  ;;  %v9479_v31 = vsel %vm1065_vm9, %v1031_v44, %v1097_v62  ;;  %v1720_v10 = vunpack.c.l.b16 %v1464_v33  ;;  %vm9485_vm12 = vcmp.gt.s32.totalorder %v317_v20, 0  ;;  %v1468_v13 = vsel %vm9471_vm11, %v1404_v51, 0 }
 0x100   : > { %1661 = vrot.lane.b32.xlu2 %v14015_v17, %s8616_s13  ;;  %v1472_v2 = vsel %vm9464_vm4, %v1408_v14, 0  ;;  %v13809_v44 = vrot.slane %v9479_v31, 1  ;;  %v9494_v58 = vsel %vm1048_vm5, %v988_v37, %v1080_v12  ;;  %v1609_v57 = vunpack.c.l.b16 %v1143_v28  ;;  %v1032_v28 = vpop.f32.mrf.mxu3  ;;  %vm9525_vm4 = vmpackc.low %vm9442_vm8, %vm9442_vm8 }
 0x101   : > { %v1643_v6 = vpack.c.b16 %v9459_v30, %v9405_v61  ;;  %v1337_v63 = vrot.slane %v9494_v58, 1  ;;  %v1746_v20 = vpack.c.b16 %v1720_v10, %v1719_v49  ;;  %v1144_v42 = vpack.c.bf16 %v9494_v58, %v9494_v58 }
 0x102   : > { %v1723_v60 = vunpack.c.l.b16 %v1467_v3  ;;  %2107 = vmatpush.bf16.msra.mxu1 %v8815_v25  ;;  %vm14018_vm5 = vcmp.lt.s32.totalorder %v8748_v43, 7  ;;  %v1161_v14 = vpack.c.bf16 %v9479_v31, %v9479_v31  ;;  %v1724_v47 = vunpack.c.l.b16 %v1468_v13 }
 0x103   : > { %v9508_v51 = vsel %vm14018_vm5, %v1353_v24, %v13809_v44  ;;  %v1728_v49 = vunpack.c.l.b16 %v1472_v2  ;;  %v1033_v37 = vadd.f32 %v8602_v11, %v1032_v28  ;;  %vm14019_vm7 = vcmask 523264   ;;  %vm14021_vm9 = vmmov %vm14018_vm5 }
 0x104   : > { %7919 = vmatmul.msk.bf16.gmra.mxu2 %vm14019_vm7, %v1746_v20  ;;  %v1610_v25 = vunpack.c.l.b16 %v1144_v42  ;;  %v14020_v22 = vrot.slane %v8809_v18, 1  ;;  %v1375_v12 = vsel %vm14018_vm5, %v1336_v38, %v1337_v63  ;;  %v14022_v33 = vmov 0 }
 0x105   : > { %v14023_v33 = vsel %vm9525_vm4, 4294967295, %v14022_v33  ;;  %v1401_v3 = vpack.c.bf16 %v1375_v12, %v1375_v12  ;;  %v14025_v10 = vunpack.c.l.b16 %v9381_v55  ;;  %v287_v2 = vadd.s32 48, %v8748_v43 }
 0x106   : > { %v1374_v62 = vsel %vm14021_vm9, %v1337_v63, %v14020_v22  ;;  %14024 = vst [vmem:[#allocation34_spill] sm:$0xff] %v14023_v33  ;;  %vm1066_vm7 = vcmp.ge.f32.partialorder %v1033_v37, 0.0  ;;  %v1098_v42 = vmul.f32 0.1, %v1033_v37  ;;  %v1635_v28 = vpack.c.b16 %v1610_v25, %v1609_v57  ;;  %2108 = vmatpush.bf16.msra.mxu1 %v8848_v45 }
 0x107   : > { %v1402_v17 = vpack.c.bf16 %v1374_v62, %v1374_v62  ;;  %v9531_v13 = vpack.c.b16 %v1728_v49, %v14025_v10  ;;  %v14026_v38 = vrot.slane %v9071_v27, 7  ;;  %v14027_v5 = vrot.slane %v9012_v52, 7 }
 0x108   : > { %vm14028_vm8 = vcmp.lt.s32.totalorder %v8748_v43, 1  ;;  %vm14029_vm9 = vcmask 523264   ;;  %v1465_v55 = vsel %vm8819_vm13, %v1401_v3, 0  ;;  %v359_v11 = vand.u32 15, %v287_v2  ;;  %1657 = vrot.lane.b32.xlu0 %v1635_v28, %s8616_s13 }
 0x109   : > { %v1220_v63 = vsel %vm14028_vm8, %v14027_v5, %v14026_v38  ;;  %7935 = vmatmul.msk.bf16.gmra.mxu0 %vm14029_vm9, %v1746_v20  ;;  %v1466_v49 = vsel %vm9525_vm4, %v1402_v17, 0  ;;  %v14030_v57 = vmov %v14027_v5  ;;  %v14031_v25 = vrot.slane %v8973_v50, 7  ;;  %vm14032_vm5 = vmmov %vm14028_vm8 }
 0x10a   : > { %v9552_v62 = vsel %vm1066_vm7, %v1033_v37, %v1098_v42  ;;  %v14033_v45 = vpack.c.b16 %v9082_v26, %v9061_v40  ;;  %v1721_v20 = vunpack.c.l.b16 %v1465_v55  ;;  %v1722_v12 = vunpack.c.l.b16 %v1466_v49  ;;  %2109 = vmatpush.bf16.msra.mxu1 %v8885_v9  ;;  %vm14038_vm9 = vmmov %vm14032_vm5 }
 0x10b   : > { %v1221_v22 = vsel %vm14032_vm5, %v14031_v25, %v14030_v57  ;;  %v13806_v17 = vrot.slane %v9552_v62, 7  ;;  %v1162_v50 = vpack.c.bf16 %v9552_v62, %v9552_v62  ;;  %v9562_v52 = vunpack.c.l.b16 %v1161_v14  ;;  %vm9583_vm5 = vmpackc.low %vm9485_vm12, %vm9485_vm12 }
 0x10c   : > { %1667 = vrot.lane.b32.xlu2 %v14033_v45, %s8616_s13  ;;  %v1234_v3 = vpack.c.bf16 %v1221_v22, %v1221_v22  ;;  %vm703_vm8 = vcmp.gt.s32.totalorder %v359_v11, 0  ;;  %v9564_v37 = vpack.c.b16 %v1724_v47, %v1723_v60  ;;  %v1235_v10 = vpack.c.bf16 %v1220_v63, %v1220_v63 }
 0x10d   : > { %vm9566_vm7 = vmpackc.low %vm703_vm8, %vm703_vm8  ;;  %v14034_v2 = vmov 0  ;;  %v302_v40 = vadd.s32 168, %v8748_v43  ;;  %v1409_v26 = vpack.c.bf16 %v9299_v16, %v9299_v16  ;;  %v1747_v42 = vpack.c.b16 %v1722_v12, %v1721_v20 }
 0x10e   : > { %v14035_v2 = vsel %vm9566_vm7, 4294967295, %v14034_v2  ;;  %v14037_v28 = vrot.slane %v8745_v41, 7  ;;  %v14039_v14 = vmov 0  ;;  %v9587_v47 = vunpack.c.l.b16 %v1162_v50  ;;  %vm14044_vm8 = vmmov %vm14038_vm9 }
 0x10f   : > { %14036 = vst [vmem:[#allocation35_spill] sm:$0xff] %v14035_v2  ;;  %v14040_v14 = vsel %vm9583_vm5, 4294967295, %v14039_v14  ;;  %v1298_v9 = vsel %vm9566_vm7, %v1234_v3, 0  ;;  %v1299_v38 = vsel %vm8819_vm13, %v1235_v10, 0  ;;  %v464_v5 = vand.u32 15, %v302_v40 }
 0x110   : > { %v1227_v60 = vsel %vm14038_vm9, %v13806_v17, %v14037_v28  ;;  %14041 = vst [vmem:[#allocation36_spill] sm:$0xff] %v14040_v14  ;;  %v1410_v63 = vpack.c.bf16 %v9349_v34, %v9349_v34  ;;  %v1523_v55 = vunpack.c.l.b16 %v1298_v9  ;;  %v1524_v15 = vunpack.c.l.b16 %v1299_v38 }
 0x111   : > { %v1228_v16 = vpack.c.bf16 %v1227_v60, %v1227_v60  ;;  %v1473_v49 = vsel %vm8819_vm13, %v1409_v26, 0  ;;  %v289_v11 = vadd.s32 64, %v8748_v43  ;;  %vm750_vm12 = vcmp.lt.s32.totalorder %v464_v5, 15 }
 0x112   : > { %v1729_v25 = vunpack.c.l.b16 %v1473_v49  ;;  %v14042_v22 = vrot.slane %v9118_v23, 7  ;;  %v14043_v45 = vrot.slane %v9071_v27, 7  ;;  %v9606_v12 = vpack.c.b16 %v1524_v15, %v1523_v55  ;;  %vm9608_vm9 = vmpackc.low %vm750_vm12, %vm750_vm12 }
 0x113   : > { %v1292_v57 = vsel %vm9583_vm5, %v1228_v16, 0  ;;  %v14045_v3 = vmov 0  ;;  %v373_v50 = vand.u32 15, %v289_v11  ;;  %v14048_v27 = vpack.c.b16 %v8926_v19, %v8857_v54 }
 0x114   : > { %v1219_v20 = vsel %vm14044_vm8, %v14043_v45, %v14042_v22  ;;  %v1517_v34 = vunpack.c.l.b16 %v1292_v57  ;;  %v14046_v3 = vsel %vm9608_vm9, 4294967295, %v14045_v3  ;;  %1673 = vrot.lane.b32.xlu2 %v1643_v6, %s8616_s13  ;;  %v1474_v40 = vsel %vm9608_vm9, %v1410_v63, 0 }
 0x115   : > { %14047 = vst [vmem:[#allocation37_spill] sm:$0xff] %v14046_v3  ;;  %v1236_v10 = vpack.c.bf16 %v1219_v20, %v1219_v20  ;;  %1663 = vrot.lane.b32.xlu0 %v14048_v27, %s8616_s13  ;;  %v304_v26 = vadd.s32 184, %v8748_v43  ;;  %v14049_v28 = vrot.slane %v9101_v53, 1  ;;  %v14050_v60 = vrot.slane %v9032_v59, 1 }
 0x116   : > { %vm14051_vm12 = vcmp.lt.s32.totalorder %v8748_v43, 7  ;;  %v14053_v30 = vrot.slane %v9005_v8, 1  ;;  %v14055_v19 = vunpack.c.l.b16 %v8931_v48  ;;  %v1730_v16 = vunpack.c.l.b16 %v1474_v40 }
 0x117   : > { %v1364_v9 = vsel %vm14051_vm12, %v14050_v60, %v14049_v28  ;;  %v14052_v61 = vmov %v14050_v60  ;;  %vm14054_vm8 = vmmov %vm14051_vm12  ;;  %vm705_vm9 = vcmp.gt.s32.totalorder %v373_v50, 0  ;;  %v14056_v5 = vmov 0 }
 0x118   : > { %v1365_v54 = vsel %vm14054_vm8, %v14053_v30, %v14052_v61  ;;  %v1549_v6 = vpack.c.b16 %v14055_v19, %v1517_v34  ;;  %vm9637_vm11 = vmpackc.low %vm705_vm9, %vm705_vm9  ;;  %v478_v63 = vand.u32 15, %v304_v26  ;;  %v1412_v55 = vpack.c.bf16 %v1364_v9, %v1364_v9 }
 0x119   : > { %v1411_v38 = vpack.c.bf16 %v1365_v54, %v1365_v54  ;;  %v14057_v5 = vsel %vm9637_vm11, 4294967295, %v14056_v5  ;;  %v306_v15 = vadd.s32 200, %v8748_v43  ;;  %v14059_v49 = vrot.slane %v9212_v4, 1  ;;  %vm14061_vm12 = vmmov %vm14054_vm8 }
 0x11a   : > { %14058 = vst [vmem:[#allocation38_spill] sm:$0xff] %v14057_v5  ;;  %v14060_v11 = vrot.slane %v9122_v21, 1  ;;  %v9648_v48 = vpack.c.b16 %v1730_v16, %v1729_v25  ;;  %v1300_v22 = vsel %vm9637_vm11, %v1236_v10, 0  ;;  %v14063_v34 = vmov %v14049_v28  ;;  %vm14064_vm9 = vmmov %vm14054_vm8  ;;  %v14073_v16 = vld [vmem:[#allocation4_spill] sm:$0xff] }
 0x11b   : > { %v1475_v45 = vsel %vm8819_vm13, %v1411_v38, 0  ;;  %vm14065_vm8 = vcmask 523264   ;;  %v14066_v27 = vrot.slane %v9175_v46, 7  ;;  %v14067_v25 = vrot.slane %v9118_v23, 7 }
 0x11c   : > { %v1362_v57 = vsel %vm14061_vm12, %v14060_v11, %v14059_v49  ;;  %v14062_v20 = vmov %v14060_v11  ;;  %7920 = vmatmul.msk.bf16.gmra.mxu2 %vm14065_vm8, %v1747_v42  ;;  %vm14068_vm12 = vcmp.lt.s32.totalorder %v8748_v43, 1  ;;  %v1525_v10 = vunpack.c.l.b16 %v1300_v22  ;;  %v14077_v11 = vld [vmem:[#allocation11_spill] sm:$0xff]  ;;  %7936 = vmatmul.msk.bf16.gmra.mxu0 %vm14065_vm8, %v1747_v42 }
 0x11d   : > { %v1363_v50 = vsel %vm14064_vm9, %v14063_v34, %v14062_v20  ;;  %v1218_v40 = vsel %vm14068_vm12, %v14067_v25, %v14066_v27  ;;  %vm752_vm11 = vcmp.lt.s32.totalorder %v478_v63, 15  ;;  %v1731_v26 = vunpack.c.l.b16 %v1475_v45  ;;  %vm14075_vm9 = vmmov %vm14068_vm12  ;;  %v14080_v45 = vld [vmem:[#allocation25_spill] sm:$0xff]  ;;  %v14081_v20 = vld [vmem:[#allocation24_spill] sm:$0xff] }
 0x11e   : > { %v1237_v28 = vpack.c.bf16 %v1218_v40, %v1218_v40  ;;  %vm9667_vm7 = vmpackc.low %vm752_vm11, %vm752_vm11  ;;  %v14069_v60 = vmov 0  ;;  %v492_v9 = vand.u32 15, %v306_v15  ;;  %v1413_v61 = vpack.c.bf16 %v1363_v50, %v1363_v50 }
 0x11f   : > { %v14070_v60 = vsel %vm9667_vm7, 4294967295, %v14069_v60  ;;  %v1414_v30 = vpack.c.bf16 %v1362_v57, %v1362_v57  ;;  %v1476_v54 = vsel %vm9667_vm7, %v1412_v55, 0  ;;  %v443_v19 = vand.u32 15, %v9280_v39  ;;  %vm14079_vm11 = vmmov %vm14075_vm9 }
 0x120   : > { %14071 = vst [vmem:[#allocation39_spill] sm:$0xff] %v14070_v60  ;;  %v14072_v23 = vrot.slane %v8859_v56, 7  ;;  %v14074_v38 = vrot.slane %v14073_v16, 7  ;;  %v14078_v22 = vrot.slane %v14077_v11, 7  ;;  %v1301_v55 = vsel %vm8819_vm13, %v1237_v28, 0 }
 0x121   : > { %v1732_v39 = vunpack.c.l.b16 %v1476_v54  ;;  %vm754_vm12 = vcmp.lt.s32.totalorder %v492_v9, 15  ;;  %v1477_v57 = vsel %vm8819_vm13, %v1413_v61, 0  ;;  %v14082_v34 = vpack.c.b16 %v14080_v45, %v14081_v20  ;;  %v14098_v20 = vld [vmem:[#allocation27_spill] sm:$0xff] }
 0x122   : > { %v1208_v63 = vsel %vm14075_vm9, %v14074_v38, %v14072_v23  ;;  %v14076_v49 = vmov %v14074_v38  ;;  %v1526_v50 = vunpack.c.l.b16 %v1301_v55  ;;  %vm9695_vm9 = vmpackc.low %vm754_vm12, %vm754_vm12  ;;  %v14083_v27 = vmov 0  ;;  %v1646_v23 = vpop.permute.xlu0 %1645 }
 0x123   : > { %v1209_v15 = vsel %vm14079_vm11, %v14078_v22, %v14076_v49  ;;  %1669 = vrot.lane.b32.xlu0 %v14082_v34, %s8616_s13  ;;  %v14084_v27 = vsel %vm9695_vm9, 4294967295, %v14083_v27  ;;  %v1733_v25 = vunpack.c.l.b16 %v1477_v57  ;;  %vm715_vm11 = vcmp.gt.s32.totalorder %v443_v19, 0  ;;  %v14089_v49 = vld [vmem:[#allocation26_spill] sm:$0xff] }
 0x124   : > { %14085 = vst [vmem:[#allocation4_spill] sm:$0xff] %v14084_v27  ;;  %v1246_v42 = vpack.c.bf16 %v1209_v15, %v1209_v15  ;;  %v9699_v40 = vpack.c.b16 %v1732_v39, %v1731_v26  ;;  %v291_v28 = vadd.s32 80, %v8748_v43  ;;  %v1478_v9 = vsel %vm9695_vm9, %v1414_v30, 0  ;;  %vm9704_vm8 = vmpackc.low %vm715_vm11, %vm715_vm11 }
 0x125   : > { %v1247_v61 = vpack.c.bf16 %v1208_v63, %v1208_v63  ;;  %v14086_v54 = vmov 0  ;;  %v9708_v16 = vpack.c.b16 %v1526_v50, %v1525_v10  ;;  %v1734_v38 = vunpack.c.l.b16 %v1478_v9  ;;  %v14094_v10 = vld [vmem:[#allocation17_spill] sm:$0xff] }
 0x126   : > { %v14087_v54 = vsel %vm9704_vm8, 4294967295, %v14086_v54  ;;  %v14090_v22 = vrot.slane %v14089_v49, 1  ;;  %v14091_v19 = vrot.slane %v9212_v4, 1  ;;  %vm14092_vm12 = vcmp.lt.s32.totalorder %v8748_v43, 7 }
 0x127   : > { %14088 = vst [vmem:[#allocation11_spill] sm:$0xff] %v14087_v54  ;;  %v1310_v15 = vsel %vm9704_vm8, %v1246_v42, 0  ;;  %vm14093_vm9 = vcmask 523264   ;;  %v387_v63 = vand.u32 15, %v291_v28  ;;  %v1311_v39 = vsel %vm8819_vm13, %v1247_v61, 0 }
 0x128   : > { %v1361_v26 = vsel %vm14092_vm12, %v14091_v19, %v14090_v22  ;;  %v1759_v30 = vsel %vm14093_vm9, %v1549_v6, %v1646_v23  ;;  %v14095_v57 = vand.u32 15, %v14094_v10  ;;  %v14099_v34 = vrot.slane %v14098_v20, 7 }
 0x129   : > { %v1415_v55 = vpack.c.bf16 %v1361_v26, %v1361_v26  ;;  %2021 = vmatmul.bf16.vlgmr.msrb.gmra.mxu1 %v1759_v30  ;;  %2199 = vmatmul.bf16.vlgmr.msrb.gmra.mxu3 %v1759_v30  ;;  %v14100_v50 = vrot.slane %v9175_v46, 7  ;;  %vm14101_vm12 = vcmp.lt.s32.totalorder %v8748_v43, 1  ;;  %v9733_v42 = vpack.c.b16 %v1734_v38, %v1733_v25  ;;  %v14105_v25 = vld [vmem:[#allocation13_spill] sm:$0xff] }
 0x12a   : > { %vm9723_vm11 = vcmp.lt.s32.totalorder %v14095_v57, 15  ;;  %v1535_v28 = vunpack.c.l.b16 %v1310_v15  ;;  %v1536_v9 = vunpack.c.l.b16 %v1311_v39  ;;  %vm707_vm9 = vcmp.gt.s32.totalorder %v387_v63, 0  ;;  %v14107_v15 = vld [vmem:[#allocation10_spill] sm:$0xff]  ;;  %vm14111_vm8 = vmmov %vm14101_vm12 }
 0x12b   : > { %v1217_v6 = vsel %vm14101_vm12, %v14100_v50, %v14099_v34  ;;  %v1479_v23 = vsel %vm8819_vm13, %v1415_v55, 0  ;;  %v301_v22 = vadd.s32 160, %v8748_v43  ;;  %v1644_v19 = vpack.c.b16 %v9587_v47, %v9562_v52  ;;  %vm9740_vm7 = vmpackc.low %vm707_vm9, %vm707_vm9 }
 0x12c   : > { %v1238_v61 = vpack.c.bf16 %v1217_v6, %v1217_v6  ;;  %v14102_v26 = vmov 0  ;;  %v9744_v46 = vpack.c.b16 %v1536_v9, %v1535_v28  ;;  %v14106_v38 = vrot.slane %v14105_v25, 7  ;;  %vm14114_vm9 = vmmov %vm14111_vm8 }
 0x12d   : > { %v14103_v26 = vsel %vm9740_vm7, 4294967295, %v14102_v26  ;;  %v14108_v30 = vrot.slane %v14107_v15, 7  ;;  %v14110_v39 = vrot.slane %v8859_v56, 7  ;;  %v308_v47 = vadd.s32 216, %v8748_v43  ;;  %1675 = vrot.lane.b32.xlu0 %v1644_v19, %s8616_s13 }
 0x12e   : > { %14104 = vst [vmem:[#allocation25_spill] sm:$0xff] %v14103_v26  ;;  %v1735_v10 = vunpack.c.l.b16 %v1479_v23  ;;  %v457_v57 = vand.u32 15, %v301_v22  ;;  %v1302_v50 = vsel %vm9740_vm7, %v1238_v61, 0  ;;  %v303_v28 = vadd.s32 176, %v8748_v43 }
 0x12f   : > { %v1206_v63 = vsel %vm14101_vm12, %v14108_v30, %v14106_v38  ;;  %v14109_v55 = vmov %v14108_v30  ;;  %v14112_v9 = vrot.slane %v9032_v59, 7  ;;  %v14113_v56 = vrot.slane %v9005_v8, 7  ;;  %vm14117_vm12 = vmmov %vm14114_vm9  ;;  %v14118_v30 = vld [vmem:[#allocation29_spill] sm:$0xff] }
 0x130   : > { %v1207_v52 = vsel %vm14111_vm8, %v14110_v39, %v14109_v55  ;;  %v1249_v6 = vpack.c.bf16 %v1206_v63, %v1206_v63  ;;  %v506_v15 = vand.u32 15, %v308_v47  ;;  %vm717_vm8 = vcmp.gt.s32.totalorder %v457_v57, 0 }
 0x131   : > { %v1248_v34 = vpack.c.bf16 %v1207_v52, %v1207_v52  ;;  %v1204_v38 = vsel %vm14114_vm9, %v14113_v56, %v14112_v9  ;;  %v14115_v23 = vmov %v14113_v56  ;;  %v14116_v22 = vrot.slane %v14105_v25, 7  ;;  %vm9781_vm0 = vmpackc.low %vm717_vm8, %vm717_vm8 }
 0x132   : > { %v1251_v61 = vpack.c.bf16 %v1204_v38, %v1204_v38  ;;  %v14119_v63 = vrot.slane %v14118_v30, 1  ;;  %v14120_v55 = vrot.slane %v14089_v49, 1  ;;  %vm14121_vm7 = vcmp.lt.s32.totalorder %v8748_v43, 7  ;;  %v14126_v38 = vld [vmem:[#allocation30_spill] sm:$0xff] }
 0x133   : > { %v1205_v19 = vsel %vm14117_vm12, %v14116_v22, %v14115_v23  ;;  %v14122_v52 = vmov 0  ;;  %v1313_v8 = vsel %vm8819_vm13, %v1249_v6, 0  ;;  %v471_v47 = vand.u32 15, %v303_v28 }
 0x134   : > { %v1360_v39 = vsel %vm14121_vm7, %v14120_v55, %v14119_v63  ;;  %v14123_v52 = vsel %vm9781_vm0, 4294967295, %v14122_v52  ;;  %v1250_v25 = vpack.c.bf16 %v1205_v19, %v1205_v19  ;;  %vm756_vm9 = vcmp.lt.s32.totalorder %v506_v15, 15 }
 0x135   : > { %14124 = vst [vmem:[#allocation24_spill] sm:$0xff] %v14123_v52  ;;  %v1416_v57 = vpack.c.bf16 %v1360_v39, %v1360_v39  ;;  %v1312_v9 = vsel %vm9781_vm0, %v1248_v34, 0  ;;  %v1538_v56 = vunpack.c.l.b16 %v1313_v8  ;;  %vm14125_vm12 = vcmask 523264   ;;  %vm9797_vm8 = vmpackc.low %vm756_vm9, %vm756_vm9 }
 0x136   : > { %7921 = vmatmul.msk.bf16.gmra.mxu2 %vm14125_vm12, %v9564_v37  ;;  %v14127_v23 = vrot.slane %v14126_v38, 7  ;;  %v14128_v22 = vrot.slane %v14098_v20, 7  ;;  %vm14129_vm7 = vcmp.lt.s32.totalorder %v8748_v43, 1  ;;  %v14130_v6 = vmov 0 }
 0x137   : > { %v14131_v6 = vsel %vm9797_vm8, 4294967295, %v14130_v6  ;;  %v1537_v28 = vunpack.c.l.b16 %v1312_v9  ;;  %vm719_vm15 = vcmp.gt.s32.totalorder %v471_v47, 0  ;;  %v1315_v34 = vsel %vm8819_vm13, %v1251_v61, 0  ;;  %vm14138_vm9 = vmmov %vm14129_vm7 }
 0x138   : > { %v1216_v63 = vsel %vm14129_vm7, %v14128_v22, %v14127_v23  ;;  %14132 = vst [vmem:[#allocation26_spill] sm:$0xff] %v14131_v6  ;;  %v1480_v19 = vsel %vm9797_vm8, %v1416_v57, 0  ;;  %vm9805_vm12 = vmpackc.low %vm719_vm15, %vm719_vm15  ;;  %v14133_v55 = vmov 0  ;;  %v1540_v20 = vunpack.c.l.b16 %v1315_v34  ;;  %v14158_v6 = vld [vmem:[#allocation6_spill] sm:$0xff] }
 0x139   : > { %v1239_v15 = vpack.c.bf16 %v1216_v63, %v1216_v63  ;;  %v14134_v55 = vsel %vm9805_vm12, 4294967295, %v14133_v55  ;;  %v305_v39 = vadd.s32 192, %v8748_v43  ;;  %v1736_v8 = vunpack.c.l.b16 %v1480_v19  ;;  %vm9825_vm7 = vmpackc.low %vm9723_vm11, %vm9723_vm11 }
 0x13a   : > { %14135 = vst [vmem:[#allocation17_spill] sm:$0xff] %v14134_v55  ;;  %v9810_v23 = vpack.c.b16 %v1538_v56, %v1537_v28  ;;  %v1314_v47 = vsel %vm9805_vm12, %v1250_v25, 0  ;;  %v14136_v9 = vrot.slane %v9101_v53, 7  ;;  %v14137_v61 = vrot.slane %v9032_v59, 7 }
 0x13b   : > { %vm14139_vm15 = vcmask 523264   ;;  %v14140_v22 = vmov 0  ;;  %v1303_v25 = vsel %vm8819_vm13, %v1239_v15, 0  ;;  %v1539_v56 = vunpack.c.l.b16 %v1314_v47  ;;  %v14145_v47 = vld [vmem:[#allocation20_spill] sm:$0xff] }
 0x13c   : > { %v1203_v57 = vsel %vm14138_vm9, %v14137_v61, %v14136_v9  ;;  %7937 = vmatmul.msk.bf16.gmra.mxu0 %vm14139_vm15, %v9564_v37  ;;  %v14141_v22 = vsel %vm9825_vm7, 4294967295, %v14140_v22  ;;  %v485_v63 = vand.u32 15, %v305_v39  ;;  %v1527_v59 = vunpack.c.l.b16 %v1302_v50  ;;  %v14147_v50 = vld [vmem:[#allocation18_spill] sm:$0xff] }
 0x13d   : > { %14142 = vst [vmem:[#allocation27_spill] sm:$0xff] %v14141_v22  ;;  %v1252_v28 = vpack.c.bf16 %v1203_v57, %v1203_v57  ;;  %v1528_v34 = vunpack.c.l.b16 %v1303_v25  ;;  %v9831_v19 = vpack.c.b16 %v1736_v8, %v1735_v10  ;;  %v14143_v9 = vrot.slane %v9122_v21, 7 }
 0x13e   : > { %v14144_v37 = vrot.slane %v9101_v53, 7  ;;  %v293_v61 = vadd.s32 96, %v8748_v43  ;;  %v9840_v17 = vpack.c.b16 %v1540_v20, %v1539_v56  ;;  %vm721_vm11 = vcmp.gt.s32.totalorder %v485_v63, 0 }
 0x13f   : > { %v14146_v39 = vpack.c.bf16 %v14145_v47, %v14145_v47  ;;  %v14148_v8 = vpack.c.bf16 %v14147_v50, %v14147_v50  ;;  %v9852_v57 = vpack.c.b16 %v1528_v34, %v1527_v59  ;;  %v14149_v20 = vrot.slane %v14118_v30, 1  ;;  %v14154_v34 = vld [vmem:[#allocation16_spill] sm:$0xff] }
 0x140   : > { %v1202_v45 = vsel %vm14138_vm9, %v14144_v37, %v14143_v9  ;;  %vm14150_vm15 = vcmp.lt.s32.totalorder %v8748_v43, 7  ;;  %vm9860_vm9 = vmpackc.low %vm721_vm11, %vm721_vm11  ;;  %v14151_v56 = vmov 0  ;;  %v1648_v9 = vpop.permute.xlu0 %1647  ;;  %v401_v37 = vand.u32 15, %v293_v61 }
 0x141   : > { %v1253_v15 = vpack.c.bf16 %v1202_v45, %v1202_v45  ;;  %v1469_v10 = vsel %vm8819_vm13, %v14146_v39, 0  ;;  %v1470_v53 = vsel %vm9825_vm7, %v14148_v8, 0  ;;  %v1359_v25 = vsel %vm14150_vm15, %v14149_v20, %v1353_v24 }
 0x142   : > { %v14152_v56 = vsel %vm9860_vm9, 4294967295, %v14151_v56  ;;  %v1316_v45 = vsel %vm9860_vm9, %v1252_v28, 0  ;;  %vm14155_vm8 = vcmask 523264   ;;  %v14156_v24 = vrot.slane %v14126_v38, 7 }
 0x143   : > { %14153 = vst [vmem:[#allocation13_spill] sm:$0xff] %v14152_v56  ;;  %v1317_v59 = vsel %vm8819_vm13, %v1253_v15, 0  ;;  %v1763_v47 = vsel %vm14155_vm8, %v14154_v34, %v1648_v9  ;;  %vm14157_vm11 = vcmp.lt.s32.totalorder %v8748_v43, 1  ;;  %v1541_v50 = vunpack.c.l.b16 %v1316_v45 }
 0x144   : > { %v1215_v39 = vsel %vm14157_vm11, %v14156_v24, %v1175_v7  ;;  %v1542_v8 = vunpack.c.l.b16 %v1317_v59  ;;  %2026 = vmatmul.bf16.gmra.mxu1 %v1763_v47  ;;  %2204 = vmatmul.bf16.gmra.mxu3 %v1763_v47  ;;  %v1725_v61 = vunpack.c.l.b16 %v1469_v10  ;;  %v1726_v20 = vunpack.c.l.b16 %v1470_v53 }
 0x145   : > { %vm709_vm15 = vcmp.gt.s32.totalorder %v401_v37, 0  ;;  %v307_v28 = vadd.s32 208, %v8748_v43  ;;  %v1417_v15 = vpack.c.bf16 %v1359_v25, %v1359_v25  ;;  %v1240_v9 = vpack.c.bf16 %v1215_v39, %v1215_v39  ;;  %v14164_v37 = vld [vmem:[#allocation8_spill] sm:$0xff] }
 0x146   : > { %v9878_v44 = vpack.c.b16 %v1542_v8, %v1541_v50  ;;  %v310_v34 = vadd.s32 232, %v8748_v43  ;;  %v1177_v38 = vrot.slane %v8809_v18, 7  ;;  %v1178_v24 = vrot.slane %v14158_v6, 7  ;;  %vm9884_vm8 = vmpackc.low %vm709_vm15, %vm709_vm15 }
 0x147   : > { %v499_v63 = vand.u32 15, %v307_v28  ;;  %v1176_v45 = vrot.slane %v9494_v58, 7  ;;  %v14159_v59 = vmov 0  ;;  %v14162_v10 = vrot.slane %v9212_v4, 7 }
 0x148   : > { %v14160_v59 = vsel %vm9884_vm8, 4294967295, %v14159_v59  ;;  %v14163_v53 = vrot.slane %v9122_v21, 7  ;;  %v1179_v47 = vrot.slane %v14164_v37, 7  ;;  %v1749_v39 = vpack.c.b16 %v1726_v20, %v1725_v61 }
 0x149   : > { %14161 = vst [vmem:[#allocation10_spill] sm:$0xff] %v14160_v59  ;;  %v295_v18 = vadd.s32 112, %v8748_v43  ;;  %v520_v50 = vand.u32 15, %v310_v34  ;;  %v1481_v8 = vsel %vm8819_vm13, %v1417_v15, 0  ;;  %vm723_vm15 = vcmp.gt.s32.totalorder %v499_v63, 0 }
 0x14a   : > { %v1201_v25 = vsel %vm14157_vm11, %v14163_v53, %v14162_v10  ;;  %v1304_v21 = vsel %vm9884_vm8, %v1240_v9, 0  ;;  %v1418_v10 = vpack.c.bf16 %v9508_v51, %v9508_v51  ;;  %vm14165_vm11 = vcmask 523264  }
 0x14b   : > { %v415_v28 = vand.u32 15, %v295_v18  ;;  %vm758_vm9 = vcmp.lt.s32.totalorder %v520_v50, 15  ;;  %7922 = vmatmul.msk.bf16.gmra.mxu2 %vm14165_vm11, %v1749_v39  ;;  %vm14166_vm12 = vcmp.lt.s32.totalorder %v8748_v43, 1  ;;  %v14169_v15 = vmov 0  ;;  %vm9917_vm11 = vmpackc.low %vm723_vm15, %vm723_vm15 }
 0x14c   : > { %v1214_v61 = vsel %vm14166_vm12, %v1175_v7, %v1176_v45  ;;  %vm14167_vm0 = vmmov %vm14166_vm12  ;;  %v1254_v9 = vpack.c.bf16 %v1201_v25, %v1201_v25  ;;  %v14172_v35 = vmov 0  ;;  %v1355_v7 = vrot.slane %v9552_v62, 1 }
 0x14d   : > { %v1212_v20 = vsel %vm14167_vm0, %v1177_v38, %v1178_v24  ;;  %vm14168_vm7 = vmmov %vm14167_vm0  ;;  %v1241_v34 = vpack.c.bf16 %v1214_v61, %v1214_v61  ;;  %vm711_vm8 = vcmp.gt.s32.totalorder %v415_v28, 0  ;;  %v14173_v35 = vsel %vm9917_vm11, 4294967295, %v14172_v35 }
 0x14e   : > { %v1213_v63 = vsel %vm14168_vm7, %v1176_v45, %v1177_v38  ;;  %vm9913_vm4 = vmpackc.low %vm758_vm9, %vm758_vm9  ;;  %v1243_v53 = vpack.c.bf16 %v1212_v20, %v1212_v20  ;;  %14174 = vst [vmem:[#allocation30_spill] sm:$0xff] %v14173_v35  ;;  %v1529_v37 = vunpack.c.l.b16 %v1304_v21  ;;  %v14175_v18 = vmov 0 }
 0x14f   : > { %v14170_v15 = vsel %vm9913_vm4, 4294967295, %v14169_v15  ;;  %v1242_v51 = vpack.c.bf16 %v1213_v63, %v1213_v63  ;;  %vm9922_vm0 = vmpackc.low %vm711_vm8, %vm711_vm8  ;;  %v1482_v38 = vsel %vm9913_vm4, %v1418_v10, 0  ;;  %v1737_v45 = vunpack.c.l.b16 %v1481_v8 }
 0x150   : > { %14171 = vst [vmem:[#allocation29_spill] sm:$0xff] %v14170_v15  ;;  %v14176_v18 = vsel %vm9922_vm0, 4294967295, %v14175_v18  ;;  %vm14178_vm12 = vcmask 523264   ;;  %v1305_v25 = vsel %vm8819_vm13, %v1241_v34, 0  ;;  %v1307_v28 = vsel %vm8819_vm13, %v1243_v53, 0  ;;  %v1650_v53 = vpop.permute.xlu1 %1649  ;;  %vm14182_vm9 = vmmov %vm14168_vm7 }
 0x151   : > { %14177 = vst [vmem:[#allocation20_spill] sm:$0xff] %v14176_v18  ;;  %7938 = vmatmul.msk.bf16.gmra.mxu0 %vm14178_vm12, %v1749_v39  ;;  %v1306_v50 = vsel %vm9922_vm0, %v1242_v51, 0  ;;  %v1738_v21 = vunpack.c.l.b16 %v1482_v38  ;;  %v1530_v61 = vunpack.c.l.b16 %v1305_v25  ;;  %v1532_v63 = vunpack.c.l.b16 %v1307_v28  ;;  %vm14184_vm8 = vmmov %vm14178_vm12 }
 0x152   : > { %v1531_v20 = vunpack.c.l.b16 %v1306_v50  ;;  %v297_v58 = vadd.s32 128, %v8748_v43  ;;  %v312_v8 = vadd.s32 248, %v8748_v43  ;;  %v14179_v39 = vrot.slane %v14089_v49, 7  ;;  %vm14185_vm15 = vmmov %vm14168_vm7 }
 0x153   : > { %v9936_v6 = vpack.c.b16 %v1738_v21, %v1737_v45  ;;  %v14180_v10 = vrot.slane %v9212_v4, 7  ;;  %v1318_v51 = vsel %vm9917_vm11, %v1254_v9, 0  ;;  %v9947_v38 = vpack.c.b16 %v1530_v61, %v1529_v37  ;;  %v14183_v21 = vld [vmem:[#allocation22_spill] sm:$0xff] }
 0x154   : > { %v9949_v25 = vpack.c.b16 %v1532_v63, %v1531_v20  ;;  %v429_v50 = vand.u32 15, %v297_v58  ;;  %v14181_v45 = vrot.slane %v14077_v11, 7  ;;  %v1767_v4 = vsel %vm14184_vm8, %v14183_v21, %v1650_v53 }
 0x155   : > { %v1200_v34 = vsel %vm14168_vm7, %v14180_v10, %v14179_v39  ;;  %v1211_v39 = vsel %vm14185_vm15, %v1178_v24, %v1179_v47  ;;  %v534_v15 = vand.u32 15, %v312_v8  ;;  %v14186_v37 = vrot.slane %v9479_v31, 1  ;;  %2031 = vmatmul.bf16.gmra.mxu1 %v1767_v4  ;;  %2209 = vmatmul.bf16.gmra.mxu3 %v1767_v4 }
 0x156   : > { %v1210_v28 = vsel %vm14182_vm9, %v1179_v47, %v14181_v45  ;;  %vm713_vm12 = vcmp.gt.s32.totalorder %v429_v50, 0  ;;  %v1244_v9 = vpack.c.bf16 %v1211_v39, %v1211_v39  ;;  %vm14187_vm7 = vcmp.lt.s32.totalorder %v8748_v43, 7 }
 0x157   : > { %v1245_v10 = vpack.c.bf16 %v1210_v28, %v1210_v28  ;;  %v1357_v58 = vsel %vm14187_vm7, %v14186_v37, %v1355_v7  ;;  %v14188_v11 = vrot.slane %v8745_v41, 1  ;;  %vm14189_vm4 = vmmov %vm14187_vm7  ;;  %v14190_v20 = vmov 0 }
 0x158   : > { %vm9967_vm9 = vmpackc.low %vm713_vm12, %vm713_vm12  ;;  %vm760_vm8 = vcmp.lt.s32.totalorder %v534_v15, 15  ;;  %v1419_v47 = vpack.c.bf16 %v1357_v58, %v1357_v58  ;;  %v14193_v41 = vmov 0  ;;  %v309_v50 = vadd.s32 224, %v8748_v43 }
 0x159   : > { %v1388_v61 = vsel %vm14189_vm4, %v1355_v7, %v14188_v11  ;;  %v14191_v20 = vsel %vm9967_vm9, 4294967295, %v14190_v20  ;;  %v1309_v24 = vsel %vm8819_vm13, %v1245_v10, 0  ;;  %v1308_v8 = vsel %vm9967_vm9, %v1244_v9, 0  ;;  %vm9975_vm15 = vmpackc.low %vm760_vm8, %vm760_vm8 }
 0x15a   : > { %14192 = vst [vmem:[#allocation18_spill] sm:$0xff] %v14191_v20  ;;  %v1420_v63 = vpack.c.bf16 %v1388_v61, %v1388_v61  ;;  %v1534_v53 = vunpack.c.l.b16 %v1309_v24  ;;  %v14194_v41 = vsel %vm9975_vm15, 4294967295, %v14193_v41  ;;  %v1255_v7 = vpack.c.bf16 %v1200_v34, %v1200_v34 }
 0x15b   : > { %14195 = vst [vmem:[#allocation16_spill] sm:$0xff] %v14194_v41  ;;  %v1533_v45 = vunpack.c.l.b16 %v1308_v8  ;;  %v1483_v28 = vsel %vm8819_vm13, %v1419_v47, 0  ;;  %v513_v10 = vand.u32 15, %v309_v50  ;;  %v1543_v37 = vunpack.c.l.b16 %v1318_v51  ;;  %v1652_v50 = vpop.permute.xlu1 %1651 }
 0x15c   : > { %v1484_v15 = vsel %vm9975_vm15, %v1420_v63, 0  ;;  %v1739_v21 = vunpack.c.l.b16 %v1483_v28  ;;  %v1319_v39 = vsel %vm8819_vm13, %v1255_v7, 0  ;;  %v14196_v34 = vrot.slane %v14118_v30, 7 }
 0x15d   : > { %v1740_v4 = vunpack.c.l.b16 %v1484_v15  ;;  %v9986_v9 = vpack.c.b16 %v1534_v53, %v1533_v45  ;;  %v1544_v58 = vunpack.c.l.b16 %v1319_v39  ;;  %v14197_v11 = vrot.slane %v14089_v49, 7 }
 0x15e   : > { %vm14198_vm4 = vcmp.lt.s32.totalorder %v8748_v43, 1  ;;  %vm725_vm12 = vcmp.gt.s32.totalorder %v513_v10, 0  ;;  %v1192_v63 = vrot.slane %v9402_v0, 7  ;;  %vm14199_vm7 = vcmask 523264  }
 0x15f   : > { %v1199_v61 = vsel %vm14198_vm4, %v14197_v11, %v14196_v34  ;;  %v9994_v24 = vpack.c.b16 %v1740_v4, %v1739_v21  ;;  %v9996_v47 = vpack.c.b16 %v1544_v58, %v1543_v37  ;;  %7923 = vmatmul.msk.bf16.gmra.mxu2 %vm14199_vm7, %v9531_v13  ;;  %vm10001_vm8 = vmpackc.low %vm725_vm12, %vm725_vm12  ;;  %v14200_v51 = vmov 0 }
 0x160   : > { %v1256_v8 = vpack.c.bf16 %v1199_v61, %v1199_v61  ;;  %v14201_v51 = vsel %vm10001_vm8, 4294967295, %v14200_v51  ;;  %vm14203_vm11 = vmmov %vm14199_vm7  ;;  %v14204_v49 = vmov %v14196_v34  ;;  %v1771_v45 = vsel %vm14199_vm7, %v9606_v12, %v1652_v50  ;;  %v1654_v34 = vpop.permute.xlu2 %1653 }
 0x161   : > { %14202 = vst [vmem:[#allocation6_spill] sm:$0xff] %v14201_v51  ;;  %7939 = vmatmul.msk.bf16.gmra.mxu0 %vm14203_vm11, %v9531_v13  ;;  %v1198_v53 = vsel %vm14198_vm4, %v14204_v49, %v1192_v63  ;;  %v1193_v15 = vrot.slane %v9479_v31, 7  ;;  %v311_v30 = vadd.s32 240, %v8748_v43  ;;  %vm14205_vm11 = vmmov %vm14198_vm4  ;;  %v14207_v37 = vmov 0 }
 0x162   : > { %v1257_v7 = vpack.c.bf16 %v1198_v53, %v1198_v53  ;;  %v1320_v0 = vsel %vm10001_vm8, %v1256_v8, 0  ;;  %vm14206_vm4 = vmmov %vm14199_vm7  ;;  %v14211_v31 = vrot.slane %v9552_v62, 7  ;;  %v2289_v62 = vpop.f32.mrf.mxu0 }
 0x163   : > { %v1545_v21 = vunpack.c.l.b16 %v1320_v0  ;;  %v527_v39 = vand.u32 15, %v311_v30  ;;  %v1197_v10 = vsel %vm14205_vm11, %v1192_v63, %v1193_v15  ;;  %vm14210_vm8 = vmmov %vm14206_vm4 }
 0x164   : > { %v1321_v28 = vsel %vm8819_vm13, %v1257_v7, 0  ;;  %v1258_v12 = vpack.c.bf16 %v1197_v10, %v1197_v10  ;;  %vm14212_vm15 = vmmov %vm14205_vm11 }
 0x165   : > { %v1546_v13 = vunpack.c.l.b16 %v1321_v28  ;;  %2036 = vmatmul.bf16.gmra.mxu1 %v1771_v45  ;;  %2214 = vmatmul.bf16.gmra.mxu3 %v1771_v45  ;;  %vm727_vm12 = vcmp.gt.s32.totalorder %v527_v39, 0  ;;  %v1196_v58 = vsel %vm14212_vm15, %v1193_v15, %v14211_v31  ;;  %vm14213_vm11 = vmmov %vm14206_vm4 }
 0x166   : > { %vm10025_vm7 = vmpackc.low %vm727_vm12, %vm727_vm12  ;;  %v1259_v11 = vpack.c.bf16 %v1196_v58, %v1196_v58  ;;  %v1775_v8 = vsel %vm14213_vm11, %v9708_v16, %v1654_v34 }
 0x167   : > { %v10019_v4 = vpack.c.b16 %v1546_v13, %v1545_v21  ;;  %v14208_v37 = vsel %vm10025_vm7, 4294967295, %v14207_v37  ;;  %v1322_v61 = vsel %vm10025_vm7, %v1258_v12, 0  ;;  %vm14214_vm15 = vmmov %vm14206_vm4  ;;  %v1660_v21 = vpop.permute.xlu1 %1659 }
 0x168   : > { %14209 = vst [vmem:[#allocation8_spill] sm:$0xff] %v14208_v37  ;;  %v1323_v63 = vsel %vm8819_vm13, %v1259_v11, 0  ;;  %v1547_v49 = vunpack.c.l.b16 %v1322_v61  ;;  %v1656_v7 = vpop.permute.xlu2 %1655  ;;  %vm14216_vm12 = vmmov %vm14206_vm4 }
 0x169   : > { %v1548_v53 = vunpack.c.l.b16 %v1323_v63  ;;  %v1779_v50 = vsel %vm14216_vm12, %v9852_v57, %v1656_v7  ;;  %vm14217_vm11 = vmmov %vm14206_vm4  ;;  %v10057_v57 = vpop.f32.mrf.mxu2 }
 0x16a   : > { %v2291_v0 = vpop.f32.mrf.mxu0  ;;  %vm14220_vm12 = vmmov %vm14206_vm4 }
 0x16f   : > { %7924 = vmatmul.msk.bf16.gmra.mxu2 %vm14206_vm4, %v9648_v48  ;;  %v1666_v7 = vpop.permute.xlu1 %1665 }
 0x170   : > { %v1662_v30 = vpop.permute.xlu2 %1661 }
 0x171   : > { %7940 = vmatmul.msk.bf16.gmra.mxu0 %vm14210_vm8, %v9648_v48  ;;  %v10041_v48 = vpack.c.b16 %v1548_v53, %v1547_v49  ;;  %vm14215_vm8 = vmmov %vm14206_vm4  ;;  %v10063_v13 = vpop.f32.mrf.mxu2 }
 0x172   : > { %v2294_v16 = vpop.f32.mrf.mxu0 }
 0x175   : > { %2041 = vmatmul.bf16.gmra.mxu1 %v1775_v8  ;;  %2219 = vmatmul.bf16.gmra.mxu3 %v1775_v8 }
 0x17a   : > { %v1658_v45 = vpop.permute.xlu0 %1657 }
 0x17f   : > { %7925 = vmatmul.msk.bf16.gmra.mxu2 %vm14214_vm15, %v9699_v40  ;;  %vm14218_vm15 = vmmov %vm14206_vm4 }
 0x180   : > { %v1783_v28 = vsel %vm14218_vm15, %v9947_v38, %v1658_v45  ;;  %vm14222_vm15 = vmmov %vm14206_vm4 }
 0x181   : > { %7941 = vmatmul.msk.bf16.gmra.mxu0 %vm14215_vm8, %v9699_v40  ;;  %v2296_v40 = vpop.f32.mrf.mxu0  ;;  %vm14219_vm8 = vmmov %vm14206_vm4 }
 0x185   : > { %2046 = vmatmul.bf16.gmra.mxu1 %v1779_v50  ;;  %2224 = vmatmul.bf16.gmra.mxu3 %v1779_v50 }
 0x187   : > { %v1664_v11 = vpop.permute.xlu0 %1663 }
 0x189   : > { %v2299_v15 = vpop.f32.mrf.mxu0 }
 0x18f   : > { %7926 = vmatmul.msk.bf16.gmra.mxu2 %vm14206_vm4, %v9733_v42 }
 0x191   : > { %7942 = vmatmul.msk.bf16.gmra.mxu0 %vm14217_vm11, %v9733_v42  ;;  %v1787_v42 = vsel %vm14206_vm4, %v9949_v25, %v1660_v21  ;;  %v2301_v38 = vpop.f32.mrf.mxu0  ;;  %vm14221_vm11 = vmmov %vm14206_vm4 }
 0x195   : > { %2051 = vmatmul.bf16.gmra.mxu1 %v1783_v28  ;;  %2229 = vmatmul.bf16.gmra.mxu3 %v1783_v28 }
 0x199   : > { %v2304_v25 = vpop.f32.mrf.mxu0 }
 0x19f   : > { %7927 = vmatmul.msk.bf16.gmra.mxu2 %vm14219_vm8, %v9831_v19  ;;  %vm14223_vm8 = vmmov %vm14206_vm4 }
 0x1a0   : > { %v1791_v10 = vsel %vm14223_vm8, %v9986_v9, %v1662_v30  ;;  %vm14227_vm8 = vmmov %vm14206_vm4  ;;  %v1668_v30 = vpop.permute.xlu2 %1667 }
 0x1a1   : > { %7943 = vmatmul.msk.bf16.gmra.mxu0 %vm14220_vm12, %v9831_v19  ;;  %v10071_v19 = vpop.f32.mrf.mxu2  ;;  %vm14224_vm12 = vmmov %vm14206_vm4 }
 0x1a5   : > { %2056 = vmatmul.bf16.gmra.mxu1 %v1787_v42  ;;  %2234 = vmatmul.bf16.gmra.mxu3 %v1787_v42 }
 0x1a6   : > { %v10069_v39 = vpop.f32.mrf.mxu1 }
 0x1a9   : > { %v10077_v58 = vpop.f32.mrf.mxu2 }
 0x1ac   : > { %v2200_v12 = vpop.f32.mrf.mxu3 }
 0x1ae   : > { %v10075_v31 = vpop.f32.mrf.mxu1 }
 0x1af   : > { %7928 = vmatmul.msk.bf16.gmra.mxu2 %vm14221_vm11, %v9936_v6  ;;  %vm14225_vm11 = vmmov %vm14206_vm4 }
 0x1b0   : > { %v1795_v9 = vsel %vm14225_vm11, %v9744_v46, %v1664_v11  ;;  %vm14229_vm11 = vmmov %vm14206_vm4 }
 0x1b1   : > { %7944 = vmatmul.msk.bf16.gmra.mxu0 %vm14222_vm15, %v9936_v6  ;;  %v2306_v6 = vpop.f32.mrf.mxu0  ;;  %vm14226_vm15 = vmmov %vm14206_vm4 }
 0x1b4   : > { %v2202_v34 = vpop.f32.mrf.mxu3 }
 0x1b5   : > { %2061 = vmatmul.bf16.gmra.mxu1 %v1791_v10  ;;  %2239 = vmatmul.bf16.gmra.mxu3 %v1791_v10 }
 0x1b9   : > { %v2309_v49 = vpop.f32.mrf.mxu0 }
 0x1bf   : > { %7929 = vmatmul.msk.bf16.gmra.mxu2 %vm14224_vm12, %v9994_v24  ;;  %vm14228_vm12 = vmmov %vm14206_vm4 }
 0x1c0   : > { %v1799_v46 = vsel %vm14228_vm12, %v9810_v23, %v1666_v7  ;;  %vm14232_vm12 = vmmov %vm14206_vm4 }
 0x1c1   : > { %7945 = vmatmul.msk.bf16.gmra.mxu0 %vm14206_vm4, %v9994_v24  ;;  %v10083_v61 = vpop.f32.mrf.mxu1  ;;  %v2311_v50 = vpop.f32.mrf.mxu0 }
 0x1c5   : > { %2066 = vmatmul.bf16.gmra.mxu1 %v1795_v9  ;;  %2244 = vmatmul.bf16.gmra.mxu3 %v1795_v9  ;;  %v10106_v9 = vpop.f32.mrf.mxu2 }
 0x1c7   : > { %v2205_v63 = vpop.f32.mrf.mxu3 }
 0x1c8   : > { %v2295_v8 = vadd.f32 %v2294_v16, %v2205_v63 }
 0x1c9   : > { %v10087_v53 = vpop.f32.mrf.mxu1  ;;  %v2314_v21 = vpop.f32.mrf.mxu0 }
 0x1ca   : > { %2374 = vst.msk [vmem:[#allocation2 + $0x48] sm:$0xff] %vm14226_vm15, %v2295_v8  ;;  %vm14230_vm15 = vmmov %vm14206_vm4 }
 0x1cb   : > { %v1803_v12 = vsel %vm14230_vm15, %v9840_v17, %v1668_v30  ;;  %vm14234_vm15 = vmmov %vm14206_vm4 }
 0x1cf   : > { %v2207_v62 = vpop.f32.mrf.mxu3 }
 0x1d0   : > { %v2297_v0 = vadd.f32 %v2296_v40, %v2207_v62 }
 0x1d1   : > { %v2316_v23 = vpop.f32.mrf.mxu0 }
 0x1d2   : > { %v10090_v24 = vpop.f32.mrf.mxu1  ;;  %2376 = vst.msk [vmem:[#allocation2 + $0x58] sm:$0xff] %vm14227_vm8, %v2297_v0  ;;  %vm14231_vm8 = vmmov %vm14206_vm4 }
 0x1d5   : > { %2071 = vmatmul.bf16.gmra.mxu1 %v1799_v46  ;;  %2249 = vmatmul.bf16.gmra.mxu3 %v1799_v46 }
 0x1d8   : > { %v2210_v45 = vpop.f32.mrf.mxu3 }
 0x1d9   : > { %v2300_v16 = vadd.f32 %v2299_v15, %v2210_v45  ;;  %v2319_v62 = vpop.f32.mrf.mxu0 }
 0x1da   : > { %v10095_v28 = vpop.f32.mrf.mxu1 }
 0x1db   : > { %2378 = vst.msk [vmem:[#allocation2 + $0x68] sm:$0xff] %vm14206_vm4, %v2300_v16 }
 0x1e0   : > { %v2212_v42 = vpop.f32.mrf.mxu3 }
 0x1e1   : > { %v2302_v40 = vadd.f32 %v2301_v38, %v2212_v42  ;;  %v1670_v38 = vpop.permute.xlu0 %1669  ;;  %v2321_v16 = vpop.f32.mrf.mxu0 }
 0x1e2   : > { %v10098_v10 = vpop.f32.mrf.mxu1  ;;  %v1807_v17 = vsel %vm14206_vm4, %v9878_v44, %v1670_v38  ;;  %v1672_v42 = vpop.permute.xlu1 %1671 }
 0x1e3   : > { %2380 = vst.msk [vmem:[#allocation2 + $0x78] sm:$0xff] %vm14229_vm11, %v2302_v40  ;;  %vm14233_vm11 = vmmov %vm14206_vm4 }
 0x1e5   : > { %2076 = vmatmul.bf16.gmra.mxu1 %v1803_v12  ;;  %2254 = vmatmul.bf16.gmra.mxu3 %v1803_v12 }
 0x1e8   : > { %v2215_v34 = vpop.f32.mrf.mxu3 }
 0x1e9   : > { %v2305_v15 = vadd.f32 %v2304_v25, %v2215_v34  ;;  %v10113_v25 = vpop.f32.mrf.mxu2 }
 0x1ea   : > { %v10103_v11 = vpop.f32.mrf.mxu1 }
 0x1eb   : > { %2382 = vst.msk [vmem:[#allocation2 + $0x88] sm:$0xff] %vm14231_vm8, %v2305_v15  ;;  %vm14235_vm8 = vmmov %vm14206_vm4 }
 0x1ec   : > { %v1811_v44 = vsel %vm14235_vm8, %v9996_v47, %v1672_v42  ;;  %vm14239_vm8 = vmmov %vm14206_vm4 }
 0x1f0   : > { %v2217_v63 = vpop.f32.mrf.mxu3 }
 0x1f1   : > { %v2307_v8 = vadd.f32 %v2306_v6, %v2217_v63  ;;  %v10118_v30 = vpop.f32.mrf.mxu2 }
 0x1f2   : > { %v10108_v7 = vpop.f32.mrf.mxu1 }
 0x1f3   : > { %2384 = vst.msk [vmem:[#allocation2 + $0x98] sm:$0xff] %vm14232_vm12, %v2307_v8  ;;  %vm14236_vm12 = vmmov %vm14206_vm4 }
 0x1f5   : > { %2081 = vmatmul.bf16.gmra.mxu1 %v1807_v17  ;;  %2259 = vmatmul.bf16.gmra.mxu3 %v1807_v17  ;;  %v1674_v17 = vpop.permute.xlu2 %1673 }
 0x1f8   : > { %v2220_v0 = vpop.f32.mrf.mxu3 }
 0x1f9   : > { %v2310_v46 = vadd.f32 %v2309_v49, %v2220_v0  ;;  %v2324_v49 = vpop.f32.mrf.mxu0  ;;  %v10127_v38 = vpop.f32.mrf.mxu2 }
 0x1fa   : > { %v10115_v45 = vpop.f32.mrf.mxu1 }
 0x1fb   : > { %2386 = vst.msk [vmem:[#allocation2 + $0xa8] sm:$0xff] %vm14233_vm11, %v2310_v46  ;;  %vm14237_vm11 = vmmov %vm14206_vm4 }
 0x1fc   : > { %v1815_v47 = vsel %vm14237_vm11, %v10019_v4, %v1674_v17  ;;  %vm14241_vm11 = vmmov %vm14206_vm4 }
 0x200   : > { %v2222_v6 = vpop.f32.mrf.mxu3 }
 0x201   : > { %v2312_v40 = vadd.f32 %v2311_v50, %v2222_v6  ;;  %v2326_v8 = vpop.f32.mrf.mxu0  ;;  %v10135_v6 = vpop.f32.mrf.mxu2 }
 0x202   : > { %v10120_v12 = vpop.f32.mrf.mxu1 }
 0x203   : > { %2388 = vst.msk [vmem:[#allocation2 + $0xb8] sm:$0xff] %vm14234_vm15, %v2312_v40  ;;  %vm14238_vm15 = vmmov %vm14206_vm4 }
 0x205   : > { %2086 = vmatmul.bf16.gmra.mxu1 %v1811_v44  ;;  %2264 = vmatmul.bf16.gmra.mxu3 %v1811_v44 }
 0x208   : > { %v2225_v34 = vpop.f32.mrf.mxu3 }
 0x209   : > { %v2315_v15 = vadd.f32 %v2314_v21, %v2225_v34  ;;  %v2329_v40 = vpop.f32.mrf.mxu0  ;;  %v10140_v34 = vpop.f32.mrf.mxu2 }
 0x20a   : > { %v10125_v63 = vpop.f32.mrf.mxu1 }
 0x20b   : > { %2390 = vst.msk [vmem:[#allocation2 + $0xc8] sm:$0xff] %vm14236_vm12, %v2315_v15  ;;  %v1676_v15 = vpop.permute.xlu0 %1675  ;;  %vm14240_vm12 = vmmov %vm14206_vm4 }
 0x20c   : > { %v1819_v17 = vsel %vm14240_vm12, %v10041_v48, %v1676_v15  ;;  %v14242_v48 = vld [vmem:[#allocation9_spill] sm:$0xff]  ;;  %vm14245_vm12 = vmmov %vm14206_vm4 }
 0x210   : > { %v2227_v50 = vpop.f32.mrf.mxu3 }
 0x211   : > { %v2317_v0 = vadd.f32 %v2316_v23, %v2227_v50  ;;  %v2331_v4 = vpop.f32.mrf.mxu0 }
 0x212   : > { %v10130_v46 = vpop.f32.mrf.mxu1 }
 0x213   : > { %2392 = vst.msk [vmem:[#allocation2 + $0xd8] sm:$0xff] %vm14206_vm4, %v2317_v0 }
 0x215   : > { %2091 = vmatmul.bf16.gmra.mxu1 %v1815_v47  ;;  %2269 = vmatmul.bf16.gmra.mxu3 %v1815_v47  ;;  %v10147_v47 = vpop.f32.mrf.mxu2 }
 0x218   : > { %v2230_v21 = vpop.f32.mrf.mxu3 }
 0x219   : > { %v2320_v42 = vadd.f32 %v2319_v62, %v2230_v21  ;;  %v2334_v37 = vpop.f32.mrf.mxu0 }
 0x21a   : > { %v10137_v44 = vpop.f32.mrf.mxu1 }
 0x21b   : > { %2394 = vst.msk [vmem:[#allocation2 + $0xe8] sm:$0xff] %vm14238_vm15, %v2320_v42  ;;  %vm14243_vm15 = vmmov %vm14206_vm4 }
 0x220   : > { %v2232_v23 = vpop.f32.mrf.mxu3 }
 0x221   : > { %v2322_v50 = vadd.f32 %v2321_v16, %v2232_v23  ;;  %v2336_v15 = vpop.f32.mrf.mxu0 }
 0x222   : > { %v10142_v0 = vpop.f32.mrf.mxu1 }
 0x223   : > { %2396 = vst.msk [vmem:[#allocation2 + $0xf8] sm:$0xff] %vm14239_vm8, %v2322_v50  ;;  %v10154_v50 = vpop.f32.mrf.mxu2  ;;  %vm14244_vm8 = vmmov %vm14206_vm4 }
 0x225   : > { %2096 = vmatmul.bf16.gmra.mxu1 %v1819_v17  ;;  %2274 = vmatmul.bf16.gmra.mxu3 %v1819_v17 }
 0x228   : > { %v2235_v62 = vpop.f32.mrf.mxu3 }
 0x229   : > { %v2325_v21 = vadd.f32 %v2324_v49, %v2235_v62 }
 0x22a   : > { %v10149_v42 = vpop.f32.mrf.mxu1 }
 0x22b   : > { %2398 = vst.msk [vmem:[#allocation2 + $0x108] sm:$0xff] %vm14206_vm4, %v2325_v21  ;;  %v10162_v62 = vpop.f32.mrf.mxu2 }
 0x230   : > { %v2237_v16 = vpop.f32.mrf.mxu3 }
 0x231   : > { %v2327_v23 = vadd.f32 %v2326_v8, %v2237_v16  ;;  %v2339_v16 = vpop.f32.mrf.mxu0 }
 0x232   : > { %v10152_v51 = vpop.f32.mrf.mxu1 }
 0x233   : > { %2400 = vst.msk [vmem:[#allocation2 + $0x118] sm:$0xff] %vm14241_vm11, %v2327_v23  ;;  %v14246_v23 = vld [vmem:[#allocation15_spill] sm:$0xff]  ;;  %vm14247_vm11 = vmmov %vm14206_vm4 }
 0x235   : > { %7914 = vmatmul.msk.bf16.vlgmr.msra.gmra.mxu1 %vm14243_vm15, %v14242_v48  ;;  %v10169_v48 = vpop.f32.mrf.mxu2  ;;  %vm14248_vm15 = vmmov %vm14206_vm4 }
 0x238   : > { %v2240_v17 = vpop.f32.mrf.mxu3 }
 0x239   : > { %v2330_v35 = vadd.f32 %v2329_v40, %v2240_v17 }
 0x23a   : > { %v10159_v49 = vpop.f32.mrf.mxu1 }
 0x23b   : > { %2402 = vst.msk [vmem:[#allocation2 + $0x128] sm:$0xff] %vm14244_vm8, %v2330_v35  ;;  %v2341_v35 = vpop.f32.mrf.mxu0  ;;  %vm14249_vm8 = vmmov %vm14206_vm4 }
 0x23d   : > { %v10174_v41 = vpop.f32.mrf.mxu2 }
 0x240   : > { %v2242_v21 = vpop.f32.mrf.mxu3 }
 0x241   : > { %v2332_v8 = vadd.f32 %v2331_v4, %v2242_v21 }
 0x242   : > { %v10164_v27 = vpop.f32.mrf.mxu1 }
 0x243   : > { %2404 = vst.msk [vmem:[#allocation2 + $0x138] sm:$0xff] %vm14245_vm12, %v2332_v8  ;;  %v2344_v8 = vpop.f32.mrf.mxu0  ;;  %vm14250_vm12 = vmmov %vm14206_vm4 }
 0x245   : > { %7915 = vmatmul.msk.bf16.gmra.mxu1 %vm14206_vm4, %v14246_v23  ;;  %v10181_v1 = vpop.f32.mrf.mxu2 }
 0x248   : > { %v2245_v56 = vpop.f32.mrf.mxu3 }
 0x249   : > { %v2335_v40 = vadd.f32 %v2334_v37, %v2245_v56 }
 0x24a   : > { %v10171_v17 = vpop.f32.mrf.mxu1 }
 0x24b   : > { %2406 = vst.msk [vmem:[#allocation2 + $0x148] sm:$0xff] %vm14247_vm11, %v2335_v40  ;;  %v2346_v56 = vpop.f32.mrf.mxu0  ;;  %vm14251_vm11 = vmmov %vm14206_vm4 }
 0x250   : > { %v2247_v55 = vpop.f32.mrf.mxu3 }
 0x251   : > { %v2337_v4 = vadd.f32 %v2336_v15, %v2247_v55  ;;  %v10187_v55 = vpop.f32.mrf.mxu2 }
 0x252   : > { %v10176_v21 = vpop.f32.mrf.mxu1 }
 0x253   : > { %2408 = vst.msk [vmem:[#allocation2 + $0x158] sm:$0xff] %vm14248_vm15, %v2337_v4  ;;  %v2349_v3 = vpop.f32.mrf.mxu0  ;;  %vm14252_vm15 = vmmov %vm14206_vm4 }
 0x258   : > { %v2250_v60 = vpop.f32.mrf.mxu3 }
 0x259   : > { %v2340_v23 = vadd.f32 %v2339_v16, %v2250_v60  ;;  %v10192_v60 = vpop.f32.mrf.mxu2 }
 0x25a   : > { %v10179_v52 = vpop.f32.mrf.mxu1 }
 0x25b   : > { %2410 = vst.msk [vmem:[#allocation2 + $0x168] sm:$0xff] %vm14249_vm8, %v2340_v23  ;;  %vm14253_vm8 = vmmov %vm14206_vm4 }
 0x260   : > { %v2252_v37 = vpop.f32.mrf.mxu3 }
 0x261   : > { %v2342_v40 = vadd.f32 %v2341_v35, %v2252_v37  ;;  %v2351_v35 = vpop.f32.mrf.mxu0 }
 0x262   : > { %v10184_v54 = vpop.f32.mrf.mxu1 }
 0x263   : > { %2412 = vst.msk [vmem:[#allocation2 + $0x178] sm:$0xff] %vm14250_vm12, %v2342_v40  ;;  %v10197_v40 = vpop.f32.mrf.mxu2  ;;  %vm14254_vm12 = vmmov %vm14206_vm4 }
 0x268   : > { %v2255_v15 = vpop.f32.mrf.mxu3 }
 0x269   : > { %v2345_v4 = vadd.f32 %v2344_v8, %v2255_v15  ;;  %v2354_v8 = vpop.f32.mrf.mxu0 }
 0x26a   : > { %v10189_v20 = vpop.f32.mrf.mxu1 }
 0x26b   : > { %2414 = vst.msk [vmem:[#allocation2 + $0x188] sm:$0xff] %vm14206_vm4, %v2345_v4  ;;  %v10204_v26 = vpop.f32.mrf.mxu2 }
 0x270   : > { %v2257_v16 = vpop.f32.mrf.mxu3 }
 0x271   : > { %v2347_v23 = vadd.f32 %v2346_v56, %v2257_v16  ;;  %v2356_v56 = vpop.f32.mrf.mxu0 }
 0x272   : > { %v10194_v22 = vpop.f32.mrf.mxu1 }
 0x273   : > { %2416 = vst.msk [vmem:[#allocation2 + $0x198] sm:$0xff] %vm14251_vm11, %v2347_v23  ;;  %vm14257_vm11 = vmmov %vm14206_vm4 }
 0x278   : > { %v2260_v37 = vpop.f32.mrf.mxu3 }
 0x279   : > { %v2350_v18 = vadd.f32 %v2349_v3, %v2260_v37  ;;  %v10210_v3 = vpop.f32.mrf.mxu2  ;;  %v2359_v2 = vpop.f32.mrf.mxu0 }
 0x27a   : > { %v10199_v59 = vpop.f32.mrf.mxu1 }
 0x27b   : > { %2418 = vst.msk [vmem:[#allocation2 + $0x1a8] sm:$0xff] %vm14252_vm15, %v2350_v18  ;;  %vm14259_vm15 = vmmov %vm14206_vm4 }
 0x280   : > { %v2262_v15 = vpop.f32.mrf.mxu3 }
 0x281   : > { %v2352_v4 = vadd.f32 %v2351_v35, %v2262_v15  ;;  %v10215_v35 = vpop.f32.mrf.mxu2 }
 0x282   : > { %v10202_v32 = vpop.f32.mrf.mxu1 }
 0x283   : > { %2420 = vst.msk [vmem:[#allocation2 + $0x1b8] sm:$0xff] %vm14253_vm8, %v2352_v4  ;;  %vm14260_vm8 = vmmov %vm14206_vm4 }
 0x288   : > { %v2265_v16 = vpop.f32.mrf.mxu3 }
 0x289   : > { %v2355_v23 = vadd.f32 %v2354_v8, %v2265_v16  ;;  %v2361_v8 = vpop.f32.mrf.mxu0 }
 0x28a   : > { %v10207_v5 = vpop.f32.mrf.mxu1 }
 0x28b   : > { %2422 = vst.msk [vmem:[#allocation2 + $0x1c8] sm:$0xff] %vm14254_vm12, %v2355_v23  ;;  %v10220_v23 = vpop.f32.mrf.mxu2  ;;  %vm14261_vm12 = vmmov %vm14206_vm4 }
 0x290   : > { %v2267_v37 = vpop.f32.mrf.mxu3 }
 0x291   : > { %v2357_v18 = vadd.f32 %v2356_v56, %v2267_v37  ;;  %v2364_v56 = vpop.f32.mrf.mxu0 }
 0x292   : > { %v10212_v33 = vpop.f32.mrf.mxu1 }
 0x293   : > { %14255 = vst [vmem:[#allocation22_spill] sm:$0xff] %v10212_v33  ;;  %v10225_v33 = vpop.f32.mrf.mxu2 }
 0x294   : > { %2424 = vst.msk [vmem:[#allocation2 + $0x1d8] sm:$0xff] %vm14206_vm4, %v2357_v18 }
 0x298   : > { %v2270_v15 = vpop.f32.mrf.mxu3 }
 0x299   : > { %v2360_v4 = vadd.f32 %v2359_v2, %v2270_v15  ;;  %v8028_v2 = vld [vmem:[%s13728_s3 + $0x130] sm:$0xf]  ;;  %v8486_v15 = vld [vmem:[%s13728_s3 + $0x134] sm:$0xf0] }
 0x29a   : > { %v10217_v14 = vpop.f32.mrf.mxu1 }
 0x29b   : > { %14256 = vst [vmem:[#allocation9_spill] sm:$0xff] %v10217_v14 }
 0x29c   : > { %2426 = vst.msk [vmem:[#allocation2 + $0x1e8] sm:$0xff] %vm14257_vm11, %v2360_v4  ;;  %v8029_v4 = vor.u32 %v8486_v15, %v8028_v2  ;;  %vm14262_vm11 = vmmov %vm14206_vm4 }
 0x29e   : > { %3638 = vmatpush.bf16.msrb.mxu2 %v8029_v4  ;;  %v10251_v4 = vadd.f32 %v10057_v57, %v10090_v24  ;;  %v10268_v57 = vadd.f32 %v10071_v19, %v10098_v10  ;;  %v8020_v24 = vld [vmem:[%s13728_s3 + $0x120] sm:$0xf] }
 0x2a0   : > { %v2272_v16 = vpop.f32.mrf.mxu3 }
 0x2a1   : > { %v2362_v36 = vadd.f32 %v2361_v8, %v2272_v16  ;;  %v2366_v8 = vpop.f32.mrf.mxu0 }
 0x2a2   : > { %v10222_v29 = vpop.f32.mrf.mxu1 }
 0x2a3   : > { %14258 = vst [vmem:[#allocation15_spill] sm:$0xff] %v10222_v29 }
 0x2a4   : > { %2428 = vst.msk [vmem:[#allocation2 + $0x1f8] sm:$0xff] %vm14259_vm15, %v2362_v36 }
 0x2a8   : > { %v2275_v37 = vpop.f32.mrf.mxu3 }
 0x2a9   : > { %v2365_v18 = vadd.f32 %v2364_v56, %v2275_v37  ;;  %v10238_v37 = vpop.f32.mrf.mxu2 }
 0x2aa   : > { %v2099_v43 = vpop.f32.mrf.mxu1 }
 0x2ab   : > { %2430 = vst.msk [vmem:[#allocation2 + $0x208] sm:$0xff] %vm14260_vm8, %v2365_v18 }
 0x2b0   : > { %v2277_v16 = vpop.f32.mrf.mxu3 }
 0x2b1   : > { %v2367_v36 = vadd.f32 %v2366_v8, %v2277_v16  ;;  %v10247_v2 = vpop.f32.mrf.mxu2  ;;  %v10264_v8 = vadd.f32 %v10063_v13, %v10095_v28  ;;  %v8484_v13 = vld [vmem:[%s13728_s3 + $0x124] sm:$0xf0]  ;;  %v10291_v28 = vadd.f32 %v10106_v9, %v10108_v7  ;;  %v8012_v9 = vld [vmem:[%s13728_s3 + $0x110] sm:$0xf]  ;;  %v8482_v7 = vld [vmem:[%s13728_s3 + $0x114] sm:$0xf0] }
 0x2b2   : > { %v2111_v29 = vpop.f32.mrf.mxu1  ;;  %v8021_v19 = vor.u32 %v8484_v13, %v8020_v24  ;;  %v7996_v24 = vld [vmem:[%s13728_s3 + $0xf0] sm:$0xf] }
 0x2b3   : > { %2432 = vst.msk [vmem:[#allocation2 + $0x218] sm:$0xff] %vm14261_vm12, %v2367_v36  ;;  %v10236_v56 = vadd.f32 %v2111_v29, %v10069_v39  ;;  %v10300_v36 = vadd.f32 %v10113_v25, %v10115_v45  ;;  %v8013_v25 = vor.u32 %v8482_v7, %v8012_v9  ;;  %v10330_v45 = vadd.f32 %v10140_v34, %v10137_v44  ;;  %v14265_v7 = vld [vmem:[#allocation15_spill] sm:$0xff] }
 0x2b4   : > { %3639 = vmatpush.bf16.msrb.mxu2 %v8021_v19  ;;  %v10372_v44 = vadd.f32 %v10187_v55, %v10176_v21  ;;  %v10386_v34 = vadd.f32 %v10192_v60, %v10179_v52  ;;  %v10410_v52 = vadd.f32 %v10215_v35, %v10199_v59  ;;  %v2627_v55 = vld [vmem:[#allocation2 + $0x48] sm:$0xff]  ;;  %v8062_v35 = vld [vmem:[%s13728_s3 + $0x178] sm:$0xf0] }
 0x2b5   : > { %2499 = vrot.lane.b32.xlu1 %v10236_v56, %s8616_s13 }
 0x2b8   : > { %3640 = vmatpush.bf16.msrb.mxu2 %v8013_v25 }
 0x2b9   : > { %v10260_v39 = vpop.f32.mrf.mxu2 }
 0x2ba   : > { %v2113_v18 = vpop.f32.mrf.mxu1  ;;  %v2187_v25 = vadd.f32 %v10260_v39, %v14265_v7  ;;  %v8046_v39 = vld [vmem:[%s13728_s3 + $0x158] sm:$0xf0] }
 0x2bb   : > { %v10243_v14 = vadd.f32 %v2113_v18, %v10075_v31 }
 0x2bd   : > { %2501 = vrot.lane.b32.xlu2 %v10243_v14, %s8616_s13 }
 0x2c1   : > { %v2188_v10 = vpop.f32.mrf.mxu2 }
 0x2c2   : > { %v2116_v15 = vpop.f32.mrf.mxu1  ;;  %v2189_v16 = vadd.f32 %v2188_v10, %v2099_v43  ;;  %v10312_v43 = vadd.f32 %v10127_v38, %v10125_v63  ;;  %v10346_v63 = vadd.f32 %v10162_v62, %v10152_v51  ;;  %v8618_v38 = vmov 0.0   ;;  %v14263_v62 = vld [vmem:[#allocation22_spill] sm:$0xff] }
 0x2c3   : > { %v10254_v29 = vadd.f32 %v2116_v15, %v10083_v61  ;;  %764 = vst [vmem:[#allocation2 + $0x10] sm:$0xff] %v8618_v38  ;;  %v10368_v51 = vadd.f32 %v10181_v1, %v10171_v17  ;;  %v8491_v15 = vld [vmem:[%s13728_s3 + $0x164] sm:$0xf]  ;;  %v8478_v10 = vld [vmem:[%s13728_s3 + $0xf4] sm:$0xf0] }
 0x2c4   : > { %767 = vst.msk [vmem:[#allocation2 + $0x228] sm:$0xff] %vm14206_vm4, %v8618_v38 }
 0x2c5   : > { %2503 = vrot.lane.b32.xlu0 %v10254_v29, %s8616_s13  ;;  %2507 = vrot.lane.b32.xlu2 %v10251_v4, %s8616_s13  ;;  %769 = vst.msk [vmem:[#allocation2 + $0x238] sm:$0xff] %vm14262_vm11, %v8618_v38 }
 0x2ca   : > { %v2118_v31 = vpop.f32.mrf.mxu1 }
 0x2cb   : > { %v10271_v61 = vadd.f32 %v2118_v31, %v10087_v53  ;;  %v10287_v53 = vadd.f32 %v10077_v58, %v10103_v11  ;;  %v10304_v58 = vadd.f32 %v10118_v30, %v10120_v12  ;;  %v10316_v11 = vadd.f32 %v10135_v6, %v10130_v46  ;;  %v8054_v31 = vld [vmem:[%s13728_s3 + $0x168] sm:$0xf0] }
 0x2cc   : > { %v10334_v30 = vadd.f32 %v10147_v47, %v10142_v0  ;;  %v10342_v12 = vadd.f32 %v10154_v50, %v10149_v42  ;;  %v10354_v46 = vadd.f32 %v10169_v48, %v10159_v49  ;;  %v10358_v6 = vadd.f32 %v10174_v41, %v10164_v27  ;;  %v8004_v27 = vld [vmem:[%s13728_s3 + $0x100] sm:$0xf]  ;;  %v8480_v41 = vld [vmem:[%s13728_s3 + $0x104] sm:$0xf0] }
 0x2cd   : > { %2509 = vrot.lane.b32.xlu0 %v10264_v8, %s8616_s13  ;;  %2511 = vrot.lane.b32.xlu2 %v10268_v57, %s8616_s13  ;;  %v8005_v1 = vor.u32 %v8480_v41, %v8004_v27  ;;  %v10390_v0 = vadd.f32 %v10197_v40, %v10184_v54  ;;  %v10398_v47 = vadd.f32 %v10204_v26, %v10189_v20  ;;  %v2628_v26 = vld [vmem:[#allocation2 + $0x58] sm:$0xff]  ;;  %v8493_v40 = vld [vmem:[%s13728_s3 + $0x174] sm:$0xf]  ;;  %v8044_v41 = vld [vmem:[%s13728_s3 + $0x150] sm:$0xf] }
 0x2ce   : > { %2505 = vrot.lane.b32.xlu1 %v10271_v61, %s8616_s13  ;;  %v10402_v42 = vadd.f32 %v10210_v3, %v10194_v22  ;;  %v10414_v50 = vadd.f32 %v10220_v23, %v10202_v32  ;;  %v10423_v22 = vld [vmem:[%s13729_s4] ss:$0 sm:$0xff]  ;;  %v10428_v32 = vadd.f32 %v10225_v33, %v10207_v5  ;;  %v10432_v48 = vadd.f32 %v10238_v37, %v14263_v62  ;;  %v8060_v33 = vld [vmem:[%s13728_s3 + $0x170] sm:$0xf]  ;;  %v8494_v5 = vld [vmem:[%s13728_s3 + $0x174] sm:$0xf0] }
 0x2cf   : > { %3641 = vmatpush.bf16.msrb.mxu2 %v8005_v1  ;;  %v8061_v3 = vor.u32 %v8494_v5, %v8060_v33  ;;  %v8052_v23 = vld [vmem:[%s13728_s3 + $0x160] sm:$0xf]  ;;  %v8492_v37 = vld [vmem:[%s13728_s3 + $0x164] sm:$0xf0]  ;;  %v8065_v18 = vor.u32 %v8493_v40, %v8062_v35  ;;  %v8057_v38 = vor.u32 %v8491_v15, %v8054_v31  ;;  %v7997_v27 = vor.u32 %v8478_v10, %v7996_v24  ;;  %v8490_v1 = vld [vmem:[%s13728_s3 + $0x154] sm:$0xf0] }
 0x2d0   : > { %v8053_v19 = vor.u32 %v8492_v37, %v8052_v23  ;;  %v8045_v62 = vor.u32 %v8490_v1, %v8044_v41  ;;  %v8488_v33 = vld [vmem:[%s13728_s3 + $0x144] sm:$0xf0]  ;;  %v8487_v40 = vld [vmem:[%s13728_s3 + $0x144] sm:$0xf] }
 0x2d1   : > { %3731 = vmatpush.bf16.msrb.mxu1 %v8061_v3  ;;  %3909 = vmatpush.bf16.msra.mxu0 %v8065_v18  ;;  %v8038_v3 = vld [vmem:[%s13728_s3 + $0x148] sm:$0xf0] }
 0x2d2   : > { %v8041_v15 = vor.u32 %v8487_v40, %v8038_v3  ;;  %v7988_v3 = vld [vmem:[%s13728_s3 + $0xe0] sm:$0xf] }
 0x2d3   : > { %3642 = vmatpush.bf16.msrb.mxu2 %v7997_v27 }
 0x2d5   : > { %2513 = vrot.lane.b32.xlu0 %v10287_v53, %s8616_s13  ;;  %2515 = vrot.lane.b32.xlu2 %v10291_v28, %s8616_s13 }
 0x2d6   : > { %2561 = vrot.lane.b32.xlu1 %v2189_v16, %s8616_s13  ;;  %v14264_v16 = vld [vmem:[#allocation9_spill] sm:$0xff]  ;;  %3732 = vmatpush.bf16.msrb.mxu1 %v8053_v19 }
 0x2d7   : > { %v10472_v9 = vadd.f32 %v10247_v2, %v14264_v16  ;;  %v8489_v2 = vld [vmem:[%s13728_s3 + $0x154] sm:$0xf]  ;;  %3910 = vmatpush.bf16.msra.mxu0 %v8057_v38  ;;  %v2629_v16 = vld [vmem:[#allocation2 + $0x68] sm:$0xff] }
 0x2da   : > { %3733 = vmatpush.bf16.msrb.mxu1 %v8045_v62 }
 0x2dd   : > { %2517 = vrot.lane.b32.xlu0 %v10300_v36, %s8616_s13  ;;  %2519 = vrot.lane.b32.xlu2 %v10304_v58, %s8616_s13 }
 0x2e5   : > { %2521 = vrot.lane.b32.xlu0 %v10312_v43, %s8616_s13  ;;  %2523 = vrot.lane.b32.xlu2 %v10316_v11, %s8616_s13 }
 0x2ed   : > { %2525 = vrot.lane.b32.xlu0 %v10330_v45, %s8616_s13  ;;  %2527 = vrot.lane.b32.xlu2 %v10334_v30, %s8616_s13 }
 0x2f5   : > { %2529 = vrot.lane.b32.xlu0 %v10342_v12, %s8616_s13  ;;  %2531 = vrot.lane.b32.xlu2 %v10346_v63, %s8616_s13 }
 0x2fd   : > { %2533 = vrot.lane.b32.xlu0 %v10354_v46, %s8616_s13  ;;  %2535 = vrot.lane.b32.xlu2 %v10358_v6, %s8616_s13 }
 0x305   : > { %2537 = vrot.lane.b32.xlu0 %v10368_v51, %s8616_s13  ;;  %2539 = vrot.lane.b32.xlu2 %v10372_v44, %s8616_s13 }
 0x30d   : > { %2541 = vrot.lane.b32.xlu0 %v10386_v34, %s8616_s13  ;;  %2543 = vrot.lane.b32.xlu2 %v10390_v0, %s8616_s13 }
 0x315   : > { %2545 = vrot.lane.b32.xlu0 %v10398_v47, %s8616_s13  ;;  %2547 = vrot.lane.b32.xlu2 %v10402_v42, %s8616_s13 }
 0x317   : > { %v2502_v54 = vpop.permute.xlu2 %2501 }
 0x318   : > { %v2660_v20 = vadd.f32 %v2628_v26, %v2502_v54 }
 0x31a   : > { %v2694_v59 = vadd.f32 %v10423_v22, %v2660_v20 }
 0x31c   : > { %vm2726_vm15 = vcmp.ge.f32.partialorder %v2694_v59, 0.0  ;;  %v2758_v17 = vmul.f32 0.1, %v2694_v59 }
 0x31d   : > { %2549 = vrot.lane.b32.xlu0 %v10410_v52, %s8616_s13  ;;  %2551 = vrot.lane.b32.xlu2 %v10414_v50, %s8616_s13 }
 0x31e   : > { %v10484_v26 = vsel %vm2726_vm15, %v2694_v59, %v2758_v17 }
 0x31f   : > { %v2508_v49 = vpop.permute.xlu2 %2507  ;;  %v2822_v17 = vpack.c.bf16 %v10484_v26, %v10484_v26  ;;  %v2982_v41 = vrot.slane %v10484_v26, 1 }
 0x320   : > { %v2599_v24 = vadd.f32 %v2508_v49, %v10254_v29  ;;  %v14266_v29 = vld [vmem:[#allocation3_spill] sm:$0xff] }
 0x321   : > { %v3222_v18 = vunpack.c.l.b16 %v2822_v17  ;;  %vm14267_vm12 = vcmp.lt.s32.totalorder %v14266_v29, 7 }
 0x322   : > { %vm14268_vm11 = vmmov %vm14267_vm12 }
 0x325   : > { %2553 = vrot.lane.b32.xlu0 %v10428_v32, %s8616_s13  ;;  %2555 = vrot.lane.b32.xlu2 %v10432_v48, %s8616_s13 }
 0x327   : > { %v10438_v21 = vpop.permute.xlu2 %2511  ;;  %v2500_v60 = vpop.permute.xlu1 %2499 }
 0x328   : > { %v2659_v13 = vadd.f32 %v2627_v55, %v2500_v60  ;;  %v8049_v55 = vor.u32 %v8489_v2, %v8046_v39  ;;  %v8036_v60 = vld [vmem:[%s13728_s3 + $0x140] sm:$0xf] }
 0x329   : > { %v8037_v23 = vor.u32 %v8488_v33, %v8036_v60  ;;  %v2632_v33 = vld [vmem:[#allocation2 + $0x98] sm:$0xff] }
 0x32a   : > { %v2693_v54 = vadd.f32 %v10423_v22, %v2659_v13  ;;  %3911 = vmatpush.bf16.msra.mxu0 %v8049_v55 }
 0x32b   : > { %3734 = vmatpush.bf16.msrb.mxu1 %v8037_v23 }
 0x32c   : > { %vm2725_vm8 = vcmp.ge.f32.partialorder %v2693_v54, 0.0  ;;  %v2757_v20 = vmul.f32 0.1, %v2693_v54 }
 0x32d   : > { %2557 = vrot.lane.b32.xlu0 %v10472_v9, %s8616_s13  ;;  %2559 = vrot.lane.b32.xlu2 %v2187_v25, %s8616_s13  ;;  %v2631_v25 = vld [vmem:[#allocation2 + $0x88] sm:$0xff] }
 0x32e   : > { %v10505_v5 = vsel %vm2725_vm8, %v2693_v54, %v2757_v20  ;;  %3912 = vmatpush.bf16.msra.mxu0 %v8041_v15  ;;  %v2663_v27 = vadd.f32 %v2631_v25, %v2599_v24 }
 0x32f   : > { %v10495_v59 = vpop.permute.xlu2 %2515  ;;  %v2821_v35 = vpack.c.bf16 %v10505_v5, %v10505_v5  ;;  %v13886_v7 = vrot.slane %v10505_v5, 1 }
 0x330   : > { %v2697_v2 = vadd.f32 %v10423_v22, %v2663_v27 }
 0x331   : > { %v3221_v37 = vunpack.c.l.b16 %v2821_v35  ;;  %v3043_v49 = vsel %vm14267_vm12, %v13886_v7, %v2982_v41  ;;  %v8476_v35 = vld [vmem:[%s13728_s3 + $0xe4] sm:$0xf0]  ;;  %v2658_v7 = vld [vmem:[#allocation2 + $0x238] sm:$0xff] }
 0x332   : > { %v3045_v62 = vpack.c.bf16 %v3043_v49, %v3043_v49  ;;  %vm2729_vm15 = vcmp.ge.f32.partialorder %v2697_v2, 0.0 }
 0x333   : > { %v3253_v31 = vpack.c.b16 %v3222_v18, %v3221_v37  ;;  %v2630_v37 = vld [vmem:[#allocation2 + $0x78] sm:$0xff]  ;;  %v2761_v18 = vmul.f32 0.1, %v2697_v2 }
 0x335   : > { %3269 = vrot.lane.b32.xlu1 %v3253_v31, %s8616_s13 }
 0x337   : > { %v2504_v13 = vpop.permute.xlu0 %2503  ;;  %v10516_v19 = vpop.permute.xlu2 %2519 }
 0x338   : > { %v2597_v10 = vadd.f32 %v2504_v13, %v10236_v56 }
 0x33a   : > { %v2661_v38 = vadd.f32 %v2629_v16, %v2597_v10  ;;  %v7989_v16 = vor.u32 %v8476_v35, %v7988_v3 }
 0x33c   : > { %v2695_v1 = vadd.f32 %v10423_v22, %v2661_v38  ;;  %3643 = vmatpush.bf16.msrb.mxu2 %v7989_v16 }
 0x33e   : > { %vm2727_vm4 = vcmp.ge.f32.partialorder %v2695_v1, 0.0  ;;  %v2759_v54 = vmul.f32 0.1, %v2695_v1 }
 0x33f   : > { %v2510_v56 = vpop.permute.xlu0 %2509  ;;  %v10528_v39 = vpop.permute.xlu2 %2523 }
 0x340   : > { %v10530_v20 = vsel %vm2727_vm4, %v2695_v1, %v2759_v54  ;;  %v2600_v17 = vadd.f32 %v2510_v56, %v10271_v61  ;;  %v2506_v55 = vpop.permute.xlu1 %2505  ;;  %v2601_v61 = vadd.f32 %v10438_v21, %v10251_v4  ;;  %v2633_v1 = vld [vmem:[#allocation2 + $0xa8] sm:$0xff]  ;;  %vm14271_vm4 = vcmask 523264  }
 0x341   : > { %v2983_v60 = vrot.slane %v10530_v20, 1  ;;  %v2598_v40 = vadd.f32 %v2506_v55, %v10243_v14  ;;  %v3077_v14 = vsel %vm8819_vm13, %v3045_v62, 0  ;;  %v10554_v55 = vsel %vm2729_vm15, %v2697_v2, %v2761_v18 }
 0x342   : > { %v2664_v23 = vadd.f32 %v2632_v33, %v2600_v17  ;;  %v3333_v4 = vunpack.c.l.b16 %v3077_v14  ;;  %v2665_v56 = vadd.f32 %v2633_v1, %v2601_v61  ;;  %v2634_v33 = vld [vmem:[#allocation2 + $0xb8] sm:$0xff]  ;;  %v2823_v35 = vpack.c.bf16 %v10530_v20, %v10530_v20 }
 0x343   : > { %v3042_v15 = vsel %vm14268_vm11, %v2982_v41, %v2983_v60  ;;  %v2662_v31 = vadd.f32 %v2630_v37, %v2598_v40  ;;  %vm14272_vm11 = vmmov %vm14271_vm4  ;;  %v2985_v2 = vrot.slane %v10554_v55, 1  ;;  %vm14273_vm15 = vcmp.lt.s32.totalorder %v14266_v29, 7 }
 0x344   : > { %v3046_v13 = vpack.c.bf16 %v3042_v15, %v3042_v15  ;;  %v2698_v10 = vadd.f32 %v10423_v22, %v2664_v23  ;;  %v3223_v14 = vunpack.c.l.b16 %v2823_v35 }
 0x345   : > { %v2696_v25 = vadd.f32 %v10423_v22, %v2662_v31  ;;  %v2699_v31 = vadd.f32 %v10423_v22, %v2665_v56 }
 0x346   : > { %v3078_v27 = vsel %vm8836_vm14, %v3046_v13, 0  ;;  %v2762_v62 = vmul.f32 0.1, %v2698_v10  ;;  %vm2730_vm12 = vcmp.ge.f32.partialorder %v2698_v10, 0.0 }
 0x347   : > { %v3334_v21 = vunpack.c.l.b16 %v3078_v27  ;;  %vm2728_vm8 = vcmp.ge.f32.partialorder %v2696_v25, 0.0  ;;  %v2760_v41 = vmul.f32 0.1, %v2696_v25  ;;  %v2514_v49 = vpop.permute.xlu0 %2513  ;;  %v10551_v54 = vpop.permute.xlu2 %2527 }
 0x348   : > { %v2602_v17 = vadd.f32 %v2514_v49, %v10264_v8  ;;  %v10567_v15 = vsel %vm2730_vm12, %v2698_v10, %v2762_v62  ;;  %v2763_v62 = vmul.f32 0.1, %v2699_v31 }
 0x349   : > { %v3365_v40 = vpack.c.b16 %v3334_v21, %v3333_v4  ;;  %v10556_v3 = vsel %vm2728_vm8, %v2696_v25, %v2760_v41  ;;  %vm14274_vm8 = vmmov %vm14273_vm15  ;;  %v2603_v25 = vadd.f32 %v10495_v59, %v10268_v57  ;;  %v2826_v10 = vpack.c.bf16 %v10567_v15, %v10567_v15 }
 0x34a   : > { %v2666_v23 = vadd.f32 %v2634_v33, %v2602_v17  ;;  %v2824_v37 = vpack.c.bf16 %v10556_v3, %v10556_v3  ;;  %v2984_v8 = vrot.slane %v10556_v3, 1  ;;  %v2635_v17 = vld [vmem:[#allocation2 + $0xc8] sm:$0xff]  ;;  %v2636_v33 = vld [vmem:[#allocation2 + $0xd8] sm:$0xff]  ;;  %v2825_v57 = vpack.c.bf16 %v10554_v55, %v10554_v55 }
 0x34b   : > { %8066 = vmatmul.msk.bf16.vlgmr.msrb.gmra.mxu1 %vm14271_vm4, %v3365_v40  ;;  %8082 = vmatmul.msk.bf16.vlgmr.msra.gmra.mxu0 %vm14272_vm11, %v3365_v40  ;;  %v2667_v59 = vadd.f32 %v2635_v17, %v2603_v25  ;;  %vm2731_vm4 = vcmp.ge.f32.partialorder %v2699_v31, 0.0  ;;  %v2638_v17 = vld [vmem:[#allocation2 + $0xf8] sm:$0xff] }
 0x34c   : > { %v2700_v18 = vadd.f32 %v10423_v22, %v2666_v23  ;;  %v3224_v61 = vunpack.c.l.b16 %v2824_v37  ;;  %v3040_v13 = vsel %vm14273_vm15, %v2984_v8, %v2985_v2  ;;  %v3041_v16 = vsel %vm14274_vm8, %v2983_v60, %v2984_v8 }
 0x34d   : > { %v3047_v49 = vpack.c.bf16 %v3041_v16, %v3041_v16  ;;  %v3048_v56 = vpack.c.bf16 %v3040_v13, %v3040_v13  ;;  %v2605_v37 = vadd.f32 %v10516_v19, %v10291_v28  ;;  %v2701_v25 = vadd.f32 %v10423_v22, %v2667_v59 }
 0x34e   : > { %v3254_v4 = vpack.c.b16 %v3224_v61, %v3223_v14  ;;  %v2764_v21 = vmul.f32 0.1, %v2700_v18  ;;  %vm2732_vm12 = vcmp.ge.f32.partialorder %v2700_v18, 0.0  ;;  %v3225_v14 = vunpack.c.l.b16 %v2825_v57 }
 0x34f   : > { %v2518_v27 = vpop.permute.xlu0 %2517  ;;  %v10576_v1 = vpop.permute.xlu2 %2531  ;;  %v3079_v40 = vsel %vm8819_vm13, %v3047_v49, 0  ;;  %v3080_v23 = vsel %vm8941_vm10, %v3048_v56, 0  ;;  %v2765_v57 = vmul.f32 0.1, %v2701_v25  ;;  %vm2733_vm15 = vcmp.ge.f32.partialorder %v2701_v25, 0.0 }
 0x350   : > { %v2604_v41 = vadd.f32 %v2518_v27, %v10287_v53  ;;  %3271 = vrot.lane.b32.xlu1 %v3254_v4, %s8616_s13  ;;  %v3226_v53 = vunpack.c.l.b16 %v2826_v10  ;;  %v10591_v61 = vsel %vm2732_vm12, %v2700_v18, %v2764_v21  ;;  %v3335_v13 = vunpack.c.l.b16 %v3079_v40  ;;  %v2637_v4 = vld [vmem:[#allocation2 + $0xe8] sm:$0xff] }
 0x351   : > { %v3336_v16 = vunpack.c.l.b16 %v3080_v23  ;;  %v10594_v27 = vsel %vm2731_vm4, %v2699_v31, %v2763_v62  ;;  %v2986_v10 = vrot.slane %v10567_v15, 1  ;;  %v2828_v28 = vpack.c.bf16 %v10591_v61, %v10591_v61 }
 0x352   : > { %v2668_v60 = vadd.f32 %v2636_v33, %v2604_v41  ;;  %v3255_v56 = vpack.c.b16 %v3226_v53, %v3225_v14  ;;  %v2669_v19 = vadd.f32 %v2637_v4, %v2605_v37  ;;  %v2827_v62 = vpack.c.bf16 %v10594_v27, %v10594_v27 }
 0x353   : > { %v3366_v31 = vpack.c.b16 %v3336_v16, %v3335_v13  ;;  %v13887_v33 = vrot.slane %v10594_v27, 1  ;;  %vm14276_vm8 = vcmask 523264   ;;  %vm14278_vm4 = vcmp.lt.s32.totalorder %v14266_v29, 7 }
 0x354   : > { %v2702_v8 = vadd.f32 %v10423_v22, %v2668_v60  ;;  %vm14277_vm12 = vmmov %vm14276_vm8  ;;  %v3228_v60 = vunpack.c.l.b16 %v2828_v28  ;;  %v2703_v37 = vadd.f32 %v10423_v22, %v2669_v19  ;;  %v2607_v14 = vadd.f32 %v10528_v39, %v10304_v58  ;;  %v7980_v58 = vld [vmem:[%s13728_s3 + $0xd0] sm:$0xf]  ;;  %v8474_v39 = vld [vmem:[%s13728_s3 + $0xd4] sm:$0xf0] }
 0x355   : > { %vm14279_vm10 = vmmov %vm14278_vm4  ;;  %v3227_v13 = vunpack.c.l.b16 %v2827_v62  ;;  %v10620_v16 = vsel %vm2733_vm15, %v2701_v25, %v2765_v57 }
 0x356   : > { %v2766_v18 = vmul.f32 0.1, %v2702_v8  ;;  %vm2734_vm11 = vcmp.ge.f32.partialorder %v2702_v8, 0.0  ;;  %v3039_v40 = vsel %vm14279_vm10, %v2985_v2, %v2986_v10  ;;  %v2767_v25 = vmul.f32 0.1, %v2703_v37 }
 0x357   : > { %v2522_v41 = vpop.permute.xlu0 %2521  ;;  %v10596_v49 = vpop.permute.xlu2 %2535  ;;  %v3049_v4 = vpack.c.bf16 %v3039_v40, %v3039_v40  ;;  %v2829_v62 = vpack.c.bf16 %v10620_v16, %v10620_v16 }
 0x358   : > { %v2606_v21 = vadd.f32 %v2522_v41, %v10300_v36  ;;  %3273 = vrot.lane.b32.xlu1 %v3255_v56, %s8616_s13  ;;  %v3038_v36 = vsel %vm14278_vm4, %v2986_v10, %v13887_v33  ;;  %v10615_v53 = vsel %vm2734_vm11, %v2702_v8, %v2766_v18  ;;  %v2639_v56 = vld [vmem:[#allocation2 + $0x108] sm:$0xff]  ;;  %v2562_v18 = vpop.permute.xlu1 %2561  ;;  %vm2735_vm11 = vcmp.ge.f32.partialorder %v2703_v37, 0.0  ;;  %vm14281_vm4 = vmmov %vm14277_vm12 }
 0x359   : > { %v3050_v41 = vpack.c.bf16 %v3038_v36, %v3038_v36  ;;  %v2830_v2 = vpack.c.bf16 %v10615_v53, %v10615_v53  ;;  %v2671_v19 = vadd.f32 %v2639_v56, %v2607_v14  ;;  %v7981_v14 = vor.u32 %v8474_v39, %v7980_v58 }
 0x35a   : > { %v2670_v59 = vadd.f32 %v2638_v17, %v2606_v21  ;;  %v3256_v17 = vpack.c.b16 %v3228_v60, %v3227_v13  ;;  %v2626_v13 = vadd.f32 %v2562_v18, %v10472_v9  ;;  %v3229_v33 = vunpack.c.l.b16 %v2829_v62 }
 0x35b   : > { %8067 = vmatmul.msk.bf16.gmra.mxu1 %vm14276_vm8, %v3366_v31  ;;  %8083 = vmatmul.msk.bf16.gmra.mxu0 %vm14277_vm12, %v3366_v31  ;;  %v2640_v31 = vld [vmem:[#allocation2 + $0x118] sm:$0xff]  ;;  %v3082_v36 = vsel %vm9041_vm6, %v3050_v41, 0  ;;  %v3230_v40 = vunpack.c.l.b16 %v2830_v2  ;;  %v2988_v9 = vrot.slane %v10591_v61, 1  ;;  %v2611_v62 = vadd.f32 %v10576_v1, %v10334_v30 }
 0x35c   : > { %v2704_v23 = vadd.f32 %v10423_v22, %v2670_v59  ;;  %v3081_v59 = vsel %vm8819_vm13, %v3049_v4, 0  ;;  %3644 = vmatpush.bf16.msrb.mxu2 %v7981_v14  ;;  %v2690_v18 = vadd.f32 %v2658_v7, %v2626_v13  ;;  %v14283_v1 = vrot.slane %v10594_v27, 1  ;;  %v2643_v13 = vld [vmem:[#allocation2 + $0x148] sm:$0xff]  ;;  %v8014_v4 = vld [vmem:[%s13728_s3 + $0x118] sm:$0xf0] }
 0x35e   : > { %v2768_v8 = vmul.f32 0.1, %v2704_v23  ;;  %vm2736_vm10 = vcmp.ge.f32.partialorder %v2704_v23, 0.0 }
 0x35f   : > { %v2526_v28 = vpop.permute.xlu0 %2525  ;;  %v10622_v21 = vpop.permute.xlu2 %2539 }
 0x360   : > { %v2608_v10 = vadd.f32 %v2526_v28, %v10312_v43  ;;  %3275 = vrot.lane.b32.xlu1 %v3256_v17, %s8616_s13  ;;  %v2609_v43 = vadd.f32 %v10551_v54, %v10316_v11  ;;  %v10644_v28 = vsel %vm2736_vm10, %v2704_v23, %v2768_v8  ;;  %v2641_v17 = vld [vmem:[#allocation2 + $0x128] sm:$0xff]  ;;  %v3337_v11 = vunpack.c.l.b16 %v3081_v59 }
 0x361   : > { %v3338_v54 = vunpack.c.l.b16 %v3082_v36  ;;  %v3257_v8 = vpack.c.b16 %v3230_v40, %v3229_v33  ;;  %v2832_v39 = vpack.c.bf16 %v10644_v28, %v10644_v28  ;;  %vm14282_vm10 = vcmp.lt.s32.totalorder %v14266_v29, 7 }
 0x362   : > { %v2672_v57 = vadd.f32 %v2640_v31, %v2608_v10  ;;  %v2705_v10 = vadd.f32 %v10423_v22, %v2671_v19  ;;  %v2673_v41 = vadd.f32 %v2641_v17, %v2609_v43  ;;  %v10648_v31 = vsel %vm2735_vm11, %v2703_v37, %v2767_v25  ;;  %v2642_v37 = vld [vmem:[#allocation2 + $0x138] sm:$0xff]  ;;  %vm14284_vm11 = vmmov %vm14282_vm10 }
 0x363   : > { %v13888_v25 = vrot.slane %v10620_v16, 1  ;;  %v3367_v43 = vpack.c.b16 %v3338_v54, %v3337_v11  ;;  %v2831_v33 = vpack.c.bf16 %v10648_v31, %v10648_v31  ;;  %v3037_v14 = vsel %vm14284_vm11, %v14283_v1, %v2988_v9 }
 0x364   : > { %v2706_v56 = vadd.f32 %v10423_v22, %v2672_v57  ;;  %v2769_v36 = vmul.f32 0.1, %v2705_v10  ;;  %v2707_v7 = vadd.f32 %v10423_v22, %v2673_v41  ;;  %vm2737_vm8 = vcmp.ge.f32.partialorder %v2705_v10, 0.0 }
 0x365   : > { %v3036_v30 = vsel %vm14282_vm10, %v2988_v9, %v13888_v25 }
 0x366   : > { %v2770_v57 = vmul.f32 0.1, %v2706_v56  ;;  %vm2738_vm15 = vcmp.ge.f32.partialorder %v2706_v56, 0.0  ;;  %v10686_v9 = vsel %vm2737_vm8, %v2705_v10, %v2769_v36  ;;  %v2771_v1 = vmul.f32 0.1, %v2707_v7 }
 0x367   : > { %v2530_v58 = vpop.permute.xlu0 %2529  ;;  %v10652_v23 = vpop.permute.xlu2 %2543  ;;  %v8485_v10 = vld [vmem:[%s13728_s3 + $0x134] sm:$0xf]  ;;  %v8030_v36 = vld [vmem:[%s13728_s3 + $0x138] sm:$0xf0] }
 0x368   : > { %v2610_v19 = vadd.f32 %v2530_v58, %v10330_v45  ;;  %3277 = vrot.lane.b32.xlu1 %v3257_v8, %s8616_s13  ;;  %v3232_v45 = vunpack.c.l.b16 %v2832_v39  ;;  %v10679_v41 = vsel %vm2738_vm15, %v2706_v56, %v2770_v57  ;;  %v10682_v58 = vadd.f32 %v10423_v22, %v2690_v18 }
 0x369   : > { %v2675_v8 = vadd.f32 %v2643_v13, %v2611_v62  ;;  %v2834_v18 = vpack.c.bf16 %v10679_v41, %v10679_v41  ;;  %v8033_v2 = vor.u32 %v8485_v10, %v8030_v36 }
 0x36a   : > { %v2674_v40 = vadd.f32 %v2642_v37, %v2610_v19  ;;  %v3231_v19 = vunpack.c.l.b16 %v2831_v33  ;;  %v3051_v37 = vpack.c.bf16 %v3037_v14, %v3037_v14 }
 0x36b   : > { %8068 = vmatmul.msk.bf16.gmra.mxu1 %vm14277_vm12, %v3367_v43  ;;  %8084 = vmatmul.msk.bf16.gmra.mxu0 %vm14281_vm4, %v3367_v43  ;;  %vm2739_vm12 = vcmp.ge.f32.partialorder %v2707_v7, 0.0  ;;  %v3052_v43 = vpack.c.bf16 %v3036_v30, %v3036_v30  ;;  %v2645_v30 = vld [vmem:[#allocation2 + $0x168] sm:$0xff]  ;;  %v3234_v17 = vunpack.c.l.b16 %v2834_v18 }
 0x36c   : > { %v2708_v54 = vadd.f32 %v10423_v22, %v2674_v40  ;;  %v2613_v40 = vadd.f32 %v10596_v49, %v10346_v63  ;;  %v3258_v57 = vpack.c.b16 %v3232_v45, %v3231_v19  ;;  %v10702_v63 = vmul.f32 0.1, %v10682_v58  ;;  %v2644_v45 = vld [vmem:[#allocation2 + $0x158] sm:$0xff]  ;;  %3816 = vmatpush.bf16.msra.mxu3 %v8033_v2  ;;  %v2649_v19 = vld [vmem:[#allocation2 + $0x1a8] sm:$0xff] }
 0x36d   : > { %v2709_v49 = vadd.f32 %v10423_v22, %v2675_v8  ;;  %v3084_v39 = vsel %vm9140_vm3, %v3052_v43, 0  ;;  %v2615_v8 = vadd.f32 %v10622_v21, %v10358_v6  ;;  %v2990_v21 = vrot.slane %v10615_v53, 1 }
 0x36e   : > { %v2772_v62 = vmul.f32 0.1, %v2708_v54  ;;  %vm2740_vm15 = vcmp.ge.f32.partialorder %v2708_v54, 0.0  ;;  %v2677_v59 = vadd.f32 %v2645_v30, %v2613_v40  ;;  %v3340_v14 = vunpack.c.l.b16 %v3084_v39  ;;  %v2647_v40 = vld [vmem:[#allocation2 + $0x188] sm:$0xff] }
 0x36f   : > { %v2534_v11 = vpop.permute.xlu0 %2533  ;;  %v10690_v56 = vpop.permute.xlu2 %2547  ;;  %vm2741_vm8 = vcmp.ge.f32.partialorder %v2709_v49, 0.0  ;;  %v2773_v43 = vmul.f32 0.1, %v2709_v49  ;;  %v10724_v18 = vsel %vm2739_vm12, %v2707_v7, %v2771_v1  ;;  %v2679_v36 = vadd.f32 %v2647_v40, %v2615_v8  ;;  %v8483_v7 = vld [vmem:[%s13728_s3 + $0x124] sm:$0xf] }
 0x370   : > { %v2612_v33 = vadd.f32 %v2534_v11, %v10342_v12  ;;  %3279 = vrot.lane.b32.xlu1 %v3258_v57, %s8616_s13  ;;  %v2833_v12 = vpack.c.bf16 %v10686_v9, %v10686_v9  ;;  %v3083_v11 = vsel %vm8819_vm13, %v3051_v37, 0  ;;  %v10727_v10 = vadd.f32 %v10423_v22, %v2677_v59  ;;  %v8022_v59 = vld [vmem:[%s13728_s3 + $0x128] sm:$0xf0]  ;;  %v8472_v8 = vld [vmem:[%s13728_s3 + $0xc4] sm:$0xf0] }
 0x371   : > { %v13889_v1 = vrot.slane %v10648_v31, 1  ;;  %vm14287_vm12 = vcmask 523264   ;;  %v10775_v40 = vsel %vm2741_vm8, %v2709_v49, %v2773_v43  ;;  %v2619_v49 = vadd.f32 %v10690_v56, %v10390_v0  ;;  %v8006_v0 = vld [vmem:[%s13728_s3 + $0x108] sm:$0xf0] }
 0x372   : > { %v2676_v13 = vadd.f32 %v2644_v45, %v2612_v33  ;;  %v10719_v33 = vsel %vm2740_vm15, %v2708_v54, %v2772_v62  ;;  %v3233_v37 = vunpack.c.l.b16 %v2833_v12  ;;  %v3339_v45 = vunpack.c.l.b16 %v3083_v11  ;;  %v2646_v54 = vld [vmem:[#allocation2 + $0x178] sm:$0xff]  ;;  %vm14288_vm15 = vmmov %vm14287_vm12 }
 0x373   : > { %v2836_v2 = vpack.c.bf16 %v10719_v33, %v10719_v33  ;;  %v2835_v11 = vpack.c.bf16 %v10724_v18, %v10724_v18  ;;  %vm2743_vm11 = vcmp.ge.f32.partialorder %v10727_v10, 0.0  ;;  %v2775_v57 = vmul.f32 0.1, %v10727_v10 }
 0x374   : > { %v2710_v25 = vadd.f32 %v10423_v22, %v2676_v13  ;;  %v3259_v12 = vpack.c.b16 %v3234_v17, %v3233_v37  ;;  %v3368_v17 = vpack.c.b16 %v3340_v14, %v3339_v45  ;;  %v2617_v37 = vadd.f32 %v10652_v23, %v10372_v44  ;;  %v8481_v45 = vld [vmem:[%s13728_s3 + $0x114] sm:$0xf] }
 0x375   : > { %v10765_v44 = vadd.f32 %v10423_v22, %v2679_v36  ;;  %v3236_v23 = vunpack.c.l.b16 %v2836_v2  ;;  %v8017_v60 = vor.u32 %v8481_v45, %v8014_v4  ;;  %v2651_v45 = vld [vmem:[#allocation2 + $0x1c8] sm:$0xff] }
 0x376   : > { %v2774_v39 = vmul.f32 0.1, %v2710_v25  ;;  %vm2742_vm4 = vcmp.ge.f32.partialorder %v2710_v25, 0.0  ;;  %v2681_v35 = vadd.f32 %v2649_v19, %v2617_v37 }
 0x377   : > { %v2538_v62 = vpop.permute.xlu0 %2537  ;;  %v10729_v30 = vpop.permute.xlu2 %2551  ;;  %vm2745_vm8 = vcmp.ge.f32.partialorder %v10765_v44, 0.0  ;;  %v10800_v56 = vmul.f32 0.1, %v10765_v44 }
 0x378   : > { %v2614_v13 = vadd.f32 %v2538_v62, %v10354_v46  ;;  %3281 = vrot.lane.b32.xlu1 %v3259_v12, %s8616_s13  ;;  %v7972_v46 = vld [vmem:[%s13728_s3 + $0xc0] sm:$0xf]  ;;  %v14286_v12 = vrot.slane %v10620_v16, 1  ;;  %v10778_v6 = vsel %vm2742_vm4, %v2710_v25, %v2774_v39 }
 0x379   : > { %v7973_v36 = vor.u32 %v8472_v8, %v7972_v46  ;;  %v2838_v4 = vpack.c.bf16 %v10778_v6, %v10778_v6  ;;  %v8479_v8 = vld [vmem:[%s13728_s3 + $0x104] sm:$0xf] }
 0x37a   : > { %v2678_v62 = vadd.f32 %v2646_v54, %v2614_v13  ;;  %v3035_v14 = vsel %vm14282_vm10, %v14286_v12, %v2990_v21  ;;  %v3034_v54 = vsel %vm14282_vm10, %v2990_v21, %v13889_v1  ;;  %v8025_v13 = vor.u32 %v8483_v7, %v8022_v59 }
 0x37b   : > { %8069 = vmatmul.msk.bf16.gmra.mxu1 %vm14287_vm12, %v3368_v17  ;;  %8085 = vmatmul.msk.bf16.gmra.mxu0 %vm14288_vm15, %v3368_v17  ;;  %v3235_v17 = vunpack.c.l.b16 %v2835_v11  ;;  %v3053_v2 = vpack.c.bf16 %v3035_v14, %v3035_v14  ;;  %v2992_v21 = vrot.slane %v10644_v28, 1  ;;  %v3054_v59 = vpack.c.bf16 %v3034_v54, %v3034_v54 }
 0x37c   : > { %v2712_v12 = vadd.f32 %v10423_v22, %v2678_v62  ;;  %3817 = vmatpush.bf16.msra.mxu3 %v8025_v13  ;;  %3645 = vmatpush.bf16.msrb.mxu2 %v7973_v36  ;;  %v2837_v11 = vpack.c.bf16 %v10775_v40, %v10775_v40  ;;  %v2648_v62 = vld [vmem:[#allocation2 + $0x198] sm:$0xff]  ;;  %vm2756_vm12 = vcmp.ge.f32.partialorder %v10682_v58, 0.0  ;;  %v10808_v14 = vadd.f32 %v10423_v22, %v2681_v35 }
 0x37d   : > { %v3260_v39 = vpack.c.b16 %v3236_v23, %v3235_v17  ;;  %v2621_v23 = vadd.f32 %v10729_v30, %v10402_v42  ;;  %v3086_v36 = vsel %vm9311_vm2, %v3054_v59, 0  ;;  %v8477_v17 = vld [vmem:[%s13728_s3 + $0xf4] sm:$0xf]  ;;  %v3238_v35 = vunpack.c.l.b16 %v2838_v4 }
 0x37e   : > { %v2776_v19 = vmul.f32 0.1, %v2712_v12  ;;  %vm2744_vm4 = vcmp.ge.f32.partialorder %v2712_v12, 0.0  ;;  %v14290_v30 = vrot.slane %v10484_v26, 7  ;;  %v14291_v59 = vrot.slane %v10505_v5, 7 }
 0x37f   : > { %v2542_v25 = vpop.permute.xlu0 %2541  ;;  %v10785_v43 = vpop.permute.xlu2 %2555  ;;  %vm14292_vm15 = vcmp.lt.s32.totalorder %v14266_v29, 1  ;;  %v3342_v7 = vunpack.c.l.b16 %v3086_v36  ;;  %v14294_v4 = vrot.slane %v10648_v31, 1 }
 0x380   : > { %v2616_v46 = vadd.f32 %v2542_v25, %v10368_v51  ;;  %3283 = vrot.lane.b32.xlu1 %v3260_v39, %s8616_s13  ;;  %v3085_v51 = vsel %vm8819_vm13, %v3053_v2, 0  ;;  %3818 = vmatpush.bf16.msra.mxu3 %v8017_v60  ;;  %v7998_v60 = vld [vmem:[%s13728_s3 + $0xf8] sm:$0xf0]  ;;  %v2683_v2 = vadd.f32 %v2651_v45, %v2619_v49  ;;  %v3237_v25 = vunpack.c.l.b16 %v2837_v11 }
 0x381   : > { %v8009_v39 = vor.u32 %v8479_v8, %v8006_v0  ;;  %v3341_v1 = vunpack.c.l.b16 %v3085_v51  ;;  %v10822_v42 = vsel %vm2744_vm4, %v2712_v12, %v2776_v19  ;;  %v14293_v49 = vrot.slane %v10686_v9, 1  ;;  %vm14295_vm4 = vmmov %vm14282_vm10 }
 0x382   : > { %v2680_v54 = vadd.f32 %v2648_v62, %v2616_v46  ;;  %v10830_v46 = vsel %vm14292_vm15, %v14291_v59, %v14290_v30  ;;  %v2653_v62 = vld [vmem:[#allocation2 + $0x1e8] sm:$0xff]  ;;  %v3033_v12 = vsel %vm14295_vm4, %v14294_v4, %v2992_v21  ;;  %v8001_v19 = vor.u32 %v8477_v17, %v7998_v60 }
 0x383   : > { %v3032_v11 = vsel %vm14282_vm10, %v2992_v21, %v14293_v49  ;;  %v2685_v8 = vadd.f32 %v2653_v62, %v2621_v23  ;;  %v10844_v45 = vsel %vm2743_vm11, %v10727_v10, %v2775_v57  ;;  %vm2747_vm15 = vcmp.ge.f32.partialorder %v10808_v14, 0.0  ;;  %v2650_v23 = vld [vmem:[#allocation2 + $0x1b8] sm:$0xff] }
 0x384   : > { %v2714_v37 = vadd.f32 %v10423_v22, %v2680_v54  ;;  %3819 = vmatpush.bf16.msra.mxu3 %v8009_v39  ;;  %v2717_v54 = vadd.f32 %v10423_v22, %v2683_v2  ;;  %v2657_v39 = vld [vmem:[#allocation2 + $0x228] sm:$0xff]  ;;  %v3261_v59 = vpack.c.b16 %v3238_v35, %v3237_v25  ;;  %v2840_v21 = vpack.c.bf16 %v10822_v42, %v10822_v42  ;;  %v8475_v25 = vld [vmem:[%s13728_s3 + $0xe4] sm:$0xf] }
 0x385   : > { %v3055_v62 = vpack.c.bf16 %v3033_v12, %v3033_v12  ;;  %v3056_v57 = vpack.c.bf16 %v3032_v11, %v3032_v11  ;;  %v2779_v10 = vmul.f32 0.1, %v10808_v14  ;;  %v3369_v2 = vpack.c.b16 %v3342_v7, %v3341_v1 }
 0x386   : > { %v2778_v0 = vmul.f32 0.1, %v2714_v37  ;;  %vm2746_vm10 = vcmp.ge.f32.partialorder %v2714_v37, 0.0  ;;  %v2839_v49 = vpack.c.bf16 %v10844_v45, %v10844_v45  ;;  %v2781_v1 = vmul.f32 0.1, %v2717_v54 }
 0x387   : > { %v2546_v36 = vpop.permute.xlu0 %2545  ;;  %v2560_v30 = vpop.permute.xlu2 %2559  ;;  %v2623_v7 = vadd.f32 %v10785_v43, %v10414_v50  ;;  %vm14296_vm11 = vcmask 523264   ;;  %v3240_v12 = vunpack.c.l.b16 %v2840_v21  ;;  %v3087_v43 = vsel %vm8819_vm13, %v3055_v62, 0  ;;  %v2655_v21 = vld [vmem:[#allocation2 + $0x208] sm:$0xff] }
 0x388   : > { %v2618_v17 = vadd.f32 %v2546_v36, %v10386_v34  ;;  %v2625_v60 = vadd.f32 %v2560_v30, %v10432_v48  ;;  %3285 = vrot.lane.b32.xlu1 %v3261_v59, %s8616_s13  ;;  %3820 = vmatpush.bf16.msra.mxu3 %v8001_v19  ;;  %v7990_v34 = vld [vmem:[%s13728_s3 + $0xe8] sm:$0xf0]  ;;  %v10863_v48 = vadd.f32 %v10423_v22, %v2685_v8  ;;  %vm14297_vm4 = vmmov %vm14296_vm11  ;;  %v7982_v8 = vld [vmem:[%s13728_s3 + $0xd8] sm:$0xf0]  ;;  %v3088_v36 = vsel %vm9454_vm1, %v3056_v57, 0 }
 0x389   : > { %v10866_v4 = vsel %vm2746_vm10, %v2714_v37, %v2778_v0  ;;  %v10876_v19 = vsel %vm2745_vm8, %v10765_v44, %v10800_v56  ;;  %v8473_v37 = vld [vmem:[%s13728_s3 + $0xd4] sm:$0xf]  ;;  %vm2749_vm10 = vcmp.ge.f32.partialorder %v2717_v54, 0.0  ;;  %v3239_v44 = vunpack.c.l.b16 %v2839_v49 }
 0x38a   : > { %v2682_v35 = vadd.f32 %v2650_v23, %v2618_v17  ;;  %v2689_v11 = vadd.f32 %v2657_v39, %v2625_v60  ;;  %v7993_v39 = vor.u32 %v8475_v25, %v7990_v34  ;;  %v2842_v56 = vpack.c.bf16 %v10866_v4, %v10866_v4 }
 0x38b   : > { %8070 = vmatmul.msk.bf16.gmra.mxu1 %vm14296_vm11, %v3369_v2  ;;  %8086 = vmatmul.msk.bf16.gmra.mxu0 %vm14297_vm4, %v3369_v2  ;;  %v10895_v30 = vsel %vm2756_vm12, %v10682_v58, %v10702_v63  ;;  %v2783_v59 = vmul.f32 0.1, %v10863_v48  ;;  %v2841_v17 = vpack.c.bf16 %v10876_v19, %v10876_v19  ;;  %v7985_v60 = vor.u32 %v8473_v37, %v7982_v8 }
 0x38c   : > { %v2716_v50 = vadd.f32 %v10423_v22, %v2682_v35  ;;  %v2723_v23 = vadd.f32 %v10423_v22, %v2689_v11  ;;  %3821 = vmatpush.bf16.msra.mxu3 %v7993_v39  ;;  %v2687_v62 = vadd.f32 %v2655_v21, %v2623_v7  ;;  %v3262_v2 = vpack.c.b16 %v3240_v12, %v3239_v44  ;;  %v2652_v35 = vld [vmem:[#allocation2 + $0x1d8] sm:$0xff]  ;;  %v8471_v7 = vld [vmem:[%s13728_s3 + $0xc4] sm:$0xf]  ;;  %v7974_v12 = vld [vmem:[%s13728_s3 + $0xc8] sm:$0xf0] }
 0x38d   : > { %v3343_v49 = vunpack.c.l.b16 %v3087_v43  ;;  %v3344_v25 = vunpack.c.l.b16 %v3088_v36  ;;  %v10903_v63 = vsel %vm2749_vm10, %v2717_v54, %v2781_v1  ;;  %v2884_v51 = vrot.slane %v10895_v30, 7 }
 0x38e   : > { %v2780_v34 = vmul.f32 0.1, %v2716_v50  ;;  %vm2751_vm8 = vcmp.ge.f32.partialorder %v10863_v48, 0.0  ;;  %vm2748_vm12 = vcmp.ge.f32.partialorder %v2716_v50, 0.0  ;;  %v3242_v11 = vunpack.c.l.b16 %v2842_v56 }
 0x38f   : > { %v2550_v57 = vpop.permute.xlu0 %2549  ;;  %v2787_v54 = vmul.f32 0.1, %v2723_v23  ;;  %v3241_v37 = vunpack.c.l.b16 %v2841_v17  ;;  %v10919_v8 = vsel %vm2747_vm15, %v10808_v14, %v2779_v10  ;;  %v10922_v43 = vadd.f32 %v10423_v22, %v2687_v62 }
 0x390   : > { %v2620_v58 = vadd.f32 %v2550_v57, %v10398_v47  ;;  %3287 = vrot.lane.b32.xlu1 %v3262_v2, %s8616_s13  ;;  %v2918_v47 = vpack.c.bf16 %v10830_v46, %v10830_v46  ;;  %3822 = vmatpush.bf16.msra.mxu3 %v7985_v60  ;;  %vm2755_vm11 = vcmp.ge.f32.partialorder %v2723_v23, 0.0  ;;  %v3370_v36 = vpack.c.b16 %v3344_v25, %v3343_v49 }
 0x391   : > { %v2845_v39 = vpack.c.bf16 %v10903_v63, %v10903_v63  ;;  %v10928_v46 = vsel %vm2748_vm12, %v2716_v50, %v2780_v34  ;;  %v7977_v56 = vor.u32 %v8471_v7, %v7974_v12  ;;  %v14299_v21 = vrot.slane %v10505_v5, 7 }
 0x392   : > { %v2684_v1 = vadd.f32 %v2652_v35, %v2620_v58  ;;  %vm14300_vm15 = vcmp.lt.s32.totalorder %v14266_v29, 1  ;;  %v3263_v10 = vpack.c.b16 %v3242_v11, %v3241_v37  ;;  %v2843_v17 = vpack.c.bf16 %v10919_v8, %v10919_v8 }
 0x393   : > { %v2916_v14 = vsel %vm14300_vm15, %v2884_v51, %v14299_v21  ;;  %v2950_v62 = vsel %vm8819_vm13, %v2918_v47, 0  ;;  %v10940_v50 = vsel %vm2755_vm11, %v2723_v23, %v2787_v54  ;;  %v14301_v2 = vrot.slane %v10724_v18, 1  ;;  %v2654_v21 = vld [vmem:[#allocation2 + $0x1f8] sm:$0xff] }
 0x394   : > { %v2718_v44 = vadd.f32 %v10423_v22, %v2684_v1  ;;  %v2917_v60 = vpack.c.bf16 %v2916_v14, %v2916_v14  ;;  %3823 = vmatpush.bf16.msra.mxu3 %v7977_v56  ;;  %v14302_v49 = vrot.slane %v10679_v41, 1  ;;  %vm14303_vm10 = vcmp.lt.s32.totalorder %v14266_v29, 7 }
 0x395   : > { %v2844_v35 = vpack.c.bf16 %v10928_v46, %v10928_v46  ;;  %v2852_v58 = vpack.c.bf16 %v10895_v30, %v10895_v30  ;;  %v14306_v12 = vrot.slane %v10686_v9, 1  ;;  %vm14307_vm12 = vmmov %vm14303_vm10  ;;  %v3142_v56 = vunpack.c.l.b16 %v2950_v62 }
 0x396   : > { %vm2750_vm4 = vcmp.ge.f32.partialorder %v2718_v44, 0.0  ;;  %v2782_v57 = vmul.f32 0.1, %v2718_v44  ;;  %v3030_v25 = vsel %vm14303_vm10, %v14302_v49, %v14301_v2  ;;  %v2949_v7 = vsel %vm9583_vm5, %v2917_v60, 0 }
 0x397   : > { %v2554_v34 = vpop.permute.xlu0 %2553  ;;  %v14305_v23 = vmov %v14302_v49  ;;  %v3141_v37 = vunpack.c.l.b16 %v2949_v7  ;;  %v2851_v60 = vpack.c.bf16 %v10940_v50, %v10940_v50  ;;  %v10971_v2 = vsel %vm2751_vm8, %v10863_v48, %v2783_v59 }
 0x398   : > { %v3031_v47 = vsel %vm14307_vm12, %v14306_v12, %v14305_v23  ;;  %v2622_v54 = vadd.f32 %v2554_v34, %v10410_v52  ;;  %v10961_v1 = vsel %vm2750_vm4, %v2718_v44, %v2782_v57  ;;  %3289 = vrot.lane.b32.xlu1 %v3263_v10, %s8616_s13  ;;  %v3058_v49 = vpack.c.bf16 %v3030_v25, %v3030_v25 }
 0x399   : > { %v2846_v14 = vpack.c.bf16 %v10961_v1, %v10961_v1  ;;  %v2996_v52 = vrot.slane %v10719_v33, 1  ;;  %v10974_v57 = vpack.c.b16 %v3142_v56, %v3141_v37  ;;  %v3057_v62 = vpack.c.bf16 %v3031_v47, %v3031_v47  ;;  %v14310_v37 = vld [vmem:[#allocation34_spill] sm:$0xff] }
 0x39a   : > { %v2686_v44 = vadd.f32 %v2654_v21, %v2622_v54  ;;  %vm2753_vm11 = vcmp.ge.f32.partialorder %v10922_v43, 0.0  ;;  %vm14308_vm15 = vcmask 523264   ;;  %v3245_v10 = vunpack.c.l.b16 %v2845_v39 }
 0x39b   : > { %8071 = vmatmul.msk.bf16.gmra.mxu1 %vm14308_vm15, %v3370_v36  ;;  %vm14309_vm4 = vmmov %vm14308_vm15  ;;  %v3246_v34 = vunpack.c.l.b16 %v2846_v14  ;;  %v3244_v7 = vunpack.c.l.b16 %v2844_v35  ;;  %v2785_v23 = vmul.f32 0.1, %v10922_v43  ;;  %v3243_v59 = vunpack.c.l.b16 %v2843_v17 }
 0x39c   : > { %8087 = vmatmul.msk.bf16.gmra.mxu0 %vm14309_vm4, %v3370_v36  ;;  %v2720_v48 = vadd.f32 %v10423_v22, %v2686_v44  ;;  %v2847_v25 = vpack.c.bf16 %v10971_v2, %v10971_v2  ;;  %v3251_v54 = vunpack.c.l.b16 %v2851_v60  ;;  %v3252_v47 = vunpack.c.l.b16 %v2852_v58 }
 0x39d   : > { %v3265_v12 = vpack.c.b16 %v3246_v34, %v3245_v10  ;;  %vm14311_vm8 = vnez %v14310_v37  ;;  %v3089_v36 = vsel %vm8819_vm13, %v3057_v62, 0  ;;  %v14312_v39 = vrot.slane %v10556_v3, 7 }
 0x39e   : > { %v3090_v56 = vsel %vm14311_vm8, %v3058_v49, 0  ;;  %vm2752_vm10 = vcmp.ge.f32.partialorder %v2720_v48, 0.0  ;;  %v2784_v21 = vmul.f32 0.1, %v2720_v48  ;;  %v14313_v35 = vrot.slane %v10530_v20, 7  ;;  %v2656_v20 = vld [vmem:[#allocation2 + $0x218] sm:$0xff] }
 0x39f   : > { %vm14314_vm12 = vcmp.lt.s32.totalorder %v14266_v29, 1  ;;  %v2558_v17 = vpop.permute.xlu0 %2557  ;;  %3293 = vrot.lane.b32.xlu0 %v3265_v12, %s8616_s13  ;;  %v3264_v14 = vpack.c.b16 %v3244_v7, %v3243_v59  ;;  %v14316_v60 = vrot.slane %v10484_v26, 7  ;;  %v14318_v62 = vrot.slane %v10567_v15, 7 }
 0x3a0   : > { %v2913_v22 = vsel %vm14314_vm12, %v14313_v35, %v14312_v39  ;;  %v14315_v58 = vmov %v14313_v35  ;;  %vm14317_vm15 = vmmov %vm14314_vm12  ;;  %v14319_v10 = vrot.slane %v10554_v55, 7  ;;  %v2624_v39 = vadd.f32 %v2558_v17, %v10428_v32  ;;  %v14324_v17 = vld [vmem:[#allocation14_spill] sm:$0xff] }
 0x3a1   : > { %v2914_v49 = vsel %vm14317_vm15, %v14316_v60, %v14315_v58  ;;  %v2920_v44 = vpack.c.bf16 %v2913_v22, %v2913_v22  ;;  %vm14320_vm4 = vmmov %vm14314_vm12  ;;  %v11007_v35 = vsel %vm2752_vm10, %v2720_v48, %v2784_v21  ;;  %v3247_v7 = vunpack.c.l.b16 %v2847_v25  ;;  %3291 = vrot.lane.b32.xlu1 %v3264_v14, %s8616_s13 }
 0x3a2   : > { %v2911_v34 = vsel %vm14320_vm4, %v14319_v10, %v14318_v62  ;;  %v11012_v26 = vsel %vm2753_vm11, %v10922_v43, %v2785_v23  ;;  %v3268_v59 = vpack.c.b16 %v3252_v47, %v3251_v54  ;;  %v2848_v12 = vpack.c.bf16 %v11007_v35, %v11007_v35  ;;  %vm14323_vm11 = vmmov %vm14320_vm4 }
 0x3a3   : > { %v3345_v22 = vunpack.c.l.b16 %v3089_v36  ;;  %v3346_v58 = vunpack.c.l.b16 %v3090_v56  ;;  %v2688_v60 = vadd.f32 %v2656_v20, %v2624_v39  ;;  %v2919_v62 = vpack.c.bf16 %v2914_v49, %v2914_v49  ;;  %v8603_v56 = vld [vmem:[%s13729_s4] ss:$0 sm:$0xff]  ;;  %vm14328_vm12 = vmmov %vm14320_vm4  ;;  %v14329_v20 = vld [vmem:[#allocation21_spill] sm:$0xff] }
 0x3a4   : > { %v2952_v32 = vsel %vm8819_vm13, %v2920_v44, 0  ;;  %v14321_v48 = vmov %v14319_v10  ;;  %v14322_v25 = vrot.slane %v10556_v3, 7  ;;  %v3248_v23 = vunpack.c.l.b16 %v2848_v12 }
 0x3a5   : > { %v2849_v54 = vpack.c.bf16 %v11012_v26, %v11012_v26  ;;  %v3144_v47 = vunpack.c.l.b16 %v2952_v32  ;;  %v2722_v36 = vadd.f32 %v8603_v56, %v2688_v60  ;;  %vm14325_vm10 = vnez %v14324_v17 }
 0x3a6   : > { %v2912_v43 = vsel %vm14323_vm11, %v14322_v25, %v14321_v48  ;;  %v2951_v14 = vsel %vm14325_vm10, %v2919_v62, 0  ;;  %v2922_v55 = vpack.c.bf16 %v2911_v34, %v2911_v34  ;;  %v14326_v3 = vrot.slane %v10591_v61, 7 }
 0x3a7   : > { %v2921_v21 = vpack.c.bf16 %v2912_v43, %v2912_v43  ;;  %v14327_v49 = vrot.slane %v10594_v27, 7  ;;  %v3266_v10 = vpack.c.b16 %v3248_v23, %v3247_v7  ;;  %v3143_v39 = vunpack.c.l.b16 %v2951_v14  ;;  %3299 = vrot.lane.b32.xlu0 %v3268_v59, %s8616_s13 }
 0x3a8   : > { %vm14330_vm15 = vnez %v14329_v20  ;;  %v14332_v60 = vrot.slane %v10567_v15, 7  ;;  %vm2754_vm11 = vcmp.ge.f32.partialorder %v2722_v36, 0.0  ;;  %v2786_v34 = vmul.f32 0.1, %v2722_v36 }
 0x3a9   : > { %v2909_v44 = vsel %vm14328_vm12, %v14327_v49, %v14326_v3  ;;  %v2953_v12 = vsel %vm14330_vm15, %v2921_v21, 0  ;;  %v14331_v32 = vmov %v14327_v49  ;;  %v2954_v48 = vsel %vm8819_vm13, %v2922_v55, 0  ;;  %vm14335_vm12 = vmmov %vm14320_vm4  ;;  %3295 = vrot.lane.b32.xlu1 %v3266_v10, %s8616_s13 }
 0x3aa   : > { %v2910_v62 = vsel %vm14320_vm4, %v14332_v60, %v14331_v32  ;;  %v3145_v25 = vunpack.c.l.b16 %v2953_v12  ;;  %v11049_v7 = vpack.c.b16 %v3144_v47, %v3143_v39  ;;  %v3146_v43 = vunpack.c.l.b16 %v2954_v48  ;;  %v3270_v39 = vpop.permute.xlu1 %3269  ;;  %v14342_v60 = vld [vmem:[#allocation35_spill] sm:$0xff] }
 0x3ab   : > { %v2923_v23 = vpack.c.bf16 %v2910_v62, %v2910_v62  ;;  %v2924_v21 = vpack.c.bf16 %v2909_v44, %v2909_v44  ;;  %v11051_v56 = vsel %vm2754_vm11, %v2722_v36, %v2786_v34  ;;  %v14333_v15 = vrot.slane %v10615_v53, 7  ;;  %vm14340_vm11 = vmmov %vm14320_vm4 }
 0x3ac   : > { %v14334_v27 = vrot.slane %v10620_v16, 7  ;;  %v14337_v55 = vrot.slane %v10591_v61, 7  ;;  %v14338_v47 = vrot.slane %v10648_v31, 7  ;;  %v2997_v44 = vrot.slane %v10775_v40, 1 }
 0x3ad   : > { %v14339_v49 = vmov %v14333_v15  ;;  %v3371_v12 = vpack.c.b16 %v3346_v58, %v3345_v22  ;;  %v2850_v16 = vpack.c.bf16 %v11051_v56, %v11051_v56  ;;  %v11075_v61 = vpack.c.b16 %v3146_v43, %v3145_v25 }
 0x3ae   : > { %v2907_v14 = vsel %vm14335_vm12, %v14334_v27, %v14333_v15  ;;  %v14336_v3 = vmov %v14334_v27  ;;  %v2906_v36 = vsel %vm14340_vm11, %v14339_v49, %v14338_v47  ;;  %vm14341_vm12 = vcmask 523264   ;;  %v14349_v27 = vld [vmem:[#allocation38_spill] sm:$0xff] }
 0x3af   : > { %v2908_v59 = vsel %vm14320_vm4, %v14337_v55, %v14336_v3  ;;  %v3383_v32 = vsel %vm14341_vm12, %v10974_v57, %v3270_v39  ;;  %vm14343_vm4 = vnez %v14342_v60  ;;  %v2956_v62 = vsel %vm8819_vm13, %v2924_v21, 0  ;;  %vm14344_vm11 = vmmov %vm14341_vm12  ;;  %v8204_v60 = vld [vmem:[%s13728_s3 + $0x220] sm:$0xf] }
 0x3b0   : > { %v2955_v53 = vsel %vm14343_vm4, %v2923_v23, 0  ;;  %v2925_v34 = vpack.c.bf16 %v2908_v59, %v2908_v59  ;;  %3646 = vmatmul.bf16.vlgmr.msrb.gmra.mxu2 %v3383_v32  ;;  %8072 = vmatmul.msk.bf16.gmra.mxu1 %vm14344_vm11, %v3371_v12  ;;  %v3249_v10 = vunpack.c.l.b16 %v2849_v54  ;;  %v3250_v22 = vunpack.c.l.b16 %v2850_v16  ;;  %vm14348_vm4 = vmmov %vm14344_vm11 }
 0x3b1   : > { %vm14345_vm15 = vcmp.lt.s32.totalorder %v14266_v29, 7  ;;  %v14346_v57 = vrot.slane %v10724_v18, 1  ;;  %v2864_v25 = vrot.slane %v10644_v28, 7  ;;  %3824 = vmatmul.bf16.vlgmr.msra.gmra.mxu3 %v3383_v32  ;;  %8088 = vmatmul.msk.bf16.gmra.mxu0 %vm14348_vm4, %v3371_v12  ;;  %v3147_v43 = vunpack.c.l.b16 %v2955_v53  ;;  %v14354_v32 = vld [vmem:[#allocation25_spill] sm:$0xff] }
 0x3b2   : > { %v3028_v58 = vsel %vm14345_vm15, %v2996_v52, %v2997_v44  ;;  %vm14347_vm12 = vmmov %vm14345_vm15  ;;  %v3148_v54 = vunpack.c.l.b16 %v2956_v62  ;;  %v2926_v23 = vpack.c.bf16 %v2907_v14, %v2907_v14  ;;  %v2865_v21 = vrot.slane %v10686_v9, 7 }
 0x3b3   : > { %v3029_v48 = vsel %vm14347_vm12, %v14346_v57, %v2996_v52  ;;  %v3267_v15 = vpack.c.b16 %v3250_v22, %v3249_v10  ;;  %vm14350_vm15 = vnez %v14349_v27  ;;  %v2927_v55 = vpack.c.bf16 %v2906_v36, %v2906_v36  ;;  %v8604_v27 = vld [vmem:[#allocation2 + $0x10] sm:$0xff] }
 0x3b4   : > { %v2957_v3 = vsel %vm14350_vm15, %v2925_v34, 0  ;;  %v3059_v59 = vpack.c.bf16 %v3029_v48, %v3029_v48  ;;  %v3060_v47 = vpack.c.bf16 %v3028_v58, %v3028_v58  ;;  %v11099_v49 = vpack.c.b16 %v3148_v54, %v3147_v43  ;;  %v14356_v34 = vld [vmem:[#allocation33_spill] sm:$0xff] }
 0x3b5   : > { %v2958_v28 = vsel %vm8819_vm13, %v2926_v23, 0  ;;  %3297 = vrot.lane.b32.xlu2 %v3267_v15, %s8616_s13  ;;  %v3149_v52 = vunpack.c.l.b16 %v2957_v3  ;;  %v14351_v14 = vrot.slane %v10648_v31, 7  ;;  %vm14352_vm4 = vcmp.lt.s32.totalorder %v14266_v29, 1 }
 0x3b6   : > { %v3150_v39 = vunpack.c.l.b16 %v2958_v28  ;;  %vm14353_vm11 = vmmov %vm14352_vm4  ;;  %vm14355_vm12 = vnez %v14354_v32  ;;  %v3091_v62 = vsel %vm8819_vm13, %v3059_v59, 0  ;;  %vm14357_vm15 = vnez %v14356_v34  ;;  %v14359_v28 = vld [vmem:[#allocation10_spill] sm:$0xff] }
 0x3b7   : > { %v2905_v9 = vsel %vm14352_vm4, %v14351_v14, %v2864_v25  ;;  %v2904_v12 = vsel %vm14353_vm11, %v2864_v25, %v2865_v21  ;;  %v2959_v53 = vsel %vm14355_vm12, %v2927_v55, 0  ;;  %v3092_v10 = vsel %vm14357_vm15, %v3060_v47, 0  ;;  %vm14358_vm11 = vmmov %vm14352_vm4 }
 0x3b8   : > { %v11110_v36 = vpack.c.b16 %v3150_v39, %v3149_v52  ;;  %v2928_v16 = vpack.c.bf16 %v2905_v9, %v2905_v9  ;;  %v2866_v22 = vrot.slane %v10679_v41, 7  ;;  %v3151_v58 = vunpack.c.l.b16 %v2959_v53 }
 0x3b9   : > { %v3347_v48 = vunpack.c.l.b16 %v3091_v62  ;;  %v3348_v25 = vunpack.c.l.b16 %v3092_v10  ;;  %v2929_v43 = vpack.c.bf16 %v2904_v12, %v2904_v12  ;;  %v2867_v54 = vrot.slane %v10724_v18, 7 }
 0x3ba   : > { %v2960_v31 = vsel %vm8819_vm13, %v2928_v16, 0  ;;  %v2998_v15 = vrot.slane %v10778_v6, 1  ;;  %v2903_v3 = vsel %vm14352_vm4, %v2865_v21, %v2866_v22  ;;  %v2999_v59 = vrot.slane %v10844_v45, 1 }
 0x3bb   : > { %v3152_v57 = vunpack.c.l.b16 %v2960_v31  ;;  %v2902_v55 = vsel %vm14358_vm11, %v2866_v22, %v2867_v54  ;;  %v3372_v41 = vpack.c.b16 %v3348_v25, %v3347_v48  ;;  %v2930_v47 = vpack.c.bf16 %v2903_v3, %v2903_v3  ;;  %v14368_v25 = vld [vmem:[#allocation27_spill] sm:$0xff] }
 0x3bc   : > { %vm14360_vm12 = vnez %v14359_v28  ;;  %vm14361_vm10 = vcmask 523264   ;;  %vm14362_vm5 = vcmp.lt.s32.totalorder %v14266_v29, 7  ;;  %v2868_v14 = vrot.slane %v10719_v33, 7 }
 0x3bd   : > { %v11122_v23 = vpack.c.b16 %v3152_v57, %v3151_v58  ;;  %v2961_v52 = vsel %vm14360_vm12, %v2929_v43, 0  ;;  %v3026_v18 = vsel %vm14362_vm5, %v2998_v15, %v2999_v59  ;;  %vm14363_vm15 = vmmov %vm14362_vm5  ;;  %v2962_v21 = vsel %vm8819_vm13, %v2930_v47, 0  ;;  %v14367_v57 = vld [vmem:[#allocation20_spill] sm:$0xff] }
 0x3be   : > { %v3027_v39 = vsel %vm14363_vm15, %v2997_v44, %v2998_v15  ;;  %vm14364_vm4 = vmmov %vm14361_vm10  ;;  %v3153_v9 = vunpack.c.l.b16 %v2961_v52  ;;  %v3154_v12 = vunpack.c.l.b16 %v2962_v21  ;;  %v2931_v16 = vpack.c.bf16 %v2902_v55, %v2902_v55 }
 0x3bf   : > { %v2869_v53 = vrot.slane %v10775_v40, 7  ;;  %v3061_v62 = vpack.c.bf16 %v3027_v39, %v3027_v39  ;;  %v3062_v10 = vpack.c.bf16 %v3026_v18, %v3026_v18  ;;  %vm14365_vm5 = vmmov %vm14358_vm11  ;;  %vm14369_vm15 = vnez %v14368_v25 }
 0x3c0   : > { %8073 = vmatmul.msk.bf16.gmra.mxu1 %vm14361_vm10, %v3372_v41  ;;  %v11142_v31 = vpack.c.b16 %v3154_v12, %v3153_v9  ;;  %v2901_v22 = vsel %vm14365_vm5, %v2867_v54, %v2868_v14  ;;  %vm14366_vm10 = vmmov %vm14365_vm5  ;;  %v2963_v33 = vsel %vm9922_vm0, %v2931_v16, 0  ;;  %v2870_v3 = vrot.slane %v10778_v6, 7 }
 0x3c1   : > { %8089 = vmatmul.msk.bf16.gmra.mxu0 %vm14364_vm4, %v3372_v41  ;;  %v2900_v44 = vsel %vm14366_vm10, %v2868_v14, %v2869_v53  ;;  %v2932_v58 = vpack.c.bf16 %v2901_v22, %v2901_v22  ;;  %v3093_v48 = vsel %vm8819_vm13, %v3061_v62, 0  ;;  %v3094_v40 = vsel %vm14369_vm15, %v3062_v10, 0  ;;  %vm14370_vm11 = vmmov %vm14364_vm4  ;;  %v14373_v22 = vld [vmem:[#allocation18_spill] sm:$0xff] }
 0x3c2   : > { %v3272_v43 = vpop.permute.xlu1 %3271  ;;  %v3155_v55 = vunpack.c.l.b16 %v2963_v33  ;;  %v3349_v47 = vunpack.c.l.b16 %v3093_v48  ;;  %v3350_v52 = vunpack.c.l.b16 %v3094_v40  ;;  %v2933_v18 = vpack.c.bf16 %v2900_v44, %v2900_v44  ;;  %vm14371_vm4 = vmmov %vm14365_vm5 }
 0x3c3   : > { %v2964_v15 = vsel %vm8819_vm13, %v2932_v58, 0  ;;  %v3387_v54 = vsel %vm14370_vm11, %v11049_v7, %v3272_v43  ;;  %v2871_v39 = vrot.slane %v10844_v45, 7  ;;  %v3000_v21 = vrot.slane %v10822_v42, 1  ;;  %vm14372_vm5 = vmmov %vm14371_vm4 }
 0x3c4   : > { %v3156_v41 = vunpack.c.l.b16 %v2964_v15  ;;  %3651 = vmatmul.bf16.gmra.mxu2 %v3387_v54  ;;  %3829 = vmatmul.bf16.gmra.mxu3 %v3387_v54  ;;  %v3002_v9 = vrot.slane %v10866_v4, 1  ;;  %v3001_v6 = vrot.slane %v10876_v19, 1  ;;  %v2899_v7 = vsel %vm14371_vm4, %v2869_v53, %v2870_v3 }
 0x3c5   : > { %v2898_v12 = vsel %vm14372_vm5, %v2870_v3, %v2871_v39  ;;  %v3003_v16 = vrot.slane %v10919_v8, 1  ;;  %v3373_v62 = vpack.c.b16 %v3350_v52, %v3349_v47  ;;  %v2934_v10 = vpack.c.bf16 %v2899_v7, %v2899_v7  ;;  %v14379_v52 = vld [vmem:[#allocation37_spill] sm:$0xff] }
 0x3c6   : > { %v11161_v14 = vpack.c.b16 %v3156_v41, %v3155_v55  ;;  %v2965_v45 = vsel %vm9967_vm9, %v2933_v18, 0  ;;  %v2872_v44 = vrot.slane %v10822_v42, 7  ;;  %vm14374_vm10 = vcmp.lt.s32.totalorder %v14266_v29, 7  ;;  %vm14378_vm9 = vmmov %vm14370_vm11 }
 0x3c7   : > { %v3025_v58 = vsel %vm14374_vm10, %v2999_v59, %v3000_v21  ;;  %vm14375_vm0 = vmmov %vm14374_vm10  ;;  %v2966_v40 = vsel %vm8819_vm13, %v2934_v10, 0  ;;  %v3157_v15 = vunpack.c.l.b16 %v2965_v45  ;;  %v2873_v3 = vrot.slane %v10876_v19, 7  ;;  %v14383_v45 = vld [vmem:[#allocation11_spill] sm:$0xff] }
 0x3c8   : > { %v3024_v53 = vsel %vm14375_vm0, %v3000_v21, %v3001_v6  ;;  %vm14376_vm4 = vmmov %vm14375_vm0  ;;  %v3158_v59 = vunpack.c.l.b16 %v2966_v40  ;;  %v3063_v54 = vpack.c.bf16 %v3025_v58, %v3025_v58  ;;  %v2935_v55 = vpack.c.bf16 %v2898_v12, %v2898_v12  ;;  %v3736_v32 = vpop.f32.mrf.mxu1 }
 0x3c9   : > { %v3022_v33 = vsel %vm14376_vm4, %v3002_v9, %v3003_v16  ;;  %vm14377_vm5 = vmmov %vm14375_vm0  ;;  %v3064_v41 = vpack.c.bf16 %v3024_v53, %v3024_v53  ;;  %vm14380_vm0 = vnez %v14379_v52  ;;  %v2874_v40 = vrot.slane %v10866_v4, 7 }
 0x3ca   : > { %v3023_v48 = vsel %vm14377_vm5, %v3001_v6, %v3002_v9  ;;  %v3066_v43 = vpack.c.bf16 %v3022_v33, %v3022_v33  ;;  %v11190_v21 = vpack.c.b16 %v3158_v59, %v3157_v15  ;;  %v3274_v19 = vpop.permute.xlu1 %3273  ;;  %v3095_v53 = vsel %vm8819_vm13, %v3063_v54, 0  ;;  %v14385_v33 = vld [vmem:[#allocation32_spill] sm:$0xff] }
 0x3cb   : > { %v3065_v42 = vpack.c.bf16 %v3023_v48, %v3023_v48  ;;  %vm14386_vm4 = vnez %v14385_v33  ;;  %vm14387_vm5 = vcmask 523264   ;;  %v3351_v59 = vunpack.c.l.b16 %v3095_v53 }
 0x3cc   : > { %v3098_v18 = vsel %vm14380_vm0, %v3066_v43, 0  ;;  %v3096_v48 = vsel %vm14386_vm4, %v3064_v41, 0  ;;  %v3004_v4 = vrot.slane %v10928_v46, 1  ;;  %vm14393_vm12 = vcmask 523264  }
 0x3cd   : > { %v3097_v47 = vsel %vm8819_vm13, %v3065_v42, 0  ;;  %v3354_v6 = vunpack.c.l.b16 %v3098_v18  ;;  %v3391_v42 = vsel %vm14387_vm5, %v11075_v61, %v3274_v19  ;;  %v14388_v18 = vrot.slane %v10505_v5, 1 }
 0x3ce   : > { %v3353_v9 = vunpack.c.l.b16 %v3097_v47  ;;  %v2875_v47 = vrot.slane %v10919_v8, 7  ;;  %v14391_v8 = vld [vmem:[#allocation24_spill] sm:$0xff]  ;;  %v13896_v5 = vrot.slane %v10940_v50, 1 }
 0x3d0   : > { %8074 = vmatmul.msk.bf16.gmra.mxu1 %vm14370_vm11, %v3373_v62  ;;  %v11196_v10 = vpack.c.b16 %v3354_v6, %v3353_v9  ;;  %vm14384_vm11 = vnez %v14383_v45 }
 0x3d1   : > { %8090 = vmatmul.msk.bf16.gmra.mxu0 %vm14378_vm9, %v3373_v62  ;;  %vm14381_vm9 = vcmp.lt.s32.totalorder %v14266_v29, 1  ;;  %v2967_v58 = vsel %vm14384_vm11, %v2935_v55, 0  ;;  %v3352_v55 = vunpack.c.l.b16 %v3096_v48  ;;  %vm14392_vm11 = vnez %v14391_v8 }
 0x3d2   : > { %v2897_v7 = vsel %vm14381_vm9, %v2871_v39, %v2872_v44  ;;  %vm14382_vm10 = vmmov %vm14381_vm9  ;;  %v3159_v43 = vunpack.c.l.b16 %v2967_v58  ;;  %vm14389_vm9 = vcmp.lt.s32.totalorder %v14266_v29, 7  ;;  %v2876_v58 = vrot.slane %v10928_v46, 7 }
 0x3d3   : > { %v2896_v62 = vsel %vm14382_vm10, %v2872_v44, %v2873_v3  ;;  %v2936_v12 = vpack.c.bf16 %v2897_v7, %v2897_v7  ;;  %v3012_v44 = vrot.slane %v10895_v30, 1  ;;  %v2895_v61 = vsel %vm14382_vm10, %v2873_v3, %v2874_v40  ;;  %vm14390_vm5 = vmmov %vm14382_vm10 }
 0x3d4   : > { %3656 = vmatmul.bf16.gmra.mxu2 %v3391_v42  ;;  %3834 = vmatmul.bf16.gmra.mxu3 %v3391_v42  ;;  %v2937_v54 = vpack.c.bf16 %v2896_v62, %v2896_v62  ;;  %v2894_v6 = vsel %vm14390_vm5, %v2874_v40, %v2875_v47  ;;  %v3005_v7 = vrot.slane %v10903_v63, 1  ;;  %v3374_v62 = vpack.c.b16 %v3352_v55, %v3351_v59  ;;  %vm14394_vm10 = vmmov %vm14389_vm9 }
 0x3d5   : > { %v2968_v39 = vsel %vm8819_vm13, %v2936_v12, 0  ;;  %v3044_v9 = vsel %vm14389_vm9, %v3012_v44, %v14388_v18  ;;  %v2938_v19 = vpack.c.bf16 %v2895_v61, %v2895_v61  ;;  %v3021_v3 = vsel %vm14394_vm10, %v3003_v16, %v3004_v4  ;;  %vm14395_vm5 = vmmov %vm14393_vm12 }
 0x3d6   : > { %v3160_v15 = vunpack.c.l.b16 %v2968_v39  ;;  %v2969_v12 = vsel %vm14392_vm11, %v2937_v54, 0  ;;  %v3020_v53 = vsel %vm14389_vm9, %v3004_v4, %v3005_v7  ;;  %v3076_v48 = vpack.c.bf16 %v3044_v9, %v3044_v9  ;;  %v14396_v54 = vld [vmem:[#allocation39_spill] sm:$0xff] }
 0x3d7   : > { %v2970_v40 = vsel %vm8819_vm13, %v2938_v19, 0  ;;  %v3067_v39 = vpack.c.bf16 %v3021_v3, %v3021_v3  ;;  %v3068_v42 = vpack.c.bf16 %v3020_v53, %v3020_v53  ;;  %v2877_v59 = vrot.slane %v10903_v63, 7 }
 0x3d8   : > { %v11211_v41 = vpack.c.b16 %v3160_v15, %v3159_v43  ;;  %v3161_v43 = vunpack.c.l.b16 %v2969_v12  ;;  %v3162_v46 = vunpack.c.l.b16 %v2970_v40  ;;  %v2939_v15 = vpack.c.bf16 %v2894_v6, %v2894_v6  ;;  %v3276_v12 = vpop.permute.xlu1 %3275 }
 0x3d9   : > { %v3099_v55 = vsel %vm8819_vm13, %v3067_v39, 0  ;;  %v3013_v61 = vsel %vm14389_vm9, %v13896_v5, %v3012_v44  ;;  %v14402_v39 = vld [vmem:[#allocation17_spill] sm:$0xff]  ;;  %v3006_v44 = vrot.slane %v10961_v1, 1 }
 0x3da   : > { %v11240_v16 = vpack.c.b16 %v3162_v46, %v3161_v43  ;;  %v3355_v4 = vunpack.c.l.b16 %v3099_v55  ;;  %v3075_v3 = vpack.c.bf16 %v3013_v61, %v3013_v61  ;;  %v2878_v43 = vrot.slane %v10961_v1, 7 }
 0x3db   : > { %v3007_v1 = vrot.slane %v10971_v2, 1 }
 0x3e0   : > { %8075 = vmatmul.msk.bf16.gmra.mxu1 %vm14393_vm12, %v3374_v62  ;;  %vm14397_vm12 = vnez %v14396_v54 }
 0x3e1   : > { %8091 = vmatmul.msk.bf16.gmra.mxu0 %vm14395_vm5, %v3374_v62  ;;  %v3100_v18 = vsel %vm14397_vm12, %v3068_v42, 0  ;;  %v14398_v62 = vld [vmem:[#allocation16_spill] sm:$0xff]  ;;  %vm14400_vm5 = vcmp.lt.s32.totalorder %v14266_v29, 1  ;;  %vm14403_vm12 = vnez %v14402_v39 }
 0x3e2   : > { %v3356_v9 = vunpack.c.l.b16 %v3100_v18  ;;  %vm14399_vm10 = vnez %v14398_v62  ;;  %v2893_v63 = vsel %vm14400_vm5, %v2875_v47, %v2876_v58  ;;  %vm14401_vm11 = vmmov %vm14400_vm5  ;;  %v2971_v42 = vsel %vm14403_vm12, %v2939_v15, 0 }
 0x3e3   : > { %v3108_v6 = vsel %vm14399_vm10, %v3076_v48, 0  ;;  %v2892_v19 = vsel %vm14401_vm11, %v2876_v58, %v2877_v59  ;;  %v2940_v40 = vpack.c.bf16 %v2893_v63, %v2893_v63  ;;  %v3107_v48 = vsel %vm8819_vm13, %v3075_v3, 0  ;;  %vm14405_vm5 = vmmov %vm14389_vm9 }
 0x3e4   : > { %v11252_v53 = vpack.c.b16 %v3356_v9, %v3355_v4  ;;  %v3364_v46 = vunpack.c.l.b16 %v3108_v6  ;;  %vm14404_vm11 = vcmask 523264   ;;  %v3363_v55 = vunpack.c.l.b16 %v3107_v48 }
 0x3e5   : > { %v2972_v47 = vsel %vm8819_vm13, %v2940_v40, 0  ;;  %v3395_v58 = vsel %vm14404_vm11, %v11099_v49, %v3276_v12  ;;  %v3163_v18 = vunpack.c.l.b16 %v2971_v42  ;;  %v2941_v15 = vpack.c.bf16 %v2892_v19, %v2892_v19 }
 0x3e6   : > { %v3164_v4 = vunpack.c.l.b16 %v2972_v47  ;;  %3661 = vmatmul.bf16.gmra.mxu2 %v3395_v58  ;;  %3839 = vmatmul.bf16.gmra.mxu3 %v3395_v58  ;;  %v2879_v9 = vrot.slane %v10971_v2, 7  ;;  %v11266_v61 = vpack.c.b16 %v3364_v46, %v3363_v55  ;;  %v3018_v6 = vsel %vm14389_vm9, %v3006_v44, %v3007_v1  ;;  %v14408_v2 = vld [vmem:[#allocation13_spill] sm:$0xff] }
 0x3e7   : > { %v3019_v49 = vsel %vm14405_vm5, %v3005_v7, %v3006_v44  ;;  %vm14406_vm11 = vcmp.lt.s32.totalorder %v14266_v29, 1  ;;  %v3070_v40 = vpack.c.bf16 %v3018_v6, %v3018_v6  ;;  %vm14409_vm10 = vnez %v14408_v2 }
 0x3e8   : > { %v11268_v63 = vpack.c.b16 %v3164_v4, %v3163_v18  ;;  %v2891_v12 = vsel %vm14406_vm11, %v2877_v59, %v2878_v43  ;;  %vm14407_vm12 = vmmov %vm14406_vm11  ;;  %v3069_v3 = vpack.c.bf16 %v3019_v49, %v3019_v49  ;;  %v2973_v48 = vsel %vm14409_vm10, %v2941_v15, 0  ;;  %v14411_v59 = vld [vmem:[#allocation4_spill] sm:$0xff] }
 0x3e9   : > { %v2890_v19 = vsel %vm14407_vm12, %v2878_v43, %v2879_v9  ;;  %v2942_v42 = vpack.c.bf16 %v2891_v12, %v2891_v12  ;;  %v2883_v46 = vrot.slane %v10940_v50, 7  ;;  %v2880_v47 = vrot.slane %v11007_v35, 7  ;;  %vm14416_vm10 = vmmov %vm14406_vm11 }
 0x3ea   : > { %v3008_v58 = vrot.slane %v11007_v35, 1  ;;  %vm14410_vm9 = vcmask 523264   ;;  %v3101_v7 = vsel %vm8819_vm13, %v3069_v3, 0  ;;  %vm14412_vm12 = vnez %v14411_v59 }
 0x3eb   : > { %v3102_v43 = vsel %vm14412_vm12, %v3070_v40, 0  ;;  %v2974_v44 = vsel %vm8819_vm13, %v2942_v42, 0  ;;  %vm14413_vm5 = vmmov %vm14410_vm9  ;;  %v3357_v55 = vunpack.c.l.b16 %v3101_v7  ;;  %v3165_v4 = vunpack.c.l.b16 %v2973_v48  ;;  %v3278_v40 = vpop.permute.xlu1 %3277 }
 0x3ec   : > { %v3358_v18 = vunpack.c.l.b16 %v3102_v43  ;;  %v3166_v15 = vunpack.c.l.b16 %v2974_v44  ;;  %v2943_v35 = vpack.c.bf16 %v2890_v19, %v2890_v19  ;;  %v2881_v6 = vrot.slane %v11012_v26, 7  ;;  %vm14417_vm12 = vmmov %vm14416_vm10 }
 0x3ed   : > { %v3009_v49 = vrot.slane %v11012_v26, 1  ;;  %v2885_v42 = vsel %vm14406_vm11, %v2883_v46, %v2884_v51  ;;  %v2889_v48 = vsel %vm14416_vm10, %v2879_v9, %v2880_v47  ;;  %v2882_v51 = vrot.slane %v11051_v56, 7 }
 0x3ee   : > { %v11295_v12 = vpack.c.b16 %v3358_v18, %v3357_v55  ;;  %v11297_v3 = vpack.c.b16 %v3166_v15, %v3165_v4  ;;  %v2888_v26 = vsel %vm14417_vm12, %v2880_v47, %v2881_v6  ;;  %v2944_v44 = vpack.c.bf16 %v2889_v48, %v2889_v48  ;;  %v14418_v55 = vld [vmem:[#allocation30_spill] sm:$0xff] }
 0x3ef   : > { %vm14419_vm0 = vnez %v14418_v55  ;;  %v3010_v18 = vrot.slane %v11051_v56, 1  ;;  %vm14420_vm11 = vcmask 523264   ;;  %v3914_v56 = vpop.f32.mrf.mxu0 }
 0x3f0   : > { %8076 = vmatmul.msk.bf16.gmra.mxu1 %vm14410_vm9, %v11196_v10  ;;  %vm14414_vm9 = vcmp.lt.s32.totalorder %v14266_v29, 7  ;;  %v2975_v30 = vsel %vm14419_vm0, %v2943_v35, 0  ;;  %v3399_v4 = vsel %vm14420_vm11, %v11110_v36, %v3278_v40  ;;  %v2976_v15 = vsel %vm8819_vm13, %v2944_v44, 0 }
 0x3f1   : > { %8092 = vmatmul.msk.bf16.gmra.mxu0 %vm14413_vm5, %v11196_v10  ;;  %v3016_v10 = vsel %vm14414_vm9, %v3008_v58, %v3009_v49  ;;  %vm14415_vm5 = vmmov %vm14414_vm9  ;;  %v3167_v48 = vunpack.c.l.b16 %v2975_v30  ;;  %v3168_v5 = vunpack.c.l.b16 %v2976_v15  ;;  %v14425_v44 = vrot.slane %v10940_v50, 1 }
 0x3f2   : > { %v3017_v19 = vsel %vm14415_vm5, %v3007_v1, %v3008_v58  ;;  %v3072_v43 = vpack.c.bf16 %v3016_v10, %v3016_v10  ;;  %v2948_v1 = vpack.c.bf16 %v2885_v42, %v2885_v42  ;;  %v14421_v58 = vld [vmem:[#allocation26_spill] sm:$0xff]  ;;  %v2945_v10 = vpack.c.bf16 %v2888_v26, %v2888_v26  ;;  %vm14426_vm9 = vmmov %vm14415_vm5 }
 0x3f3   : > { %v3071_v7 = vpack.c.bf16 %v3017_v19, %v3017_v19  ;;  %vm14422_vm10 = vnez %v14421_v58  ;;  %v11323_v40 = vpack.c.b16 %v3168_v5, %v3167_v48  ;;  %v14423_v42 = vld [vmem:[#allocation6_spill] sm:$0xff]  ;;  %v3014_v26 = vsel %vm14426_vm9, %v3010_v18, %v14425_v44 }
 0x3f4   : > { %v3104_v47 = vsel %vm14422_vm10, %v3072_v43, 0  ;;  %vm14424_vm12 = vnez %v14423_v42  ;;  %v2980_v43 = vsel %vm8819_vm13, %v2948_v1, 0  ;;  %v3015_v30 = vsel %vm14415_vm5, %v3009_v49, %v3010_v18 }
 0x3f5   : > { %v3103_v9 = vsel %vm8819_vm13, %v3071_v7, 0  ;;  %v3360_v35 = vunpack.c.l.b16 %v3104_v47  ;;  %v2977_v7 = vsel %vm14424_vm12, %v2945_v10, 0  ;;  %vm14427_vm11 = vcmp.lt.s32.totalorder %v14266_v29, 1 }
 0x3f6   : > { %v3359_v19 = vunpack.c.l.b16 %v3103_v9  ;;  %3666 = vmatmul.bf16.gmra.mxu2 %v3399_v4  ;;  %3844 = vmatmul.bf16.gmra.mxu3 %v3399_v4  ;;  %v2887_v4 = vsel %vm14427_vm11, %v2881_v6, %v2882_v51  ;;  %vm14428_vm0 = vmmov %vm14427_vm11  ;;  %v3073_v9 = vpack.c.bf16 %v3015_v30, %v3015_v30  ;;  %v3074_v47 = vpack.c.bf16 %v3014_v26, %v3014_v26  ;;  %v3738_v30 = vpop.f32.mrf.mxu1 }
 0x3f7   : > { %v2886_v5 = vsel %vm14428_vm0, %v2882_v51, %v2883_v46  ;;  %v2946_v15 = vpack.c.bf16 %v2887_v4, %v2887_v4  ;;  %v3172_v1 = vunpack.c.l.b16 %v2980_v43  ;;  %vm14429_vm12 = vcmask 523264   ;;  %v3916_v4 = vpop.f32.mrf.mxu0 }
 0x3f8   : > { %v3378_v36 = vpack.c.b16 %v3360_v35, %v3359_v19  ;;  %v2947_v10 = vpack.c.bf16 %v2886_v5, %v2886_v5  ;;  %v3169_v19 = vunpack.c.l.b16 %v2977_v7  ;;  %v3105_v50 = vsel %vm8819_vm13, %v3073_v9, 0  ;;  %v14430_v35 = vld [vmem:[#allocation29_spill] sm:$0xff]  ;;  %vm14433_vm0 = vmmov %vm14429_vm12  ;;  %v3280_v5 = vpop.permute.xlu1 %3279 }
 0x3f9   : > { %vm14431_vm9 = vnez %v14430_v35  ;;  %v2978_v6 = vsel %vm8819_vm13, %v2946_v15, 0  ;;  %v3361_v51 = vunpack.c.l.b16 %v3105_v50  ;;  %vm14435_vm5 = vmmov %vm14433_vm0 }
 0x3fa   : > { %v3106_v49 = vsel %vm14431_vm9, %v3074_v47, 0  ;;  %v2979_v46 = vsel %vm10025_vm7, %v2947_v10, 0  ;;  %v3170_v56 = vunpack.c.l.b16 %v2978_v6  ;;  %vm14436_vm11 = vmmov %vm14433_vm0 }
 0x3fb   : > { %v3362_v48 = vunpack.c.l.b16 %v3106_v49  ;;  %v3171_v7 = vunpack.c.l.b16 %v2979_v46  ;;  %vm14437_vm7 = vmmov %vm14433_vm0 }
 0x3fc   : > { %v11351_v44 = vpack.c.b16 %v3170_v56, %v3169_v19  ;;  %vm14441_vm9 = vmmov %vm14433_vm0 }
 0x3fd   : > { %v3379_v43 = vpack.c.b16 %v3362_v48, %v3361_v51  ;;  %v11353_v26 = vpack.c.b16 %v3172_v1, %v3171_v7 }
 0x3fe   : > { %v3741_v47 = vpop.f32.mrf.mxu1 }
 0x3ff   : > { %v3919_v15 = vpop.f32.mrf.mxu0 }
 0x400   : > { %8077 = vmatmul.msk.bf16.gmra.mxu1 %vm14429_vm12, %v11252_v53  ;;  %vm14434_vm12 = vmmov %vm14433_vm0 }
 0x401   : > { %8093 = vmatmul.msk.bf16.gmra.mxu0 %vm14433_vm0, %v11252_v53  ;;  %v3403_v9 = vsel %vm14434_vm12, %v11122_v23, %v3280_v5  ;;  %v3282_v53 = vpop.permute.xlu1 %3281  ;;  %vm14438_vm12 = vmmov %vm14433_vm0 }
 0x402   : > { %v3407_v1 = vsel %vm14433_vm0, %v11142_v31, %v3282_v53 }
 0x406   : > { %3671 = vmatmul.bf16.gmra.mxu2 %v3403_v9  ;;  %3849 = vmatmul.bf16.gmra.mxu3 %v3403_v9  ;;  %v3743_v10 = vpop.f32.mrf.mxu1 }
 0x407   : > { %v3921_v19 = vpop.f32.mrf.mxu0 }
 0x409   : > { %v3284_v49 = vpop.permute.xlu1 %3283 }
 0x40e   : > { %v3746_v23 = vpop.f32.mrf.mxu1 }
 0x40f   : > { %v3924_v50 = vpop.f32.mrf.mxu0 }
 0x410   : > { %8078 = vmatmul.msk.bf16.gmra.mxu1 %vm14435_vm5, %v11295_v12  ;;  %vm14439_vm5 = vmmov %vm14433_vm0 }
 0x411   : > { %8094 = vmatmul.msk.bf16.gmra.mxu0 %vm14436_vm11, %v11295_v12  ;;  %v3411_v6 = vsel %vm14439_vm5, %v11161_v14, %v3284_v49  ;;  %vm14440_vm11 = vmmov %vm14433_vm0 }
 0x412   : > { %vm14445_vm5 = vmmov %vm14433_vm0 }
 0x416   : > { %3676 = vmatmul.bf16.gmra.mxu2 %v3407_v1  ;;  %3854 = vmatmul.bf16.gmra.mxu3 %v3407_v1  ;;  %v3748_v12 = vpop.f32.mrf.mxu1 }
 0x417   : > { %v3926_v46 = vpop.f32.mrf.mxu0 }
 0x41e   : > { %v3751_v56 = vpop.f32.mrf.mxu1 }
 0x41f   : > { %v3929_v7 = vpop.f32.mrf.mxu0 }
 0x420   : > { %8079 = vmatmul.msk.bf16.gmra.mxu1 %vm14437_vm7, %v3378_v36  ;;  %vm14442_vm7 = vmmov %vm14433_vm0 }
 0x421   : > { %8095 = vmatmul.msk.bf16.gmra.mxu0 %vm14438_vm12, %v3378_v36  ;;  %v3286_v36 = vpop.permute.xlu1 %3285  ;;  %vm14444_vm12 = vmmov %vm14433_vm0 }
 0x422   : > { %v3415_v14 = vsel %vm14442_vm7, %v11190_v21, %v3286_v36  ;;  %vm14447_vm7 = vmmov %vm14433_vm0 }
 0x426   : > { %3681 = vmatmul.bf16.gmra.mxu2 %v3411_v6  ;;  %3859 = vmatmul.bf16.gmra.mxu3 %v3411_v6 }
 0x429   : > { %v3288_v53 = vpop.permute.xlu1 %3287 }
 0x42a   : > { %v3419_v21 = vsel %vm14444_vm12, %v11211_v41, %v3288_v53  ;;  %vm14449_vm12 = vmmov %vm14433_vm0 }
 0x430   : > { %8080 = vmatmul.msk.bf16.gmra.mxu1 %vm14440_vm11, %v3379_v43  ;;  %vm14446_vm11 = vmmov %vm14433_vm0 }
 0x431   : > { %8096 = vmatmul.msk.bf16.gmra.mxu0 %vm14441_vm9, %v3379_v43  ;;  %vm14443_vm9 = vmmov %vm14433_vm0  ;;  %v3931_v43 = vpop.f32.mrf.mxu0 }
 0x433   : > { %v3647_v31 = vpop.f32.mrf.mxu2 }
 0x434   : > { %v11369_v51 = vadd.f32 %v3736_v32, %v3647_v31  ;;  %v3825_v48 = vpop.f32.mrf.mxu3  ;;  %v3753_v32 = vpop.f32.mrf.mxu1 }
 0x436   : > { %4124 = vrot.lane.b32.xlu1 %v11369_v51, %s8616_s13  ;;  %3686 = vmatmul.bf16.gmra.mxu2 %v3415_v14 }
 0x437   : > { %3864 = vmatmul.bf16.gmra.mxu3 %v3415_v14  ;;  %v3290_v14 = vpop.permute.xlu1 %3289 }
 0x439   : > { %v3934_v6 = vpop.f32.mrf.mxu0 }
 0x43b   : > { %v3649_v4 = vpop.f32.mrf.mxu2 }
 0x43c   : > { %v11375_v5 = vadd.f32 %v3738_v30, %v3649_v4  ;;  %v3827_v9 = vpop.f32.mrf.mxu3  ;;  %v3756_v30 = vpop.f32.mrf.mxu1 }
 0x43e   : > { %4126 = vrot.lane.b32.xlu2 %v11375_v5, %s8616_s13 }
 0x440   : > { %8081 = vmatmul.msk.bf16.gmra.mxu1 %vm14443_vm9, %v11266_v61  ;;  %vm14448_vm9 = vmmov %vm14433_vm0 }
 0x441   : > { %8097 = vmatmul.msk.bf16.gmra.mxu0 %vm14433_vm0, %v11266_v61  ;;  %v3936_v53 = vpop.f32.mrf.mxu0 }
 0x444   : > { %v3758_v4 = vpop.f32.mrf.mxu1 }
 0x446   : > { %3691 = vmatmul.bf16.gmra.mxu2 %v3419_v21 }
 0x447   : > { %3869 = vmatmul.bf16.gmra.mxu3 %v3419_v21  ;;  %v3652_v1 = vpop.f32.mrf.mxu2  ;;  %v3830_v49 = vpop.f32.mrf.mxu3 }
 0x448   : > { %v11385_v31 = vadd.f32 %v3741_v47, %v3652_v1  ;;  %v3920_v48 = vadd.f32 %v3919_v15, %v3830_v49  ;;  %v3423_v47 = vsel %vm14447_vm7, %v11240_v16, %v3290_v14  ;;  %vm14452_vm7 = vmmov %vm14433_vm0 }
 0x44a   : > { %3999 = vst.msk [vmem:[#allocation2 + $0x48] sm:$0xff] %vm14445_vm5, %v3920_v48  ;;  %4128 = vrot.lane.b32.xlu0 %v11385_v31, %s8616_s13  ;;  %vm14450_vm5 = vmmov %vm14433_vm0 }
 0x44c   : > { %v3761_v48 = vpop.f32.mrf.mxu1 }
 0x44f   : > { %v3654_v36 = vpop.f32.mrf.mxu2  ;;  %v3832_v61 = vpop.f32.mrf.mxu3 }
 0x450   : > { %v11390_v9 = vadd.f32 %v3743_v10, %v3654_v36  ;;  %v3922_v41 = vadd.f32 %v3921_v19, %v3832_v61  ;;  %v3939_v10 = vpop.f32.mrf.mxu0  ;;  %v3292_v61 = vpop.permute.xlu1 %3291 }
 0x452   : > { %4001 = vst.msk [vmem:[#allocation2 + $0x58] sm:$0xff] %vm14446_vm11, %v3922_v41  ;;  %4130 = vrot.lane.b32.xlu1 %v11390_v9, %s8616_s13  ;;  %vm14451_vm11 = vmmov %vm14433_vm0 }
 0x456   : > { %3696 = vmatmul.bf16.gmra.mxu2 %v3423_v47 }
 0x457   : > { %3874 = vmatmul.bf16.gmra.mxu3 %v3423_v47  ;;  %v3657_v15 = vpop.f32.mrf.mxu2  ;;  %v3835_v21 = vpop.f32.mrf.mxu3 }
 0x458   : > { %v11397_v1 = vadd.f32 %v3746_v23, %v3657_v15  ;;  %v3925_v49 = vadd.f32 %v3924_v50, %v3835_v21  ;;  %v3427_v23 = vsel %vm14449_vm12, %v11268_v63, %v3292_v61  ;;  %v3763_v50 = vpop.f32.mrf.mxu1  ;;  %v3941_v14 = vpop.f32.mrf.mxu0  ;;  %vm14454_vm12 = vmmov %vm14433_vm0 }
 0x45a   : > { %4003 = vst.msk [vmem:[#allocation2 + $0x68] sm:$0xff] %vm14448_vm9, %v3925_v49  ;;  %4132 = vrot.lane.b32.xlu2 %v11397_v1, %s8616_s13  ;;  %vm14453_vm9 = vmmov %vm14433_vm0 }
 0x45f   : > { %v3659_v19 = vpop.f32.mrf.mxu2  ;;  %v3837_v36 = vpop.f32.mrf.mxu3 }
 0x460   : > { %v11402_v41 = vadd.f32 %v3748_v12, %v3659_v19  ;;  %v3927_v16 = vadd.f32 %v3926_v46, %v3837_v36  ;;  %v3766_v12 = vpop.f32.mrf.mxu1  ;;  %v3294_v36 = vpop.permute.xlu0 %3293 }
 0x462   : > { %4005 = vst.msk [vmem:[#allocation2 + $0x78] sm:$0xff] %vm14433_vm0, %v3927_v16  ;;  %4134 = vrot.lane.b32.xlu0 %v11402_v41, %s8616_s13  ;;  %v3944_v16 = vpop.f32.mrf.mxu0 }
 0x466   : > { %3701 = vmatmul.bf16.gmra.mxu2 %v3427_v23 }
 0x467   : > { %3879 = vmatmul.bf16.gmra.mxu3 %v3427_v23 }
 0x469   : > { %v3662_v47 = vpop.f32.mrf.mxu2  ;;  %v3840_v15 = vpop.f32.mrf.mxu3 }
 0x46a   : > { %v11409_v21 = vadd.f32 %v3751_v56, %v3662_v47  ;;  %v3930_v49 = vadd.f32 %v3929_v7, %v3840_v15  ;;  %v3431_v56 = vsel %vm14452_vm7, %v11297_v3, %v3294_v36  ;;  %v3768_v47 = vpop.f32.mrf.mxu1  ;;  %v3946_v18 = vpop.f32.mrf.mxu0  ;;  %vm14457_vm7 = vmmov %vm14433_vm0 }
 0x46c   : > { %4007 = vst.msk [vmem:[#allocation2 + $0x88] sm:$0xff] %vm14450_vm5, %v3930_v49  ;;  %4136 = vrot.lane.b32.xlu2 %v11409_v21, %s8616_s13  ;;  %vm14455_vm5 = vmmov %vm14433_vm0 }
 0x471   : > { %v3664_v46 = vpop.f32.mrf.mxu2  ;;  %v3842_v19 = vpop.f32.mrf.mxu3 }
 0x472   : > { %v11414_v63 = vadd.f32 %v3753_v32, %v3664_v46  ;;  %v3932_v61 = vadd.f32 %v3931_v43, %v3842_v19  ;;  %v3296_v46 = vpop.permute.xlu1 %3295  ;;  %v3771_v36 = vpop.f32.mrf.mxu1 }
 0x474   : > { %4009 = vst.msk [vmem:[#allocation2 + $0x98] sm:$0xff] %vm14451_vm11, %v3932_v61  ;;  %4138 = vrot.lane.b32.xlu0 %v11414_v63, %s8616_s13  ;;  %vm14456_vm11 = vmmov %vm14433_vm0 }
 0x476   : > { %3706 = vmatmul.bf16.gmra.mxu2 %v3431_v56 }
 0x477   : > { %3884 = vmatmul.bf16.gmra.mxu3 %v3431_v56 }
 0x479   : > { %v3667_v7 = vpop.f32.mrf.mxu2  ;;  %v3845_v23 = vpop.f32.mrf.mxu3 }
 0x47a   : > { %v11421_v15 = vadd.f32 %v3756_v30, %v3667_v7  ;;  %v3935_v49 = vadd.f32 %v3934_v6, %v3845_v23  ;;  %v3435_v30 = vsel %vm14454_vm12, %v11323_v40, %v3296_v46  ;;  %v3949_v6 = vpop.f32.mrf.mxu0  ;;  %v3298_v40 = vpop.permute.xlu2 %3297  ;;  %vm14459_vm12 = vmmov %vm14433_vm0 }
 0x47c   : > { %4011 = vst.msk [vmem:[#allocation2 + $0xa8] sm:$0xff] %vm14453_vm9, %v3935_v49  ;;  %4140 = vrot.lane.b32.xlu2 %v11421_v15, %s8616_s13  ;;  %vm14458_vm9 = vmmov %vm14433_vm0 }
 0x481   : > { %v3669_v32 = vpop.f32.mrf.mxu2  ;;  %v3847_v43 = vpop.f32.mrf.mxu3 }
 0x482   : > { %v11426_v19 = vadd.f32 %v3758_v4, %v3669_v32  ;;  %v3937_v3 = vadd.f32 %v3936_v53, %v3847_v43  ;;  %v11438_v4 = vpop.f32.mrf.mxu1  ;;  %v11440_v53 = vpop.f32.mrf.mxu0 }
 0x484   : > { %4013 = vst.msk [vmem:[#allocation2 + $0xb8] sm:$0xff] %vm14433_vm0, %v3937_v3  ;;  %4142 = vrot.lane.b32.xlu0 %v11426_v19, %s8616_s13 }
 0x486   : > { %3711 = vmatmul.bf16.gmra.mxu2 %v3435_v30 }
 0x487   : > { %3889 = vmatmul.bf16.gmra.mxu3 %v3435_v30 }
 0x489   : > { %v3672_v61 = vpop.f32.mrf.mxu2  ;;  %v3850_v56 = vpop.f32.mrf.mxu3 }
 0x48a   : > { %v11433_v7 = vadd.f32 %v3761_v48, %v3672_v61  ;;  %v3940_v23 = vadd.f32 %v3939_v10, %v3850_v56  ;;  %v3439_v48 = vsel %vm14457_vm7, %v11351_v44, %v3298_v40  ;;  %v11449_v10 = vpop.f32.mrf.mxu1  ;;  %v11451_v61 = vpop.f32.mrf.mxu0 }
 0x48c   : > { %4015 = vst.msk [vmem:[#allocation2 + $0xc8] sm:$0xff] %vm14455_vm5, %v3940_v23  ;;  %4144 = vrot.lane.b32.xlu2 %v11433_v7, %s8616_s13  ;;  %vm14460_vm5 = vmmov %vm14433_vm0 }
 0x491   : > { %v3674_v49 = vpop.f32.mrf.mxu2  ;;  %v3852_v32 = vpop.f32.mrf.mxu3 }
 0x492   : > { %v11442_v43 = vadd.f32 %v3763_v50, %v3674_v49  ;;  %v3942_v46 = vadd.f32 %v3941_v14, %v3852_v32  ;;  %v3300_v49 = vpop.permute.xlu0 %3299  ;;  %v11458_v44 = vpop.f32.mrf.mxu1 }
 0x494   : > { %4017 = vst.msk [vmem:[#allocation2 + $0xd8] sm:$0xff] %vm14456_vm11, %v3942_v46  ;;  %4146 = vrot.lane.b32.xlu0 %v11442_v43, %s8616_s13  ;;  %v11462_v46 = vpop.f32.mrf.mxu0  ;;  %vm14461_vm11 = vmmov %vm14433_vm0 }
 0x496   : > { %3716 = vmatmul.bf16.gmra.mxu2 %v3439_v48 }
 0x497   : > { %3894 = vmatmul.bf16.gmra.mxu3 %v3439_v48 }
 0x499   : > { %v3677_v3 = vpop.f32.mrf.mxu2  ;;  %v3855_v30 = vpop.f32.mrf.mxu3 }
 0x49a   : > { %v11453_v56 = vadd.f32 %v3766_v12, %v3677_v3  ;;  %v3945_v50 = vadd.f32 %v3944_v16, %v3855_v30  ;;  %v8180_v12 = vld [vmem:[%s13728_s3 + $0x1f0] sm:$0xf]  ;;  %v8510_v16 = vld [vmem:[%s13728_s3 + $0x1f4] sm:$0xf0] }
 0x49b   : > { %v8181_v48 = vor.u32 %v8510_v16, %v8180_v12  ;;  %v8212_v12 = vld [vmem:[%s13728_s3 + $0x230] sm:$0xf] }
 0x49c   : > { %4019 = vst.msk [vmem:[#allocation2 + $0xe8] sm:$0xff] %vm14458_vm9, %v3945_v50  ;;  %4148 = vrot.lane.b32.xlu2 %v11453_v56, %s8616_s13 }
 0x49d   : > { %5263 = vmatpush.bf16.msra.mxu2 %v8181_v48  ;;  %v8214_v48 = vld [vmem:[%s13728_s3 + $0x238] sm:$0xf0] }
 0x4a1   : > { %v3679_v14 = vpop.f32.mrf.mxu2  ;;  %v3857_v23 = vpop.f32.mrf.mxu3 }
 0x4a2   : > { %v11460_v32 = vadd.f32 %v3768_v47, %v3679_v14  ;;  %v3947_v40 = vadd.f32 %v3946_v18, %v3857_v23  ;;  %v3443_v47 = vsel %vm14459_vm12, %v11353_v26, %v3300_v49  ;;  %v11477_v23 = vpop.f32.mrf.mxu1  ;;  %v11482_v49 = vpop.f32.mrf.mxu0  ;;  %vm14462_vm12 = vcmp.lt.s32.totalorder %v14266_v29, 7 }
 0x4a4   : > { %4021 = vst.msk [vmem:[#allocation2 + $0xf8] sm:$0xff] %vm14433_vm0, %v3947_v40  ;;  %4150 = vrot.lane.b32.xlu0 %v11460_v32, %s8616_s13  ;;  %v4127_v40 = vpop.permute.xlu2 %4126 }
 0x4a6   : > { %3721 = vmatmul.bf16.gmra.mxu2 %v3443_v47 }
 0x4a7   : > { %3899 = vmatmul.bf16.gmra.mxu3 %v3443_v47  ;;  %v8517_v47 = vld [vmem:[%s13728_s3 + $0x234] sm:$0xf] }
 0x4a8   : > { %v4125_v14 = vpop.permute.xlu1 %4124 }
 0x4a9   : > { %v3682_v18 = vpop.f32.mrf.mxu2  ;;  %v3860_v3 = vpop.f32.mrf.mxu3  ;;  %v4220_v26 = vadd.f32 %v8604_v27, %v4125_v14 }
 0x4aa   : > { %v11475_v30 = vadd.f32 %v3771_v36, %v3682_v18  ;;  %v3950_v50 = vadd.f32 %v3949_v6, %v3860_v3  ;;  %v8518_v36 = vld [vmem:[%s13728_s3 + $0x234] sm:$0xf0]  ;;  %v4221_v6 = vadd.f32 %v8604_v27, %v4127_v40  ;;  %v4252_v18 = vld [vmem:[#allocation2 + $0x48] sm:$0xff]  ;;  %v8217_v3 = vor.u32 %v8517_v47, %v8214_v48  ;;  %v8515_v40 = vld [vmem:[%s13728_s3 + $0x224] sm:$0xf] }
 0x4ab   : > { %v8213_v16 = vor.u32 %v8518_v36, %v8212_v12  ;;  %v8516_v27 = vld [vmem:[%s13728_s3 + $0x224] sm:$0xf0]  ;;  %v4253_v12 = vld [vmem:[#allocation2 + $0x58] sm:$0xff]  ;;  %v8206_v47 = vld [vmem:[%s13728_s3 + $0x228] sm:$0xf0] }
 0x4ac   : > { %4023 = vst.msk [vmem:[#allocation2 + $0x108] sm:$0xff] %vm14460_vm5, %v3950_v50  ;;  %4152 = vrot.lane.b32.xlu2 %v11475_v30, %s8616_s13  ;;  %v4284_v50 = vadd.f32 %v4252_v18, %v4220_v26  ;;  %5534 = vmatpush.bf16.msrb.mxu0 %v8217_v3  ;;  %v11515_v48 = vld [vmem:[%s13729_s4 + $0x1] ss:$0 sm:$0xff]  ;;  %v4285_v18 = vadd.f32 %v4253_v12, %v4221_v6  ;;  %v8513_v6 = vld [vmem:[%s13728_s3 + $0x214] sm:$0xf]  ;;  %vm14463_vm5 = vmmov %vm14433_vm0 }
 0x4ad   : > { %5356 = vmatpush.bf16.msra.mxu1 %v8213_v16  ;;  %v8205_v16 = vor.u32 %v8516_v27, %v8204_v60  ;;  %v8209_v55 = vor.u32 %v8515_v40, %v8206_v47  ;;  %v8196_v60 = vld [vmem:[%s13728_s3 + $0x210] sm:$0xf]  ;;  %v8198_v3 = vld [vmem:[%s13728_s3 + $0x218] sm:$0xf0]  ;;  %v8188_v40 = vld [vmem:[%s13728_s3 + $0x200] sm:$0xf] }
 0x4ae   : > { %v8201_v27 = vor.u32 %v8513_v6, %v8198_v3  ;;  %v4319_v12 = vadd.f32 %v11515_v48, %v4285_v18 }
 0x4b0   : > { %5535 = vmatpush.bf16.msrb.mxu0 %v8209_v55  ;;  %v11548_v55 = vpop.f32.mrf.mxu0  ;;  %v4383_v2 = vmul.f32 0.1, %v4319_v12  ;;  %vm4351_vm9 = vcmp.ge.f32.partialorder %v4319_v12, 0.0 }
 0x4b1   : > { %v3684_v14 = vpop.f32.mrf.mxu2  ;;  %v3862_v42 = vpop.f32.mrf.mxu3  ;;  %5357 = vmatpush.bf16.msra.mxu1 %v8205_v16  ;;  %v8190_v16 = vld [vmem:[%s13728_s3 + $0x208] sm:$0xf0] }
 0x4b2   : > { %v11506_v36 = vadd.f32 %v11438_v4, %v3684_v14  ;;  %v3952_v26 = vadd.f32 %v11440_v53, %v3862_v42  ;;  %v8514_v42 = vld [vmem:[%s13728_s3 + $0x214] sm:$0xf0]  ;;  %v4318_v4 = vadd.f32 %v11515_v48, %v4284_v50  ;;  %v11533_v14 = vpop.f32.mrf.mxu1  ;;  %v8512_v50 = vld [vmem:[%s13728_s3 + $0x204] sm:$0xf0] }
 0x4b3   : > { %v8197_v53 = vor.u32 %v8514_v42, %v8196_v60  ;;  %v8189_v6 = vor.u32 %v8512_v50, %v8188_v40 }
 0x4b4   : > { %4025 = vst.msk [vmem:[#allocation2 + $0x118] sm:$0xff] %vm14461_vm11, %v3952_v26  ;;  %4154 = vrot.lane.b32.xlu0 %v11506_v36, %s8616_s13  ;;  %v8511_v26 = vld [vmem:[%s13728_s3 + $0x204] sm:$0xf]  ;;  %v4382_v47 = vmul.f32 0.1, %v4318_v4  ;;  %vm4350_vm7 = vcmp.ge.f32.partialorder %v4318_v4, 0.0  ;;  %5536 = vmatpush.bf16.msrb.mxu0 %v8201_v27  ;;  %v4133_v17 = vpop.permute.xlu2 %4132 }
 0x4b5   : > { %5358 = vmatpush.bf16.msra.mxu1 %v8197_v53  ;;  %v8193_v20 = vor.u32 %v8511_v26, %v8190_v16  ;;  %v4224_v53 = vadd.f32 %v4133_v17, %v11385_v31  ;;  %v4254_v26 = vld [vmem:[#allocation2 + $0x68] sm:$0xff] }
 0x4b6   : > { %v11557_v39 = vsel %vm4350_vm7, %v4318_v4, %v4382_v47  ;;  %v4256_v16 = vld [vmem:[#allocation2 + $0x88] sm:$0xff]  ;;  %vm14464_vm7 = vmmov %vm14462_vm12 }
 0x4b7   : > { %v13899_v50 = vrot.slane %v11557_v39, 1  ;;  %v4288_v17 = vadd.f32 %v4256_v16, %v4224_v53 }
 0x4b8   : > { %5537 = vmatpush.bf16.msrb.mxu0 %v8193_v20  ;;  %v11566_v4 = vpop.f32.mrf.mxu0 }
 0x4b9   : > { %v3687_v60 = vpop.f32.mrf.mxu2  ;;  %5359 = vmatpush.bf16.msra.mxu1 %v8189_v6  ;;  %v4322_v53 = vadd.f32 %v11515_v48, %v4288_v17 }
 0x4ba   : > { %v3865_v42 = vpop.f32.mrf.mxu3  ;;  %v11551_v3 = vadd.f32 %v11449_v10, %v3687_v60  ;;  %v11560_v10 = vsel %vm4351_vm9, %v4319_v12, %v4383_v2  ;;  %v11563_v27 = vpop.f32.mrf.mxu1  ;;  %v8172_v12 = vld [vmem:[%s13728_s3 + $0x1e0] sm:$0xf] }
 0x4bb   : > { %v3955_v18 = vadd.f32 %v11451_v61, %v3865_v42  ;;  %v4607_v47 = vrot.slane %v11560_v10, 1  ;;  %v4386_v11 = vmul.f32 0.1, %v4322_v53  ;;  %vm4354_vm9 = vcmp.ge.f32.partialorder %v4322_v53, 0.0 }
 0x4bc   : > { %4156 = vrot.lane.b32.xlu2 %v11551_v3, %s8616_s13  ;;  %v4129_v40 = vpop.permute.xlu0 %4128 }
 0x4bd   : > { %4027 = vst.msk [vmem:[#allocation2 + $0x128] sm:$0xff] %vm14433_vm0, %v3955_v18  ;;  %v4222_v61 = vadd.f32 %v4129_v40, %v11369_v51  ;;  %v4668_v31 = vsel %vm14462_vm12, %v13899_v50, %v4607_v47 }
 0x4bf   : > { %v4286_v18 = vadd.f32 %v4254_v26, %v4222_v61  ;;  %v4670_v61 = vpack.c.bf16 %v4668_v31, %v4668_v31 }
 0x4c1   : > { %v3689_v60 = vpop.f32.mrf.mxu2  ;;  %v4320_v51 = vadd.f32 %v11515_v48, %v4286_v18 }
 0x4c2   : > { %v3867_v42 = vpop.f32.mrf.mxu3  ;;  %v11570_v20 = vadd.f32 %v11458_v44, %v3689_v60  ;;  %v8508_v44 = vld [vmem:[%s13728_s3 + $0x1e4] sm:$0xf0]  ;;  %v11592_v62 = vpop.f32.mrf.mxu1 }
 0x4c3   : > { %v3957_v2 = vadd.f32 %v11462_v46, %v3867_v42  ;;  %vm4352_vm11 = vcmp.ge.f32.partialorder %v4320_v51, 0.0  ;;  %v4384_v46 = vmul.f32 0.1, %v4320_v51  ;;  %v8173_v6 = vor.u32 %v8508_v44, %v8172_v12  ;;  %v4255_v42 = vld [vmem:[#allocation2 + $0x78] sm:$0xff] }
 0x4c4   : > { %4158 = vrot.lane.b32.xlu0 %v11570_v20, %s8616_s13  ;;  %v4131_v40 = vpop.permute.xlu1 %4130 }
 0x4c5   : > { %4029 = vst.msk [vmem:[#allocation2 + $0x138] sm:$0xff] %vm14463_vm5, %v3957_v2  ;;  %v11588_v26 = vsel %vm4352_vm11, %v4320_v51, %v4384_v46  ;;  %v4223_v16 = vadd.f32 %v4131_v40, %v11375_v5  ;;  %5264 = vmatpush.bf16.msra.mxu2 %v8173_v6  ;;  %v4702_v5 = vsel %vm8819_vm13, %v4670_v61, 0  ;;  %v11603_v6 = vpop.f32.mrf.mxu0  ;;  %v11611_v40 = vsel %vm4354_vm9, %v4322_v53, %v4386_v11  ;;  %vm14465_vm5 = vmmov %vm14433_vm0 }
 0x4c6   : > { %v4608_v60 = vrot.slane %v11588_v26, 1  ;;  %v4137_v31 = vpop.permute.xlu2 %4136  ;;  %vm14466_vm11 = vmmov %vm14433_vm0 }
 0x4c7   : > { %v4287_v50 = vadd.f32 %v4255_v42, %v4223_v16  ;;  %v4258_v42 = vld [vmem:[#allocation2 + $0xa8] sm:$0xff]  ;;  %vm14467_vm9 = vmmov %vm14464_vm7 }
 0x4c8   : > { %v4667_v12 = vsel %vm14464_vm7, %v4607_v47, %v4608_v60  ;;  %v4958_v47 = vunpack.c.l.b16 %v4702_v5 }
 0x4c9   : > { %v3692_v18 = vpop.f32.mrf.mxu2  ;;  %v4671_v44 = vpack.c.bf16 %v4667_v12, %v4667_v12  ;;  %v4321_v46 = vadd.f32 %v11515_v48, %v4287_v50 }
 0x4ca   : > { %v3870_v2 = vpop.f32.mrf.mxu3  ;;  %v11597_v17 = vadd.f32 %v11477_v23, %v3692_v18 }
 0x4cb   : > { %v3960_v51 = vadd.f32 %v11482_v49, %v3870_v2  ;;  %v4703_v23 = vsel %vm8836_vm14, %v4671_v44, 0  ;;  %v4226_v49 = vadd.f32 %v4137_v31, %v11397_v1  ;;  %vm4353_vm12 = vcmp.ge.f32.partialorder %v4321_v46, 0.0  ;;  %v11627_v31 = vpop.f32.mrf.mxu1 }
 0x4cc   : > { %4160 = vrot.lane.b32.xlu2 %v11597_v17, %s8616_s13  ;;  %v4959_v61 = vunpack.c.l.b16 %v4703_v23  ;;  %v4385_v16 = vmul.f32 0.1, %v4321_v46  ;;  %v4610_v2 = vrot.slane %v11611_v40, 1  ;;  %v4257_v23 = vld [vmem:[#allocation2 + $0x98] sm:$0xff] }
 0x4cd   : > { %4031 = vst.msk [vmem:[#allocation2 + $0x148] sm:$0xff] %vm14433_vm0, %v3960_v51  ;;  %v4290_v12 = vadd.f32 %v4258_v42, %v4226_v49  ;;  %v14468_v42 = vld [vmem:[#allocation12_spill] sm:$0xff] }
 0x4ce   : > { %v11613_v50 = vsel %vm4353_vm12, %v4321_v46, %v4385_v16  ;;  %v4990_v18 = vpack.c.b16 %v4959_v61, %v4958_v47  ;;  %vm14469_vm12 = vnez %v14468_v42 }
 0x4cf   : > { %v4609_v51 = vrot.slane %v11613_v50, 1 }
 0x4d0   : > { %8218 = vmatmul.msk.bf16.vlgmr.msra.gmra.mxu1 %vm14465_vm5, %v4990_v18  ;;  %8234 = vmatmul.msk.bf16.vlgmr.msrb.gmra.mxu0 %vm14466_vm11, %v4990_v18  ;;  %vm14470_vm11 = vmmov %vm14433_vm0 }
 0x4d1   : > { %v3694_v8 = vpop.f32.mrf.mxu2  ;;  %v4665_v11 = vsel %vm14464_vm7, %v4609_v51, %v4610_v2  ;;  %v4666_v53 = vsel %vm14467_vm9, %v4608_v60, %v4609_v51  ;;  %vm14471_vm9 = vmmov %vm14433_vm0 }
 0x4d2   : > { %v3872_v38 = vpop.f32.mrf.mxu3  ;;  %v11618_v44 = vadd.f32 %v11533_v14, %v3694_v8  ;;  %v4324_v8 = vadd.f32 %v11515_v48, %v4290_v12  ;;  %v4673_v14 = vpack.c.bf16 %v4665_v11, %v4665_v11 }
 0x4d3   : > { %v3962_v1 = vadd.f32 %v11548_v55, %v3872_v38  ;;  %v4672_v38 = vpack.c.bf16 %v4666_v53, %v4666_v53  ;;  %v3969_v55 = vpop.f32.mrf.mxu0 }
 0x4d4   : > { %4162 = vrot.lane.b32.xlu0 %v11618_v44, %s8616_s13  ;;  %v4135_v5 = vpop.permute.xlu0 %4134  ;;  %v4388_v49 = vmul.f32 0.1, %v4324_v8  ;;  %v4705_v18 = vsel %vm14469_vm12, %v4673_v14, 0  ;;  %vm4356_vm5 = vcmp.ge.f32.partialorder %v4324_v8, 0.0 }
 0x4d5   : > { %4033 = vst.msk [vmem:[#allocation2 + $0x158] sm:$0xff] %vm14433_vm0, %v3962_v1  ;;  %v4225_v46 = vadd.f32 %v4135_v5, %v11390_v9  ;;  %v4704_v16 = vsel %vm8819_vm13, %v4672_v38, 0  ;;  %v4961_v53 = vunpack.c.l.b16 %v4705_v18 }
 0x4d6   : > { %v4141_v1 = vpop.permute.xlu2 %4140  ;;  %v4960_v11 = vunpack.c.l.b16 %v4704_v16  ;;  %v11646_v38 = vsel %vm4356_vm5, %v4324_v8, %v4388_v49  ;;  %vm14472_vm5 = vcmp.lt.s32.totalorder %v14266_v29, 7 }
 0x4d7   : > { %v4289_v60 = vadd.f32 %v4257_v23, %v4225_v46  ;;  %v4228_v5 = vadd.f32 %v4141_v1, %v11409_v21  ;;  %v4612_v23 = vrot.slane %v11646_v38, 1 }
 0x4d9   : > { %v3697_v47 = vpop.f32.mrf.mxu2  ;;  %v4323_v9 = vadd.f32 %v11515_v48, %v4289_v60  ;;  %v4991_v60 = vpack.c.b16 %v4961_v53, %v4960_v11 }
 0x4da   : > { %v3875_v61 = vpop.f32.mrf.mxu3  ;;  %v11639_v12 = vadd.f32 %v11563_v27, %v3697_v47  ;;  %v3793_v27 = vpop.f32.mrf.mxu1 }
 0x4db   : > { %v3965_v51 = vadd.f32 %v11566_v4, %v3875_v61  ;;  %vm4355_vm7 = vcmp.ge.f32.partialorder %v4323_v9, 0.0  ;;  %v4387_v14 = vmul.f32 0.1, %v4323_v9  ;;  %v3971_v4 = vpop.f32.mrf.mxu0  ;;  %v4260_v61 = vld [vmem:[#allocation2 + $0xc8] sm:$0xff] }
 0x4dc   : > { %4164 = vrot.lane.b32.xlu2 %v11639_v12, %s8616_s13 }
 0x4dd   : > { %4035 = vst.msk [vmem:[#allocation2 + $0x168] sm:$0xff] %vm14470_vm11, %v3965_v51  ;;  %v11649_v46 = vsel %vm4355_vm7, %v4323_v9, %v4387_v14  ;;  %v4292_v51 = vadd.f32 %v4260_v61, %v4228_v5  ;;  %vm14473_vm11 = vmmov %vm14472_vm5  ;;  %v4259_v5 = vld [vmem:[#allocation2 + $0xb8] sm:$0xff] }
 0x4de   : > { %v4611_v47 = vrot.slane %v11649_v46, 1  ;;  %vm14474_vm7 = vmmov %vm14433_vm0 }
 0x4e0   : > { %8219 = vmatmul.msk.bf16.gmra.mxu1 %vm14471_vm9, %v4991_v60  ;;  %8235 = vmatmul.msk.bf16.gmra.mxu0 %vm14433_vm0, %v4991_v60  ;;  %v4663_v21 = vsel %vm14472_vm5, %v4611_v47, %v4612_v23  ;;  %v4664_v18 = vsel %vm14473_vm11, %v4610_v2, %v4611_v47  ;;  %vm14476_vm11 = vmmov %vm14433_vm0 }
 0x4e1   : > { %v3699_v42 = vpop.f32.mrf.mxu2  ;;  %v4674_v1 = vpack.c.bf16 %v4664_v18, %v4664_v18  ;;  %v4675_v9 = vpack.c.bf16 %v4663_v21, %v4663_v21 }
 0x4e2   : > { %v3877_v16 = vpop.f32.mrf.mxu3  ;;  %v11654_v8 = vadd.f32 %v11592_v62, %v3699_v42  ;;  %v8164_v62 = vld [vmem:[%s13728_s3 + $0x1d0] sm:$0xf]  ;;  %v4326_v42 = vadd.f32 %v11515_v48, %v4292_v51  ;;  %v3796_v14 = vpop.f32.mrf.mxu1 }
 0x4e3   : > { %v3967_v49 = vadd.f32 %v11603_v6, %v3877_v16  ;;  %v8506_v6 = vld [vmem:[%s13728_s3 + $0x1d4] sm:$0xf0]  ;;  %v4707_v45 = vsel %vm9041_vm6, %v4675_v9, 0  ;;  %v3974_v51 = vpop.f32.mrf.mxu0 }
 0x4e4   : > { %4166 = vrot.lane.b32.xlu0 %v11654_v8, %s8616_s13  ;;  %v8165_v11 = vor.u32 %v8506_v6, %v8164_v62  ;;  %v4390_v47 = vmul.f32 0.1, %v4326_v42  ;;  %vm4358_vm9 = vcmp.ge.f32.partialorder %v4326_v42, 0.0 }
 0x4e5   : > { %4037 = vst.msk [vmem:[#allocation2 + $0x178] sm:$0xff] %vm14474_vm7, %v3967_v49  ;;  %v4706_v49 = vsel %vm8819_vm13, %v4674_v1, 0  ;;  %vm14477_vm7 = vmmov %vm14433_vm0 }
 0x4e6   : > { %v4139_v53 = vpop.permute.xlu0 %4138  ;;  %5265 = vmatpush.bf16.msra.mxu2 %v8165_v11  ;;  %v4962_v6 = vunpack.c.l.b16 %v4706_v49  ;;  %v4963_v11 = vunpack.c.l.b16 %v4707_v45  ;;  %v11685_v1 = vsel %vm4358_vm9, %v4326_v42, %v4390_v47  ;;  %vm14478_vm9 = vcmp.lt.s32.totalorder %v14266_v29, 7 }
 0x4e7   : > { %v4227_v2 = vadd.f32 %v4139_v53, %v11402_v41  ;;  %v4145_v41 = vpop.permute.xlu2 %4144 }
 0x4e8   : > { %v4230_v53 = vadd.f32 %v4145_v41, %v11421_v15 }
 0x4e9   : > { %v3702_v61 = vpop.f32.mrf.mxu2  ;;  %v4291_v16 = vadd.f32 %v4259_v5, %v4227_v2  ;;  %v4262_v5 = vld [vmem:[#allocation2 + $0xe8] sm:$0xff] }
 0x4ea   : > { %v3880_v60 = vpop.f32.mrf.mxu3  ;;  %v11679_v21 = vadd.f32 %v11627_v31, %v3702_v61  ;;  %v4614_v31 = vrot.slane %v11685_v1, 1  ;;  %v4992_v61 = vpack.c.b16 %v4963_v11, %v4962_v6  ;;  %v3798_v35 = vpop.f32.mrf.mxu1  ;;  %v4261_v11 = vld [vmem:[#allocation2 + $0xd8] sm:$0xff] }
 0x4eb   : > { %v3970_v18 = vadd.f32 %v3969_v55, %v3880_v60  ;;  %v4325_v62 = vadd.f32 %v11515_v48, %v4291_v16  ;;  %v4294_v60 = vadd.f32 %v4262_v5, %v4230_v53  ;;  %v3976_v47 = vpop.f32.mrf.mxu0 }
 0x4ec   : > { %4168 = vrot.lane.b32.xlu2 %v11679_v21, %s8616_s13 }
 0x4ed   : > { %4039 = vst.msk [vmem:[#allocation2 + $0x188] sm:$0xff] %vm14433_vm0, %v3970_v18  ;;  %vm4357_vm5 = vcmp.ge.f32.partialorder %v4325_v62, 0.0  ;;  %v4389_v9 = vmul.f32 0.1, %v4325_v62  ;;  %vm14479_vm0 = vmmov %vm14478_vm9 }
 0x4ef   : > { %v11688_v2 = vsel %vm4357_vm5, %v4325_v62, %v4389_v9  ;;  %vm14480_vm5 = vmmov %vm14477_vm7 }
 0x4f0   : > { %v4613_v55 = vrot.slane %v11688_v2, 1  ;;  %8220 = vmatmul.msk.bf16.gmra.mxu1 %vm14476_vm11, %v4992_v61  ;;  %8236 = vmatmul.msk.bf16.gmra.mxu0 %vm14477_vm7, %v4992_v61  ;;  %vm14482_vm7 = vmmov %vm14480_vm5 }
 0x4f1   : > { %v3704_v16 = vpop.f32.mrf.mxu2 }
 0x4f2   : > { %v3882_v18 = vpop.f32.mrf.mxu3  ;;  %v11692_v49 = vadd.f32 %v3793_v27, %v3704_v16  ;;  %v4661_v15 = vsel %vm14478_vm9, %v4613_v55, %v4614_v31  ;;  %v4662_v42 = vsel %vm14479_vm0, %v4612_v23, %v4613_v55  ;;  %v4328_v27 = vadd.f32 %v11515_v48, %v4294_v60  ;;  %vm14483_vm0 = vmmov %vm14480_vm5 }
 0x4f3   : > { %v3972_v45 = vadd.f32 %v3971_v4, %v3882_v18  ;;  %v4676_v41 = vpack.c.bf16 %v4662_v42, %v4662_v42  ;;  %v4677_v4 = vpack.c.bf16 %v4661_v15, %v4661_v15  ;;  %v3801_v42 = vpop.f32.mrf.mxu1 }
 0x4f4   : > { %4170 = vrot.lane.b32.xlu0 %v11692_v49, %s8616_s13  ;;  %v4392_v9 = vmul.f32 0.1, %v4328_v27  ;;  %vm4360_vm11 = vcmp.ge.f32.partialorder %v4328_v27, 0.0 }
 0x4f5   : > { %4041 = vst.msk [vmem:[#allocation2 + $0x198] sm:$0xff] %vm14480_vm5, %v3972_v45  ;;  %v4708_v23 = vsel %vm8819_vm13, %v4676_v41, 0  ;;  %v4709_v16 = vsel %vm9140_vm3, %v4677_v4, 0  ;;  %vm14484_vm5 = vmmov %vm14483_vm0 }
 0x4f6   : > { %v4143_v62 = vpop.permute.xlu0 %4142  ;;  %v4149_v45 = vpop.permute.xlu2 %4148 }
 0x4f7   : > { %v4229_v6 = vadd.f32 %v4143_v62, %v11414_v63  ;;  %v4964_v63 = vunpack.c.l.b16 %v4708_v23  ;;  %v4965_v62 = vunpack.c.l.b16 %v4709_v16  ;;  %v4232_v4 = vadd.f32 %v4149_v45, %v11433_v7 }
 0x4f9   : > { %v3707_v53 = vpop.f32.mrf.mxu2  ;;  %v4293_v61 = vadd.f32 %v4261_v11, %v4229_v6  ;;  %v11715_v6 = vsel %vm4360_vm11, %v4328_v27, %v4392_v9  ;;  %vm14485_vm11 = vcmp.lt.s32.totalorder %v14266_v29, 7 }
 0x4fa   : > { %v3885_v5 = vpop.f32.mrf.mxu3  ;;  %v11709_v18 = vadd.f32 %v3796_v14, %v3707_v53  ;;  %v3979_v14 = vpop.f32.mrf.mxu0 }
 0x4fb   : > { %v3975_v60 = vadd.f32 %v3974_v51, %v3885_v5  ;;  %v4327_v15 = vadd.f32 %v11515_v48, %v4293_v61  ;;  %v4616_v51 = vrot.slane %v11715_v6, 1  ;;  %v4264_v5 = vld [vmem:[#allocation2 + $0x108] sm:$0xff]  ;;  %v4993_v61 = vpack.c.b16 %v4965_v62, %v4964_v63 }
 0x4fc   : > { %4172 = vrot.lane.b32.xlu2 %v11709_v18, %s8616_s13 }
 0x4fd   : > { %4043 = vst.msk [vmem:[#allocation2 + $0x1a8] sm:$0xff] %vm14482_vm7, %v3975_v60  ;;  %vm4359_vm9 = vcmp.ge.f32.partialorder %v4327_v15, 0.0  ;;  %v4391_v41 = vmul.f32 0.1, %v4327_v15  ;;  %v4296_v60 = vadd.f32 %v4264_v5, %v4232_v4  ;;  %vm14486_vm7 = vmmov %vm14485_vm11 }
 0x4ff   : > { %v11718_v11 = vsel %vm4359_vm9, %v4327_v15, %v4391_v41  ;;  %vm14487_vm9 = vmmov %vm14483_vm0  ;;  %v3803_v15 = vpop.f32.mrf.mxu1  ;;  %v4263_v41 = vld [vmem:[#allocation2 + $0xf8] sm:$0xff] }
 0x500   : > { %v4615_v53 = vrot.slane %v11718_v11, 1  ;;  %8221 = vmatmul.msk.bf16.gmra.mxu1 %vm14483_vm0, %v4993_v61  ;;  %8237 = vmatmul.msk.bf16.gmra.mxu0 %vm14484_vm5, %v4993_v61 }
 0x501   : > { %v3709_v55 = vpop.f32.mrf.mxu2 }
 0x502   : > { %v3887_v58 = vpop.f32.mrf.mxu3  ;;  %v11722_v23 = vadd.f32 %v3798_v35, %v3709_v55  ;;  %v4659_v7 = vsel %vm14485_vm11, %v4615_v53, %v4616_v51  ;;  %v4660_v9 = vsel %vm14486_vm7, %v4614_v31, %v4615_v53  ;;  %v8156_v35 = vld [vmem:[%s13728_s3 + $0x1c0] sm:$0xf]  ;;  %v3981_v62 = vpop.f32.mrf.mxu0  ;;  %vm14488_vm7 = vmmov %vm14484_vm5 }
 0x503   : > { %v3977_v27 = vadd.f32 %v3976_v47, %v3887_v58  ;;  %v8504_v58 = vld [vmem:[%s13728_s3 + $0x1c4] sm:$0xf0]  ;;  %v4330_v47 = vadd.f32 %v11515_v48, %v4296_v60  ;;  %v4678_v55 = vpack.c.bf16 %v4660_v9, %v4660_v9  ;;  %v4679_v16 = vpack.c.bf16 %v4659_v7, %v4659_v7 }
 0x504   : > { %4174 = vrot.lane.b32.xlu0 %v11722_v23, %s8616_s13  ;;  %v8157_v45 = vor.u32 %v8504_v58, %v8156_v35 }
 0x505   : > { %4045 = vst.msk [vmem:[#allocation2 + $0x1b8] sm:$0xff] %vm14487_vm9, %v3977_v27  ;;  %v4394_v4 = vmul.f32 0.1, %v4330_v47  ;;  %v4710_v27 = vsel %vm8819_vm13, %v4678_v55, 0  ;;  %v4711_v60 = vsel %vm9311_vm2, %v4679_v16, 0  ;;  %vm4362_vm0 = vcmp.ge.f32.partialorder %v4330_v47, 0.0  ;;  %vm14489_vm9 = vmmov %vm14484_vm5 }
 0x506   : > { %v4147_v31 = vpop.permute.xlu0 %4146  ;;  %5266 = vmatpush.bf16.msra.mxu2 %v8157_v45  ;;  %v4153_v35 = vpop.permute.xlu2 %4152  ;;  %v4966_v58 = vunpack.c.l.b16 %v4710_v27  ;;  %v4967_v45 = vunpack.c.l.b16 %v4711_v60 }
 0x507   : > { %v4231_v63 = vadd.f32 %v4147_v31, %v11426_v19  ;;  %v11751_v31 = vsel %vm4362_vm0, %v4330_v47, %v4394_v4  ;;  %v4234_v16 = vadd.f32 %v4153_v35, %v11453_v56  ;;  %vm14490_vm0 = vcmp.lt.s32.totalorder %v14266_v29, 7 }
 0x509   : > { %v3712_v53 = vpop.f32.mrf.mxu2  ;;  %v4295_v61 = vadd.f32 %v4263_v41, %v4231_v63 }
 0x50a   : > { %v3890_v5 = vpop.f32.mrf.mxu3  ;;  %v11745_v7 = vadd.f32 %v3801_v42, %v3712_v53  ;;  %v3806_v42 = vpop.f32.mrf.mxu1  ;;  %v4266_v53 = vld [vmem:[#allocation2 + $0x128] sm:$0xff] }
 0x50b   : > { %v3980_v9 = vadd.f32 %v3979_v14, %v3890_v5  ;;  %v4329_v19 = vadd.f32 %v11515_v48, %v4295_v61  ;;  %v4618_v14 = vrot.slane %v11751_v31, 1  ;;  %v4994_v5 = vpack.c.b16 %v4967_v45, %v4966_v58  ;;  %v3984_v27 = vpop.f32.mrf.mxu0  ;;  %v4265_v58 = vld [vmem:[#allocation2 + $0x118] sm:$0xff] }
 0x50c   : > { %4176 = vrot.lane.b32.xlu2 %v11745_v7, %s8616_s13  ;;  %v4298_v61 = vadd.f32 %v4266_v53, %v4234_v16 }
 0x50d   : > { %4047 = vst.msk [vmem:[#allocation2 + $0x1c8] sm:$0xff] %vm14484_vm5, %v3980_v9  ;;  %vm4361_vm11 = vcmp.ge.f32.partialorder %v4329_v19, 0.0  ;;  %v4393_v55 = vmul.f32 0.1, %v4329_v19  ;;  %vm14491_vm5 = vmmov %vm14490_vm0 }
 0x50e   : > { %v4332_v35 = vadd.f32 %v11515_v48, %v4298_v61 }
 0x50f   : > { %v11754_v63 = vsel %vm4361_vm11, %v4329_v19, %v4393_v55  ;;  %vm14492_vm11 = vmmov %vm14488_vm7 }
 0x510   : > { %v4617_v41 = vrot.slane %v11754_v63, 1  ;;  %8222 = vmatmul.msk.bf16.gmra.mxu1 %vm14488_vm7, %v4994_v5  ;;  %8238 = vmatmul.msk.bf16.gmra.mxu0 %vm14489_vm9, %v4994_v5  ;;  %v4396_v45 = vmul.f32 0.1, %v4332_v35  ;;  %vm4364_vm7 = vcmp.ge.f32.partialorder %v4332_v35, 0.0 }
 0x511   : > { %v3714_v9 = vpop.f32.mrf.mxu2 }
 0x512   : > { %v3892_v13 = vpop.f32.mrf.mxu3  ;;  %v11758_v60 = vadd.f32 %v3803_v15, %v3714_v9  ;;  %v4657_v56 = vsel %vm14490_vm0, %v4617_v41, %v4618_v14  ;;  %v4658_v4 = vsel %vm14491_vm5, %v4616_v51, %v4617_v41  ;;  %vm14493_vm5 = vmmov %vm14489_vm9 }
 0x513   : > { %v3982_v47 = vadd.f32 %v3981_v62, %v3892_v13  ;;  %v4680_v15 = vpack.c.bf16 %v4658_v4, %v4658_v4  ;;  %v4681_v19 = vpack.c.bf16 %v4657_v56, %v4657_v56 }
 0x514   : > { %4178 = vrot.lane.b32.xlu0 %v11758_v60, %s8616_s13 }
 0x515   : > { %4049 = vst.msk [vmem:[#allocation2 + $0x1d8] sm:$0xff] %vm14492_vm11, %v3982_v47  ;;  %v4712_v51 = vsel %vm8819_vm13, %v4680_v15, 0  ;;  %v4713_v41 = vsel %vm9454_vm1, %v4681_v19, 0  ;;  %v3808_v47 = vpop.f32.mrf.mxu1  ;;  %v11781_v15 = vsel %vm4364_vm7, %v4332_v35, %v4396_v45  ;;  %v8148_v35 = vld [vmem:[%s13728_s3 + $0x1b0] sm:$0xf]  ;;  %vm14494_vm11 = vmmov %vm14493_vm5  ;;  %vm14495_vm7 = vcmp.lt.s32.totalorder %v14266_v29, 7 }
 0x516   : > { %v4151_v13 = vpop.permute.xlu0 %4150  ;;  %v4157_v9 = vpop.permute.xlu2 %4156  ;;  %v4968_v4 = vunpack.c.l.b16 %v4712_v51  ;;  %v8502_v45 = vld [vmem:[%s13728_s3 + $0x1b4] sm:$0xf0] }
 0x517   : > { %v4233_v62 = vadd.f32 %v4151_v13, %v11442_v43  ;;  %v3986_v43 = vpop.f32.mrf.mxu0  ;;  %v4969_v13 = vunpack.c.l.b16 %v4713_v41 }
 0x519   : > { %v3717_v55 = vpop.f32.mrf.mxu2  ;;  %v4297_v53 = vadd.f32 %v4265_v58, %v4233_v62 }
 0x51a   : > { %v3895_v16 = vpop.f32.mrf.mxu3  ;;  %v11775_v5 = vadd.f32 %v3806_v42, %v3717_v55  ;;  %v4236_v42 = vadd.f32 %v4157_v9, %v11475_v30  ;;  %v4268_v55 = vld [vmem:[#allocation2 + $0x148] sm:$0xff] }
 0x51b   : > { %v3985_v61 = vadd.f32 %v3984_v27, %v3895_v16  ;;  %v4331_v56 = vadd.f32 %v11515_v48, %v4297_v53  ;;  %v4620_v27 = vrot.slane %v11781_v15, 1  ;;  %v4995_v16 = vpack.c.b16 %v4969_v13, %v4968_v4 }
 0x51c   : > { %4180 = vrot.lane.b32.xlu2 %v11775_v5, %s8616_s13  ;;  %v4300_v53 = vadd.f32 %v4268_v55, %v4236_v42  ;;  %v4267_v55 = vld [vmem:[#allocation2 + $0x138] sm:$0xff] }
 0x51d   : > { %4051 = vst.msk [vmem:[#allocation2 + $0x1e8] sm:$0xff] %vm14489_vm9, %v3985_v61  ;;  %vm4363_vm0 = vcmp.ge.f32.partialorder %v4331_v56, 0.0  ;;  %v4395_v19 = vmul.f32 0.1, %v4331_v56  ;;  %vm14496_vm9 = vmmov %vm14495_vm7 }
 0x51f   : > { %v11784_v62 = vsel %vm4363_vm0, %v4331_v56, %v4395_v19  ;;  %v8149_v56 = vor.u32 %v8502_v45, %v8148_v35  ;;  %vm14497_vm0 = vmmov %vm14493_vm5  ;;  %v3989_v13 = vpop.f32.mrf.mxu0 }
 0x520   : > { %v4619_v58 = vrot.slane %v11784_v62, 1  ;;  %8223 = vmatmul.msk.bf16.gmra.mxu1 %vm14493_vm5, %v4995_v16  ;;  %8239 = vmatmul.msk.bf16.gmra.mxu0 %vm14494_vm11, %v4995_v16  ;;  %vm14498_vm11 = vmmov %vm14497_vm0 }
 0x521   : > { %v3719_v61 = vpop.f32.mrf.mxu2  ;;  %5267 = vmatpush.bf16.msra.mxu2 %v8149_v56 }
 0x522   : > { %v3897_v0 = vpop.f32.mrf.mxu3  ;;  %v11794_v30 = vadd.f32 %v3808_v47, %v3719_v61  ;;  %v4655_v41 = vsel %vm14495_vm7, %v4619_v58, %v4620_v27  ;;  %v4656_v9 = vsel %vm14496_vm9, %v4618_v14, %v4619_v58  ;;  %v3811_v47 = vpop.f32.mrf.mxu1  ;;  %vm14499_vm9 = vmmov %vm14497_vm0 }
 0x523   : > { %v3987_v51 = vadd.f32 %v3986_v43, %v3897_v0  ;;  %v4334_v0 = vadd.f32 %v11515_v48, %v4300_v53  ;;  %v4682_v43 = vpack.c.bf16 %v4656_v9, %v4656_v9  ;;  %v4683_v4 = vpack.c.bf16 %v4655_v41, %v4655_v41 }
 0x524   : > { %4182 = vrot.lane.b32.xlu0 %v11794_v30, %s8616_s13 }
 0x525   : > { %4053 = vst.msk [vmem:[#allocation2 + $0x1f8] sm:$0xff] %vm14497_vm0, %v3987_v51  ;;  %v4398_v16 = vmul.f32 0.1, %v4334_v0  ;;  %v4714_v35 = vsel %vm8819_vm13, %v4682_v43, 0  ;;  %v4715_v45 = vsel %vm14311_vm8, %v4683_v4, 0  ;;  %vm4366_vm5 = vcmp.ge.f32.partialorder %v4334_v0, 0.0 }
 0x526   : > { %v4155_v19 = vpop.permute.xlu0 %4154  ;;  %v4161_v41 = vpop.permute.xlu2 %4160  ;;  %v4971_v56 = vunpack.c.l.b16 %v4715_v45 }
 0x527   : > { %v4235_v42 = vadd.f32 %v4155_v19, %v11460_v32  ;;  %v4970_v32 = vunpack.c.l.b16 %v4714_v35  ;;  %v11816_v19 = vsel %vm4366_vm5, %v4334_v0, %v4398_v16  ;;  %v4238_v43 = vadd.f32 %v4161_v41, %v11551_v3 }
 0x528   : > { %v4446_v0 = vpack.c.bf16 %v11557_v39, %v11557_v39  ;;  %vm14500_vm5 = vcmp.lt.s32.totalorder %v14266_v29, 7 }
 0x529   : > { %v3722_v61 = vpop.f32.mrf.mxu2  ;;  %v4299_v58 = vadd.f32 %v4267_v55, %v4235_v42 }
 0x52a   : > { %v3900_v14 = vpop.f32.mrf.mxu3  ;;  %v3812_v53 = vadd.f32 %v3811_v47, %v3722_v61  ;;  %v3813_v4 = vpop.f32.mrf.mxu1 }
 0x52b   : > { %v3990_v51 = vadd.f32 %v3989_v13, %v3900_v14  ;;  %v4333_v9 = vadd.f32 %v11515_v48, %v4299_v58  ;;  %v3991_v47 = vpop.f32.mrf.mxu0  ;;  %v4622_v13 = vrot.slane %v11816_v19, 1  ;;  %v4270_v14 = vld [vmem:[#allocation2 + $0x168] sm:$0xff]  ;;  %v4996_v58 = vpack.c.b16 %v4971_v56, %v4970_v32 }
 0x52c   : > { %4184 = vrot.lane.b32.xlu2 %v3812_v53, %s8616_s13 }
 0x52d   : > { %4055 = vst.msk [vmem:[#allocation2 + $0x208] sm:$0xff] %vm14498_vm11, %v3990_v51  ;;  %vm4365_vm7 = vcmp.ge.f32.partialorder %v4333_v9, 0.0  ;;  %v4397_v42 = vmul.f32 0.1, %v4333_v9  ;;  %v4302_v51 = vadd.f32 %v4270_v14, %v4238_v43  ;;  %vm14501_vm11 = vmmov %vm14500_vm5  ;;  %v4269_v14 = vld [vmem:[#allocation2 + $0x158] sm:$0xff] }
 0x52f   : > { %v11819_v55 = vsel %vm4365_vm7, %v4333_v9, %v4397_v42  ;;  %vm14502_vm7 = vmmov %vm14497_vm0  ;;  %v4447_v9 = vpack.c.bf16 %v11560_v10, %v11560_v10  ;;  %v4336_v32 = vadd.f32 %v11515_v48, %v4302_v51 }
 0x530   : > { %v4621_v61 = vrot.slane %v11819_v55, 1  ;;  %8224 = vmatmul.msk.bf16.gmra.mxu1 %vm14499_vm9, %v4996_v58  ;;  %8240 = vmatmul.msk.bf16.gmra.mxu0 %vm14497_vm0, %v4996_v58  ;;  %vm14503_vm9 = vnez %v14356_v34 }
 0x531   : > { %v3724_v53 = vpop.f32.mrf.mxu2  ;;  %v4847_v58 = vunpack.c.l.b16 %v4447_v9  ;;  %vm4368_vm0 = vcmp.ge.f32.partialorder %v4336_v32, 0.0 }
 0x532   : > { %v3902_v35 = vpop.f32.mrf.mxu3  ;;  %v3814_v16 = vadd.f32 %v3813_v4, %v3724_v53  ;;  %v4653_v3 = vsel %vm14500_vm5, %v4621_v61, %v4622_v13  ;;  %v4654_v41 = vsel %vm14501_vm11, %v4620_v27, %v4621_v61  ;;  %v4846_v4 = vunpack.c.l.b16 %v4446_v0  ;;  %vm14504_vm11 = vmmov %vm14502_vm7 }
 0x533   : > { %v3992_v45 = vadd.f32 %v3991_v47, %v3902_v35  ;;  %v4684_v56 = vpack.c.bf16 %v4654_v41, %v4654_v41  ;;  %v4685_v42 = vpack.c.bf16 %v4653_v3, %v4653_v3  ;;  %v4449_v27 = vpack.c.bf16 %v11613_v50, %v11613_v50 }
 0x534   : > { %4186 = vrot.lane.b32.xlu1 %v3814_v16, %s8616_s13  ;;  %v4400_v61 = vmul.f32 0.1, %v4336_v32 }
 0x535   : > { %4057 = vst.msk [vmem:[#allocation2 + $0x218] sm:$0xff] %vm14502_vm7, %v3992_v45  ;;  %v4716_v35 = vsel %vm8819_vm13, %v4684_v56, 0  ;;  %v4717_v16 = vsel %vm14503_vm9, %v4685_v42, 0  ;;  %v4878_v45 = vpack.c.b16 %v4847_v58, %v4846_v4  ;;  %v4849_v9 = vunpack.c.l.b16 %v4449_v27 }
 0x536   : > { %v4159_v43 = vpop.permute.xlu0 %4158  ;;  %v4165_v51 = vpop.permute.xlu2 %4164  ;;  %v4972_v3 = vunpack.c.l.b16 %v4716_v35  ;;  %v4973_v41 = vunpack.c.l.b16 %v4717_v16  ;;  %v4451_v27 = vpack.c.bf16 %v11649_v46, %v11649_v46 }
 0x537   : > { %v4237_v47 = vadd.f32 %v4159_v43, %v11506_v36  ;;  %v4448_v36 = vpack.c.bf16 %v11588_v26, %v11588_v26  ;;  %v11849_v43 = vsel %vm4368_vm0, %v4336_v32, %v4400_v61  ;;  %v8140_v32 = vld [vmem:[%s13728_s3 + $0x1a0] sm:$0xf]  ;;  %vm14505_vm0 = vcmp.lt.s32.totalorder %v14266_v29, 7 }
 0x538   : > { %v4624_v4 = vrot.slane %v11849_v43, 1  ;;  %v4997_v34 = vpack.c.b16 %v4973_v41, %v4972_v3 }
 0x539   : > { %v4301_v53 = vadd.f32 %v4269_v14, %v4237_v47  ;;  %v4240_v47 = vadd.f32 %v4165_v51, %v11597_v17  ;;  %v4848_v14 = vunpack.c.l.b16 %v4448_v36  ;;  %v8500_v17 = vld [vmem:[%s13728_s3 + $0x1a4] sm:$0xf0]  ;;  %v4450_v51 = vpack.c.bf16 %v11611_v40, %v11611_v40 }
 0x53a   : > { %v8141_v16 = vor.u32 %v8500_v17, %v8140_v32 }
 0x53b   : > { %v4335_v0 = vadd.f32 %v11515_v48, %v4301_v53  ;;  %v4272_v53 = vld [vmem:[#allocation2 + $0x188] sm:$0xff] }
 0x53c   : > { %4894 = vrot.lane.b32.xlu1 %v4878_v45, %s8616_s13  ;;  %v4304_v37 = vadd.f32 %v4272_v53, %v4240_v47  ;;  %v4879_v45 = vpack.c.b16 %v4849_v9, %v4848_v14  ;;  %5268 = vmatpush.bf16.msra.mxu2 %v8141_v16  ;;  %v4851_v9 = vunpack.c.l.b16 %v4451_v27  ;;  %v4850_v47 = vunpack.c.l.b16 %v4450_v51 }
 0x53d   : > { %vm4367_vm5 = vcmp.ge.f32.partialorder %v4335_v0, 0.0  ;;  %v4399_v56 = vmul.f32 0.1, %v4335_v0 }
 0x53e   : > { %v4880_v32 = vpack.c.b16 %v4851_v9, %v4850_v47 }
 0x53f   : > { %v11852_v42 = vsel %vm4367_vm5, %v4335_v0, %v4399_v56  ;;  %vm14506_vm5 = vmmov %vm14505_vm0  ;;  %v4338_v0 = vadd.f32 %v11515_v48, %v4304_v37  ;;  %v4271_v56 = vld [vmem:[#allocation2 + $0x178] sm:$0xff] }
 0x540   : > { %v4623_v58 = vrot.slane %v11852_v42, 1  ;;  %8225 = vmatmul.msk.bf16.gmra.mxu1 %vm14504_vm11, %v4997_v34  ;;  %8241 = vmatmul.msk.bf16.gmra.mxu0 %vm14502_vm7, %v4997_v34 }
 0x541   : > { %v4402_v14 = vmul.f32 0.1, %v4338_v0  ;;  %vm4370_vm11 = vcmp.ge.f32.partialorder %v4338_v0, 0.0 }
 0x542   : > { %v4651_v61 = vsel %vm14505_vm0, %v4623_v58, %v4624_v4  ;;  %v4652_v35 = vsel %vm14506_vm5, %v4622_v13, %v4623_v58  ;;  %v4453_v13 = vpack.c.bf16 %v11688_v2, %v11688_v2  ;;  %vm14507_vm0 = vcmask 523264  }
 0x543   : > { %v4686_v36 = vpack.c.bf16 %v4652_v35, %v4652_v35  ;;  %v4687_v3 = vpack.c.bf16 %v4651_v61, %v4651_v61  ;;  %v11885_v16 = vsel %vm4370_vm11, %v4338_v0, %v4402_v14  ;;  %vm14508_vm5 = vmmov %vm14507_vm0  ;;  %v4455_v0 = vpack.c.bf16 %v11718_v11, %v11718_v11 }
 0x544   : > { %4896 = vrot.lane.b32.xlu1 %v4879_v45, %s8616_s13  ;;  %v4853_v35 = vunpack.c.l.b16 %v4453_v13  ;;  %v4626_v9 = vrot.slane %v11885_v16, 1  ;;  %vm14509_vm11 = vcmp.lt.s32.totalorder %v14266_v29, 7  ;;  %v4454_v14 = vpack.c.bf16 %v11685_v1, %v11685_v1 }
 0x545   : > { %v4718_v53 = vsel %vm8819_vm13, %v4686_v36, 0  ;;  %v4719_v45 = vsel %vm14369_vm15, %v4687_v3, 0 }
 0x546   : > { %v4163_v41 = vpop.permute.xlu0 %4162  ;;  %v4169_v37 = vpop.permute.xlu2 %4168  ;;  %v4974_v17 = vunpack.c.l.b16 %v4718_v53  ;;  %v4975_v61 = vunpack.c.l.b16 %v4719_v45 }
 0x547   : > { %v4239_v34 = vadd.f32 %v4163_v41, %v11570_v20  ;;  %v4452_v20 = vpack.c.bf16 %v11646_v38, %v11646_v38  ;;  %v4242_v36 = vadd.f32 %v4169_v37, %v11639_v12 }
 0x548   : > { %v4998_v47 = vpack.c.b16 %v4975_v61, %v4974_v17  ;;  %v4273_v61 = vld [vmem:[#allocation2 + $0x198] sm:$0xff] }
 0x549   : > { %v4303_v58 = vadd.f32 %v4271_v56, %v4239_v34  ;;  %v4852_v41 = vunpack.c.l.b16 %v4452_v20  ;;  %v4274_v56 = vld [vmem:[#allocation2 + $0x1a8] sm:$0xff]  ;;  %v4855_v20 = vunpack.c.l.b16 %v4455_v0 }
 0x54b   : > { %v4337_v27 = vadd.f32 %v11515_v48, %v4303_v58  ;;  %v4306_v58 = vadd.f32 %v4274_v56, %v4242_v36 }
 0x54c   : > { %4898 = vrot.lane.b32.xlu1 %v4880_v32, %s8616_s13  ;;  %v4881_v32 = vpack.c.b16 %v4853_v35, %v4852_v41  ;;  %v4854_v35 = vunpack.c.l.b16 %v4454_v14 }
 0x54d   : > { %vm4369_vm7 = vcmp.ge.f32.partialorder %v4337_v27, 0.0  ;;  %v4401_v51 = vmul.f32 0.1, %v4337_v27  ;;  %v4340_v53 = vadd.f32 %v11515_v48, %v4306_v58 }
 0x54f   : > { %v11888_v3 = vsel %vm4369_vm7, %v4337_v27, %v4401_v51  ;;  %vm14510_vm7 = vmmov %vm14509_vm11  ;;  %v4457_v51 = vpack.c.bf16 %v11754_v63, %v11754_v63  ;;  %v4404_v36 = vmul.f32 0.1, %v4340_v53 }
 0x550   : > { %v4625_v34 = vrot.slane %v11888_v3, 1  ;;  %8226 = vmatmul.msk.bf16.gmra.mxu1 %vm14507_vm0, %v4998_v47  ;;  %8242 = vmatmul.msk.bf16.gmra.mxu0 %vm14508_vm5, %v4998_v47  ;;  %vm4372_vm0 = vcmp.ge.f32.partialorder %v4340_v53, 0.0  ;;  %v4882_v47 = vpack.c.b16 %v4855_v20, %v4854_v35  ;;  %v8132_v35 = vld [vmem:[%s13728_s3 + $0x190] sm:$0xf] }
 0x552   : > { %v4649_v12 = vsel %vm14509_vm11, %v4625_v34, %v4626_v9  ;;  %v4650_v13 = vsel %vm14510_vm7, %v4624_v4, %v4625_v34  ;;  %vm14511_vm11 = vcmask 523264  }
 0x553   : > { %v4688_v45 = vpack.c.bf16 %v4650_v13, %v4650_v13  ;;  %v4689_v37 = vpack.c.bf16 %v4649_v12, %v4649_v12  ;;  %v4857_v12 = vunpack.c.l.b16 %v4457_v51  ;;  %v11915_v13 = vsel %vm4372_vm0, %v4340_v53, %v4404_v36  ;;  %vm14512_vm7 = vmmov %vm14511_vm11 }
 0x554   : > { %4900 = vrot.lane.b32.xlu1 %v4881_v32, %s8616_s13  ;;  %v4628_v20 = vrot.slane %v11915_v13, 1  ;;  %v4459_v36 = vpack.c.bf16 %v11784_v62, %v11784_v62  ;;  %vm14513_vm0 = vcmp.lt.s32.totalorder %v14266_v29, 7 }
 0x555   : > { %v4720_v41 = vsel %vm8819_vm13, %v4688_v45, 0  ;;  %v4721_v34 = vsel %vm14386_vm4, %v4689_v37, 0 }
 0x556   : > { %v4167_v27 = vpop.permute.xlu0 %4166  ;;  %v4173_v56 = vpop.permute.xlu2 %4172  ;;  %v4976_v32 = vunpack.c.l.b16 %v4720_v41  ;;  %v4977_v0 = vunpack.c.l.b16 %v4721_v34 }
 0x557   : > { %v4241_v17 = vadd.f32 %v4167_v27, %v11618_v44  ;;  %v4456_v44 = vpack.c.bf16 %v11715_v6, %v11715_v6  ;;  %v4244_v45 = vadd.f32 %v4173_v56, %v11679_v21  ;;  %v8498_v21 = vld [vmem:[%s13728_s3 + $0x194] sm:$0xf0]  ;;  %v13905_v56 = vrot.slane %v11754_v63, 7 }
 0x558   : > { %v8133_v34 = vor.u32 %v8498_v21, %v8132_v35 }
 0x559   : > { %v4305_v4 = vadd.f32 %v4273_v61, %v4241_v17  ;;  %v4856_v27 = vunpack.c.l.b16 %v4456_v44  ;;  %v4276_v17 = vld [vmem:[#allocation2 + $0x1c8] sm:$0xff]  ;;  %v4999_v61 = vpack.c.b16 %v4977_v0, %v4976_v32  ;;  %v11946_v44 = vld [vmem:[%s13729_s4 + $0x1] ss:$0 sm:$0xff] }
 0x55a   : > { %v4308_v51 = vadd.f32 %v4276_v17, %v4244_v45  ;;  %5269 = vmatpush.bf16.msra.mxu2 %v8133_v34  ;;  %v4461_v17 = vpack.c.bf16 %v11819_v55, %v11819_v55  ;;  %v4460_v34 = vpack.c.bf16 %v11781_v15, %v11781_v15 }
 0x55b   : > { %v4339_v58 = vadd.f32 %v11515_v48, %v4305_v4  ;;  %v4883_v53 = vpack.c.b16 %v4857_v12, %v4856_v27 }
 0x55c   : > { %4902 = vrot.lane.b32.xlu1 %v4882_v47, %s8616_s13  ;;  %v4458_v47 = vpack.c.bf16 %v11751_v31, %v11751_v31  ;;  %v4342_v32 = vadd.f32 %v11946_v44, %v4308_v51 }
 0x55d   : > { %vm4371_vm5 = vcmp.ge.f32.partialorder %v4339_v58, 0.0  ;;  %v4403_v14 = vmul.f32 0.1, %v4339_v58 }
 0x55f   : > { %v11918_v37 = vsel %vm4371_vm5, %v4339_v58, %v4403_v14  ;;  %vm14514_vm5 = vmmov %vm14513_vm0  ;;  %v4490_v58 = vrot.slane %v11751_v31, 7  ;;  %v4859_v14 = vunpack.c.l.b16 %v4459_v36  ;;  %v4858_v31 = vunpack.c.l.b16 %v4458_v47 }
 0x560   : > { %v4627_v48 = vrot.slane %v11918_v37, 1  ;;  %8227 = vmatmul.msk.bf16.gmra.mxu1 %vm14511_vm11, %v4999_v61  ;;  %8243 = vmatmul.msk.bf16.gmra.mxu0 %vm14512_vm7, %v4999_v61  ;;  %vm14515_vm11 = vcmp.lt.s32.totalorder %v14266_v29, 1  ;;  %v4406_v61 = vmul.f32 0.1, %v4342_v32  ;;  %vm14516_vm7 = vnez %v14379_v52 }
 0x561   : > { %v4529_v27 = vsel %vm14515_vm11, %v13905_v56, %v4490_v58  ;;  %v4884_v36 = vpack.c.b16 %v4859_v14, %v4858_v31  ;;  %v4860_v31 = vunpack.c.l.b16 %v4460_v34 }
 0x562   : > { %v4647_v4 = vsel %vm14513_vm0, %v4627_v48, %v4628_v20  ;;  %v4648_v41 = vsel %vm14514_vm5, %v4626_v9, %v4627_v48  ;;  %v4275_v48 = vld [vmem:[#allocation2 + $0x1b8] sm:$0xff]  ;;  %vm4374_vm0 = vcmp.ge.f32.partialorder %v4342_v32, 0.0  ;;  %v4554_v21 = vpack.c.bf16 %v4529_v27, %v4529_v27 }
 0x563   : > { %v4690_v0 = vpack.c.bf16 %v4648_v41, %v4648_v41  ;;  %v4691_v9 = vpack.c.bf16 %v4647_v4, %v4647_v4 }
 0x564   : > { %4904 = vrot.lane.b32.xlu1 %v4883_v53, %s8616_s13 }
 0x565   : > { %v4722_v51 = vsel %vm8819_vm13, %v4690_v0, 0  ;;  %v4723_v53 = vsel %vm14516_vm7, %v4691_v9, 0  ;;  %v4861_v9 = vunpack.c.l.b16 %v4461_v17  ;;  %vm14517_vm7 = vnez %v14359_v28 }
 0x566   : > { %v4171_v12 = vpop.permute.xlu0 %4170  ;;  %v4177_v41 = vpop.permute.xlu2 %4176  ;;  %v4978_v47 = vunpack.c.l.b16 %v4722_v51  ;;  %v4586_v27 = vsel %vm14517_vm7, %v4554_v21, 0 }
 0x567   : > { %v4243_v45 = vadd.f32 %v4171_v12, %v11654_v8  ;;  %v4491_v8 = vrot.slane %v11784_v62, 7  ;;  %v4979_v12 = vunpack.c.l.b16 %v4723_v53  ;;  %v4246_v62 = vadd.f32 %v4177_v41, %v11709_v18  ;;  %v4278_v53 = vld [vmem:[#allocation2 + $0x1e8] sm:$0xff] }
 0x568   : > { %v4463_v18 = vpack.c.bf16 %v11852_v42, %v11852_v42  ;;  %v4778_v17 = vunpack.c.l.b16 %v4586_v27 }
 0x569   : > { %v4307_v35 = vadd.f32 %v4275_v48, %v4243_v45  ;;  %v11965_v45 = vsel %vm4374_vm0, %v4342_v32, %v4406_v61  ;;  %v4528_v14 = vsel %vm14515_vm11, %v4490_v58, %v4491_v8  ;;  %v5000_v61 = vpack.c.b16 %v4979_v12, %v4978_v47 }
 0x56a   : > { %v13906_v51 = vrot.slane %v11965_v45, 1  ;;  %v4310_v41 = vadd.f32 %v4278_v53, %v4246_v62  ;;  %vm14518_vm0 = vcmask 523264   ;;  %vm14520_vm11 = vcmp.lt.s32.totalorder %v14266_v29, 7 }
 0x56b   : > { %v4341_v4 = vadd.f32 %v11946_v44, %v4307_v35  ;;  %v4555_v35 = vpack.c.bf16 %v4528_v14, %v4528_v14  ;;  %vm14521_vm7 = vmmov %vm14520_vm11  ;;  %v4462_v47 = vpack.c.bf16 %v11816_v19, %v11816_v19  ;;  %v4492_v62 = vrot.slane %v11781_v15, 7 }
 0x56c   : > { %4906 = vrot.lane.b32.xlu1 %v4884_v36, %s8616_s13  ;;  %v4885_v36 = vpack.c.b16 %v4861_v9, %v4860_v31  ;;  %v4344_v14 = vadd.f32 %v11946_v44, %v4310_v41  ;;  %v4863_v31 = vunpack.c.l.b16 %v4463_v18  ;;  %v13909_v18 = vrot.slane %v11819_v55, 7 }
 0x56d   : > { %vm4373_vm5 = vcmp.ge.f32.partialorder %v4341_v4, 0.0  ;;  %v4405_v0 = vmul.f32 0.1, %v4341_v4  ;;  %v4587_v58 = vsel %vm8819_vm13, %v4555_v35, 0 }
 0x56e   : > { %v4779_v34 = vunpack.c.l.b16 %v4587_v58  ;;  %v4408_v41 = vmul.f32 0.1, %v4344_v14 }
 0x56f   : > { %v11972_v48 = vsel %vm4373_vm5, %v4341_v4, %v4405_v0  ;;  %vm14519_vm5 = vmmov %vm14518_vm0 }
 0x570   : > { %v4629_v32 = vrot.slane %v11972_v48, 1  ;;  %8228 = vmatmul.msk.bf16.gmra.mxu1 %vm14518_vm0, %v5000_v61  ;;  %8244 = vmatmul.msk.bf16.gmra.mxu0 %vm14519_vm5, %v5000_v61  ;;  %v11993_v12 = vpack.c.b16 %v4779_v34, %v4778_v17  ;;  %v4277_v61 = vld [vmem:[#allocation2 + $0x1d8] sm:$0xff]  ;;  %vm14523_vm0 = vnez %v14396_v54  ;;  %vm4376_vm5 = vcmp.ge.f32.partialorder %v4344_v14, 0.0 }
 0x572   : > { %v4645_v21 = vsel %vm14520_vm11, %v4629_v32, %v13906_v51  ;;  %v4646_v4 = vsel %vm14521_vm7, %v4628_v20, %v4629_v32  ;;  %v4862_v20 = vunpack.c.l.b16 %v4462_v47  ;;  %v4465_v32 = vpack.c.bf16 %v11888_v3, %v11888_v3  ;;  %v5539_v47 = vpop.f32.mrf.mxu0 }
 0x573   : > { %v4692_v0 = vpack.c.bf16 %v4646_v4, %v4646_v4  ;;  %v4693_v9 = vpack.c.bf16 %v4645_v21, %v4645_v21  ;;  %vm14522_vm7 = vcmp.lt.s32.totalorder %v14266_v29, 1  ;;  %v4464_v21 = vpack.c.bf16 %v11849_v43, %v11849_v43  ;;  %v12009_v4 = vpop.f32.mrf.mxu1 }
 0x574   : > { %4908 = vrot.lane.b32.xlu1 %v4885_v36, %s8616_s13  ;;  %v4527_v53 = vsel %vm14522_vm7, %v4491_v8, %v4492_v62 }
 0x575   : > { %v4724_v17 = vsel %vm8819_vm13, %v4692_v0, 0  ;;  %v4725_v15 = vsel %vm14523_vm0, %v4693_v9, 0  ;;  %v4556_v34 = vpack.c.bf16 %v4527_v53, %v4527_v53  ;;  %v4864_v56 = vunpack.c.l.b16 %v4464_v21  ;;  %v8124_v53 = vld [vmem:[%s13728_s3 + $0x180] sm:$0xf] }
 0x576   : > { %v4175_v27 = vpop.permute.xlu0 %4174  ;;  %v4181_v58 = vpop.permute.xlu2 %4180  ;;  %v4980_v0 = vunpack.c.l.b16 %v4724_v17  ;;  %v4981_v9 = vunpack.c.l.b16 %v4725_v15  ;;  %v8182_v15 = vld [vmem:[%s13728_s3 + $0x1f8] sm:$0xf0] }
 0x577   : > { %v4245_v35 = vadd.f32 %v4175_v27, %v11692_v49  ;;  %v4886_v49 = vpack.c.b16 %v4863_v31, %v4862_v20  ;;  %v4248_v27 = vadd.f32 %v4181_v58, %v11745_v7  ;;  %v4470_v31 = vpack.c.bf16 %v11965_v45, %v11965_v45  ;;  %v8496_v7 = vld [vmem:[%s13728_s3 + $0x184] sm:$0xf0] }
 0x578   : > { %v12016_v20 = vsel %vm4376_vm5, %v4344_v14, %v4408_v41  ;;  %v4280_v14 = vld [vmem:[#allocation2 + $0x208] sm:$0xff]  ;;  %v8125_v17 = vor.u32 %v8496_v7, %v8124_v53  ;;  %vm14524_vm5 = vnez %v14367_v57  ;;  %v5001_v47 = vpack.c.b16 %v4981_v9, %v4980_v0 }
 0x579   : > { %v4309_v36 = vadd.f32 %v4277_v61, %v4245_v35  ;;  %v4865_v35 = vunpack.c.l.b16 %v4465_v32  ;;  %v8509_v32 = vld [vmem:[%s13728_s3 + $0x1f4] sm:$0xf]  ;;  %v4312_v21 = vadd.f32 %v4280_v14, %v4248_v27  ;;  %v4870_v7 = vunpack.c.l.b16 %v4470_v31 }
 0x57a   : > { %5270 = vmatpush.bf16.msra.mxu2 %v8125_v17  ;;  %v4467_v27 = vpack.c.bf16 %v11918_v37, %v11918_v37  ;;  %v14528_v31 = vrot.slane %v11965_v45, 1 }
 0x57b   : > { %v4343_v8 = vadd.f32 %v11946_v44, %v4309_v36  ;;  %v4526_v36 = vsel %vm14522_vm7, %v4492_v62, %v13909_v18  ;;  %v4887_v51 = vpack.c.b16 %v4865_v35, %v4864_v56  ;;  %v8507_v62 = vld [vmem:[%s13728_s3 + $0x1e4] sm:$0xf]  ;;  %v4346_v14 = vadd.f32 %v11946_v44, %v4312_v21  ;;  %v5541_v21 = vpop.f32.mrf.mxu0 }
 0x57c   : > { %4910 = vrot.lane.b32.xlu1 %v4886_v49, %s8616_s13  ;;  %v4557_v41 = vpack.c.bf16 %v4526_v36, %v4526_v36  ;;  %v4588_v49 = vsel %vm14524_vm5, %v4556_v34, 0  ;;  %v8185_v34 = vor.u32 %v8509_v32, %v8182_v15  ;;  %vm14527_vm5 = vcmp.lt.s32.totalorder %v14266_v29, 7 }
 0x57d   : > { %vm4375_vm11 = vcmp.ge.f32.partialorder %v4343_v8, 0.0  ;;  %v4407_v61 = vmul.f32 0.1, %v4343_v8  ;;  %v4780_v9 = vunpack.c.l.b16 %v4588_v49  ;;  %vm14529_vm0 = vmmov %vm14527_vm5  ;;  %v4466_v15 = vpack.c.bf16 %v11885_v16, %v11885_v16  ;;  %v8166_v49 = vld [vmem:[%s13728_s3 + $0x1d8] sm:$0xf0] }
 0x57e   : > { %v4589_v0 = vsel %vm8819_vm13, %v4557_v41, 0  ;;  %5441 = vmatpush.bf16.msrb.mxu3 %v8185_v34  ;;  %v8505_v41 = vld [vmem:[%s13728_s3 + $0x1d4] sm:$0xf]  ;;  %v4494_v34 = vrot.slane %v11816_v19, 7 }
 0x57f   : > { %v12031_v58 = vsel %vm4375_vm11, %v4343_v8, %v4407_v61  ;;  %v8174_v8 = vld [vmem:[%s13728_s3 + $0x1e8] sm:$0xf0]  ;;  %v13908_v61 = vrot.slane %v12016_v20, 1  ;;  %vm14525_vm11 = vcmask 523264   ;;  %v4866_v18 = vunpack.c.l.b16 %v4466_v15 }
 0x580   : > { %v4471_v54 = vpack.c.bf16 %v12031_v58, %v12031_v58  ;;  %v4631_v53 = vrot.slane %v12031_v58, 1  ;;  %8229 = vmatmul.msk.bf16.gmra.mxu1 %vm14525_vm11, %v5001_v47  ;;  %vm14526_vm7 = vmmov %vm14525_vm11  ;;  %v8177_v36 = vor.u32 %v8507_v62, %v8174_v8  ;;  %vm4378_vm11 = vcmp.ge.f32.partialorder %v4346_v14, 0.0 }
 0x581   : > { %8245 = vmatmul.msk.bf16.gmra.mxu0 %vm14526_vm7, %v5001_v47  ;;  %v12072_v47 = vpop.f32.mrf.mxu1 }
 0x582   : > { %v4871_v56 = vunpack.c.l.b16 %v4471_v54  ;;  %v4643_v35 = vsel %vm14527_vm5, %v4631_v53, %v13908_v61  ;;  %v4644_v32 = vsel %vm14529_vm0, %v14528_v31, %v4631_v53  ;;  %v4781_v54 = vunpack.c.l.b16 %v4589_v0  ;;  %5442 = vmatpush.bf16.msrb.mxu3 %v8177_v36  ;;  %v4279_v61 = vld [vmem:[#allocation2 + $0x1f8] sm:$0xff] }
 0x583   : > { %v4694_v62 = vpack.c.bf16 %v4644_v32, %v4644_v32  ;;  %v4695_v8 = vpack.c.bf16 %v4643_v35, %v4643_v35  ;;  %v8169_v0 = vor.u32 %v8505_v41, %v8166_v49  ;;  %v4410_v31 = vmul.f32 0.1, %v4346_v14 }
 0x584   : > { %4912 = vrot.lane.b32.xlu1 %v4887_v51, %s8616_s13  ;;  %v4890_v17 = vpack.c.b16 %v4871_v56, %v4870_v7  ;;  %v12074_v53 = vpack.c.b16 %v4781_v54, %v4780_v9  ;;  %v4867_v7 = vunpack.c.l.b16 %v4467_v27  ;;  %vm14530_vm0 = vnez %v14411_v59 }
 0x585   : > { %v4726_v9 = vsel %vm8819_vm13, %v4694_v62, 0  ;;  %v4727_v35 = vsel %vm14530_vm0, %v4695_v8, 0  ;;  %v14531_v32 = vrot.slane %v11819_v55, 7  ;;  %vm14532_vm5 = vcmp.lt.s32.totalorder %v14266_v29, 1  ;;  %v4282_v62 = vld [vmem:[#allocation2 + $0x228] sm:$0xff] }
 0x586   : > { %v4179_v51 = vpop.permute.xlu0 %4178  ;;  %4918 = vrot.lane.b32.xlu0 %v4890_v17, %s8616_s13  ;;  %v4185_v28 = vpop.permute.xlu2 %4184  ;;  %v4888_v27 = vpack.c.b16 %v4867_v7, %v4866_v18  ;;  %v4469_v36 = vpack.c.bf16 %v11972_v48, %v11972_v48  ;;  %v4468_v17 = vpack.c.bf16 %v11915_v13, %v11915_v13  ;;  %5443 = vmatpush.bf16.msrb.mxu3 %v8169_v0  ;;  %v4982_v15 = vunpack.c.l.b16 %v4726_v9  ;;  %vm14533_vm0 = vmmov %vm14532_vm5 }
 0x587   : > { %v4247_v56 = vadd.f32 %v4179_v51, %v11722_v23  ;;  %v4525_v19 = vsel %vm14532_vm5, %v14531_v32, %v4494_v34  ;;  %v4495_v23 = vrot.slane %v11852_v42, 7  ;;  %v4250_v55 = vadd.f32 %v4185_v28, %v11775_v5  ;;  %v8158_v32 = vld [vmem:[%s13728_s3 + $0x1c8] sm:$0xf0] }
 0x588   : > { %v4983_v41 = vunpack.c.l.b16 %v4727_v35  ;;  %v4558_v42 = vpack.c.bf16 %v4525_v19, %v4525_v19  ;;  %v12096_v49 = vsel %vm4378_vm11, %v4346_v14, %v4410_v31  ;;  %v4869_v8 = vunpack.c.l.b16 %v4469_v36  ;;  %v12110_v14 = vpop.f32.mrf.mxu0  ;;  %v8501_v19 = vld [vmem:[%s13728_s3 + $0x1b4] sm:$0xf] }
 0x589   : > { %v4311_v57 = vadd.f32 %v4279_v61, %v4247_v56  ;;  %v4496_v61 = vrot.slane %v11849_v43, 7  ;;  %v4868_v28 = vunpack.c.l.b16 %v4468_v17  ;;  %v12108_v7 = vpop.f32.mrf.mxu1  ;;  %v4634_v56 = vrot.slane %v12096_v49, 1  ;;  %v8150_v17 = vld [vmem:[%s13728_s3 + $0x1b8] sm:$0xf0] }
 0x58a   : > { %v4314_v0 = vadd.f32 %v4282_v62, %v4250_v55  ;;  %v5002_v31 = vpack.c.b16 %v4983_v41, %v4982_v15  ;;  %vm14534_vm11 = vnez %v14373_v22  ;;  %v14538_v41 = vrot.slane %v12016_v20, 1 }
 0x58b   : > { %v4345_v54 = vadd.f32 %v11946_v44, %v4311_v57  ;;  %v4524_v57 = vsel %vm14532_vm5, %v4494_v34, %v4495_v23  ;;  %v12104_v21 = vsel %vm14533_vm0, %v4495_v23, %v4496_v61  ;;  %v8503_v34 = vld [vmem:[%s13728_s3 + $0x1c4] sm:$0xf]  ;;  %v4590_v9 = vsel %vm14534_vm11, %v4558_v42, 0 }
 0x58c   : > { %4914 = vrot.lane.b32.xlu1 %v4888_v27, %s8616_s13  ;;  %v4559_v51 = vpack.c.bf16 %v4524_v57, %v4524_v57  ;;  %vm14535_vm0 = vcmask 523264   ;;  %v4889_v27 = vpack.c.b16 %v4869_v8, %v4868_v28  ;;  %vm14537_vm5 = vcmp.lt.s32.totalorder %v14266_v29, 7 }
 0x58d   : > { %vm4377_vm7 = vcmp.ge.f32.partialorder %v4345_v54, 0.0  ;;  %v4409_v18 = vmul.f32 0.1, %v4345_v54  ;;  %v4348_v62 = vadd.f32 %v11946_v44, %v4314_v0  ;;  %v4472_v8 = vpack.c.bf16 %v12016_v20, %v12016_v20 }
 0x58e   : > { %v4591_v23 = vsel %vm8819_vm13, %v4559_v51, 0  ;;  %v8153_v57 = vor.u32 %v8501_v19, %v8150_v17 }
 0x58f   : > { %v12106_v5 = vsel %vm4377_vm7, %v4345_v54, %v4409_v18  ;;  %vm14536_vm7 = vmmov %vm14535_vm0  ;;  %v8161_v54 = vor.u32 %v8503_v34, %v8158_v32  ;;  %v4783_v55 = vunpack.c.l.b16 %v4591_v23  ;;  %v4782_v18 = vunpack.c.l.b16 %v4590_v9 }
 0x590   : > { %v4633_v35 = vrot.slane %v12106_v5, 1  ;;  %8230 = vmatmul.msk.bf16.gmra.mxu1 %vm14535_vm0, %v5002_v31  ;;  %v4473_v36 = vpack.c.bf16 %v12106_v5, %v12106_v5  ;;  %vm14539_vm0 = vmmov %vm14537_vm5  ;;  %v4412_v9 = vmul.f32 0.1, %v4348_v62  ;;  %v4872_v0 = vunpack.c.l.b16 %v4472_v8 }
 0x591   : > { %8246 = vmatmul.msk.bf16.gmra.mxu0 %vm14536_vm7, %v5002_v31  ;;  %5444 = vmatpush.bf16.msrb.mxu3 %v8161_v54  ;;  %v12146_v31 = vpack.c.b16 %v4783_v55, %v4782_v18  ;;  %vm4380_vm7 = vcmp.ge.f32.partialorder %v4348_v62, 0.0  ;;  %v12154_v55 = vpop.f32.mrf.mxu1  ;;  %v4560_v18 = vpack.c.bf16 %v12104_v21, %v12104_v21  ;;  %v4498_v8 = vrot.slane %v11885_v16, 7 }
 0x592   : > { %v4641_v15 = vsel %vm14537_vm5, %v4633_v35, %v4634_v56  ;;  %v4642_v42 = vsel %vm14539_vm0, %v14538_v41, %v4633_v35  ;;  %v4873_v32 = vunpack.c.l.b16 %v4473_v36  ;;  %v4497_v35 = vrot.slane %v11888_v3, 7  ;;  %v4281_v41 = vld [vmem:[#allocation2 + $0x218] sm:$0xff]  ;;  %v8142_v3 = vld [vmem:[%s13728_s3 + $0x1a8] sm:$0xf0] }
 0x593   : > { %v4696_v28 = vpack.c.bf16 %v4642_v42, %v4642_v42  ;;  %v4697_v51 = vpack.c.bf16 %v4641_v15, %v4641_v15  ;;  %v12156_v15 = vpop.f32.mrf.mxu0  ;;  %v8497_v42 = vld [vmem:[%s13728_s3 + $0x194] sm:$0xf]  ;;  %vm14541_vm0 = vcmp.lt.s32.totalorder %v14266_v29, 1 }
 0x594   : > { %4916 = vrot.lane.b32.xlu1 %v4889_v27, %s8616_s13  ;;  %v4891_v36 = vpack.c.b16 %v4873_v32, %v4872_v0  ;;  %v4522_v16 = vsel %vm14541_vm0, %v4496_v61, %v4497_v35 }
 0x595   : > { %5445 = vmatpush.bf16.msrb.mxu3 %v8153_v57  ;;  %v4728_v54 = vsel %vm8819_vm13, %v4696_v28, 0  ;;  %v4729_v17 = vsel %vm14422_vm10, %v4697_v51, 0  ;;  %v8134_v51 = vld [vmem:[%s13728_s3 + $0x198] sm:$0xf0]  ;;  %vm14542_vm10 = vmmov %vm14541_vm0 }
 0x596   : > { %v4183_v34 = vpop.permute.xlu0 %4182  ;;  %v4984_v32 = vunpack.c.l.b16 %v4728_v54  ;;  %v4521_v21 = vsel %vm14542_vm10, %v4497_v35, %v4498_v8  ;;  %v4561_v54 = vpack.c.bf16 %v4522_v16, %v4522_v16  ;;  %vm14545_vm10 = vcmask 523264  }
 0x597   : > { %v4249_v23 = vadd.f32 %v4183_v34, %v11758_v60  ;;  %v8499_v60 = vld [vmem:[%s13728_s3 + $0x1a4] sm:$0xf]  ;;  %v12174_v34 = vsel %vm4380_vm7, %v4348_v62, %v4412_v9  ;;  %v4474_v62 = vpack.c.bf16 %v12096_v49, %v12096_v49  ;;  %vm14546_vm0 = vmmov %vm14545_vm10 }
 0x598   : > { %v8145_v28 = vor.u32 %v8499_v60, %v8142_v3  ;;  %v8495_v9 = vld [vmem:[%s13728_s3 + $0x184] sm:$0xf]  ;;  %v13913_v61 = vrot.slane %v12174_v34, 1 }
 0x599   : > { %v4313_v27 = vadd.f32 %v4281_v41, %v4249_v23  ;;  %v4985_v23 = vunpack.c.l.b16 %v4729_v17  ;;  %v8137_v41 = vor.u32 %v8497_v42, %v8134_v51  ;;  %v14543_v17 = vld [vmem:[#allocation11_spill] sm:$0xff]  ;;  %v4593_v42 = vsel %vm8819_vm13, %v4561_v54, 0 }
 0x59a   : > { %5446 = vmatpush.bf16.msrb.mxu3 %v8145_v28  ;;  %vm14544_vm7 = vnez %v14543_v17  ;;  %v4785_v16 = vunpack.c.l.b16 %v4593_v42  ;;  %v4478_v42 = vrot.slane %v11557_v39, 7 }
 0x59b   : > { %v4347_v57 = vadd.f32 %v11946_v44, %v4313_v27  ;;  %v8126_v27 = vld [vmem:[%s13728_s3 + $0x188] sm:$0xf0]  ;;  %v4592_v43 = vsel %vm14544_vm7, %v4560_v18, 0  ;;  %v5003_v35 = vpack.c.b16 %v4985_v23, %v4984_v32  ;;  %v4874_v18 = vunpack.c.l.b16 %v4474_v62 }
 0x59c   : > { %4920 = vrot.lane.b32.xlu1 %v4891_v36, %s8616_s13  ;;  %v8129_v28 = vor.u32 %v8495_v9, %v8126_v27  ;;  %v4784_v51 = vunpack.c.l.b16 %v4592_v43  ;;  %v12215_v9 = vpop.f32.mrf.mxu0  ;;  %v4283_v43 = vld [vmem:[#allocation2 + $0x238] sm:$0xff] }
 0x59d   : > { %vm4379_vm5 = vcmp.ge.f32.partialorder %v4347_v57, 0.0  ;;  %v4411_v0 = vmul.f32 0.1, %v4347_v57 }
 0x59e   : > { %5447 = vmatpush.bf16.msrb.mxu3 %v8137_v41  ;;  %v12211_v41 = vpack.c.b16 %v4785_v16, %v4784_v51  ;;  %v4499_v16 = vrot.slane %v11918_v37, 7 }
 0x59f   : > { %v12194_v36 = vsel %vm4379_vm5, %v4347_v57, %v4411_v0  ;;  %vm14547_vm5 = vcmp.lt.s32.totalorder %v14266_v29, 7  ;;  %v12213_v0 = vpop.f32.mrf.mxu1 }
 0x5a0   : > { %v4475_v60 = vpack.c.bf16 %v12194_v36, %v12194_v36  ;;  %v4635_v3 = vrot.slane %v12194_v36, 1  ;;  %8231 = vmatmul.msk.bf16.gmra.mxu1 %vm14545_vm10, %v5003_v35  ;;  %vm14548_vm7 = vmmov %vm14547_vm5  ;;  %vm14551_vm10 = vcmp.lt.s32.totalorder %v14266_v29, 1 }
 0x5a1   : > { %8247 = vmatmul.msk.bf16.gmra.mxu0 %vm14546_vm0, %v5003_v35 }
 0x5a2   : > { %v4875_v57 = vunpack.c.l.b16 %v4475_v60  ;;  %v4639_v32 = vsel %vm14547_vm5, %v4635_v3, %v13913_v61  ;;  %v4640_v23 = vsel %vm14548_vm7, %v4634_v56, %v4635_v3  ;;  %5448 = vmatpush.bf16.msrb.mxu3 %v8129_v28  ;;  %v14549_v3 = vld [vmem:[#allocation29_spill] sm:$0xff]  ;;  %v4562_v28 = vpack.c.bf16 %v4521_v21, %v4521_v21  ;;  %vm14552_vm5 = vmmov %vm14551_vm10 }
 0x5a3   : > { %v4698_v54 = vpack.c.bf16 %v4640_v23, %v4640_v23  ;;  %v4699_v62 = vpack.c.bf16 %v4639_v32, %v4639_v32  ;;  %vm14550_vm7 = vnez %v14549_v3  ;;  %v4500_v32 = vrot.slane %v11915_v13, 7 }
 0x5a4   : > { %v4892_v27 = vpack.c.b16 %v4875_v57, %v4874_v18  ;;  %v4479_v57 = vrot.slane %v11560_v10, 7  ;;  %v4520_v37 = vsel %vm14552_vm5, %v4498_v8, %v4499_v16  ;;  %v12238_v13 = vpop.f32.mrf.mxu0 }
 0x5a5   : > { %v4730_v56 = vsel %vm8819_vm13, %v4698_v54, 0  ;;  %v4731_v51 = vsel %vm14550_vm7, %v4699_v62, 0  ;;  %v4476_v54 = vpack.c.bf16 %v12174_v34, %v12174_v34  ;;  %vm14553_vm7 = vmmov %vm14552_vm5 }
 0x5a6   : > { %4922 = vrot.lane.b32.xlu2 %v4892_v27, %s8616_s13  ;;  %v4187_v35 = vpop.permute.xlu1 %4186  ;;  %v4986_v27 = vunpack.c.l.b16 %v4730_v56  ;;  %v4519_v10 = vsel %vm14553_vm7, %v4499_v16, %v4500_v32  ;;  %vm14556_vm7 = vmmov %vm14552_vm5  ;;  %vm14560_vm5 = vcmp.lt.s32.totalorder %v14266_v29, 7 }
 0x5a7   : > { %v4251_v60 = vadd.f32 %v4187_v35, %v11794_v30  ;;  %v4987_v30 = vunpack.c.l.b16 %v4731_v51  ;;  %v4540_v35 = vsel %vm14551_vm10, %v4478_v42, %v4479_v57  ;;  %v12236_v21 = vpop.f32.mrf.mxu1  ;;  %v4876_v19 = vunpack.c.l.b16 %v4476_v54 }
 0x5a8   : > { %v4543_v51 = vpack.c.bf16 %v4540_v35, %v4540_v35  ;;  %vm14557_vm10 = vcmask 523264   ;;  %v14561_v35 = vrot.slane %v11557_v39, 1  ;;  %v4480_v39 = vrot.slane %v11588_v26, 7 }
 0x5a9   : > { %v4315_v18 = vadd.f32 %v4283_v43, %v4251_v60  ;;  %v14554_v43 = vld [vmem:[#allocation24_spill] sm:$0xff]  ;;  %v4564_v26 = vpack.c.bf16 %v4519_v10, %v4519_v10 }
 0x5aa   : > { %vm14555_vm11 = vnez %v14554_v43  ;;  %v4481_v43 = vrot.slane %v11613_v50, 7 }
 0x5ab   : > { %v4349_v23 = vadd.f32 %v11946_v44, %v4315_v18  ;;  %v4563_v44 = vpack.c.bf16 %v4520_v37, %v4520_v37  ;;  %v4594_v60 = vsel %vm14555_vm11, %v4562_v28, 0  ;;  %v5004_v18 = vpack.c.b16 %v4987_v30, %v4986_v27  ;;  %vm14562_vm11 = vmmov %vm14560_vm5 }
 0x5ac   : > { %v4786_v59 = vunpack.c.l.b16 %v4594_v60  ;;  %v14559_v27 = vrot.slane %v12174_v34, 1 }
 0x5ad   : > { %vm4381_vm0 = vcmp.ge.f32.partialorder %v4349_v23, 0.0  ;;  %v4413_v62 = vmul.f32 0.1, %v4349_v23  ;;  %v4595_v16 = vsel %vm8819_vm13, %v4563_v44, 0  ;;  %v4575_v44 = vsel %vm8819_vm13, %v4543_v51, 0 }
 0x5ae   : > { %v4787_v37 = vunpack.c.l.b16 %v4595_v16  ;;  %v14563_v16 = vld [vmem:[#allocation36_spill] sm:$0xff]  ;;  %v4767_v17 = vunpack.c.l.b16 %v4575_v44  ;;  %v4895_v51 = vpop.permute.xlu1 %4894 }
 0x5af   : > { %v12242_v56 = vsel %vm4381_vm0, %v4349_v23, %v4413_v62  ;;  %vm14558_vm0 = vmmov %vm14557_vm10 }
 0x5b0   : > { %v13915_v61 = vrot.slane %v12242_v56, 7  ;;  %v4637_v3 = vrot.slane %v12242_v56, 1  ;;  %v4477_v8 = vpack.c.bf16 %v12242_v56, %v12242_v56  ;;  %8232 = vmatmul.msk.bf16.gmra.mxu1 %vm14557_vm10, %v5004_v18  ;;  %vm14567_vm10 = vmmov %vm14558_vm0 }
 0x5b1   : > { %8248 = vmatmul.msk.bf16.gmra.mxu0 %vm14558_vm0, %v5004_v18  ;;  %vm14568_vm0 = vcmp.lt.s32.totalorder %v14266_v29, 1 }
 0x5b2   : > { %v4541_v28 = vsel %vm14556_vm7, %v13915_v61, %v4478_v42  ;;  %v4877_v23 = vunpack.c.l.b16 %v4477_v8  ;;  %v4638_v30 = vsel %vm14560_vm5, %v14559_v27, %v4637_v3  ;;  %v4669_v54 = vsel %vm14562_vm11, %v4637_v3, %v14561_v35  ;;  %v12273_v3 = vpop.f32.mrf.mxu1  ;;  %vm14569_vm5 = vmmov %vm14568_vm0 }
 0x5b3   : > { %v4542_v62 = vpack.c.bf16 %v4541_v28, %v4541_v28  ;;  %v12266_v42 = vpack.c.b16 %v4787_v37, %v4786_v59  ;;  %vm14564_vm7 = vnez %v14563_v16  ;;  %v4700_v8 = vpack.c.bf16 %v4638_v30, %v4638_v30  ;;  %v12275_v28 = vpop.f32.mrf.mxu0 }
 0x5b4   : > { %v4893_v60 = vpack.c.b16 %v4877_v23, %v4876_v19  ;;  %v4701_v61 = vpack.c.bf16 %v4669_v54, %v4669_v54  ;;  %v4501_v19 = vrot.slane %v11972_v48, 7  ;;  %v14565_v23 = vld [vmem:[#allocation16_spill] sm:$0xff]  ;;  %v4538_v35 = vsel %vm14568_vm0, %v4480_v39, %v4481_v43 }
 0x5b5   : > { %v4574_v18 = vsel %vm14564_vm7, %v4542_v62, 0  ;;  %v4732_v37 = vsel %vm8819_vm13, %v4700_v8, 0  ;;  %vm14566_vm11 = vnez %v14565_v23  ;;  %v4502_v54 = vrot.slane %v11965_v45, 7  ;;  %vm14570_vm7 = vmmov %vm14568_vm0  ;;  %v14572_v8 = vld [vmem:[#allocation17_spill] sm:$0xff] }
 0x5b6   : > { %v4766_v27 = vunpack.c.l.b16 %v4574_v18  ;;  %4924 = vrot.lane.b32.xlu0 %v4893_v60, %s8616_s13  ;;  %v4733_v50 = vsel %vm14566_vm11, %v4701_v61, 0  ;;  %v4539_v48 = vsel %vm14569_vm5, %v4479_v57, %v4480_v39  ;;  %v4545_v44 = vpack.c.bf16 %v4538_v35, %v4538_v35  ;;  %vm14571_vm11 = vmmov %vm14568_vm0 }
 0x5b7   : > { %v4989_v62 = vunpack.c.l.b16 %v4733_v50  ;;  %v4518_v60 = vsel %vm14570_vm7, %v4500_v32, %v4501_v19  ;;  %v4517_v61 = vsel %vm14571_vm11, %v4501_v19, %v4502_v54  ;;  %vm14574_vm7 = vcmask 523264   ;;  %v14576_v19 = vld [vmem:[#allocation14_spill] sm:$0xff] }
 0x5b8   : > { %v4798_v59 = vpack.c.b16 %v4767_v17, %v4766_v27  ;;  %v4988_v17 = vunpack.c.l.b16 %v4732_v37  ;;  %v4565_v18 = vpack.c.bf16 %v4518_v60, %v4518_v60  ;;  %v4544_v27 = vpack.c.bf16 %v4539_v48, %v4539_v48  ;;  %vm14575_vm11 = vmmov %vm14574_vm7 }
 0x5b9   : > { %vm14577_vm0 = vnez %v14576_v19  ;;  %v4482_v48 = vrot.slane %v11611_v40, 7  ;;  %v4503_v60 = vrot.slane %v12031_v58, 7  ;;  %vm14578_vm5 = vmmov %vm14574_vm7 }
 0x5ba   : > { %v5008_v30 = vsel %vm14567_vm10, %v4798_v59, %v4895_v51  ;;  %vm14573_vm10 = vnez %v14572_v8  ;;  %v5005_v45 = vpack.c.b16 %v4989_v62, %v4988_v17  ;;  %v4597_v59 = vsel %vm8819_vm13, %v4565_v18, 0  ;;  %v12298_v37 = vpop.f32.mrf.mxu1  ;;  %v4897_v62 = vpop.permute.xlu1 %4896 }
 0x5bb   : > { %5271 = vmatmul.bf16.vlgmr.msra.gmra.mxu2 %v5008_v30  ;;  %5449 = vmatmul.bf16.vlgmr.msrb.gmra.mxu3 %v5008_v30  ;;  %v4596_v10 = vsel %vm14573_vm10, %v4564_v26, 0  ;;  %v4577_v51 = vsel %vm8819_vm13, %v4545_v44, 0  ;;  %v4789_v39 = vunpack.c.l.b16 %v4597_v59  ;;  %v12300_v32 = vpop.f32.mrf.mxu0  ;;  %v4576_v50 = vsel %vm14577_vm0, %v4544_v27, 0 }
 0x5bc   : > { %v4788_v57 = vunpack.c.l.b16 %v4596_v10  ;;  %v4769_v35 = vunpack.c.l.b16 %v4577_v51  ;;  %v4483_v26 = vrot.slane %v11649_v46, 7  ;;  %v4768_v17 = vunpack.c.l.b16 %v4576_v50 }
 0x5bd   : > { %v4504_v27 = vrot.slane %v12016_v20, 7 }
 0x5be   : > { %v12306_v30 = vpack.c.b16 %v4789_v39, %v4788_v57  ;;  %v4799_v44 = vpack.c.b16 %v4769_v35, %v4768_v17  ;;  %v14583_v57 = vld [vmem:[#allocation13_spill] sm:$0xff] }
 0x5bf   : > { %v14585_v17 = vld [vmem:[#allocation21_spill] sm:$0xff] }
 0x5c0   : > { %8233 = vmatmul.msk.bf16.gmra.mxu1 %vm14574_vm7, %v5005_v45  ;;  %v5012_v18 = vsel %vm14578_vm5, %v4799_v44, %v4897_v62  ;;  %vm14579_vm7 = vcmp.lt.s32.totalorder %v14266_v29, 1  ;;  %vm14584_vm5 = vnez %v14583_v57  ;;  %v4485_v44 = vrot.slane %v11688_v2, 7 }
 0x5c1   : > { %8249 = vmatmul.msk.bf16.gmra.mxu0 %vm14575_vm11, %v5005_v45  ;;  %v4536_v10 = vsel %vm14579_vm7, %v4482_v48, %v4483_v26  ;;  %v4566_v45 = vpack.c.bf16 %v4517_v61, %v4517_v61  ;;  %vm14580_vm11 = vmmov %vm14579_vm7 }
 0x5c2   : > { %v4537_v46 = vsel %vm14580_vm11, %v4481_v43, %v4482_v48  ;;  %v4547_v59 = vpack.c.bf16 %v4536_v10, %v4536_v10  ;;  %vm14581_vm0 = vmmov %vm14579_vm7  ;;  %vm14586_vm7 = vnez %v14585_v17  ;;  %v4484_v10 = vrot.slane %v11646_v38, 7 }
 0x5c3   : > { %v4516_v40 = vsel %vm14581_vm0, %v4502_v54, %v4503_v60  ;;  %vm14582_vm10 = vmmov %vm14581_vm0  ;;  %v4598_v39 = vsel %vm14584_vm5, %v4566_v45, 0  ;;  %v4546_v50 = vpack.c.bf16 %v4537_v46, %v4537_v46  ;;  %v4505_v46 = vrot.slane %v12106_v5, 7 }
 0x5c4   : > { %v4515_v58 = vsel %vm14582_vm10, %v4503_v60, %v4504_v27  ;;  %v4567_v51 = vpack.c.bf16 %v4516_v40, %v4516_v40  ;;  %v4579_v61 = vsel %vm8819_vm13, %v4547_v59, 0  ;;  %v4790_v35 = vunpack.c.l.b16 %v4598_v39  ;;  %vm14588_vm11 = vmmov %vm14581_vm0 }
 0x5c5   : > { %v4578_v62 = vsel %vm14586_vm7, %v4546_v50, 0  ;;  %v4771_v48 = vunpack.c.l.b16 %v4579_v61  ;;  %vm14587_vm10 = vcmask 523264   ;;  %v4534_v59 = vsel %vm14581_vm0, %v4484_v10, %v4485_v44  ;;  %vm14589_vm5 = vmmov %vm14581_vm0  ;;  %v14591_v61 = vld [vmem:[#allocation30_spill] sm:$0xff] }
 0x5c6   : > { %v4599_v20 = vsel %vm8819_vm13, %v4567_v51, 0  ;;  %v4770_v60 = vunpack.c.l.b16 %v4578_v62  ;;  %v4568_v51 = vpack.c.bf16 %v4515_v58, %v4515_v58  ;;  %v4506_v39 = vrot.slane %v12096_v49, 7  ;;  %vm14590_vm7 = vmmov %vm14581_vm0 }
 0x5c7   : > { %v4791_v43 = vunpack.c.l.b16 %v4599_v20  ;;  %v4535_v2 = vsel %vm14588_vm11, %v4483_v26, %v4484_v10  ;;  %v4549_v50 = vpack.c.bf16 %v4534_v59, %v4534_v59  ;;  %v4514_v38 = vsel %vm14589_vm5, %v4504_v27, %v4505_v46  ;;  %vm14596_vm11 = vmmov %vm14590_vm7 }
 0x5c8   : > { %v4800_v45 = vpack.c.b16 %v4771_v48, %v4770_v60  ;;  %v4513_v5 = vsel %vm14590_vm7, %v4505_v46, %v4506_v39  ;;  %v4569_v20 = vpack.c.bf16 %v4514_v38, %v4514_v38  ;;  %v14593_v48 = vld [vmem:[#allocation35_spill] sm:$0xff]  ;;  %v4487_v10 = vrot.slane %v11718_v11, 7 }
 0x5c9   : > { %v12329_v54 = vpack.c.b16 %v4791_v43, %v4790_v35  ;;  %v4548_v43 = vpack.c.bf16 %v4535_v2, %v4535_v2  ;;  %v4581_v58 = vsel %vm8819_vm13, %v4549_v50, 0  ;;  %vm14594_vm0 = vnez %v14593_v48 }
 0x5ca   : > { %v4601_v49 = vsel %vm8819_vm13, %v4569_v20, 0  ;;  %vm14595_vm5 = vcmask 523264   ;;  %v4570_v38 = vpack.c.bf16 %v4513_v5, %v4513_v5  ;;  %v4508_v20 = vrot.slane %v12174_v34, 7 }
 0x5cb   : > { %5276 = vmatmul.bf16.gmra.mxu2 %v5012_v18  ;;  %5454 = vmatmul.bf16.gmra.mxu3 %v5012_v18  ;;  %v4899_v18 = vpop.permute.xlu1 %4898  ;;  %v4793_v26 = vunpack.c.l.b16 %v4601_v49  ;;  %v4580_v60 = vsel %vm14594_vm0, %v4548_v43, 0  ;;  %vm14598_vm0 = vmmov %vm14590_vm7  ;;  %v14599_v49 = vld [vmem:[#allocation6_spill] sm:$0xff] }
 0x5cc   : > { %v5016_v40 = vsel %vm14587_vm10, %v4800_v45, %v4899_v18  ;;  %vm14592_vm10 = vnez %v14591_v61  ;;  %v4773_v18 = vunpack.c.l.b16 %v4581_v58  ;;  %v4772_v45 = vunpack.c.l.b16 %v4580_v60  ;;  %v14601_v60 = vld [vmem:[#allocation38_spill] sm:$0xff] }
 0x5cd   : > { %v4600_v35 = vsel %vm14592_vm10, %v4568_v51, 0  ;;  %v4507_v51 = vrot.slane %v12194_v36, 7  ;;  %vm14597_vm10 = vmmov %vm14590_vm7 }
 0x5ce   : > { %v4792_v62 = vunpack.c.l.b16 %v4600_v35  ;;  %v4801_v59 = vpack.c.b16 %v4773_v18, %v4772_v45 }
 0x5cf   : > { %v4511_v36 = vsel %vm14598_vm0, %v4507_v51, %v4508_v20 }
 0x5d0   : > { %v12352_v27 = vpack.c.b16 %v4793_v26, %v4792_v62 }
 0x5d3   : > { %v4901_v46 = vpop.permute.xlu1 %4900 }
 0x5d4   : > { %v5020_v2 = vsel %vm14595_vm5, %v4801_v59, %v4901_v46  ;;  %vm14600_vm5 = vnez %v14599_v49  ;;  %v4488_v59 = vrot.slane %v11715_v6, 7 }
 0x5d5   : > { %v4602_v58 = vsel %vm14600_vm5, %v4570_v38, 0  ;;  %vm14607_vm5 = vmmov %vm14598_vm0 }
 0x5d6   : > { %v4794_v26 = vunpack.c.l.b16 %v4602_v58 }
 0x5db   : > { %5281 = vmatmul.bf16.gmra.mxu2 %v5016_v40  ;;  %5459 = vmatmul.bf16.gmra.mxu3 %v5016_v40  ;;  %v4486_v40 = vrot.slane %v11685_v1, 7  ;;  %v4512_v1 = vsel %vm14597_vm10, %v4506_v39, %v4507_v51  ;;  %vm14603_vm10 = vcmask 523264  }
 0x5dc   : > { %v4571_v43 = vpack.c.bf16 %v4512_v1, %v4512_v1 }
 0x5dd   : > { %v4532_v50 = vsel %vm14590_vm7, %v4486_v40, %v4487_v10  ;;  %v4533_v11 = vsel %vm14596_vm11, %v4485_v44, %v4486_v40  ;;  %vm14602_vm7 = vnez %v14601_v60  ;;  %v4903_v40 = vpop.permute.xlu1 %4902  ;;  %vm14605_vm11 = vmmov %vm14598_vm0 }
 0x5de   : > { %v4551_v35 = vpack.c.bf16 %v4532_v50, %v4532_v50  ;;  %v4550_v62 = vpack.c.bf16 %v4533_v11, %v4533_v11  ;;  %v4603_v34 = vsel %vm8819_vm13, %v4571_v43, 0  ;;  %v14604_v50 = vrot.slane %v11754_v63, 7 }
 0x5df   : > { %v4795_v44 = vunpack.c.l.b16 %v4603_v34  ;;  %v4572_v11 = vpack.c.bf16 %v4511_v36, %v4511_v36  ;;  %v14606_v43 = vrot.slane %v12242_v56, 7 }
 0x5e0   : > { %v4583_v5 = vsel %vm8819_vm13, %v4551_v35, 0  ;;  %v4582_v18 = vsel %vm14602_vm7, %v4550_v62, 0  ;;  %v4530_v38 = vsel %vm14598_vm0, %v4488_v59, %v14604_v50  ;;  %v4531_v35 = vsel %vm14605_vm11, %v4487_v10, %v4488_v59  ;;  %v14608_v62 = vld [vmem:[#allocation8_spill] sm:$0xff]  ;;  %v14610_v10 = vld [vmem:[#allocation25_spill] sm:$0xff] }
 0x5e1   : > { %v12375_v39 = vpack.c.b16 %v4795_v44, %v4794_v26  ;;  %v4775_v45 = vunpack.c.l.b16 %v4583_v5  ;;  %v4774_v46 = vunpack.c.l.b16 %v4582_v18  ;;  %v4553_v1 = vpack.c.bf16 %v4530_v38, %v4530_v38 }
 0x5e2   : > { %v4510_v6 = vsel %vm14607_vm5, %v4508_v20, %v14606_v43  ;;  %v4552_v63 = vpack.c.bf16 %v4531_v35, %v4531_v35  ;;  %vm14611_vm0 = vnez %v14610_v10  ;;  %vm14612_vm5 = vcmask 523264  }
 0x5e3   : > { %v4802_v51 = vpack.c.b16 %v4775_v45, %v4774_v46  ;;  %v4573_v58 = vpack.c.bf16 %v4510_v6, %v4510_v6  ;;  %v4585_v36 = vsel %vm8819_vm13, %v4553_v1, 0  ;;  %vm14613_vm11 = vmmov %vm14612_vm5 }
 0x5e4   : > { %v4584_v18 = vsel %vm14611_vm0, %v4552_v63, 0  ;;  %v4777_v45 = vunpack.c.l.b16 %v4585_v36  ;;  %vm14615_vm0 = vmmov %vm14612_vm5  ;;  %v5381_v63 = vpop.f32.mrf.mxu1  ;;  %v5559_v36 = vpop.f32.mrf.mxu0 }
 0x5e5   : > { %v4605_v5 = vsel %vm8819_vm13, %v4573_v58, 0  ;;  %v4776_v20 = vunpack.c.l.b16 %v4584_v18  ;;  %v4905_v46 = vpop.permute.xlu1 %4904 }
 0x5e6   : > { %v4797_v44 = vunpack.c.l.b16 %v4605_v5 }
 0x5eb   : > { %5286 = vmatmul.bf16.gmra.mxu2 %v5020_v2  ;;  %5464 = vmatmul.bf16.gmra.mxu3 %v5020_v2  ;;  %v5024_v2 = vsel %vm14603_vm10, %v4802_v51, %v4903_v40  ;;  %vm14609_vm10 = vnez %v14608_v62  ;;  %v4803_v40 = vpack.c.b16 %v4777_v45, %v4776_v20 }
 0x5ec   : > { %v4604_v34 = vsel %vm14609_vm10, %v4572_v11, 0  ;;  %vm14614_vm10 = vmmov %vm14612_vm5  ;;  %v5383_v45 = vpop.f32.mrf.mxu1 }
 0x5ed   : > { %v4796_v26 = vunpack.c.l.b16 %v4604_v34  ;;  %v5028_v59 = vsel %vm14612_vm5, %v4803_v40, %v4905_v46  ;;  %v4907_v51 = vpop.permute.xlu1 %4906  ;;  %v5561_v40 = vpop.f32.mrf.mxu0  ;;  %vm14617_vm5 = vmmov %vm14615_vm0 }
 0x5ef   : > { %v12397_v56 = vpack.c.b16 %v4797_v44, %v4796_v26 }
 0x5f5   : > { %v4909_v50 = vpop.permute.xlu1 %4908 }
 0x5f6   : > { %v5036_v38 = vsel %vm14614_vm10, %v12074_v53, %v4909_v50  ;;  %vm14616_vm10 = vmmov %vm14615_vm0 }
 0x5fb   : > { %5291 = vmatmul.bf16.gmra.mxu2 %v5024_v2  ;;  %5469 = vmatmul.bf16.gmra.mxu3 %v5024_v2  ;;  %v5032_v2 = vsel %vm14613_vm11, %v11993_v12, %v4907_v51  ;;  %vm14618_vm11 = vmmov %vm14615_vm0 }
 0x5fd   : > { %v4911_v11 = vpop.permute.xlu1 %4910 }
 0x5fe   : > { %v5040_v35 = vsel %vm14615_vm0, %v12146_v31, %v4911_v11 }
 0x605   : > { %v4913_v34 = vpop.permute.xlu1 %4912 }
 0x606   : > { %v5044_v31 = vsel %vm14616_vm10, %v12211_v41, %v4913_v34  ;;  %vm14619_vm10 = vmmov %vm14615_vm0 }
 0x60b   : > { %5296 = vmatmul.bf16.gmra.mxu2 %v5028_v59  ;;  %5474 = vmatmul.bf16.gmra.mxu3 %v5028_v59 }
 0x60d   : > { %v4915_v41 = vpop.permute.xlu1 %4914 }
 0x615   : > { %v4917_v11 = vpop.permute.xlu1 %4916 }
 0x61b   : > { %5301 = vmatmul.bf16.gmra.mxu2 %v5032_v2  ;;  %5479 = vmatmul.bf16.gmra.mxu3 %v5032_v2  ;;  %v5386_v2 = vpop.f32.mrf.mxu1 }
 0x62b   : > { %5306 = vmatmul.bf16.gmra.mxu2 %v5036_v38  ;;  %5484 = vmatmul.bf16.gmra.mxu3 %v5036_v38 }
 0x63b   : > { %5311 = vmatmul.bf16.gmra.mxu2 %v5040_v35  ;;  %5489 = vmatmul.bf16.gmra.mxu3 %v5040_v35 }
 0x63e   : > { %v5272_v1 = vpop.f32.mrf.mxu2  ;;  %v5450_v43 = vpop.f32.mrf.mxu3 }
 0x63f   : > { %v12407_v6 = vadd.f32 %v12009_v4, %v5272_v1 }
 0x641   : > { %5749 = vrot.lane.b32.xlu1 %v12407_v6, %s8616_s13 }
 0x646   : > { %v5274_v12 = vpop.f32.mrf.mxu2  ;;  %v5452_v58 = vpop.f32.mrf.mxu3 }
 0x647   : > { %v12412_v53 = vadd.f32 %v12072_v47, %v5274_v12 }
 0x649   : > { %5751 = vrot.lane.b32.xlu2 %v12412_v53, %s8616_s13 }
 0x64b   : > { %5316 = vmatmul.bf16.gmra.mxu2 %v5044_v31  ;;  %5494 = vmatmul.bf16.gmra.mxu3 %v5044_v31 }
 0x64e   : > { %v5277_v4 = vpop.f32.mrf.mxu2  ;;  %v5455_v5 = vpop.f32.mrf.mxu3 }
 0x64f   : > { %v12419_v26 = vadd.f32 %v12108_v7, %v5277_v4  ;;  %v5545_v44 = vadd.f32 %v12110_v14, %v5455_v5  ;;  %v5048_v7 = vsel %vm14618_vm11, %v12266_v42, %v4915_v41  ;;  %vm14621_vm11 = vmmov %vm14615_vm0  ;;  %v4919_v4 = vpop.permute.xlu0 %4918 }
 0x651   : > { %5624 = vst.msk [vmem:[#allocation2 + $0x48] sm:$0xff] %vm14615_vm0, %v5545_v44  ;;  %5753 = vrot.lane.b32.xlu0 %v12419_v26, %s8616_s13 }
 0x656   : > { %v5279_v47 = vpop.f32.mrf.mxu2  ;;  %v5457_v18 = vpop.f32.mrf.mxu3 }
 0x657   : > { %v12426_v20 = vadd.f32 %v12154_v55, %v5279_v47  ;;  %v5547_v46 = vadd.f32 %v12156_v15, %v5457_v18  ;;  %v5564_v15 = vpop.f32.mrf.mxu0 }
 0x659   : > { %5626 = vst.msk [vmem:[#allocation2 + $0x58] sm:$0xff] %vm14617_vm5, %v5547_v46  ;;  %5755 = vrot.lane.b32.xlu1 %v12426_v20, %s8616_s13  ;;  %vm14620_vm5 = vmmov %vm14615_vm0 }
 0x65b   : > { %5321 = vmatmul.bf16.gmra.mxu2 %v5048_v7  ;;  %5499 = vmatmul.bf16.gmra.mxu3 %v5048_v7 }
 0x65e   : > { %v5282_v14 = vpop.f32.mrf.mxu2  ;;  %v5460_v59 = vpop.f32.mrf.mxu3 }
 0x65f   : > { %v12435_v51 = vadd.f32 %v12213_v0, %v5282_v14  ;;  %v5550_v55 = vadd.f32 %v12215_v9, %v5460_v59  ;;  %v5052_v0 = vsel %vm14620_vm5, %v12306_v30, %v4917_v11  ;;  %v5388_v9 = vpop.f32.mrf.mxu1  ;;  %v5566_v1 = vpop.f32.mrf.mxu0  ;;  %vm14623_vm5 = vmmov %vm14615_vm0 }
 0x660   : > { %v4921_v14 = vpop.permute.xlu1 %4920 }
 0x661   : > { %5628 = vst.msk [vmem:[#allocation2 + $0x68] sm:$0xff] %vm14619_vm10, %v5550_v55  ;;  %5757 = vrot.lane.b32.xlu2 %v12435_v51, %s8616_s13  ;;  %vm14622_vm10 = vmmov %vm14615_vm0 }
 0x666   : > { %v5284_v50 = vpop.f32.mrf.mxu2  ;;  %v5462_v38 = vpop.f32.mrf.mxu3 }
 0x667   : > { %v12442_v42 = vadd.f32 %v12236_v21, %v5284_v50  ;;  %v5552_v35 = vadd.f32 %v12238_v13, %v5462_v38  ;;  %v5391_v13 = vpop.f32.mrf.mxu1  ;;  %v5569_v30 = vpop.f32.mrf.mxu0 }
 0x669   : > { %5630 = vst.msk [vmem:[#allocation2 + $0x78] sm:$0xff] %vm14615_vm0, %v5552_v35  ;;  %5759 = vrot.lane.b32.xlu0 %v12442_v42, %s8616_s13 }
 0x66b   : > { %5326 = vmatmul.bf16.gmra.mxu2 %v5052_v0  ;;  %5504 = vmatmul.bf16.gmra.mxu3 %v5052_v0 }
 0x66e   : > { %v5287_v43 = vpop.f32.mrf.mxu2  ;;  %v5465_v12 = vpop.f32.mrf.mxu3 }
 0x66f   : > { %v12451_v58 = vadd.f32 %v12273_v3, %v5287_v43  ;;  %v5555_v21 = vadd.f32 %v12275_v28, %v5465_v12  ;;  %v5056_v3 = vsel %vm14615_vm0, %v12329_v54, %v4919_v4  ;;  %v5393_v18 = vpop.f32.mrf.mxu1 }
 0x671   : > { %5632 = vst.msk [vmem:[#allocation2 + $0x88] sm:$0xff] %vm14621_vm11, %v5555_v21  ;;  %5761 = vrot.lane.b32.xlu2 %v12451_v58, %s8616_s13  ;;  %vm14624_vm11 = vmmov %vm14615_vm0 }
 0x676   : > { %v5289_v34 = vpop.f32.mrf.mxu2  ;;  %v5467_v31 = vpop.f32.mrf.mxu3 }
 0x677   : > { %v12458_v5 = vadd.f32 %v12298_v37, %v5289_v34  ;;  %v5557_v44 = vadd.f32 %v12300_v32, %v5467_v31  ;;  %v5571_v37 = vpop.f32.mrf.mxu0  ;;  %v5396_v55 = vpop.f32.mrf.mxu1 }
 0x679   : > { %5634 = vst.msk [vmem:[#allocation2 + $0x98] sm:$0xff] %vm14622_vm10, %v5557_v44  ;;  %5763 = vrot.lane.b32.xlu0 %v12458_v5, %s8616_s13  ;;  %vm14625_vm10 = vmmov %vm14615_vm0 }
 0x67b   : > { %5331 = vmatmul.bf16.gmra.mxu2 %v5056_v3  ;;  %5509 = vmatmul.bf16.gmra.mxu3 %v5056_v3 }
 0x67e   : > { %v5292_v28 = vpop.f32.mrf.mxu2  ;;  %v5470_v47 = vpop.f32.mrf.mxu3 }
 0x67f   : > { %v12466_v41 = vadd.f32 %v5381_v63, %v5292_v28  ;;  %v5560_v46 = vadd.f32 %v5559_v36, %v5470_v47  ;;  %v5060_v63 = vsel %vm14625_vm10, %v12352_v27, %v4921_v14  ;;  %v5574_v36 = vpop.f32.mrf.mxu0  ;;  %v4923_v27 = vpop.permute.xlu2 %4922  ;;  %vm14628_vm10 = vmmov %vm14615_vm0 }
 0x681   : > { %5636 = vst.msk [vmem:[#allocation2 + $0xa8] sm:$0xff] %vm14623_vm5, %v5560_v46  ;;  %5765 = vrot.lane.b32.xlu2 %v12466_v41, %s8616_s13  ;;  %vm14626_vm5 = vmmov %vm14615_vm0 }
 0x686   : > { %v5294_v32 = vpop.f32.mrf.mxu2  ;;  %v5472_v7 = vpop.f32.mrf.mxu3 }
 0x687   : > { %v12471_v59 = vadd.f32 %v5383_v45, %v5294_v32  ;;  %v5562_v54 = vadd.f32 %v5561_v40, %v5472_v7  ;;  %v12483_v45 = vpop.f32.mrf.mxu1  ;;  %v12485_v40 = vpop.f32.mrf.mxu0 }
 0x689   : > { %5638 = vst.msk [vmem:[#allocation2 + $0xb8] sm:$0xff] %vm14624_vm11, %v5562_v54  ;;  %5767 = vrot.lane.b32.xlu0 %v12471_v59, %s8616_s13  ;;  %vm14627_vm11 = vmmov %vm14615_vm0 }
 0x68b   : > { %5336 = vmatmul.bf16.gmra.mxu2 %v5060_v63  ;;  %5514 = vmatmul.bf16.gmra.mxu3 %v5060_v63 }
 0x68e   : > { %v5297_v50 = vpop.f32.mrf.mxu2  ;;  %v5475_v38 = vpop.f32.mrf.mxu3 }
 0x68f   : > { %v12478_v11 = vadd.f32 %v5386_v2, %v5297_v50  ;;  %v5565_v35 = vadd.f32 %v5564_v15, %v5475_v38  ;;  %v5064_v2 = vsel %vm14627_vm11, %v12375_v39, %v4923_v27  ;;  %v12494_v15 = vpop.f32.mrf.mxu1  ;;  %v12496_v4 = vpop.f32.mrf.mxu0  ;;  %vm14630_vm11 = vmmov %vm14615_vm0 }
 0x690   : > { %v4925_v39 = vpop.permute.xlu0 %4924 }
 0x691   : > { %5640 = vst.msk [vmem:[#allocation2 + $0xc8] sm:$0xff] %vm14615_vm0, %v5565_v35  ;;  %5769 = vrot.lane.b32.xlu2 %v12478_v11, %s8616_s13 }
 0x696   : > { %v5299_v0 = vpop.f32.mrf.mxu2  ;;  %v5477_v43 = vpop.f32.mrf.mxu3 }
 0x697   : > { %v12487_v12 = vadd.f32 %v5388_v9, %v5299_v0  ;;  %v5567_v21 = vadd.f32 %v5566_v1, %v5477_v43  ;;  %v12503_v28 = vpop.f32.mrf.mxu1  ;;  %v12507_v32 = vpop.f32.mrf.mxu0  ;;  %v8364_v0 = vld [vmem:[%s13728_s3 + $0x2f0] sm:$0xf] }
 0x698   : > { %v8606_v43 = vld [vmem:[#allocation2 + $0x10] sm:$0xff] }
 0x699   : > { %5642 = vst.msk [vmem:[#allocation2 + $0xd8] sm:$0xff] %vm14626_vm5, %v5567_v21  ;;  %5771 = vrot.lane.b32.xlu0 %v12487_v12, %s8616_s13  ;;  %vm14629_vm5 = vmmov %vm14615_vm0 }
 0x69b   : > { %5341 = vmatmul.bf16.gmra.mxu2 %v5064_v2  ;;  %5519 = vmatmul.bf16.gmra.mxu3 %v5064_v2 }
 0x69e   : > { %v5302_v34 = vpop.f32.mrf.mxu2  ;;  %v5480_v31 = vpop.f32.mrf.mxu3 }
 0x69f   : > { %v12498_v44 = vadd.f32 %v5391_v13, %v5302_v34  ;;  %v5570_v9 = vadd.f32 %v5569_v30, %v5480_v31  ;;  %v8332_v13 = vld [vmem:[%s13728_s3 + $0x2b0] sm:$0xf]  ;;  %v8534_v30 = vld [vmem:[%s13728_s3 + $0x2b4] sm:$0xf0]  ;;  %v12522_v50 = vpop.f32.mrf.mxu1  ;;  %v12527_v35 = vpop.f32.mrf.mxu0  ;;  %v8366_v34 = vld [vmem:[%s13728_s3 + $0x2f8] sm:$0xf0] }
 0x6a0   : > { %v8333_v7 = vor.u32 %v8534_v30, %v8332_v13  ;;  %v5877_v31 = vld [vmem:[#allocation2 + $0x48] sm:$0xff]  ;;  %v8539_v30 = vld [vmem:[%s13728_s3 + $0x2e4] sm:$0xf] }
 0x6a1   : > { %5644 = vst.msk [vmem:[#allocation2 + $0xe8] sm:$0xff] %vm14628_vm10, %v5570_v9  ;;  %5773 = vrot.lane.b32.xlu2 %v12498_v44, %s8616_s13  ;;  %v8540_v13 = vld [vmem:[%s13728_s3 + $0x2e4] sm:$0xf0]  ;;  %vm14631_vm10 = vmmov %vm14615_vm0 }
 0x6a2   : > { %6888 = vmatpush.bf16.msrb.mxu2 %v8333_v7 }
 0x6a3   : > { %v5752_v38 = vpop.permute.xlu2 %5751 }
 0x6a4   : > { %v5846_v27 = vadd.f32 %v8606_v43, %v5752_v38  ;;  %v12560_v38 = vld [vmem:[%s13729_s4 + $0x2] ss:$0 sm:$0xff] }
 0x6a6   : > { %v5304_v1 = vpop.f32.mrf.mxu2  ;;  %v5482_v3 = vpop.f32.mrf.mxu3 }
 0x6a7   : > { %v12505_v47 = vadd.f32 %v5393_v18, %v5304_v1  ;;  %v5572_v46 = vadd.f32 %v5571_v37, %v5482_v3  ;;  %v5068_v18 = vsel %vm14629_vm5, %v12397_v56, %v4925_v39 }
 0x6a9   : > { %5646 = vst.msk [vmem:[#allocation2 + $0xf8] sm:$0xff] %vm14615_vm0, %v5572_v46  ;;  %5775 = vrot.lane.b32.xlu0 %v12505_v47, %s8616_s13  ;;  %v8356_v46 = vld [vmem:[%s13728_s3 + $0x2e0] sm:$0xf] }
 0x6ab   : > { %5346 = vmatmul.bf16.gmra.mxu2 %v5068_v18  ;;  %5524 = vmatmul.bf16.gmra.mxu3 %v5068_v18  ;;  %v5878_v18 = vld [vmem:[#allocation2 + $0x58] sm:$0xff] }
 0x6ae   : > { %v5307_v37 = vpop.f32.mrf.mxu2  ;;  %v5485_v14 = vpop.f32.mrf.mxu3 }
 0x6af   : > { %v12520_v54 = vadd.f32 %v5396_v55, %v5307_v37  ;;  %v5575_v63 = vadd.f32 %v5574_v36, %v5485_v14  ;;  %v8542_v55 = vld [vmem:[%s13728_s3 + $0x2f4] sm:$0xf0]  ;;  %v8541_v36 = vld [vmem:[%s13728_s3 + $0x2f4] sm:$0xf]  ;;  %v8357_v14 = vor.u32 %v8540_v13, %v8356_v46 }
 0x6b0   : > { %v8365_v2 = vor.u32 %v8542_v55, %v8364_v0  ;;  %v8369_v9 = vor.u32 %v8541_v36, %v8366_v34  ;;  %v8536_v34 = vld [vmem:[%s13728_s3 + $0x2c4] sm:$0xf0] }
 0x6b1   : > { %5648 = vst.msk [vmem:[#allocation2 + $0x108] sm:$0xff] %vm14630_vm11, %v5575_v63  ;;  %5777 = vrot.lane.b32.xlu2 %v12520_v54, %s8616_s13  ;;  %v8358_v63 = vld [vmem:[%s13728_s3 + $0x2e8] sm:$0xf0]  ;;  %vm14632_vm11 = vmmov %vm14631_vm10 }
 0x6b2   : > { %6981 = vmatpush.bf16.msrb.mxu1 %v8365_v2  ;;  %7159 = vmatpush.bf16.msra.mxu0 %v8369_v9  ;;  %v8361_v0 = vor.u32 %v8539_v30, %v8358_v63  ;;  %v8340_v2 = vld [vmem:[%s13728_s3 + $0x2c0] sm:$0xf] }
 0x6b3   : > { %v5750_v56 = vpop.permute.xlu1 %5749 }
 0x6b4   : > { %v5845_v21 = vadd.f32 %v8606_v43, %v5750_v56  ;;  %v5910_v56 = vadd.f32 %v5878_v18, %v5846_v27  ;;  %v8537_v43 = vld [vmem:[%s13728_s3 + $0x2d4] sm:$0xf]  ;;  %v12575_v27 = vpop.f32.mrf.mxu1  ;;  %v8341_v18 = vor.u32 %v8536_v34, %v8340_v2  ;;  %v5879_v2 = vld [vmem:[#allocation2 + $0x68] sm:$0xff] }
 0x6b5   : > { %v5881_v34 = vld [vmem:[#allocation2 + $0x88] sm:$0xff] }
 0x6b6   : > { %v5309_v1 = vpop.f32.mrf.mxu2  ;;  %v5487_v3 = vpop.f32.mrf.mxu3  ;;  %v5909_v39 = vadd.f32 %v5877_v31, %v5845_v21  ;;  %6982 = vmatpush.bf16.msrb.mxu1 %v8357_v14  ;;  %7160 = vmatpush.bf16.msra.mxu0 %v8361_v0  ;;  %v8350_v21 = vld [vmem:[%s13728_s3 + $0x2d8] sm:$0xf0]  ;;  %v5944_v31 = vadd.f32 %v12560_v38, %v5910_v56 }
 0x6b7   : > { %v12551_v7 = vadd.f32 %v12483_v45, %v5309_v1  ;;  %v5577_v37 = vadd.f32 %v12485_v40, %v5487_v3  ;;  %v8348_v45 = vld [vmem:[%s13728_s3 + $0x2d0] sm:$0xf]  ;;  %v8538_v40 = vld [vmem:[%s13728_s3 + $0x2d4] sm:$0xf0]  ;;  %v8353_v9 = vor.u32 %v8537_v43, %v8350_v21  ;;  %v8535_v1 = vld [vmem:[%s13728_s3 + $0x2c4] sm:$0xf] }
 0x6b8   : > { %v5943_v55 = vadd.f32 %v12560_v38, %v5909_v39  ;;  %v8349_v36 = vor.u32 %v8538_v40, %v8348_v45  ;;  %v8342_v3 = vld [vmem:[%s13728_s3 + $0x2c8] sm:$0xf0]  ;;  %v12593_v39 = vpop.f32.mrf.mxu0  ;;  %v6008_v56 = vmul.f32 0.1, %v5944_v31  ;;  %vm5976_vm5 = vcmp.ge.f32.partialorder %v5944_v31, 0.0 }
 0x6b9   : > { %5650 = vst.msk [vmem:[#allocation2 + $0x118] sm:$0xff] %vm14631_vm10, %v5577_v37  ;;  %5779 = vrot.lane.b32.xlu0 %v12551_v7, %s8616_s13  ;;  %v8345_v63 = vor.u32 %v8535_v1, %v8342_v3  ;;  %vm14633_vm10 = vcmp.lt.s32.totalorder %v14266_v29, 7 }
 0x6ba   : > { %v6007_v46 = vmul.f32 0.1, %v5943_v55  ;;  %6983 = vmatpush.bf16.msrb.mxu1 %v8349_v36  ;;  %vm5975_vm0 = vcmp.ge.f32.partialorder %v5943_v55, 0.0  ;;  %7161 = vmatpush.bf16.msra.mxu0 %v8353_v9 }
 0x6bb   : > { %v5758_v0 = vpop.permute.xlu2 %5757 }
 0x6bc   : > { %v12602_v45 = vsel %vm5975_vm0, %v5943_v55, %v6007_v46  ;;  %v5849_v40 = vadd.f32 %v5758_v0, %v12419_v26  ;;  %v12608_v43 = vpop.f32.mrf.mxu1  ;;  %vm14634_vm0 = vmmov %vm14632_vm11 }
 0x6bd   : > { %v13916_v21 = vrot.slane %v12602_v45, 1 }
 0x6be   : > { %v5312_v13 = vpop.f32.mrf.mxu2  ;;  %v5490_v30 = vpop.f32.mrf.mxu3  ;;  %6984 = vmatpush.bf16.msrb.mxu1 %v8341_v18  ;;  %7162 = vmatpush.bf16.msra.mxu0 %v8345_v63  ;;  %v5913_v26 = vadd.f32 %v5881_v34, %v5849_v40  ;;  %v8324_v18 = vld [vmem:[%s13728_s3 + $0x2a0] sm:$0xf] }
 0x6bf   : > { %v12596_v37 = vadd.f32 %v12494_v15, %v5312_v13  ;;  %v5580_v14 = vadd.f32 %v12496_v4, %v5490_v30  ;;  %v12605_v15 = vsel %vm5976_vm5, %v5944_v31, %v6008_v56 }
 0x6c0   : > { %v12611_v55 = vpop.f32.mrf.mxu0  ;;  %v6232_v46 = vrot.slane %v12605_v15, 1  ;;  %v5947_v63 = vadd.f32 %v12560_v38, %v5913_v26 }
 0x6c1   : > { %5652 = vst.msk [vmem:[#allocation2 + $0x128] sm:$0xff] %vm14632_vm11, %v5580_v14  ;;  %5781 = vrot.lane.b32.xlu2 %v12596_v37, %s8616_s13  ;;  %vm14635_vm11 = vmmov %vm14633_vm10 }
 0x6c2   : > { %v6293_v30 = vsel %vm14633_vm10, %v13916_v21, %v6232_v46  ;;  %vm5979_vm10 = vcmp.ge.f32.partialorder %v5947_v63, 0.0 }
 0x6c3   : > { %v5754_v36 = vpop.permute.xlu0 %5753  ;;  %v6295_v0 = vpack.c.bf16 %v6293_v30, %v6293_v30 }
 0x6c4   : > { %v5847_v4 = vadd.f32 %v5754_v36, %v12407_v6 }
 0x6c6   : > { %v5314_v9 = vpop.f32.mrf.mxu2  ;;  %v5492_v1 = vpop.f32.mrf.mxu3  ;;  %v5911_v3 = vadd.f32 %v5879_v2, %v5847_v4  ;;  %v5880_v2 = vld [vmem:[#allocation2 + $0x78] sm:$0xff] }
 0x6c7   : > { %v12615_v13 = vadd.f32 %v12503_v28, %v5314_v9  ;;  %v5582_v31 = vadd.f32 %v12507_v32, %v5492_v1  ;;  %v8532_v28 = vld [vmem:[%s13728_s3 + $0x2a4] sm:$0xf0] }
 0x6c8   : > { %v5945_v6 = vadd.f32 %v12560_v38, %v5911_v3  ;;  %v8325_v14 = vor.u32 %v8532_v28, %v8324_v18  ;;  %v12637_v3 = vpop.f32.mrf.mxu1 }
 0x6c9   : > { %5654 = vst.msk [vmem:[#allocation2 + $0x138] sm:$0xff] %vm14634_vm0, %v5582_v31  ;;  %5783 = vrot.lane.b32.xlu0 %v12615_v13, %s8616_s13  ;;  %v6011_v31 = vmul.f32 0.1, %v5947_v63 }
 0x6ca   : > { %vm5977_vm5 = vcmp.ge.f32.partialorder %v5945_v6, 0.0  ;;  %v6009_v32 = vmul.f32 0.1, %v5945_v6  ;;  %6889 = vmatpush.bf16.msrb.mxu2 %v8325_v14  ;;  %v12648_v14 = vpop.f32.mrf.mxu0 }
 0x6cb   : > { %v5756_v56 = vpop.permute.xlu1 %5755  ;;  %v5762_v30 = vpop.permute.xlu2 %5761 }
 0x6cc   : > { %v12633_v40 = vsel %vm5977_vm5, %v5945_v6, %v6009_v32  ;;  %v5848_v36 = vadd.f32 %v5756_v56, %v12412_v53  ;;  %v6327_v53 = vsel %vm8819_vm13, %v6295_v0, 0 }
 0x6cd   : > { %v6233_v4 = vrot.slane %v12633_v40, 1  ;;  %v6583_v56 = vunpack.c.l.b16 %v6327_v53 }
 0x6ce   : > { %v5317_v34 = vpop.f32.mrf.mxu2  ;;  %v5495_v9 = vpop.f32.mrf.mxu3  ;;  %v5912_v1 = vadd.f32 %v5880_v2, %v5848_v36  ;;  %v12656_v36 = vsel %vm5979_vm10, %v5947_v63, %v6011_v31  ;;  %vm14639_vm10 = vcmp.lt.s32.totalorder %v14266_v29, 7 }
 0x6cf   : > { %v6292_v18 = vsel %vm14635_vm11, %v6232_v46, %v6233_v4  ;;  %v12642_v26 = vadd.f32 %v12522_v50, %v5317_v34  ;;  %v5585_v6 = vadd.f32 %v12527_v35, %v5495_v9  ;;  %v5851_v35 = vadd.f32 %v5762_v30, %v12435_v51  ;;  %v5883_v34 = vld [vmem:[#allocation2 + $0xa8] sm:$0xff]  ;;  %vm14638_vm11 = vmmov %vm14634_vm0 }
 0x6d0   : > { %v6296_v28 = vpack.c.bf16 %v6292_v18, %v6292_v18  ;;  %v5946_v32 = vadd.f32 %v12560_v38, %v5912_v1  ;;  %v6235_v18 = vrot.slane %v12656_v36, 1  ;;  %v12672_v30 = vpop.f32.mrf.mxu1 }
 0x6d1   : > { %5656 = vst.msk [vmem:[#allocation2 + $0x148] sm:$0xff] %vm14634_vm0, %v5585_v6  ;;  %5785 = vrot.lane.b32.xlu2 %v12642_v26, %s8616_s13  ;;  %v5915_v6 = vadd.f32 %v5883_v34, %v5851_v35  ;;  %v5882_v35 = vld [vmem:[#allocation2 + $0x98] sm:$0xff] }
 0x6d2   : > { %v6328_v50 = vsel %vm8836_vm14, %v6296_v28, 0  ;;  %vm5978_vm5 = vcmp.ge.f32.partialorder %v5946_v32, 0.0  ;;  %v6010_v2 = vmul.f32 0.1, %v5946_v32  ;;  %vm14637_vm14 = vmmov %vm14634_vm0  ;;  %v5594_v53 = vpop.f32.mrf.mxu0 }
 0x6d3   : > { %v6584_v0 = vunpack.c.l.b16 %v6328_v50  ;;  %vm14640_vm0 = vmmov %vm14639_vm10 }
 0x6d4   : > { %v12658_v9 = vsel %vm5978_vm5, %v5946_v32, %v6010_v2  ;;  %vm14641_vm5 = vmmov %vm14638_vm11 }
 0x6d5   : > { %v6615_v1 = vpack.c.b16 %v6584_v0, %v6583_v56  ;;  %v6234_v21 = vrot.slane %v12658_v9, 1 }
 0x6d6   : > { %v5319_v62 = vpop.f32.mrf.mxu2  ;;  %v5497_v46 = vpop.f32.mrf.mxu3 }
 0x6d7   : > { %v12663_v28 = vadd.f32 %v12575_v27, %v5319_v62  ;;  %v5587_v51 = vadd.f32 %v12593_v39, %v5497_v46  ;;  %8370 = vmatmul.msk.bf16.vlgmr.msrb.gmra.mxu1 %vm14637_vm14, %v6615_v1  ;;  %8386 = vmatmul.msk.bf16.vlgmr.msra.gmra.mxu0 %vm14638_vm11, %v6615_v1  ;;  %v6290_v63 = vsel %vm14639_vm10, %v6234_v21, %v6235_v18  ;;  %vm14643_vm11 = vmmov %vm14641_vm5 }
 0x6d8   : > { %v6291_v31 = vsel %vm14640_vm0, %v6233_v4, %v6234_v21  ;;  %v5949_v62 = vadd.f32 %v12560_v38, %v5915_v6  ;;  %v6298_v39 = vpack.c.bf16 %v6290_v63, %v6290_v63  ;;  %vm14645_vm0 = vmmov %vm14641_vm5 }
 0x6d9   : > { %5658 = vst.msk [vmem:[#allocation2 + $0x158] sm:$0xff] %vm14641_vm5, %v5587_v51  ;;  %5787 = vrot.lane.b32.xlu0 %v12663_v28, %s8616_s13  ;;  %v6297_v27 = vpack.c.bf16 %v6291_v31, %v6291_v31 }
 0x6da   : > { %v6013_v56 = vmul.f32 0.1, %v5949_v62  ;;  %v6330_v1 = vsel %vm14469_vm12, %v6298_v39, 0  ;;  %vm5981_vm14 = vcmp.ge.f32.partialorder %v5949_v62, 0.0  ;;  %vm14644_vm12 = vmmov %vm14641_vm5  ;;  %vm14646_vm5 = vcmp.lt.s32.totalorder %v14266_v29, 7 }
 0x6db   : > { %v5760_v32 = vpop.permute.xlu0 %5759  ;;  %v6329_v4 = vsel %vm8819_vm13, %v6297_v27, 0  ;;  %v5766_v51 = vpop.permute.xlu2 %5765  ;;  %v6586_v31 = vunpack.c.l.b16 %v6330_v1 }
 0x6dc   : > { %v5850_v50 = vadd.f32 %v5760_v32, %v12426_v20  ;;  %v6585_v63 = vunpack.c.l.b16 %v6329_v4  ;;  %v12691_v27 = vsel %vm5981_vm14, %v5949_v62, %v6013_v56  ;;  %v5853_v32 = vadd.f32 %v5766_v51, %v12451_v58  ;;  %vm14647_vm14 = vmmov %vm14646_vm5 }
 0x6de   : > { %v5322_v0 = vpop.f32.mrf.mxu2  ;;  %v5500_v2 = vpop.f32.mrf.mxu3  ;;  %v5914_v21 = vadd.f32 %v5882_v35, %v5850_v50  ;;  %v6237_v35 = vrot.slane %v12691_v27, 1 }
 0x6df   : > { %v12684_v6 = vadd.f32 %v12608_v43, %v5322_v0  ;;  %v5590_v46 = vadd.f32 %v12611_v55, %v5500_v2  ;;  %v5418_v43 = vpop.f32.mrf.mxu1  ;;  %v5596_v55 = vpop.f32.mrf.mxu0  ;;  %v5885_v2 = vld [vmem:[#allocation2 + $0xc8] sm:$0xff] }
 0x6e0   : > { %v5948_v20 = vadd.f32 %v12560_v38, %v5914_v21  ;;  %v6616_v21 = vpack.c.b16 %v6586_v31, %v6585_v63  ;;  %v5917_v34 = vadd.f32 %v5885_v2, %v5853_v32 }
 0x6e1   : > { %5660 = vst.msk [vmem:[#allocation2 + $0x168] sm:$0xff] %vm14643_vm11, %v5590_v46  ;;  %5789 = vrot.lane.b32.xlu2 %v12684_v6, %s8616_s13  ;;  %vm14648_vm11 = vmmov %vm14645_vm0 }
 0x6e2   : > { %vm5980_vm10 = vcmp.ge.f32.partialorder %v5948_v20, 0.0  ;;  %v6012_v39 = vmul.f32 0.1, %v5948_v20  ;;  %v5951_v51 = vadd.f32 %v12560_v38, %v5917_v34 }
 0x6e4   : > { %v12694_v50 = vsel %vm5980_vm10, %v5948_v20, %v6012_v39  ;;  %v6015_v2 = vmul.f32 0.1, %v5951_v51  ;;  %vm5983_vm10 = vcmp.ge.f32.partialorder %v5951_v51, 0.0 }
 0x6e5   : > { %v6236_v0 = vrot.slane %v12694_v50, 1 }
 0x6e6   : > { %v5324_v46 = vpop.f32.mrf.mxu2  ;;  %v5502_v4 = vpop.f32.mrf.mxu3 }
 0x6e7   : > { %v12699_v62 = vadd.f32 %v12637_v3, %v5324_v46  ;;  %v5592_v56 = vadd.f32 %v12648_v14, %v5502_v4  ;;  %8371 = vmatmul.msk.bf16.gmra.mxu1 %vm14644_vm12, %v6616_v21  ;;  %8387 = vmatmul.msk.bf16.gmra.mxu0 %vm14645_vm0, %v6616_v21  ;;  %v6288_v58 = vsel %vm14646_vm5, %v6236_v0, %v6237_v35  ;;  %v8316_v3 = vld [vmem:[%s13728_s3 + $0x290] sm:$0xf]  ;;  %v8530_v14 = vld [vmem:[%s13728_s3 + $0x294] sm:$0xf0]  ;;  %v5421_v32 = vpop.f32.mrf.mxu1  ;;  %v5599_v34 = vpop.f32.mrf.mxu0  ;;  %vm14650_vm12 = vmmov %vm14645_vm0 }
 0x6e8   : > { %v6289_v1 = vsel %vm14647_vm14, %v6235_v18, %v6236_v0  ;;  %v6300_v63 = vpack.c.bf16 %v6288_v58, %v6288_v58  ;;  %v8317_v31 = vor.u32 %v8530_v14, %v8316_v3  ;;  %v5884_v0 = vld [vmem:[#allocation2 + $0xb8] sm:$0xff] }
 0x6e9   : > { %5662 = vst.msk [vmem:[#allocation2 + $0x178] sm:$0xff] %vm14648_vm11, %v5592_v56  ;;  %5791 = vrot.lane.b32.xlu0 %v12699_v62, %s8616_s13  ;;  %v6299_v20 = vpack.c.bf16 %v6289_v1, %v6289_v1 }
 0x6ea   : > { %6890 = vmatpush.bf16.msrb.mxu2 %v8317_v31  ;;  %v6332_v61 = vsel %vm9041_vm6, %v6300_v63, 0  ;;  %vm14652_vm6 = vmmov %vm14648_vm11 }
 0x6eb   : > { %v5764_v39 = vpop.permute.xlu0 %5763  ;;  %v6331_v56 = vsel %vm8819_vm13, %v6299_v20, 0  ;;  %v6588_v31 = vunpack.c.l.b16 %v6332_v61  ;;  %v12730_v20 = vsel %vm5983_vm10, %v5951_v51, %v6015_v2  ;;  %vm14653_vm5 = vmmov %vm14652_vm6 }
 0x6ec   : > { %v5852_v18 = vadd.f32 %v5764_v39, %v12442_v42  ;;  %v5770_v42 = vpop.permute.xlu2 %5769  ;;  %v6587_v14 = vunpack.c.l.b16 %v6331_v56  ;;  %vm14654_vm11 = vmmov %vm14647_vm14 }
 0x6ed   : > { %v5855_v63 = vadd.f32 %v5770_v42, %v12466_v41  ;;  %vm14655_vm10 = vmmov %vm14653_vm5 }
 0x6ee   : > { %v5327_v21 = vpop.f32.mrf.mxu2  ;;  %v5505_v46 = vpop.f32.mrf.mxu3  ;;  %v5916_v4 = vadd.f32 %v5884_v0, %v5852_v18  ;;  %v5887_v18 = vld [vmem:[#allocation2 + $0xe8] sm:$0xff]  ;;  %v6617_v0 = vpack.c.b16 %v6588_v31, %v6587_v14  ;;  %v5886_v31 = vld [vmem:[#allocation2 + $0xd8] sm:$0xff] }
 0x6ef   : > { %v12724_v58 = vadd.f32 %v12672_v30, %v5327_v21  ;;  %v5595_v1 = vadd.f32 %v5594_v53, %v5505_v46  ;;  %v6239_v30 = vrot.slane %v12730_v20, 1  ;;  %v5919_v21 = vadd.f32 %v5887_v18, %v5855_v63  ;;  %v5601_v56 = vpop.f32.mrf.mxu0 }
 0x6f0   : > { %v5950_v3 = vadd.f32 %v12560_v38, %v5916_v4 }
 0x6f1   : > { %5664 = vst.msk [vmem:[#allocation2 + $0x188] sm:$0xff] %vm14650_vm12, %v5595_v1  ;;  %5793 = vrot.lane.b32.xlu2 %v12724_v58, %s8616_s13  ;;  %v12737_v1 = vpop.f32.mrf.mxu1 }
 0x6f2   : > { %vm5982_vm0 = vcmp.ge.f32.partialorder %v5950_v3, 0.0  ;;  %v6014_v49 = vmul.f32 0.1, %v5950_v3 }
 0x6f4   : > { %v12733_v39 = vsel %vm5982_vm0, %v5950_v3, %v6014_v49  ;;  %vm14658_vm0 = vmmov %vm14653_vm5 }
 0x6f5   : > { %v6238_v53 = vrot.slane %v12733_v39, 1 }
 0x6f6   : > { %v5329_v46 = vpop.f32.mrf.mxu2  ;;  %v5507_v4 = vpop.f32.mrf.mxu3 }
 0x6f7   : > { %v12739_v61 = vadd.f32 %v5418_v43, %v5329_v46  ;;  %v5597_v51 = vadd.f32 %v5596_v55, %v5507_v4  ;;  %8372 = vmatmul.msk.bf16.gmra.mxu1 %vm14652_vm6, %v6617_v0  ;;  %8388 = vmatmul.msk.bf16.gmra.mxu0 %vm14653_vm5, %v6617_v0  ;;  %v6286_v41 = vsel %vm14647_vm14, %v6238_v53, %v6239_v30  ;;  %vm14660_vm5 = vmmov %vm14658_vm0 }
 0x6f8   : > { %v6287_v2 = vsel %vm14654_vm11, %v6237_v35, %v6238_v53  ;;  %v5953_v43 = vadd.f32 %v12560_v38, %v5919_v21  ;;  %v6302_v55 = vpack.c.bf16 %v6286_v41, %v6286_v41  ;;  %vm14661_vm14 = vmmov %vm14654_vm11 }
 0x6f9   : > { %14651 = vst [vmem:[#allocation22_spill] sm:$0xff] %v12739_v61  ;;  %5795 = vrot.lane.b32.xlu0 %v12739_v61, %s8616_s13  ;;  %v6301_v42 = vpack.c.bf16 %v6287_v2, %v6287_v2  ;;  %v5426_v2 = vpop.f32.mrf.mxu1 }
 0x6fa   : > { %5666 = vst.msk [vmem:[#allocation2 + $0x198] sm:$0xff] %vm14655_vm10, %v5597_v51  ;;  %v6017_v49 = vmul.f32 0.1, %v5953_v43  ;;  %v6334_v46 = vsel %vm9140_vm3, %v6302_v55, 0  ;;  %vm5985_vm12 = vcmp.ge.f32.partialorder %v5953_v43, 0.0  ;;  %vm14659_vm3 = vmmov %vm14658_vm0 }
 0x6fb   : > { %v5768_v3 = vpop.permute.xlu0 %5767  ;;  %v6333_v35 = vsel %vm8819_vm13, %v6301_v42, 0  ;;  %v5774_v51 = vpop.permute.xlu2 %5773  ;;  %vm14662_vm10 = vmmov %vm14658_vm0 }
 0x6fc   : > { %v5854_v14 = vadd.f32 %v5768_v3, %v12458_v5  ;;  %v6589_v5 = vunpack.c.l.b16 %v6333_v35  ;;  %v6590_v3 = vunpack.c.l.b16 %v6334_v46  ;;  %v5857_v55 = vadd.f32 %v5774_v51, %v12478_v11 }
 0x6fe   : > { %v5332_v63 = vpop.f32.mrf.mxu2  ;;  %v5510_v18 = vpop.f32.mrf.mxu3  ;;  %v5918_v0 = vadd.f32 %v5886_v31, %v5854_v14  ;;  %v12762_v14 = vsel %vm5985_vm12, %v5953_v43, %v6017_v49  ;;  %v8308_v49 = vld [vmem:[%s13728_s3 + $0x280] sm:$0xf] }
 0x6ff   : > { %v12756_v4 = vadd.f32 %v5421_v32, %v5332_v63  ;;  %v5600_v21 = vadd.f32 %v5599_v34, %v5510_v18  ;;  %v5604_v32 = vpop.f32.mrf.mxu0  ;;  %v13917_v34 = vrot.slane %v12762_v14, 1  ;;  %v5889_v18 = vld [vmem:[#allocation2 + $0x108] sm:$0xff] }
 0x700   : > { %v5952_v41 = vadd.f32 %v12560_v38, %v5918_v0  ;;  %v6618_v0 = vpack.c.b16 %v6590_v3, %v6589_v5  ;;  %v5921_v53 = vadd.f32 %v5889_v18, %v5857_v55 }
 0x701   : > { %14657 = vst [vmem:[#allocation9_spill] sm:$0xff] %v12756_v4  ;;  %5797 = vrot.lane.b32.xlu0 %v12756_v4, %s8616_s13  ;;  %v12793_v55 = vpop.f32.mrf.mxu1 }
 0x702   : > { %5668 = vst.msk [vmem:[#allocation2 + $0x1a8] sm:$0xff] %vm14658_vm0, %v5600_v21  ;;  %vm5984_vm6 = vcmp.ge.f32.partialorder %v5952_v41, 0.0  ;;  %v6016_v42 = vmul.f32 0.1, %v5952_v41  ;;  %v5955_v51 = vadd.f32 %v12560_v38, %v5921_v53  ;;  %v5888_v53 = vld [vmem:[#allocation2 + $0xf8] sm:$0xff] }
 0x704   : > { %v12765_v31 = vsel %vm5984_vm6, %v5952_v41, %v6016_v42  ;;  %v8533_v42 = vld [vmem:[%s13728_s3 + $0x2b4] sm:$0xf]  ;;  %vm5987_vm12 = vcmp.ge.f32.partialorder %v5955_v51, 0.0 }
 0x705   : > { %v6240_v63 = vrot.slane %v12765_v31, 1 }
 0x706   : > { %v12769_v21 = vpop.f32.mrf.mxu2  ;;  %v5512_v35 = vpop.f32.mrf.mxu3 }
 0x707   : > { %v5602_v46 = vadd.f32 %v5601_v56, %v5512_v35  ;;  %8373 = vmatmul.msk.bf16.gmra.mxu1 %vm14659_vm3, %v6618_v0  ;;  %8389 = vmatmul.msk.bf16.gmra.mxu0 %vm14660_vm5, %v6618_v0  ;;  %v6284_v11 = vsel %vm14661_vm14, %v6240_v63, %v13917_v34  ;;  %v6285_v43 = vsel %vm14654_vm11, %v6239_v30, %v6240_v63  ;;  %v8528_v56 = vld [vmem:[%s13728_s3 + $0x284] sm:$0xf0]  ;;  %v8334_v30 = vld [vmem:[%s13728_s3 + $0x2b8] sm:$0xf0]  ;;  %v5606_v35 = vpop.f32.mrf.mxu0  ;;  %vm14666_vm3 = vmmov %vm14658_vm0 }
 0x708   : > { %v6303_v41 = vpack.c.bf16 %v6285_v43, %v6285_v43  ;;  %v6304_v5 = vpack.c.bf16 %v6284_v11, %v6284_v11  ;;  %v8309_v3 = vor.u32 %v8528_v56, %v8308_v49  ;;  %v8337_v18 = vor.u32 %v8533_v42, %v8334_v30  ;;  %vm14667_vm5 = vmmov %vm14654_vm11 }
 0x709   : > { %5670 = vst.msk [vmem:[#allocation2 + $0x1b8] sm:$0xff] %vm14662_vm10, %v5602_v46  ;;  %v6019_v46 = vmul.f32 0.1, %v5955_v51  ;;  %vm14669_vm14 = vmmov %vm14667_vm5 }
 0x70a   : > { %6891 = vmatpush.bf16.msrb.mxu2 %v8309_v3  ;;  %7066 = vmatpush.bf16.msra.mxu3 %v8337_v18  ;;  %v6335_v56 = vsel %vm8819_vm13, %v6303_v41, 0  ;;  %v6336_v57 = vsel %vm9311_vm2, %v6304_v5, 0  ;;  %vm14665_vm2 = vmmov %vm14658_vm0 }
 0x70b   : > { %v5772_v63 = vpop.permute.xlu0 %5771  ;;  %v5778_v30 = vpop.permute.xlu2 %5777  ;;  %v6591_v3 = vunpack.c.l.b16 %v6335_v56  ;;  %v12806_v18 = vsel %vm5987_vm12, %v5955_v51, %v6019_v46  ;;  %v14668_v46 = vrot.slane %v12762_v14, 1  ;;  %vm14670_vm11 = vmmov %vm14658_vm0 }
 0x70c   : > { %v5856_v0 = vadd.f32 %v5772_v63, %v12471_v59  ;;  %v6592_v63 = vunpack.c.l.b16 %v6336_v57  ;;  %v5859_v34 = vadd.f32 %v5778_v30, %v12498_v44  ;;  %vm14673_vm12 = vmmov %vm14658_vm0 }
 0x70e   : > { %v5337_v11 = vpop.f32.mrf.mxu2  ;;  %v5515_v43 = vpop.f32.mrf.mxu3  ;;  %v5920_v49 = vadd.f32 %v5888_v53, %v5856_v0  ;;  %v5891_v53 = vld [vmem:[#allocation2 + $0x128] sm:$0xff] }
 0x70f   : > { %v12800_v23 = vadd.f32 %v5426_v2, %v5337_v11  ;;  %v5605_v42 = vadd.f32 %v5604_v32, %v5515_v43  ;;  %v5431_v2 = vpop.f32.mrf.mxu1  ;;  %v6243_v32 = vrot.slane %v12806_v18, 1  ;;  %v6619_v11 = vpack.c.b16 %v6592_v63, %v6591_v3  ;;  %v5609_v57 = vpop.f32.mrf.mxu0 }
 0x710   : > { %v5954_v59 = vadd.f32 %v12560_v38, %v5920_v49  ;;  %v5923_v43 = vadd.f32 %v5891_v53, %v5859_v34 }
 0x711   : > { %14664 = vst [vmem:[#allocation15_spill] sm:$0xff] %v12800_v23  ;;  %5801 = vrot.lane.b32.xlu0 %v12800_v23, %s8616_s13  ;;  %v5892_v23 = vld [vmem:[#allocation2 + $0x138] sm:$0xff] }
 0x712   : > { %5672 = vst.msk [vmem:[#allocation2 + $0x1c8] sm:$0xff] %vm14658_vm0, %v5605_v42  ;;  %vm5986_vm6 = vcmp.ge.f32.partialorder %v5954_v59, 0.0  ;;  %v6018_v41 = vmul.f32 0.1, %v5954_v59  ;;  %v5957_v30 = vadd.f32 %v12560_v38, %v5923_v43 }
 0x714   : > { %v12809_v5 = vsel %vm5986_vm6, %v5954_v59, %v6018_v41  ;;  %v5890_v41 = vld [vmem:[#allocation2 + $0x118] sm:$0xff]  ;;  %v6021_v34 = vmul.f32 0.1, %v5957_v30  ;;  %vm5989_vm10 = vcmp.ge.f32.partialorder %v5957_v30, 0.0  ;;  %vm14674_vm6 = vmmov %vm14658_vm0 }
 0x715   : > { %v6242_v0 = vrot.slane %v12809_v5, 1 }
 0x716   : > { %v12813_v49 = vpop.f32.mrf.mxu2  ;;  %v5517_v56 = vpop.f32.mrf.mxu3 }
 0x717   : > { %v5607_v51 = vadd.f32 %v5606_v35, %v5517_v56  ;;  %8374 = vmatmul.msk.bf16.gmra.mxu1 %vm14665_vm2, %v6619_v11  ;;  %8390 = vmatmul.msk.bf16.gmra.mxu0 %vm14666_vm3, %v6619_v11  ;;  %v6282_v44 = vsel %vm14667_vm5, %v6242_v0, %v6243_v32  ;;  %v6283_v42 = vsel %vm14669_vm14, %v14668_v46, %v6242_v0  ;;  %vm14675_vm2 = vmmov %vm14667_vm5 }
 0x718   : > { %v6305_v59 = vpack.c.bf16 %v6283_v42, %v6283_v42  ;;  %v6306_v3 = vpack.c.bf16 %v6282_v44, %v6282_v44  ;;  %v12832_v44 = vpop.f32.mrf.mxu1  ;;  %v5611_v42 = vpop.f32.mrf.mxu0  ;;  %vm14676_vm3 = vmmov %vm14675_vm2 }
 0x719   : > { %5674 = vst.msk [vmem:[#allocation2 + $0x1d8] sm:$0xff] %vm14670_vm11, %v5607_v51  ;;  %vm14677_vm5 = vmmov %vm14658_vm0 }
 0x71a   : > { %v6337_v10 = vsel %vm8819_vm13, %v6305_v59, 0  ;;  %v6338_v0 = vsel %vm9454_vm1, %v6306_v3, 0  ;;  %vm14679_vm11 = vmmov %vm14658_vm0 }
 0x71b   : > { %v5776_v63 = vpop.permute.xlu0 %5775  ;;  %v5782_v46 = vpop.permute.xlu2 %5781  ;;  %v6594_v59 = vunpack.c.l.b16 %v6338_v0 }
 0x71c   : > { %v5858_v35 = vadd.f32 %v5776_v63, %v12487_v12  ;;  %v6593_v63 = vunpack.c.l.b16 %v6337_v10  ;;  %v8300_v10 = vld [vmem:[%s13728_s3 + $0x270] sm:$0xf] }
 0x71e   : > { %v5342_v53 = vpop.f32.mrf.mxu2  ;;  %v5520_v11 = vpop.f32.mrf.mxu3  ;;  %v5922_v56 = vadd.f32 %v5890_v41, %v5858_v35  ;;  %v12838_v35 = vsel %vm5989_vm10, %v5957_v30, %v6021_v34  ;;  %v8531_v30 = vld [vmem:[%s13728_s3 + $0x2a4] sm:$0xf] }
 0x71f   : > { %v12830_v51 = vadd.f32 %v5431_v2, %v5342_v53  ;;  %v5610_v43 = vadd.f32 %v5609_v57, %v5520_v11  ;;  %v5861_v2 = vadd.f32 %v5782_v46, %v12520_v54  ;;  %v13919_v3 = vrot.slane %v12838_v35, 1  ;;  %v5893_v53 = vld [vmem:[#allocation2 + $0x148] sm:$0xff]  ;;  %v8526_v54 = vld [vmem:[%s13728_s3 + $0x274] sm:$0xf0] }
 0x720   : > { %v5956_v12 = vadd.f32 %v12560_v38, %v5922_v56  ;;  %v6620_v11 = vpack.c.b16 %v6594_v59, %v6593_v63  ;;  %v8326_v46 = vld [vmem:[%s13728_s3 + $0x2a8] sm:$0xf0]  ;;  %v8301_v63 = vor.u32 %v8526_v54, %v8300_v10 }
 0x721   : > { %14672 = vst [vmem:[#allocation3_spill] sm:$0xff] %v12830_v51  ;;  %5805 = vrot.lane.b32.xlu0 %v12830_v51, %s8616_s13  ;;  %v5925_v56 = vadd.f32 %v5893_v53, %v5861_v2  ;;  %v8329_v59 = vor.u32 %v8531_v30, %v8326_v46  ;;  %v5614_v53 = vpop.f32.mrf.mxu0 }
 0x722   : > { %5676 = vst.msk [vmem:[#allocation2 + $0x1e8] sm:$0xff] %vm14673_vm12, %v5610_v43  ;;  %vm5988_vm1 = vcmp.ge.f32.partialorder %v5956_v12, 0.0  ;;  %v6020_v61 = vmul.f32 0.1, %v5956_v12  ;;  %6892 = vmatpush.bf16.msrb.mxu2 %v8301_v63  ;;  %vm14681_vm12 = vmmov %vm14658_vm0 }
 0x723   : > { %7067 = vmatpush.bf16.msra.mxu3 %v8329_v59 }
 0x724   : > { %v12841_v57 = vsel %vm5988_vm1, %v5956_v12, %v6020_v61  ;;  %vm14682_vm1 = vmmov %vm14675_vm2 }
 0x725   : > { %v6244_v41 = vrot.slane %v12841_v57, 1 }
 0x726   : > { %v12845_v43 = vpop.f32.mrf.mxu2  ;;  %v5522_v60 = vpop.f32.mrf.mxu3 }
 0x727   : > { %v5612_v34 = vadd.f32 %v5611_v42, %v5522_v60  ;;  %8375 = vmatmul.msk.bf16.gmra.mxu1 %vm14658_vm0, %v6620_v11  ;;  %8391 = vmatmul.msk.bf16.gmra.mxu0 %vm14674_vm6, %v6620_v11  ;;  %v6280_v0 = vsel %vm14675_vm2, %v6244_v41, %v13919_v3  ;;  %v6281_v12 = vsel %vm14676_vm3, %v6243_v32, %v6244_v41  ;;  %v12868_v60 = vpop.f32.mrf.mxu1  ;;  %vm14685_vm6 = vmmov %vm14677_vm5 }
 0x728   : > { %v5959_v42 = vadd.f32 %v12560_v38, %v5925_v56  ;;  %v6307_v61 = vpack.c.bf16 %v6281_v12, %v6281_v12  ;;  %v6308_v2 = vpack.c.bf16 %v6280_v0, %v6280_v0 }
 0x729   : > { %5678 = vst.msk [vmem:[#allocation2 + $0x1f8] sm:$0xff] %vm14677_vm5, %v5612_v34 }
 0x72a   : > { %v6023_v51 = vmul.f32 0.1, %v5959_v42  ;;  %v6339_v10 = vsel %vm8819_vm13, %v6307_v61, 0  ;;  %v6340_v56 = vsel %vm14311_vm8, %v6308_v2, 0  ;;  %vm5991_vm14 = vcmp.ge.f32.partialorder %v5959_v42, 0.0  ;;  %v5616_v61 = vpop.f32.mrf.mxu0  ;;  %vm14680_vm8 = vmmov %vm14658_vm0 }
 0x72b   : > { %v5780_v11 = vpop.permute.xlu0 %5779  ;;  %v5786_v34 = vpop.permute.xlu2 %5785  ;;  %v6596_v46 = vunpack.c.l.b16 %v6340_v56  ;;  %vm14684_vm0 = vmmov %vm14682_vm1 }
 0x72c   : > { %v5860_v3 = vadd.f32 %v5780_v11, %v12505_v47  ;;  %v6595_v47 = vunpack.c.l.b16 %v6339_v10  ;;  %v12880_v12 = vsel %vm5991_vm14, %v5959_v42, %v6023_v51  ;;  %v5895_v11 = vld [vmem:[#allocation2 + $0x168] sm:$0xff]  ;;  %v6071_v51 = vpack.c.bf16 %v12602_v45, %v12602_v45  ;;  %vm14688_vm14 = vmmov %vm14684_vm0 }
 0x72d   : > { %v6247_v2 = vrot.slane %v12880_v12, 1 }
 0x72e   : > { %v12872_v4 = vpop.f32.mrf.mxu2  ;;  %v5525_v32 = vpop.f32.mrf.mxu3  ;;  %v5924_v41 = vadd.f32 %v5892_v23, %v5860_v3  ;;  %v5863_v23 = vadd.f32 %v5786_v34, %v12596_v37 }
 0x72f   : > { %v5615_v30 = vadd.f32 %v5614_v53, %v5525_v32  ;;  %v5438_v59 = vpop.f32.mrf.mxu1  ;;  %v6621_v32 = vpack.c.b16 %v6596_v46, %v6595_v47 }
 0x730   : > { %v5958_v0 = vadd.f32 %v12560_v38, %v5924_v41  ;;  %v5927_v41 = vadd.f32 %v5895_v11, %v5863_v23  ;;  %v5894_v11 = vld [vmem:[#allocation2 + $0x158] sm:$0xff] }
 0x731   : > { %5680 = vst.msk [vmem:[#allocation2 + $0x208] sm:$0xff] %vm14679_vm11, %v5615_v30  ;;  %v14683_v30 = vrot.slane %v12838_v35, 1  ;;  %vm14689_vm11 = vmmov %vm14684_vm0 }
 0x732   : > { %vm5990_vm10 = vcmp.ge.f32.partialorder %v5958_v0, 0.0  ;;  %v6022_v63 = vmul.f32 0.1, %v5958_v0  ;;  %v5961_v47 = vadd.f32 %v12560_v38, %v5927_v41 }
 0x734   : > { %v12883_v3 = vsel %vm5990_vm10, %v5958_v0, %v6022_v63  ;;  %v6072_v0 = vpack.c.bf16 %v12605_v15, %v12605_v15  ;;  %vm5993_vm2 = vcmp.ge.f32.partialorder %v5961_v47, 0.0 }
 0x735   : > { %v6246_v53 = vrot.slane %v12883_v3, 1 }
 0x736   : > { %v5349_v54 = vpop.f32.mrf.mxu2  ;;  %v5527_v10 = vpop.f32.mrf.mxu3 }
 0x737   : > { %v5439_v42 = vadd.f32 %v5438_v59, %v5349_v54  ;;  %v5617_v56 = vadd.f32 %v5616_v61, %v5527_v10  ;;  %8376 = vmatmul.msk.bf16.gmra.mxu1 %vm14680_vm8, %v6621_v32  ;;  %8392 = vmatmul.msk.bf16.gmra.mxu0 %vm14681_vm12, %v6621_v32  ;;  %v6278_v37 = vsel %vm14682_vm1, %v6246_v53, %v6247_v2  ;;  %v6471_v59 = vunpack.c.l.b16 %v6071_v51  ;;  %vm14691_vm12 = vmmov %vm14677_vm5 }
 0x738   : > { %v6279_v34 = vsel %vm14684_vm0, %v14683_v30, %v6246_v53  ;;  %v6310_v63 = vpack.c.bf16 %v6278_v37, %v6278_v37  ;;  %v6472_v32 = vunpack.c.l.b16 %v6072_v0  ;;  %v6074_v53 = vpack.c.bf16 %v12658_v9, %v12658_v9  ;;  %vm14692_vm1 = vmmov %vm14684_vm0 }
 0x739   : > { %5682 = vst.msk [vmem:[#allocation2 + $0x218] sm:$0xff] %vm14685_vm6, %v5617_v56  ;;  %5811 = vrot.lane.b32.xlu1 %v5439_v42, %s8616_s13  ;;  %v6309_v46 = vpack.c.bf16 %v6279_v34, %v6279_v34  ;;  %v6025_v54 = vmul.f32 0.1, %v5961_v47 }
 0x73a   : > { %v6342_v30 = vsel %vm14503_vm9, %v6310_v63, 0  ;;  %v6503_v37 = vpack.c.b16 %v6472_v32, %v6471_v59  ;;  %vm14687_vm9 = vmmov %vm14677_vm5 }
 0x73b   : > { %v5784_v23 = vpop.permute.xlu0 %5783  ;;  %v6341_v42 = vsel %vm8819_vm13, %v6309_v46, 0  ;;  %v5790_v41 = vpop.permute.xlu2 %5789  ;;  %v6598_v0 = vunpack.c.l.b16 %v6342_v30  ;;  %v8529_v30 = vld [vmem:[%s13728_s3 + $0x294] sm:$0xf] }
 0x73c   : > { %v5862_v61 = vadd.f32 %v5784_v23, %v12551_v7  ;;  %v6073_v7 = vpack.c.bf16 %v12633_v40, %v12633_v40  ;;  %v6597_v34 = vunpack.c.l.b16 %v6341_v42  ;;  %v6474_v23 = vunpack.c.l.b16 %v6074_v53  ;;  %v8292_v42 = vld [vmem:[%s13728_s3 + $0x260] sm:$0xf] }
 0x73e   : > { %v5926_v10 = vadd.f32 %v5894_v11, %v5862_v61  ;;  %v12913_v61 = vsel %vm5993_vm2, %v5961_v47, %v6025_v54  ;;  %v5865_v11 = vadd.f32 %v5790_v41, %v12642_v26  ;;  %v6473_v56 = vunpack.c.l.b16 %v6073_v7  ;;  %v8524_v26 = vld [vmem:[%s13728_s3 + $0x264] sm:$0xf0]  ;;  %v8318_v41 = vld [vmem:[%s13728_s3 + $0x298] sm:$0xf0] }
 0x73f   : > { %v13923_v59 = vrot.slane %v12913_v61, 1  ;;  %v6622_v48 = vpack.c.b16 %v6598_v0, %v6597_v34  ;;  %v6076_v54 = vpack.c.bf16 %v12694_v50, %v12694_v50  ;;  %v8293_v7 = vor.u32 %v8524_v26, %v8292_v42 }
 0x740   : > { %v5960_v51 = vadd.f32 %v12560_v38, %v5926_v10  ;;  %v5897_v10 = vld [vmem:[#allocation2 + $0x188] sm:$0xff]  ;;  %v6504_v47 = vpack.c.b16 %v6474_v23, %v6473_v56  ;;  %v6075_v34 = vpack.c.bf16 %v12656_v36, %v12656_v36  ;;  %v8321_v0 = vor.u32 %v8529_v30, %v8318_v41 }
 0x741   : > { %6519 = vrot.lane.b32.xlu1 %v6503_v37, %s8616_s13  ;;  %v5929_v53 = vadd.f32 %v5897_v10, %v5865_v11  ;;  %6893 = vmatpush.bf16.msrb.mxu2 %v8293_v7  ;;  %v6476_v56 = vunpack.c.l.b16 %v6076_v54  ;;  %v6089_v7 = vpack.c.bf16 %v12913_v61, %v12913_v61 }
 0x742   : > { %vm5992_vm3 = vcmp.ge.f32.partialorder %v5960_v51, 0.0  ;;  %v6024_v46 = vmul.f32 0.1, %v5960_v51  ;;  %7068 = vmatpush.bf16.msra.mxu3 %v8321_v0  ;;  %v6475_v17 = vunpack.c.l.b16 %v6075_v34  ;;  %v5899_v34 = vld [vmem:[#allocation2 + $0x1a8] sm:$0xff] }
 0x744   : > { %v12916_v63 = vsel %vm5992_vm3, %v5960_v51, %v6024_v46  ;;  %v6505_v30 = vpack.c.b16 %v6476_v56, %v6475_v17 }
 0x745   : > { %v6248_v32 = vrot.slane %v12916_v63, 1 }
 0x747   : > { %8377 = vmatmul.msk.bf16.gmra.mxu1 %vm14687_vm9, %v6622_v48  ;;  %8393 = vmatmul.msk.bf16.gmra.mxu0 %vm14677_vm5, %v6622_v48  ;;  %v6276_v37 = vsel %vm14688_vm14, %v6248_v32, %v13923_v59  ;;  %v6277_v51 = vsel %vm14689_vm11, %v6247_v2, %v6248_v32  ;;  %v5963_v48 = vadd.f32 %v12560_v38, %v5929_v53  ;;  %v5896_v59 = vld [vmem:[#allocation2 + $0x178] sm:$0xff]  ;;  %vm14696_vm9 = vmmov %vm14684_vm0  ;;  %vm14698_vm14 = vcmp.lt.s32.totalorder %v14266_v29, 1 }
 0x748   : > { %v6311_v23 = vpack.c.bf16 %v6277_v51, %v6277_v51  ;;  %v6312_v46 = vpack.c.bf16 %v6276_v37, %v6276_v37  ;;  %v6078_v53 = vpack.c.bf16 %v12733_v39, %v12733_v39  ;;  %v6077_v37 = vpack.c.bf16 %v12691_v27, %v12691_v27 }
 0x749   : > { %6521 = vrot.lane.b32.xlu1 %v6504_v47, %s8616_s13  ;;  %v6027_v26 = vmul.f32 0.1, %v5963_v48  ;;  %vm5995_vm10 = vcmp.ge.f32.partialorder %v5963_v48, 0.0  ;;  %vm14699_vm11 = vnez %v14379_v52 }
 0x74a   : > { %v6343_v42 = vsel %vm8819_vm13, %v6311_v23, 0  ;;  %v6344_v47 = vsel %vm14369_vm15, %v6312_v46, 0  ;;  %v6478_v17 = vunpack.c.l.b16 %v6078_v53  ;;  %v6477_v46 = vunpack.c.l.b16 %v6077_v37  ;;  %vm14690_vm15 = vmmov %vm14677_vm5 }
 0x74b   : > { %v5788_v11 = vpop.permute.xlu0 %5787  ;;  %v5794_v32 = vpop.permute.xlu2 %5793  ;;  %v6600_v41 = vunpack.c.l.b16 %v6344_v47  ;;  %v12958_v51 = vsel %vm5995_vm10, %v5963_v48, %v6027_v26  ;;  %v14693_v26 = vrot.slane %v12913_v61, 1 }
 0x74c   : > { %v5864_v10 = vadd.f32 %v5788_v11, %v12615_v13  ;;  %v5867_v13 = vadd.f32 %v5794_v32, %v12684_v6  ;;  %v6251_v56 = vrot.slane %v12958_v51, 1  ;;  %v6506_v48 = vpack.c.b16 %v6478_v17, %v6477_v46  ;;  %v8284_v46 = vld [vmem:[%s13728_s3 + $0x250] sm:$0xf] }
 0x74e   : > { %v5928_v2 = vadd.f32 %v5896_v59, %v5864_v10  ;;  %v6599_v59 = vunpack.c.l.b16 %v6343_v42  ;;  %v5931_v23 = vadd.f32 %v5899_v34, %v5867_v13  ;;  %v6080_v42 = vpack.c.bf16 %v12765_v31, %v12765_v31 }
 0x74f   : > { %v6079_v13 = vpack.c.bf16 %v12730_v20, %v12730_v20 }
 0x750   : > { %v5962_v54 = vadd.f32 %v12560_v38, %v5928_v2  ;;  %v6623_v6 = vpack.c.b16 %v6600_v41, %v6599_v59  ;;  %v6489_v2 = vunpack.c.l.b16 %v6089_v7  ;;  %v5965_v53 = vadd.f32 %v12560_v38, %v5931_v23  ;;  %v5898_v7 = vld [vmem:[#allocation2 + $0x198] sm:$0xff] }
 0x751   : > { %6523 = vrot.lane.b32.xlu1 %v6505_v30, %s8616_s13  ;;  %v6082_v23 = vpack.c.bf16 %v12809_v5, %v12809_v5 }
 0x752   : > { %vm5994_vm8 = vcmp.ge.f32.partialorder %v5962_v54, 0.0  ;;  %v6026_v25 = vmul.f32 0.1, %v5962_v54  ;;  %v6029_v34 = vmul.f32 0.1, %v5965_v53  ;;  %vm5997_vm6 = vcmp.ge.f32.partialorder %v5965_v53, 0.0 }
 0x754   : > { %v12962_v0 = vsel %vm5994_vm8, %v5962_v54, %v6026_v25  ;;  %v6480_v25 = vunpack.c.l.b16 %v6080_v42  ;;  %vm14700_vm8 = vmmov %vm14698_vm14 }
 0x755   : > { %v6090_v11 = vpack.c.bf16 %v12962_v0, %v12962_v0  ;;  %v6250_v10 = vrot.slane %v12962_v0, 1 }
 0x757   : > { %8378 = vmatmul.msk.bf16.gmra.mxu1 %vm14690_vm15, %v6623_v6  ;;  %8394 = vmatmul.msk.bf16.gmra.mxu0 %vm14691_vm12, %v6623_v6  ;;  %v6490_v32 = vunpack.c.l.b16 %v6090_v11  ;;  %v6274_v47 = vsel %vm14692_vm1, %v6250_v10, %v6251_v56  ;;  %v6275_v30 = vsel %vm14684_vm0, %v14693_v26, %v6250_v10  ;;  %v6479_v6 = vunpack.c.l.b16 %v6079_v13  ;;  %v8522_v11 = vld [vmem:[%s13728_s3 + $0x254] sm:$0xf0] }
 0x758   : > { %v6313_v59 = vpack.c.bf16 %v6275_v30, %v6275_v30  ;;  %v6314_v41 = vpack.c.bf16 %v6274_v47, %v6274_v47  ;;  %v6081_v47 = vpack.c.bf16 %v12762_v14, %v12762_v14  ;;  %v13002_v13 = vsel %vm5997_vm6, %v5965_v53, %v6029_v34 }
 0x759   : > { %6525 = vrot.lane.b32.xlu1 %v6506_v48, %s8616_s13  ;;  %v6512_v54 = vpack.c.b16 %v6490_v32, %v6489_v2  ;;  %v8285_v2 = vor.u32 %v8522_v11, %v8284_v46  ;;  %v6507_v32 = vpack.c.b16 %v6480_v25, %v6479_v6  ;;  %v6084_v34 = vpack.c.bf16 %v12841_v57, %v12841_v57 }
 0x75a   : > { %v6345_v48 = vsel %vm8819_vm13, %v6313_v59, 0  ;;  %v6482_v59 = vunpack.c.l.b16 %v6082_v23 }
 0x75b   : > { %v5792_v37 = vpop.permute.xlu0 %5791  ;;  %6537 = vrot.lane.b32.xlu2 %v6512_v54, %s8616_s13  ;;  %6894 = vmatpush.bf16.msrb.mxu2 %v8285_v2  ;;  %v6601_v26 = vunpack.c.l.b16 %v6345_v48  ;;  %v6091_v54 = vpack.c.bf16 %v12958_v51, %v12958_v51  ;;  %v6115_v2 = vrot.slane %v12806_v18, 7 }
 0x75c   : > { %v5866_v17 = vadd.f32 %v5792_v37, %v12663_v28  ;;  %v6346_v28 = vsel %vm14386_vm4, %v6314_v41, 0  ;;  %v6481_v37 = vunpack.c.l.b16 %v6081_v47  ;;  %vm14694_vm4 = vmmov %vm14677_vm5 }
 0x75d   : > { %v6602_v30 = vunpack.c.l.b16 %v6346_v28  ;;  %v6491_v46 = vunpack.c.l.b16 %v6091_v54  ;;  %vm14695_vm3 = vmmov %vm14694_vm4  ;;  %v6083_v28 = vpack.c.bf16 %v12806_v18, %v12806_v18  ;;  %v6116_v54 = vrot.slane %v12841_v57, 7  ;;  %v8527_v18 = vld [vmem:[%s13728_s3 + $0x284] sm:$0xf] }
 0x75e   : > { %v5930_v10 = vadd.f32 %v5898_v7, %v5866_v17  ;;  %v6508_v6 = vpack.c.b16 %v6482_v59, %v6481_v37  ;;  %vm14697_vm5 = vmmov %vm14684_vm0  ;;  %v8310_v37 = vld [vmem:[%s13728_s3 + $0x288] sm:$0xf0]  ;;  %v6086_v57 = vpack.c.bf16 %v12883_v3, %v12883_v3 }
 0x75f   : > { %v6624_v17 = vpack.c.b16 %v6602_v30, %v6601_v26  ;;  %v6484_v26 = vunpack.c.l.b16 %v6084_v34  ;;  %v6483_v59 = vunpack.c.l.b16 %v6083_v28  ;;  %v6153_v28 = vsel %vm14700_vm8, %v6115_v2, %v6116_v54  ;;  %vm14703_vm12 = vmmov %vm14695_vm3 }
 0x760   : > { %v5964_v42 = vadd.f32 %v12560_v38, %v5930_v10  ;;  %v6253_v38 = vrot.slane %v13002_v13, 1  ;;  %v6114_v10 = vrot.slane %v12809_v5, 7  ;;  %vm14704_vm1 = vmmov %vm14695_vm3 }
 0x761   : > { %6527 = vrot.lane.b32.xlu1 %v6507_v32, %s8616_s13 }
 0x762   : > { %vm5996_vm2 = vcmp.ge.f32.partialorder %v5964_v42, 0.0  ;;  %v6028_v33 = vmul.f32 0.1, %v5964_v42 }
 0x764   : > { %v13004_v41 = vsel %vm5996_vm2, %v5964_v42, %v6028_v33  ;;  %v5900_v33 = vld [vmem:[#allocation2 + $0x1b8] sm:$0xff]  ;;  %vm14705_vm2 = vmmov %vm14700_vm8 }
 0x765   : > { %v6252_v25 = vrot.slane %v13004_v41, 1  ;;  %v6092_v7 = vpack.c.bf16 %v13004_v41, %v13004_v41  ;;  %vm14715_vm8 = vmmov %vm14705_vm2 }
 0x767   : > { %8379 = vmatmul.msk.bf16.gmra.mxu1 %vm14694_vm4, %v6624_v17  ;;  %8395 = vmatmul.msk.bf16.gmra.mxu0 %vm14695_vm3, %v6624_v17  ;;  %v6492_v53 = vunpack.c.l.b16 %v6092_v7  ;;  %v6272_v23 = vsel %vm14696_vm9, %v6252_v25, %v6253_v38  ;;  %v6273_v11 = vsel %vm14697_vm5, %v6251_v56, %v6252_v25  ;;  %v6154_v56 = vsel %vm14698_vm14, %v6114_v10, %v6115_v2  ;;  %vm14706_vm4 = vmmov %vm14684_vm0 }
 0x768   : > { %v6315_v32 = vpack.c.bf16 %v6273_v11, %v6273_v11  ;;  %v6316_v42 = vpack.c.bf16 %v6272_v23, %v6272_v23  ;;  %v8313_v7 = vor.u32 %v8527_v18, %v8310_v37  ;;  %v6085_v23 = vpack.c.bf16 %v12838_v35, %v12838_v35  ;;  %vm14709_vm9 = vmmov %vm14705_vm2 }
 0x769   : > { %6529 = vrot.lane.b32.xlu1 %v6508_v6, %s8616_s13  ;;  %v6513_v48 = vpack.c.b16 %v6492_v53, %v6491_v46  ;;  %v6509_v6 = vpack.c.b16 %v6484_v26, %v6483_v59  ;;  %v6179_v46 = vpack.c.bf16 %v6154_v56, %v6154_v56  ;;  %v13047_v53 = vld [vmem:[%s13729_s4 + $0x2] ss:$0 sm:$0xff]  ;;  %v6180_v26 = vpack.c.bf16 %v6153_v28, %v6153_v28  ;;  %vm14710_vm5 = vmmov %vm14705_vm2 }
 0x76a   : > { %v6348_v17 = vsel %vm14699_vm11, %v6316_v42, 0  ;;  %7069 = vmatpush.bf16.msra.mxu3 %v8313_v7  ;;  %v6486_v42 = vunpack.c.l.b16 %v6086_v57  ;;  %v6485_v18 = vunpack.c.l.b16 %v6085_v23  ;;  %v6088_v23 = vpack.c.bf16 %v12916_v63, %v12916_v63  ;;  %vm14713_vm11 = vmmov %vm14704_vm1 }
 0x76b   : > { %6539 = vrot.lane.b32.xlu2 %v6513_v48, %s8616_s13  ;;  %v5796_v47 = vpop.permute.xlu0 %5795  ;;  %v6604_v11 = vunpack.c.l.b16 %v6348_v17  ;;  %v6212_v17 = vsel %vm8819_vm13, %v6180_v26, 0  ;;  %v6087_v28 = vpack.c.bf16 %v12880_v12, %v12880_v12 }
 0x76c   : > { %v5868_v30 = vadd.f32 %v5796_v47, %v12699_v62  ;;  %v6347_v62 = vsel %vm8819_vm13, %v6315_v32, 0  ;;  %v6093_v47 = vpack.c.bf16 %v13002_v13, %v13002_v13  ;;  %v6404_v57 = vunpack.c.l.b16 %v6212_v17 }
 0x76d   : > { %v6603_v52 = vunpack.c.l.b16 %v6347_v62  ;;  %v6488_v26 = vunpack.c.l.b16 %v6088_v23 }
 0x76e   : > { %v5932_v25 = vadd.f32 %v5900_v33, %v5868_v30  ;;  %v14701_v30 = vld [vmem:[#allocation10_spill] sm:$0xff] }
 0x76f   : > { %vm14702_vm15 = vnez %v14701_v30  ;;  %v6625_v62 = vpack.c.b16 %v6604_v11, %v6603_v52 }
 0x770   : > { %v5966_v34 = vadd.f32 %v13047_v53, %v5932_v25  ;;  %v6211_v56 = vsel %vm14702_vm15, %v6179_v46, 0  ;;  %v5901_v25 = vld [vmem:[#allocation2 + $0x1c8] sm:$0xff]  ;;  %v6510_v46 = vpack.c.b16 %v6486_v42, %v6485_v18  ;;  %v6117_v42 = vrot.slane %v12838_v35, 7  ;;  %vm14716_vm15 = vmmov %vm14705_vm2 }
 0x771   : > { %6531 = vrot.lane.b32.xlu1 %v6509_v6, %s8616_s13  ;;  %v6403_v6 = vunpack.c.l.b16 %v6211_v56  ;;  %v8520_v35 = vld [vmem:[%s13728_s3 + $0x244] sm:$0xf0] }
 0x772   : > { %vm5998_vm10 = vcmp.ge.f32.partialorder %v5966_v34, 0.0  ;;  %v6030_v48 = vmul.f32 0.1, %v5966_v34 }
 0x773   : > { %v5798_v32 = vpop.permute.xlu0 %5797  ;;  %v13072_v11 = vpack.c.b16 %v6404_v57, %v6403_v6  ;;  %v6119_v6 = vrot.slane %v12880_v12, 7 }
 0x774   : > { %v13059_v33 = vsel %vm5998_vm10, %v5966_v34, %v6030_v48  ;;  %v5869_v59 = vadd.f32 %v5798_v32, %v12724_v58  ;;  %v6493_v58 = vunpack.c.l.b16 %v6093_v47  ;;  %vm14714_vm10 = vmmov %vm14704_vm1 }
 0x775   : > { %v6254_v37 = vrot.slane %v13059_v33, 1  ;;  %v6094_v2 = vpack.c.bf16 %v13059_v33, %v13059_v33 }
 0x776   : > { %v5933_v7 = vadd.f32 %v5901_v25, %v5869_v59  ;;  %v6152_v59 = vsel %vm14705_vm2, %v6116_v54, %v6117_v42  ;;  %v6487_v25 = vunpack.c.l.b16 %v6087_v28  ;;  %v14711_v28 = vld [vmem:[#allocation20_spill] sm:$0xff] }
 0x777   : > { %8380 = vmatmul.msk.bf16.gmra.mxu1 %vm14703_vm12, %v6625_v62  ;;  %8396 = vmatmul.msk.bf16.gmra.mxu0 %vm14704_vm1, %v6625_v62  ;;  %v6494_v34 = vunpack.c.l.b16 %v6094_v2  ;;  %v6271_v32 = vsel %vm14684_vm0, %v6253_v38, %v6254_v37  ;;  %v8276_v38 = vld [vmem:[%s13728_s3 + $0x240] sm:$0xf]  ;;  %v6118_v62 = vrot.slane %v12883_v3, 7  ;;  %vm14712_vm14 = vnez %v14711_v28  ;;  %vm14718_vm1 = vmmov %vm14705_vm2 }
 0x778   : > { %v5967_v52 = vadd.f32 %v13047_v53, %v5933_v7  ;;  %v6317_v56 = vpack.c.bf16 %v6271_v32, %v6271_v32  ;;  %v8277_v2 = vor.u32 %v8520_v35, %v8276_v38  ;;  %v6511_v17 = vpack.c.b16 %v6488_v26, %v6487_v25  ;;  %v14707_v3 = vld [vmem:[#allocation39_spill] sm:$0xff]  ;;  %vm14719_vm0 = vmmov %vm14718_vm1 }
 0x779   : > { %6533 = vrot.lane.b32.xlu1 %v6510_v46, %s8616_s13  ;;  %v6514_v48 = vpack.c.b16 %v6494_v34, %v6493_v58  ;;  %v6181_v7 = vpack.c.bf16 %v6152_v59, %v6152_v59  ;;  %v5437_v58 = vadd.f32 %v12868_v60, %v12872_v4  ;;  %vm14708_vm3 = vnez %v14707_v3  ;;  %v8525_v4 = vld [vmem:[%s13728_s3 + $0x274] sm:$0xf]  ;;  %v8302_v60 = vld [vmem:[%s13728_s3 + $0x278] sm:$0xf0]  ;;  %vm14722_vm2 = vmmov %vm14719_vm0 }
 0x77a   : > { %vm5999_vm6 = vcmp.ge.f32.partialorder %v5967_v52, 0.0  ;;  %v6031_v47 = vmul.f32 0.1, %v5967_v52  ;;  %v6349_v46 = vsel %vm8819_vm13, %v6317_v56, 0  ;;  %6895 = vmatpush.bf16.msrb.mxu2 %v8277_v2  ;;  %v6151_v23 = vsel %vm14709_vm9, %v6117_v42, %v6118_v62  ;;  %vm14724_vm9 = vmmov %vm14719_vm0 }
 0x77b   : > { %6541 = vrot.lane.b32.xlu2 %v6514_v48, %s8616_s13  ;;  %v6605_v12 = vunpack.c.l.b16 %v6349_v46  ;;  %v6182_v48 = vpack.c.bf16 %v6151_v23, %v6151_v23  ;;  %v6213_v32 = vsel %vm14712_vm14, %v6181_v7, 0  ;;  %v13124_v25 = vadd.f32 %v12737_v1, %v12769_v21  ;;  %v8523_v46 = vld [vmem:[%s13728_s3 + $0x264] sm:$0xf]  ;;  %vm14727_vm14 = vmmov %vm14719_vm0 }
 0x77c   : > { %v13083_v30 = vsel %vm5999_vm6, %v5967_v52, %v6031_v47  ;;  %v8305_v47 = vor.u32 %v8525_v4, %v8302_v60  ;;  %v6405_v56 = vunpack.c.l.b16 %v6213_v32  ;;  %v6120_v35 = vrot.slane %v12916_v63, 7 }
 0x77d   : > { %v6255_v18 = vrot.slane %v13083_v30, 1  ;;  %v6214_v26 = vsel %vm8819_vm13, %v6182_v48, 0  ;;  %v6121_v1 = vrot.slane %v12913_v61, 7  ;;  %vm14717_vm12 = vnez %v14373_v22  ;;  %v8294_v22 = vld [vmem:[%s13728_s3 + $0x268] sm:$0xf0]  ;;  %v14720_v48 = vld [vmem:[#allocation11_spill] sm:$0xff] }
 0x77e   : > { %v6406_v59 = vunpack.c.l.b16 %v6214_v26  ;;  %7070 = vmatpush.bf16.msra.mxu3 %v8305_v47  ;;  %v6149_v21 = vsel %vm14715_vm8, %v6119_v6, %v6120_v35  ;;  %v5434_v61 = vadd.f32 %v12832_v44, %v12845_v43  ;;  %v6123_v44 = vrot.slane %v12958_v51, 7  ;;  %v8278_v51 = vld [vmem:[%s13728_s3 + $0x248] sm:$0xf0]  ;;  %v5908_v26 = vld [vmem:[#allocation2 + $0x238] sm:$0xff]  ;;  %vm14729_vm8 = vmmov %vm14719_vm0 }
 0x77f   : > { %v6270_v54 = vsel %vm14706_vm4, %v6254_v37, %v6255_v18  ;;  %v6150_v37 = vsel %vm14710_vm5, %v6118_v62, %v6119_v6  ;;  %v13135_v62 = vadd.f32 %v12793_v55, %v12813_v49  ;;  %v6122_v6 = vrot.slane %v12962_v0, 7  ;;  %v8286_v0 = vld [vmem:[%s13728_s3 + $0x258] sm:$0xf0] }
 0x780   : > { %v6318_v57 = vpack.c.bf16 %v6270_v54, %v6270_v54  ;;  %v13128_v38 = vpack.c.b16 %v6406_v59, %v6405_v56  ;;  %v6183_v2 = vpack.c.bf16 %v6150_v37, %v6150_v37  ;;  %v6184_v54 = vpack.c.bf16 %v6149_v21, %v6149_v21 }
 0x781   : > { %6535 = vrot.lane.b32.xlu1 %v6511_v17, %s8616_s13  ;;  %v6148_v17 = vsel %vm14716_vm15, %v6120_v35, %v6121_v1  ;;  %v8297_v43 = vor.u32 %v8523_v46, %v8294_v22  ;;  %v6147_v23 = vsel %vm14718_vm1, %v6121_v1, %v6122_v6  ;;  %v6146_v37 = vsel %vm14719_vm0, %v6122_v6, %v6123_v44  ;;  %v14725_v46 = vld [vmem:[#allocation24_spill] sm:$0xff]  ;;  %vm14730_vm15 = vmmov %vm14719_vm0 }
 0x782   : > { %v6350_v34 = vsel %vm14708_vm3, %v6318_v57, 0  ;;  %v6215_v63 = vsel %vm14717_vm12, %v6183_v2, 0  ;;  %v6216_v55 = vsel %vm8819_vm13, %v6184_v54, 0  ;;  %v6185_v3 = vpack.c.bf16 %v6148_v17, %v6148_v17  ;;  %vm14723_vm3 = vmmov %vm14719_vm0 }
 0x783   : > { %5809 = vrot.lane.b32.xlu2 %v5437_v58, %s8616_s13  ;;  %v6606_v52 = vunpack.c.l.b16 %v6350_v34  ;;  %v6407_v49 = vunpack.c.l.b16 %v6215_v63  ;;  %v6408_v7 = vunpack.c.l.b16 %v6216_v55  ;;  %v8521_v58 = vld [vmem:[%s13728_s3 + $0x254] sm:$0xf]  ;;  %7071 = vmatpush.bf16.msra.mxu3 %v8297_v43  ;;  %vm14721_vm6 = vnez %v14720_v48  ;;  %vm14731_vm12 = vmmov %vm14719_vm0 }
 0x784   : > { %v8289_v34 = vor.u32 %v8521_v58, %v8286_v0  ;;  %v6217_v28 = vsel %vm14721_vm6, %v6185_v3, 0  ;;  %v6103_v35 = vrot.slane %v12602_v45, 7  ;;  %v6124_v2 = vrot.slane %v13004_v41, 7  ;;  %vm14734_vm6 = vmmov %vm14714_vm10 }
 0x785   : > { %v6626_v42 = vpack.c.b16 %v6606_v52, %v6605_v12  ;;  %v13150_v57 = vpack.c.b16 %v6408_v7, %v6407_v49  ;;  %v8519_v12 = vld [vmem:[%s13728_s3 + $0x244] sm:$0xf]  ;;  %v6186_v52 = vpack.c.bf16 %v6147_v23, %v6147_v23  ;;  %v6409_v60 = vunpack.c.l.b16 %v6217_v28 }
 0x786   : > { %v8281_v4 = vor.u32 %v8519_v12, %v8278_v51  ;;  %v6104_v21 = vrot.slane %v12605_v15, 7  ;;  %v6187_v17 = vpack.c.bf16 %v6146_v37, %v6146_v37  ;;  %v6125_v54 = vrot.slane %v13002_v13, 7 }
 0x787   : > { %8381 = vmatmul.msk.bf16.gmra.mxu1 %vm14713_vm11, %v6626_v42  ;;  %8397 = vmatmul.msk.bf16.gmra.mxu0 %vm14714_vm10, %v6626_v42  ;;  %v6218_v32 = vsel %vm8819_vm13, %v6186_v52, 0  ;;  %v6145_v7 = vsel %vm14723_vm3, %v6123_v44, %v6124_v2  ;;  %vm14726_vm5 = vnez %v14725_v46  ;;  %vm14728_vm11 = vnez %v14563_v16 }
 0x788   : > { %7072 = vmatpush.bf16.msra.mxu3 %v8289_v34  ;;  %v6410_v42 = vunpack.c.l.b16 %v6218_v32  ;;  %v6165_v55 = vsel %vm14722_vm2, %v6103_v35, %v6104_v21  ;;  %v6188_v6 = vpack.c.bf16 %v6145_v7, %v6145_v7  ;;  %v6219_v15 = vsel %vm14726_vm5, %v6187_v17, 0  ;;  %vm14739_vm5 = vmmov %vm14722_vm2 }
 0x789   : > { %5799 = vrot.lane.b32.xlu1 %v13124_v25, %s8616_s13  ;;  %v6168_v13 = vpack.c.bf16 %v6165_v55, %v6165_v55  ;;  %v6411_v43 = vunpack.c.l.b16 %v6219_v15  ;;  %v6106_v51 = vrot.slane %v12658_v9, 7  ;;  %v6105_v32 = vrot.slane %v12633_v40, 7 }
 0x78a   : > { %v13181_v47 = vpack.c.b16 %v6410_v42, %v6409_v60  ;;  %v6220_v3 = vsel %vm8819_vm13, %v6188_v6, 0  ;;  %v6126_v60 = vrot.slane %v13059_v33, 7  ;;  %vm14732_vm1 = vnez %v14572_v8 }
 0x78b   : > { %v6412_v0 = vunpack.c.l.b16 %v6220_v3  ;;  %v6200_v23 = vsel %vm8819_vm13, %v6168_v13, 0  ;;  %v6164_v16 = vsel %vm14730_vm15, %v6104_v21, %v6105_v32  ;;  %vm14733_vm0 = vnez %v14576_v19  ;;  %vm14745_vm15 = vmmov %vm14722_vm2 }
 0x78c   : > { %7073 = vmatpush.bf16.msra.mxu3 %v8281_v4  ;;  %v6392_v48 = vunpack.c.l.b16 %v6200_v23  ;;  %v6143_v40 = vsel %vm14731_vm12, %v6125_v54, %v6126_v60  ;;  %v6107_v6 = vrot.slane %v12656_v36, 7  ;;  %vm14751_vm12 = vmmov %vm14722_vm2 }
 0x78d   : > { %v13207_v37 = vpack.c.b16 %v6412_v0, %v6411_v43 }
 0x791   : > { %5803 = vrot.lane.b32.xlu1 %v13135_v62, %s8616_s13 }
 0x799   : > { %5807 = vrot.lane.b32.xlu1 %v5434_v61, %s8616_s13 }
 0x7ab   : > { %v5812_v56 = vpop.permute.xlu1 %5811 }
 0x7ac   : > { %v5876_v59 = vadd.f32 %v5812_v56, %v5434_v61  ;;  %v6144_v61 = vsel %vm14724_vm9, %v6124_v2, %v6125_v54  ;;  %vm14738_vm9 = vmmov %vm14734_vm6 }
 0x7ad   : > { %v6189_v56 = vpack.c.bf16 %v6144_v61, %v6144_v61  ;;  %v6108_v61 = vrot.slane %v12694_v50, 7 }
 0x7ae   : > { %v5940_v1 = vadd.f32 %v5908_v26, %v5876_v59  ;;  %v6163_v26 = vsel %vm14729_vm8, %v6105_v32, %v6106_v51  ;;  %vm14744_vm8 = vmmov %vm14722_vm2 }
 0x7af   : > { %v6170_v9 = vpack.c.bf16 %v6163_v26, %v6163_v26  ;;  %v6221_v2 = vsel %vm14732_vm1, %v6189_v56, 0  ;;  %v6161_v13 = vsel %vm14722_vm2, %v6107_v6, %v6108_v61 }
 0x7b0   : > { %v5974_v63 = vadd.f32 %v13047_v53, %v5940_v1  ;;  %v6169_v1 = vpack.c.bf16 %v6164_v16, %v6164_v16  ;;  %v6413_v55 = vunpack.c.l.b16 %v6221_v2  ;;  %v6172_v3 = vpack.c.bf16 %v6161_v13, %v6161_v13 }
 0x7b1   : > { %v6112_v2 = vrot.slane %v12765_v31, 7 }
 0x7b2   : > { %vm6006_vm4 = vcmp.ge.f32.partialorder %v5974_v63, 0.0  ;;  %v6038_v49 = vmul.f32 0.1, %v5974_v63  ;;  %v6204_v50 = vsel %vm8819_vm13, %v6172_v3, 0 }
 0x7b3   : > { %v6520_v41 = vpop.permute.xlu1 %6519  ;;  %v6396_v23 = vunpack.c.l.b16 %v6204_v50 }
 0x7b4   : > { %v13196_v22 = vsel %vm6006_vm4, %v5974_v63, %v6038_v49  ;;  %v6202_v63 = vsel %vm8819_vm13, %v6170_v9, 0  ;;  %v6201_v49 = vsel %vm14733_vm0, %v6169_v1, 0  ;;  %vm14735_vm4 = vmmov %vm14722_vm2  ;;  %v14741_v9 = vld [vmem:[#allocation35_spill] sm:$0xff] }
 0x7b5   : > { %v6134_v58 = vrot.slane %v13196_v22, 7  ;;  %v6394_v54 = vunpack.c.l.b16 %v6202_v63  ;;  %v6393_v8 = vunpack.c.l.b16 %v6201_v49  ;;  %v6162_v19 = vsel %vm14735_vm4, %v6106_v51, %v6107_v6  ;;  %vm14753_vm0 = vmmov %vm14734_vm6 }
 0x7b6   : > { %v6171_v0 = vpack.c.bf16 %v6162_v19, %v6162_v19  ;;  %v6109_v51 = vrot.slane %v12691_v27, 7  ;;  %v6111_v63 = vrot.slane %v12730_v20, 7  ;;  %v5903_v20 = vld [vmem:[#allocation2 + $0x1e8] sm:$0xff] }
 0x7b7   : > { %v6166_v44 = vsel %vm14727_vm14, %v6134_v58, %v6103_v35  ;;  %v6190_v35 = vpack.c.bf16 %v6143_v40, %v6143_v40  ;;  %v6424_v46 = vpack.c.b16 %v6394_v54, %v6393_v8  ;;  %vm14740_vm14 = vmmov %vm14722_vm2  ;;  %v14746_v8 = vld [vmem:[#allocation9_spill] sm:$0xff] }
 0x7b8   : > { %v6167_v34 = vpack.c.bf16 %v6166_v44, %v6166_v44  ;;  %v14736_v44 = vld [vmem:[#allocation21_spill] sm:$0xff]  ;;  %v6160_v26 = vsel %vm14740_vm14, %v6108_v61, %v6109_v51  ;;  %v6157_v54 = vsel %vm14744_vm8, %v6111_v63, %v6112_v2  ;;  %vm14761_vm8 = vmmov %vm14753_vm0 }
 0x7b9   : > { %v6222_v17 = vsel %vm8819_vm13, %v6190_v35, 0  ;;  %vm14737_vm3 = vnez %v14736_v44  ;;  %v6173_v16 = vpack.c.bf16 %v6160_v26, %v6160_v26  ;;  %v6176_v31 = vpack.c.bf16 %v6157_v54, %v6157_v54 }
 0x7ba   : > { %v6199_v12 = vsel %vm14728_vm11, %v6167_v34, 0  ;;  %v6414_v21 = vunpack.c.l.b16 %v6222_v17  ;;  %v6203_v36 = vsel %vm14737_vm3, %v6171_v0, 0  ;;  %v13246_v34 = vpop.permute.xlu2 %6537  ;;  %vm14742_vm11 = vnez %v14741_v9  ;;  %v14747_v0 = vld [vmem:[#allocation3_spill] sm:$0xff] }
 0x7bb   : > { %v6391_v52 = vunpack.c.l.b16 %v6199_v12  ;;  %v6522_v28 = vpop.permute.xlu1 %6521  ;;  %v6110_v12 = vrot.slane %v12733_v39, 7  ;;  %v6205_v40 = vsel %vm14742_vm11, %v6173_v16, 0  ;;  %v6208_v44 = vsel %vm8819_vm13, %v6176_v31, 0 }
 0x7bc   : > { %v13231_v7 = vpack.c.b16 %v6414_v21, %v6413_v55  ;;  %v6637_v15 = vsel %vm14734_vm6, %v6424_v46, %v6522_v28  ;;  %v6397_v17 = vunpack.c.l.b16 %v6205_v40  ;;  %v5802_v55 = vpop.permute.xlu0 %5801  ;;  %v6113_v26 = vrot.slane %v12762_v14, 7 }
 0x7bd   : > { %v6423_v4 = vpack.c.b16 %v6392_v48, %v6391_v52  ;;  %v6395_v48 = vunpack.c.l.b16 %v6203_v36  ;;  %v6158_v61 = vsel %vm14745_vm15, %v6110_v12, %v6111_v63  ;;  %v5871_v6 = vadd.f32 %v5802_v55, %v14746_v8  ;;  %v5907_v36 = vld [vmem:[#allocation2 + $0x228] sm:$0xff]  ;;  %vm14762_vm15 = vmmov %vm14753_vm0 }
 0x7be   : > { %v6175_v13 = vpack.c.bf16 %v6158_v61, %v6158_v61  ;;  %v6155_v55 = vsel %vm14751_vm12, %v6113_v26, %v6114_v10  ;;  %vm14763_vm12 = vmmov %vm14753_vm0 }
 0x7bf   : > { %v6633_v42 = vsel %vm14714_vm10, %v6423_v4, %v6520_v41  ;;  %v6425_v28 = vpack.c.b16 %v6396_v23, %v6395_v48  ;;  %v6159_v4 = vsel %vm14739_vm5, %v6109_v51, %v6110_v12  ;;  %vm14743_vm10 = vmmov %vm14734_vm6  ;;  %v5935_v3 = vadd.f32 %v5903_v20, %v5871_v6  ;;  %v6986_v23 = vpop.f32.mrf.mxu1  ;;  %v14748_v12 = vld [vmem:[#allocation15_spill] sm:$0xff]  ;;  %v5904_v51 = vld [vmem:[#allocation2 + $0x1f8] sm:$0xff] }
 0x7c0   : > { %6896 = vmatmul.bf16.vlgmr.msrb.gmra.mxu2 %v6633_v42  ;;  %7074 = vmatmul.bf16.vlgmr.msra.gmra.mxu3 %v6633_v42  ;;  %v6174_v56 = vpack.c.bf16 %v6159_v4, %v6159_v4  ;;  %v6400_v4 = vunpack.c.l.b16 %v6208_v44  ;;  %vm14754_vm6 = vmmov %vm14753_vm0  ;;  %vm14757_vm5 = vcmp.lt.s32.totalorder %v14266_v29, 7 }
 0x7c1   : > { %v13305_v10 = vsel %vm14754_vm6, %v13181_v47, %v13246_v34  ;;  %vm14758_vm14 = vmmov %vm14757_vm5 }
 0x7c2   : > { %v6206_v27 = vsel %vm8819_vm13, %v6174_v56, 0  ;;  %v5969_v56 = vadd.f32 %v13047_v53, %v5935_v3  ;;  %vm14766_vm6 = vmmov %vm14753_vm0 }
 0x7c3   : > { %v6524_v59 = vpop.permute.xlu1 %6523  ;;  %v6398_v35 = vunpack.c.l.b16 %v6206_v27  ;;  %v5905_v27 = vld [vmem:[#allocation2 + $0x208] sm:$0xff] }
 0x7c4   : > { %v6641_v32 = vsel %vm14738_vm9, %v6425_v28, %v6524_v59  ;;  %v5806_v19 = vpop.permute.xlu0 %5805  ;;  %v6207_v28 = vsel %vm14602_vm7, %v6175_v13, 0  ;;  %vm14752_vm7 = vmmov %vm14722_vm2  ;;  %v6033_v14 = vmul.f32 0.1, %v5969_v56  ;;  %vm6001_vm1 = vcmp.ge.f32.partialorder %v5969_v56, 0.0 }
 0x7c5   : > { %v13255_v42 = vpop.permute.xlu2 %6539  ;;  %v6426_v21 = vpack.c.b16 %v6398_v35, %v6397_v17  ;;  %v5873_v48 = vadd.f32 %v5806_v19, %v14748_v12  ;;  %v6399_v40 = vunpack.c.l.b16 %v6207_v28  ;;  %v14750_v17 = vld [vmem:[#allocation22_spill] sm:$0xff] }
 0x7c6   : > { %v13307_v20 = vsel %vm6001_vm1, %v5969_v56, %v6033_v14  ;;  %vm14765_vm1 = vmmov %vm14757_vm5 }
 0x7c7   : > { %v5937_v35 = vadd.f32 %v5905_v27, %v5873_v48  ;;  %v6427_v54 = vpack.c.b16 %v6400_v4, %v6399_v40  ;;  %v6257_v12 = vrot.slane %v13307_v20, 1 }
 0x7c9   : > { %v5971_v5 = vadd.f32 %v13047_v53, %v5937_v35 }
 0x7cb   : > { %v6526_v41 = vpop.permute.xlu1 %6525  ;;  %v6035_v47 = vmul.f32 0.1, %v5971_v5  ;;  %vm6003_vm9 = vcmp.ge.f32.partialorder %v5971_v5, 0.0 }
 0x7cc   : > { %v6645_v49 = vsel %vm14743_vm10, %v6426_v21, %v6526_v41  ;;  %v8546_v41 = vld [vmem:[%s13730_s5 + $0x18] sm:$0xff]  ;;  %v6156_v21 = vsel %vm14752_vm7, %v6112_v2, %v6113_v26  ;;  %v6988_v2 = vpop.f32.mrf.mxu1  ;;  %vm14764_vm7 = vmmov %vm14757_vm5 }
 0x7cd   : > { %7576 = vmatpush.bf16.msra.mxu2 %v8546_v41  ;;  %v6177_v31 = vpack.c.bf16 %v6156_v21, %v6156_v21  ;;  %v13330_v40 = vsel %vm6003_vm9, %v5971_v5, %v6035_v47  ;;  %vm14770_vm9 = vmmov %vm14753_vm0 }
 0x7ce   : > { %v6259_v5 = vrot.slane %v13330_v40, 1 }
 0x7d0   : > { %6901 = vmatmul.bf16.gmra.mxu2 %v6637_v15  ;;  %7079 = vmatmul.bf16.gmra.mxu3 %v6637_v15 }
 0x7d3   : > { %v13240_v43 = vpop.permute.xlu1 %6527 }
 0x7d4   : > { %v6649_v6 = vsel %vm14753_vm0, %v6427_v54, %v13240_v43  ;;  %v6097_v54 = vpack.c.bf16 %v13307_v20, %v13307_v20 }
 0x7d5   : > { %v13265_v59 = vpop.permute.xlu2 %6541 }
 0x7db   : > { %v13249_v52 = vpop.permute.xlu1 %6529 }
 0x7dd   : > { %v5810_v46 = vpop.permute.xlu2 %5809 }
 0x7de   : > { %v5875_v50 = vadd.f32 %v5810_v46, %v14747_v0  ;;  %v6178_v46 = vpack.c.bf16 %v6155_v55, %v6155_v55  ;;  %v6095_v0 = vpack.c.bf16 %v13083_v30, %v13083_v30 }
 0x7e0   : > { %6906 = vmatmul.bf16.gmra.mxu2 %v6641_v32  ;;  %7084 = vmatmul.bf16.gmra.mxu3 %v6641_v32  ;;  %v7164_v32 = vpop.f32.mrf.mxu0  ;;  %v5939_v16 = vadd.f32 %v5907_v36, %v5875_v50  ;;  %v14755_v50 = vld [vmem:[#allocation25_spill] sm:$0xff]  ;;  %v6210_v36 = vsel %vm8819_vm13, %v6178_v46, 0 }
 0x7e1   : > { %vm14756_vm3 = vnez %v14755_v50  ;;  %v6402_v56 = vunpack.c.l.b16 %v6210_v36 }
 0x7e2   : > { %v5973_v61 = vadd.f32 %v13047_v53, %v5939_v16  ;;  %v6209_v44 = vsel %vm14756_vm3, %v6177_v31, 0  ;;  %v6495_v16 = vunpack.c.l.b16 %v6095_v0  ;;  %v5906_v0 = vld [vmem:[#allocation2 + $0x218] sm:$0xff]  ;;  %vm14769_vm3 = vmmov %vm14753_vm0 }
 0x7e3   : > { %v13259_v39 = vpop.permute.xlu1 %6531  ;;  %v6401_v26 = vunpack.c.l.b16 %v6209_v44 }
 0x7e4   : > { %v6037_v19 = vmul.f32 0.1, %v5973_v61  ;;  %vm6005_vm4 = vcmp.ge.f32.partialorder %v5973_v61, 0.0 }
 0x7e6   : > { %v13322_v32 = vsel %vm6005_vm4, %v5973_v61, %v6037_v19  ;;  %v14759_v61 = vld [vmem:[#allocation4_spill] sm:$0xff]  ;;  %v6428_v19 = vpack.c.b16 %v6402_v56, %v6401_v26 }
 0x7e7   : > { %v6101_v21 = vpack.c.bf16 %v13322_v32, %v13322_v32  ;;  %vm14760_vm10 = vnez %v14759_v61  ;;  %v6261_v61 = vrot.slane %v13322_v32, 1 }
 0x7e8   : > { %v7166_v43 = vpop.f32.mrf.mxu0 }
 0x7e9   : > { %v6501_v44 = vunpack.c.l.b16 %v6101_v21 }
 0x7eb   : > { %v13268_v1 = vpop.permute.xlu1 %6533 }
 0x7ec   : > { %v6661_v26 = vsel %vm14753_vm0, %v13128_v38, %v13268_v1 }
 0x7f0   : > { %6911 = vmatmul.bf16.gmra.mxu2 %v6645_v49  ;;  %7089 = vmatmul.bf16.gmra.mxu3 %v6645_v49  ;;  %v5902_v49 = vld [vmem:[#allocation2 + $0x1d8] sm:$0xff]  ;;  %v13348_v43 = vpop.f32.mrf.mxu0 }
 0x7f3   : > { %v13277_v15 = vpop.permute.xlu1 %6535 }
 0x7fb   : > { %v5800_v9 = vpop.permute.xlu1 %5799 }
 0x7fc   : > { %v5870_v63 = vadd.f32 %v5800_v9, %v14750_v17 }
 0x7fe   : > { %v5934_v8 = vadd.f32 %v5902_v49, %v5870_v63  ;;  %v6102_v49 = vpack.c.bf16 %v13196_v22, %v13196_v22 }
 0x800   : > { %v5968_v13 = vadd.f32 %v13047_v53, %v5934_v8  ;;  %6916 = vmatmul.bf16.gmra.mxu2 %v6649_v6  ;;  %7094 = vmatmul.bf16.gmra.mxu3 %v6649_v6 }
 0x802   : > { %vm6000_vm2 = vcmp.ge.f32.partialorder %v5968_v13, 0.0  ;;  %v6032_v41 = vmul.f32 0.1, %v5968_v13 }
 0x803   : > { %v5804_v3 = vpop.permute.xlu1 %5803 }
 0x804   : > { %v13315_v34 = vsel %vm6000_vm2, %v5968_v13, %v6032_v41  ;;  %v5872_v23 = vadd.f32 %v5804_v3, %v13124_v25  ;;  %v6991_v41 = vpop.f32.mrf.mxu1 }
 0x805   : > { %v6256_v48 = vrot.slane %v13315_v34, 1  ;;  %v6096_v28 = vpack.c.bf16 %v13315_v34, %v13315_v34 }
 0x806   : > { %v5936_v4 = vadd.f32 %v5904_v51, %v5872_v23  ;;  %v6653_v23 = vsel %vm14761_vm8, %v6428_v19, %v13249_v52  ;;  %v6497_v51 = vunpack.c.l.b16 %v6097_v54 }
 0x807   : > { %v6496_v27 = vunpack.c.l.b16 %v6096_v28  ;;  %v6268_v9 = vsel %vm14757_vm5, %v6256_v48, %v6257_v12  ;;  %v6269_v25 = vsel %vm14758_vm14, %v6255_v18, %v6256_v48  ;;  %v6502_v48 = vunpack.c.l.b16 %v6102_v49  ;;  %vm14771_vm5 = vmmov %vm14753_vm0 }
 0x808   : > { %v5970_v35 = vadd.f32 %v13047_v53, %v5936_v4  ;;  %v6319_v17 = vpack.c.bf16 %v6269_v25, %v6269_v25  ;;  %v6320_v63 = vpack.c.bf16 %v6268_v9, %v6268_v9  ;;  %vm14772_vm14 = vmmov %vm14765_vm1 }
 0x809   : > { %v6515_v55 = vpack.c.b16 %v6496_v27, %v6495_v16  ;;  %v6518_v52 = vpack.c.b16 %v6502_v48, %v6501_v44  ;;  %v13368_v27 = vsel %vm14766_vm6, %v13207_v37, %v13255_v42  ;;  %v14767_v42 = vld [vmem:[#allocation26_spill] sm:$0xff]  ;;  %v14780_v48 = vrot.slane %v12602_v45, 1  ;;  %vm14783_vm6 = vmmov %vm14769_vm3 }
 0x80a   : > { %vm6002_vm11 = vcmp.ge.f32.partialorder %v5970_v35, 0.0  ;;  %v6034_v14 = vmul.f32 0.1, %v5970_v35  ;;  %v6351_v18 = vsel %vm8819_vm13, %v6319_v17, 0  ;;  %v6352_v8 = vsel %vm14760_vm10, %v6320_v63, 0  ;;  %v13382_v63 = vpop.f32.mrf.mxu0  ;;  %vm14774_vm10 = vmmov %vm14753_vm0 }
 0x80b   : > { %6543 = vrot.lane.b32.xlu0 %v6515_v55, %s8616_s13  ;;  %v5808_v6 = vpop.permute.xlu1 %5807  ;;  %v6607_v31 = vunpack.c.l.b16 %v6351_v18  ;;  %v6608_v46 = vunpack.c.l.b16 %v6352_v8  ;;  %vm14768_vm4 = vnez %v14767_v42 }
 0x80c   : > { %v13345_v13 = vsel %vm6002_vm11, %v5970_v35, %v6034_v14  ;;  %v5874_v2 = vadd.f32 %v5808_v6, %v13135_v62  ;;  %v6993_v17 = vpop.f32.mrf.mxu1  ;;  %v6657_v6 = vsel %vm14769_vm3, %v13072_v11, %v13259_v39  ;;  %vm14773_vm11 = vmmov %vm14765_vm1 }
 0x80d   : > { %v6258_v3 = vrot.slane %v13345_v13, 1  ;;  %v6627_v50 = vpack.c.b16 %v6608_v46, %v6607_v31  ;;  %v6098_v36 = vpack.c.bf16 %v13345_v13, %v13345_v13 }
 0x80e   : > { %v5938_v47 = vadd.f32 %v5906_v0, %v5874_v2  ;;  %v6665_v2 = vsel %vm14774_vm10, %v13150_v57, %v13277_v15  ;;  %v14775_v0 = vld [vmem:[#allocation29_spill] sm:$0xff]  ;;  %v6262_v57 = vrot.slane %v13196_v22, 1 }
 0x80f   : > { %8382 = vmatmul.msk.bf16.gmra.mxu1 %vm14762_vm15, %v6627_v50  ;;  %8398 = vmatmul.msk.bf16.gmra.mxu0 %vm14763_vm12, %v6627_v50  ;;  %v6498_v62 = vunpack.c.l.b16 %v6098_v36  ;;  %v6266_v28 = vsel %vm14764_vm7, %v6258_v3, %v6259_v5  ;;  %v6267_v4 = vsel %vm14765_vm1, %v6257_v12, %v6258_v3  ;;  %vm14776_vm8 = vnez %v14775_v0  ;;  %vm14777_vm15 = vmmov %vm14753_vm0 }
 0x810   : > { %v5972_v56 = vadd.f32 %v13047_v53, %v5938_v47  ;;  %6921 = vmatmul.bf16.gmra.mxu2 %v6653_v23  ;;  %7099 = vmatmul.bf16.gmra.mxu3 %v6653_v23  ;;  %v6321_v25 = vpack.c.bf16 %v6267_v4, %v6267_v4  ;;  %v6322_v35 = vpack.c.bf16 %v6266_v28, %v6266_v28  ;;  %vm14778_vm12 = vmmov %vm14753_vm0 }
 0x811   : > { %v6516_v16 = vpack.c.b16 %v6498_v62, %v6497_v51  ;;  %v6099_v53 = vpack.c.bf16 %v13330_v40, %v13330_v40  ;;  %vm14779_vm7 = vmmov %vm14765_vm1  ;;  %v6294_v51 = vsel %vm14765_vm1, %v6262_v57, %v14780_v48 }
 0x812   : > { %vm6004_vm2 = vcmp.ge.f32.partialorder %v5972_v56, 0.0  ;;  %v6036_v9 = vmul.f32 0.1, %v5972_v56  ;;  %v6353_v37 = vsel %vm8819_vm13, %v6321_v25, 0  ;;  %v6354_v12 = vsel %vm14768_vm4, %v6322_v35, 0  ;;  %v13399_v41 = vpop.f32.mrf.mxu0 }
 0x813   : > { %6549 = vrot.lane.b32.xlu0 %v6518_v52, %s8616_s13  ;;  %6545 = vrot.lane.b32.xlu1 %v6516_v16, %s8616_s13  ;;  %v6499_v55 = vunpack.c.l.b16 %v6099_v53  ;;  %v6609_v54 = vunpack.c.l.b16 %v6353_v37  ;;  %v6610_v14 = vunpack.c.l.b16 %v6354_v12  ;;  %v6263_v23 = vsel %vm14779_vm7, %v6261_v61, %v6262_v57  ;;  %v8545_v16 = vld [vmem:[%s13730_s5 + $0x10] sm:$0xff] }
 0x814   : > { %v13374_v38 = vsel %vm6004_vm2, %v5972_v56, %v6036_v9  ;;  %v6996_v19 = vpop.f32.mrf.mxu1  ;;  %v6325_v62 = vpack.c.bf16 %v6263_v23, %v6263_v23  ;;  %v6326_v28 = vpack.c.bf16 %v6294_v51, %v6294_v51  ;;  %v14781_v9 = vld [vmem:[#allocation16_spill] sm:$0xff]  ;;  %7577 = vmatpush.bf16.msra.mxu2 %v8545_v16  ;;  %vm14784_vm2 = vmmov %vm14769_vm3  ;;  %v6127_v12 = vrot.slane %v13083_v30, 7 }
 0x815   : > { %v6100_v1 = vpack.c.bf16 %v13374_v38, %v13374_v38  ;;  %v6260_v18 = vrot.slane %v13374_v38, 1  ;;  %v6628_v8 = vpack.c.b16 %v6610_v14, %v6609_v54  ;;  %vm14782_vm0 = vnez %v14781_v9 }
 0x816   : > { %v6357_v52 = vsel %vm8819_vm13, %v6325_v62, 0  ;;  %vm14785_vm4 = vcmp.lt.s32.totalorder %v14266_v29, 1  ;;  %v6129_v14 = vrot.slane %v13307_v20, 7  ;;  %v6132_v48 = vrot.slane %v13374_v38, 7 }
 0x817   : > { %v6500_v21 = vunpack.c.l.b16 %v6100_v1  ;;  %v6264_v31 = vsel %vm14772_vm14, %v6260_v18, %v6261_v61  ;;  %v6265_v46 = vsel %vm14773_vm11, %v6259_v5, %v6260_v18  ;;  %v6613_v45 = vunpack.c.l.b16 %v6357_v52  ;;  %vm14786_vm3 = vmmov %vm14785_vm4 }
 0x818   : > { %v6323_v11 = vpack.c.bf16 %v6265_v46, %v6265_v46  ;;  %v6324_v39 = vpack.c.bf16 %v6264_v31, %v6264_v31  ;;  %v6130_v46 = vrot.slane %v13345_v13, 7  ;;  %vm14790_vm14 = vmmov %vm14784_vm2 }
 0x819   : > { %v6517_v49 = vpack.c.b16 %v6500_v21, %v6499_v55  ;;  %v6142_v21 = vsel %vm14785_vm4, %v6126_v60, %v6127_v12  ;;  %vm14791_vm11 = vmmov %vm14786_vm3 }
 0x81a   : > { %v6355_v3 = vsel %vm8819_vm13, %v6323_v11, 0  ;;  %v6356_v50 = vsel %vm14776_vm8, %v6324_v39, 0  ;;  %v13405_v47 = vpop.f32.mrf.mxu0  ;;  %v6191_v54 = vpack.c.bf16 %v6142_v21, %v6142_v21  ;;  %v6133_v39 = vrot.slane %v13322_v32, 7  ;;  %vm14794_vm8 = vmmov %vm14786_vm3 }
 0x81b   : > { %6547 = vrot.lane.b32.xlu2 %v6517_v49, %s8616_s13  ;;  %v6611_v44 = vunpack.c.l.b16 %v6355_v3  ;;  %v6612_v36 = vunpack.c.l.b16 %v6356_v50  ;;  %v6128_v49 = vrot.slane %v13315_v34, 7  ;;  %v6139_v0 = vsel %vm14791_vm11, %v6129_v14, %v6130_v46  ;;  %vm14797_vm7 = vmmov %vm14786_vm3 }
 0x81c   : > { %v6998_v5 = vpop.f32.mrf.mxu1  ;;  %vm14798_vm1 = vmmov %vm14786_vm3 }
 0x81d   : > { %v6629_v15 = vpack.c.b16 %v6612_v36, %v6611_v44  ;;  %v6141_v18 = vsel %vm14786_vm3, %v6127_v12, %v6128_v49  ;;  %v6194_v36 = vpack.c.bf16 %v6139_v0, %v6139_v0  ;;  %v14792_v5 = vld [vmem:[#allocation30_spill] sm:$0xff]  ;;  %v6136_v38 = vsel %vm14798_vm1, %v6132_v48, %v6133_v39  ;;  %v14801_v12 = vld [vmem:[#allocation8_spill] sm:$0xff]  ;;  %vm14804_vm4 = vmmov %vm14784_vm2 }
 0x81e   : > { %vm14793_vm10 = vnez %v14792_v5  ;;  %vm14809_vm11 = vmmov %vm14784_vm2 }
 0x81f   : > { %8383 = vmatmul.msk.bf16.gmra.mxu1 %vm14770_vm9, %v6628_v8  ;;  %8399 = vmatmul.msk.bf16.gmra.mxu0 %vm14771_vm5, %v6628_v8  ;;  %v6192_v8 = vpack.c.bf16 %v6141_v18, %v6141_v18  ;;  %vm14789_vm5 = vmmov %vm14786_vm3 }
 0x820   : > { %6926 = vmatmul.bf16.gmra.mxu2 %v6657_v6  ;;  %7104 = vmatmul.bf16.gmra.mxu3 %v6657_v6  ;;  %v14787_v6 = vld [vmem:[#allocation13_spill] sm:$0xff]  ;;  %v6140_v34 = vsel %vm14789_vm5, %v6128_v49, %v6129_v14  ;;  %vm14807_vm5 = vmmov %vm14784_vm2 }
 0x821   : > { %vm14788_vm9 = vnez %v14787_v6  ;;  %v6193_v11 = vpack.c.bf16 %v6140_v34, %v6140_v34  ;;  %vm14815_vm1 = vmmov %vm14784_vm2 }
 0x822   : > { %v13418_v56 = vpop.f32.mrf.mxu0  ;;  %v6223_v33 = vsel %vm14788_vm9, %v6191_v54, 0  ;;  %vm14806_vm9 = vmmov %vm14784_vm2 }
 0x823   : > { %v6225_v13 = vsel %vm14793_vm10, %v6193_v11, 0  ;;  %vm14810_vm10 = vmmov %vm14784_vm2 }
 0x824   : > { %v13416_v4 = vpop.f32.mrf.mxu1  ;;  %v6417_v51 = vunpack.c.l.b16 %v6225_v13 }
 0x82a   : > { %v13429_v1 = vpop.f32.mrf.mxu0 }
 0x82c   : > { %v13427_v53 = vpop.f32.mrf.mxu1 }
 0x82f   : > { %8384 = vmatmul.msk.bf16.gmra.mxu1 %vm14777_vm15, %v6629_v15  ;;  %8400 = vmatmul.msk.bf16.gmra.mxu0 %vm14778_vm12, %v6629_v15  ;;  %vm14795_vm15 = vmmov %vm14786_vm3 }
 0x830   : > { %6931 = vmatmul.bf16.gmra.mxu2 %v6661_v26  ;;  %7109 = vmatmul.bf16.gmra.mxu3 %v6661_v26  ;;  %v6358_v26 = vsel %vm14782_vm0, %v6326_v28, 0  ;;  %v6135_v32 = vsel %vm14795_vm15, %v6133_v39, %v6134_v58  ;;  %vm14796_vm12 = vmmov %vm14784_vm2 }
 0x831   : > { %v6614_v25 = vunpack.c.l.b16 %v6358_v26  ;;  %v6198_v28 = vpack.c.bf16 %v6135_v32, %v6135_v32  ;;  %vm14805_vm3 = vmmov %vm14784_vm2 }
 0x832   : > { %v13453_v20 = vpop.f32.mrf.mxu0  ;;  %vm14812_vm15 = vmmov %vm14784_vm2 }
 0x833   : > { %v6630_v35 = vpack.c.b16 %v6614_v25, %v6613_v45  ;;  %v14799_v45 = vld [vmem:[#allocation6_spill] sm:$0xff] }
 0x834   : > { %v13446_v31 = vpop.f32.mrf.mxu1  ;;  %vm14800_vm0 = vnez %v14799_v45 }
 0x83a   : > { %v13478_v52 = vpop.f32.mrf.mxu0 }
 0x83c   : > { %v13474_v23 = vpop.f32.mrf.mxu1 }
 0x83f   : > { %8385 = vmatmul.msk.bf16.gmra.mxu1 %vm14783_vm6, %v6630_v35  ;;  %8401 = vmatmul.msk.bf16.gmra.mxu0 %vm14784_vm2, %v6630_v35  ;;  %v6197_v35 = vpack.c.bf16 %v6136_v38, %v6136_v38  ;;  %vm14802_vm6 = vnez %v14801_v12 }
 0x840   : > { %6936 = vmatmul.bf16.gmra.mxu2 %v6665_v2  ;;  %7114 = vmatmul.bf16.gmra.mxu3 %v6665_v2  ;;  %v6415_v2 = vunpack.c.l.b16 %v6223_v33 }
 0x843   : > { %v6897_v37 = vpop.f32.mrf.mxu2  ;;  %v7075_v42 = vpop.f32.mrf.mxu3 }
 0x844   : > { %v6230_v37 = vsel %vm8819_vm13, %v6198_v28, 0  ;;  %v7011_v54 = vpop.f32.mrf.mxu1 }
 0x845   : > { %v6422_v49 = vunpack.c.l.b16 %v6230_v37 }
 0x84b   : > { %v6899_v17 = vpop.f32.mrf.mxu2  ;;  %v7077_v55 = vpop.f32.mrf.mxu3 }
 0x84c   : > { %v6229_v17 = vsel %vm14802_vm6, %v6197_v35, 0  ;;  %v7013_v6 = vpop.f32.mrf.mxu1 }
 0x84d   : > { %v6421_v21 = vunpack.c.l.b16 %v6229_v17 }
 0x84f   : > { %v13500_v18 = vpack.c.b16 %v6422_v49, %v6421_v21 }
 0x850   : > { %6941 = vmatmul.bf16.gmra.mxu2 %v13305_v10  ;;  %7119 = vmatmul.bf16.gmra.mxu3 %v13305_v10  ;;  %v6224_v10 = vsel %vm8819_vm13, %v6192_v8, 0  ;;  %v6677_v8 = vsel %vm14804_vm4, %v13231_v7, %v13265_v59 }
 0x851   : > { %v6416_v19 = vunpack.c.l.b16 %v6224_v10 }
 0x853   : > { %v6902_v30 = vpop.f32.mrf.mxu2  ;;  %v7080_v61 = vpop.f32.mrf.mxu3  ;;  %v13458_v3 = vpack.c.b16 %v6416_v19, %v6415_v2 }
 0x854   : > { %v7170_v60 = vadd.f32 %v13348_v43, %v7080_v61  ;;  %v6131_v43 = vrot.slane %v13330_v40, 7  ;;  %v6226_v40 = vsel %vm8819_vm13, %v6194_v36, 0  ;;  %v7189_v30 = vpop.f32.mrf.mxu0  ;;  %v7016_v59 = vpop.f32.mrf.mxu1 }
 0x855   : > { %v6418_v62 = vunpack.c.l.b16 %v6226_v40 }
 0x856   : > { %7249 = vst.msk [vmem:[#allocation2 + $0x48] sm:$0xff] %vm14790_vm14, %v7170_v60  ;;  %v6138_v15 = vsel %vm14794_vm8, %v6130_v46, %v6131_v43  ;;  %v6137_v58 = vsel %vm14797_vm7, %v6131_v43, %v6132_v48  ;;  %vm14808_vm14 = vmmov %vm14784_vm2 }
 0x857   : > { %v13482_v22 = vpack.c.b16 %v6418_v62, %v6417_v51  ;;  %v6196_v26 = vpack.c.bf16 %v6137_v58, %v6137_v58  ;;  %vm14811_vm8 = vmmov %vm14784_vm2 }
 0x858   : > { %vm14814_vm7 = vmmov %vm14784_vm2 }
 0x859   : > { %v6228_v42 = vsel %vm8819_vm13, %v6196_v26, 0  ;;  %vm14803_vm13 = vmmov %vm14784_vm2 }
 0x85a   : > { %v6420_v55 = vunpack.c.l.b16 %v6228_v42 }
 0x85b   : > { %v6904_v50 = vpop.f32.mrf.mxu2  ;;  %v7082_v44 = vpop.f32.mrf.mxu3 }
 0x85c   : > { %v7172_v57 = vadd.f32 %v13382_v63, %v7082_v44  ;;  %v6195_v63 = vpack.c.bf16 %v6138_v15, %v6138_v15  ;;  %v7191_v34 = vpop.f32.mrf.mxu0 }
 0x85e   : > { %7251 = vst.msk [vmem:[#allocation2 + $0x58] sm:$0xff] %vm14796_vm12, %v7172_v57  ;;  %v6227_v25 = vsel %vm14800_vm0, %v6195_v63, 0  ;;  %vm14813_vm12 = vmmov %vm14784_vm2 }
 0x85f   : > { %v6419_v29 = vunpack.c.l.b16 %v6227_v25  ;;  %vm14816_vm0 = vmmov %vm14815_vm1 }
 0x860   : > { %6946 = vmatmul.bf16.gmra.mxu2 %v13368_v27  ;;  %7124 = vmatmul.bf16.gmra.mxu3 %v13368_v27  ;;  %vm14817_vm6 = vmmov %vm14816_vm0 }
 0x861   : > { %v13498_v14 = vpack.c.b16 %v6420_v55, %v6419_v29  ;;  %vm14820_vm4 = vmmov %vm14816_vm0 }
 0x863   : > { %v6907_v16 = vpop.f32.mrf.mxu2  ;;  %v7085_v9 = vpop.f32.mrf.mxu3 }
 0x864   : > { %v7175_v27 = vadd.f32 %v13399_v41, %v7085_v9 }
 0x866   : > { %7253 = vst.msk [vmem:[#allocation2 + $0x68] sm:$0xff] %vm14784_vm2, %v7175_v27  ;;  %vm14818_vm2 = vmmov %vm14816_vm0 }
 0x86b   : > { %v6909_v61 = vpop.f32.mrf.mxu2  ;;  %v7087_v41 = vpop.f32.mrf.mxu3 }
 0x86c   : > { %v7177_v24 = vadd.f32 %v13405_v47, %v7087_v41  ;;  %v8544_v47 = vld [vmem:[%s13730_s5 + $0x8] sm:$0xff]  ;;  %v8543_v61 = vld [vmem:[%s13730_s5] sm:$0xff] }
 0x86d   : > { %7578 = vmatpush.bf16.msra.mxu2 %v8544_v47 }
 0x86e   : > { %7255 = vst.msk [vmem:[#allocation2 + $0x78] sm:$0xff] %vm14803_vm13, %v7177_v24  ;;  %vm14819_vm13 = vmmov %vm14816_vm0 }
 0x870   : > { %6951 = vmatmul.bf16.gmra.mxu2 %v6677_v8  ;;  %7129 = vmatmul.bf16.gmra.mxu3 %v6677_v8 }
 0x871   : > { %7579 = vmatpush.bf16.msra.mxu2 %v8543_v61 }
 0x873   : > { %v6912_v33 = vpop.f32.mrf.mxu2  ;;  %v7090_v60 = vpop.f32.mrf.mxu3 }
 0x874   : > { %v13508_v10 = vadd.f32 %v13416_v4, %v6912_v33  ;;  %v7180_v46 = vadd.f32 %v13418_v56, %v7090_v60  ;;  %v7194_v4 = vpop.f32.mrf.mxu0 }
 0x876   : > { %7257 = vst.msk [vmem:[#allocation2 + $0x88] sm:$0xff] %vm14805_vm3, %v7180_v46  ;;  %vm14821_vm3 = vmmov %vm14816_vm0 }
 0x87b   : > { %v6914_v2 = vpop.f32.mrf.mxu2  ;;  %v7092_v7 = vpop.f32.mrf.mxu3 }
 0x87c   : > { %v13516_v19 = vadd.f32 %v13427_v53, %v6914_v2  ;;  %v7182_v11 = vadd.f32 %v13429_v1, %v7092_v7  ;;  %v7018_v53 = vpop.f32.mrf.mxu1  ;;  %v7196_v1 = vpop.f32.mrf.mxu0 }
 0x87d   : > { %v6544_v39 = vpop.permute.xlu0 %6543 }
 0x87e   : > { %v6681_v56 = vsel %vm14806_vm9, %v13458_v3, %v6544_v39  ;;  %7259 = vst.msk [vmem:[#allocation2 + $0x98] sm:$0xff] %vm14807_vm5, %v7182_v11  ;;  %vm14822_vm9 = vmmov %vm14816_vm0 }
 0x87f   : > { %vm14823_vm5 = vmmov %vm14816_vm0 }
 0x880   : > { %6956 = vmatmul.bf16.gmra.mxu2 %v6681_v56  ;;  %7134 = vmatmul.bf16.gmra.mxu3 %v6681_v56 }
 0x883   : > { %v6917_v43 = vpop.f32.mrf.mxu2  ;;  %v7095_v0 = vpop.f32.mrf.mxu3 }
 0x884   : > { %v13523_v50 = vadd.f32 %v13446_v31, %v6917_v43  ;;  %v7185_v44 = vadd.f32 %v13453_v20, %v7095_v0  ;;  %v7021_v20 = vpop.f32.mrf.mxu1  ;;  %v7199_v15 = vpop.f32.mrf.mxu0 }
 0x885   : > { %v6546_v5 = vpop.permute.xlu1 %6545  ;;  %v6550_v42 = vpop.permute.xlu0 %6549 }
 0x886   : > { %7342 = vrot.lane.b32.xlu1 %v13523_v50, %s8616_s13  ;;  %7261 = vst.msk [vmem:[#allocation2 + $0xa8] sm:$0xff] %vm14808_vm14, %v7185_v44  ;;  %v6685_v31 = vsel %vm14810_vm10, %v13482_v22, %v6546_v5  ;;  %v6693_v55 = vsel %vm14816_vm0, %v13500_v18, %v6550_v42  ;;  %vm14824_vm14 = vmmov %vm14816_vm0 }
 0x88b   : > { %v6919_v36 = vpop.f32.mrf.mxu2  ;;  %v7097_v3 = vpop.f32.mrf.mxu3 }
 0x88c   : > { %v13530_v13 = vadd.f32 %v13474_v23, %v6919_v36  ;;  %v7187_v57 = vadd.f32 %v13478_v52, %v7097_v3  ;;  %v7023_v51 = vpop.f32.mrf.mxu1  ;;  %v7201_v28 = vpop.f32.mrf.mxu0 }
 0x88d   : > { %v6548_v52 = vpop.permute.xlu2 %6547 }
 0x88e   : > { %7344 = vrot.lane.b32.xlu2 %v13530_v13, %s8616_s13  ;;  %7263 = vst.msk [vmem:[#allocation2 + $0xb8] sm:$0xff] %vm14809_vm11, %v7187_v57  ;;  %v6689_v38 = vsel %vm14813_vm12, %v13498_v14, %v6548_v52  ;;  %vm14825_vm11 = vmmov %vm14816_vm0 }
 0x88f   : > { %vm14827_vm12 = vmmov %vm14816_vm0 }
 0x890   : > { %6961 = vmatmul.bf16.gmra.mxu2 %v6685_v31  ;;  %7139 = vmatmul.bf16.gmra.mxu3 %v6685_v31 }
 0x893   : > { %v6922_v32 = vpop.f32.mrf.mxu2  ;;  %v7100_v40 = vpop.f32.mrf.mxu3 }
 0x894   : > { %v13538_v48 = vadd.f32 %v7011_v54, %v6922_v32  ;;  %v7190_v23 = vadd.f32 %v7189_v30, %v7100_v40  ;;  %v7026_v26 = vpop.f32.mrf.mxu1  ;;  %v7204_v35 = vpop.f32.mrf.mxu0 }
 0x896   : > { %7346 = vrot.lane.b32.xlu0 %v13538_v48, %s8616_s13  ;;  %7265 = vst.msk [vmem:[#allocation2 + $0xc8] sm:$0xff] %vm14811_vm8, %v7190_v23  ;;  %vm14826_vm8 = vmmov %vm14816_vm0 }
 0x89b   : > { %v6924_v62 = vpop.f32.mrf.mxu2  ;;  %v7102_v63 = vpop.f32.mrf.mxu3 }
 0x89c   : > { %v13543_v22 = vadd.f32 %v7013_v6, %v6924_v62  ;;  %v7192_v58 = vadd.f32 %v7191_v34, %v7102_v63  ;;  %v7028_v29 = vpop.f32.mrf.mxu1  ;;  %v7206_v21 = vpop.f32.mrf.mxu0 }
 0x89e   : > { %7348 = vrot.lane.b32.xlu1 %v13543_v22, %s8616_s13  ;;  %7267 = vst.msk [vmem:[#allocation2 + $0xd8] sm:$0xff] %vm14812_vm15, %v7192_v58 }
 0x8a0   : > { %6966 = vmatmul.bf16.gmra.mxu2 %v6689_v38  ;;  %7144 = vmatmul.bf16.gmra.mxu3 %v6689_v38 }
 0x8a3   : > { %v6927_v16 = vpop.f32.mrf.mxu2  ;;  %v7105_v9 = vpop.f32.mrf.mxu3 }
 0x8a4   : > { %v13550_v45 = vadd.f32 %v7016_v59, %v6927_v16  ;;  %v7195_v25 = vadd.f32 %v7194_v4, %v7105_v9  ;;  %v7031_v41 = vpop.f32.mrf.mxu1  ;;  %v7209_v18 = vpop.f32.mrf.mxu0 }
 0x8a5   : > { %v7407_v42 = vld [vmem:[#allocation2 + $0xd8] sm:$0xff] }
 0x8a6   : > { %7350 = vrot.lane.b32.xlu2 %v13550_v45, %s8616_s13  ;;  %7269 = vst.msk [vmem:[#allocation2 + $0xe8] sm:$0xff] %vm14814_vm7, %v7195_v25  ;;  %vm14828_vm7 = vmmov %vm14816_vm0 }
 0x8ab   : > { %v6929_v37 = vpop.f32.mrf.mxu2  ;;  %v7107_v27 = vpop.f32.mrf.mxu3 }
 0x8ac   : > { %v13555_v12 = vadd.f32 %v7018_v53, %v6929_v37  ;;  %v7197_v17 = vadd.f32 %v7196_v1, %v7107_v27  ;;  %v7033_v60 = vpop.f32.mrf.mxu1  ;;  %v7211_v47 = vpop.f32.mrf.mxu0 }
 0x8ae   : > { %7352 = vrot.lane.b32.xlu0 %v13555_v12, %s8616_s13  ;;  %7271 = vst.msk [vmem:[#allocation2 + $0xf8] sm:$0xff] %vm14815_vm1, %v7197_v17  ;;  %vm14829_vm1 = vmmov %vm14816_vm0 }
 0x8b0   : > { %6971 = vmatmul.bf16.gmra.mxu2 %v6693_v55  ;;  %7149 = vmatmul.bf16.gmra.mxu3 %v6693_v55  ;;  %v13609_v55 = vld [vmem:[%s13729_s4 + $0x3] ss:$0 sm:$0xff] }
 0x8b3   : > { %v6932_v49 = vpop.f32.mrf.mxu2  ;;  %v7110_v54 = vpop.f32.mrf.mxu3 }
 0x8b4   : > { %v13562_v14 = vadd.f32 %v7021_v20, %v6932_v49  ;;  %v7200_v30 = vadd.f32 %v7199_v15, %v7110_v54  ;;  %v7036_v39 = vpop.f32.mrf.mxu1  ;;  %v7214_v43 = vpop.f32.mrf.mxu0 }
 0x8b6   : > { %7354 = vrot.lane.b32.xlu1 %v13562_v14, %s8616_s13  ;;  %7273 = vst.msk [vmem:[#allocation2 + $0x108] sm:$0xff] %vm14817_vm6, %v7200_v30  ;;  %v7406_v30 = vld [vmem:[#allocation2 + $0xc8] sm:$0xff]  ;;  %vm14830_vm6 = vmmov %vm14829_vm1 }
 0x8bb   : > { %v6934_v24 = vpop.f32.mrf.mxu2  ;;  %v7112_v8 = vpop.f32.mrf.mxu3 }
 0x8bc   : > { %v13570_v6 = vadd.f32 %v7023_v51, %v6934_v24  ;;  %v7202_v33 = vadd.f32 %v7201_v28, %v7112_v8  ;;  %v7038_v36 = vpop.f32.mrf.mxu1  ;;  %v7216_v3 = vpop.f32.mrf.mxu0 }
 0x8be   : > { %7356 = vrot.lane.b32.xlu2 %v13570_v6, %s8616_s13  ;;  %7275 = vst.msk [vmem:[#allocation2 + $0x118] sm:$0xff] %vm14818_vm2, %v7202_v33 }
 0x8c3   : > { %v6937_v34 = vpop.f32.mrf.mxu2  ;;  %v7115_v46 = vpop.f32.mrf.mxu3 }
 0x8c4   : > { %v13575_v2 = vadd.f32 %v7026_v26, %v6937_v34  ;;  %v7205_v7 = vadd.f32 %v7204_v35, %v7115_v46  ;;  %v7041_v15 = vpop.f32.mrf.mxu1  ;;  %v7219_v32 = vpop.f32.mrf.mxu0 }
 0x8c6   : > { %7358 = vrot.lane.b32.xlu0 %v13575_v2, %s8616_s13  ;;  %7277 = vst.msk [vmem:[#allocation2 + $0x128] sm:$0xff] %vm14819_vm13, %v7205_v7  ;;  %vm14831_vm13 = vmmov %vm14829_vm1 }
 0x8cb   : > { %v6939_v59 = vpop.f32.mrf.mxu2  ;;  %v7117_v11 = vpop.f32.mrf.mxu3 }
 0x8cc   : > { %v13580_v4 = vadd.f32 %v7028_v29, %v6939_v59  ;;  %v7207_v56 = vadd.f32 %v7206_v21, %v7117_v11  ;;  %v7043_v63 = vpop.f32.mrf.mxu1  ;;  %v7221_v58 = vpop.f32.mrf.mxu0 }
 0x8ce   : > { %7360 = vrot.lane.b32.xlu1 %v13580_v4, %s8616_s13  ;;  %7279 = vst.msk [vmem:[#allocation2 + $0x138] sm:$0xff] %vm14820_vm4, %v7207_v56  ;;  %vm14832_vm4 = vmmov %vm14829_vm1 }
 0x8d3   : > { %v6942_v0 = vpop.f32.mrf.mxu2  ;;  %v7120_v44 = vpop.f32.mrf.mxu3 }
 0x8d4   : > { %v13585_v53 = vadd.f32 %v7031_v41, %v6942_v0  ;;  %v7210_v1 = vadd.f32 %v7209_v18, %v7120_v44  ;;  %v7046_v25 = vpop.f32.mrf.mxu1  ;;  %v7224_v27 = vpop.f32.mrf.mxu0 }
 0x8d6   : > { %7362 = vrot.lane.b32.xlu2 %v13585_v53, %s8616_s13  ;;  %7281 = vst.msk [vmem:[#allocation2 + $0x148] sm:$0xff] %vm14821_vm3, %v7210_v1 }
 0x8db   : > { %v6944_v5 = vpop.f32.mrf.mxu2  ;;  %v7122_v57 = vpop.f32.mrf.mxu3 }
 0x8dc   : > { %v13590_v31 = vadd.f32 %v7033_v60, %v6944_v5  ;;  %v7212_v20 = vadd.f32 %v7211_v47, %v7122_v57  ;;  %v7048_v24 = vpop.f32.mrf.mxu1  ;;  %v7226_v46 = vpop.f32.mrf.mxu0  ;;  %v7408_v57 = vld [vmem:[#allocation2 + $0xe8] sm:$0xff] }
 0x8de   : > { %7364 = vrot.lane.b32.xlu0 %v13590_v31, %s8616_s13  ;;  %7283 = vst.msk [vmem:[#allocation2 + $0x158] sm:$0xff] %vm14822_vm9, %v7212_v20  ;;  %vm14833_vm9 = vmmov %vm14829_vm1 }
 0x8e3   : > { %v6947_v40 = vpop.f32.mrf.mxu2  ;;  %v7125_v23 = vpop.f32.mrf.mxu3 }
 0x8e4   : > { %v13595_v51 = vadd.f32 %v7036_v39, %v6947_v40  ;;  %v7215_v62 = vadd.f32 %v7214_v43, %v7125_v23  ;;  %v7051_v43 = vpop.f32.mrf.mxu1  ;;  %v7229_v0 = vpop.f32.mrf.mxu0 }
 0x8e5   : > { %v7412_v43 = vld [vmem:[#allocation2 + $0x128] sm:$0xff] }
 0x8e6   : > { %7366 = vrot.lane.b32.xlu1 %v13595_v51, %s8616_s13  ;;  %7285 = vst.msk [vmem:[#allocation2 + $0x168] sm:$0xff] %vm14823_vm5, %v7215_v62 }
 0x8e8   : > { %v7345_v9 = vpop.permute.xlu2 %7344 }
 0x8e9   : > { %v7391_v26 = vadd.f32 %v7345_v9, %v13516_v19 }
 0x8eb   : > { %v6949_v28 = vpop.f32.mrf.mxu2  ;;  %v7127_v52 = vpop.f32.mrf.mxu3  ;;  %v7423_v21 = vadd.f32 %v7407_v42, %v7391_v26 }
 0x8ec   : > { %v13600_v38 = vadd.f32 %v7038_v36, %v6949_v28  ;;  %v7217_v16 = vadd.f32 %v7216_v3, %v7127_v52  ;;  %v7231_v62 = vpop.f32.mrf.mxu0 }
 0x8ed   : > { %v7441_v19 = vadd.f32 %v13609_v55, %v7423_v21 }
 0x8ee   : > { %7368 = vrot.lane.b32.xlu2 %v13600_v38, %s8616_s13  ;;  %7287 = vst.msk [vmem:[#allocation2 + $0x178] sm:$0xff] %vm14824_vm14, %v7217_v16  ;;  %vm14834_vm14 = vmmov %vm14829_vm1 }
 0x8ef   : > { %v7473_v60 = vmul.f32 0.1, %v7441_v19  ;;  %vm7457_vm10 = vcmp.ge.f32.partialorder %v7441_v19, 0.0 }
 0x8f1   : > { %v7489_v7 = vsel %vm7457_vm10, %v7441_v19, %v7473_v60 }
 0x8f3   : > { %v6952_v35 = vpop.f32.mrf.mxu2  ;;  %v7130_v37 = vpop.f32.mrf.mxu3 }
 0x8f4   : > { %v7042_v17 = vadd.f32 %v7041_v15, %v6952_v35  ;;  %v7220_v29 = vadd.f32 %v7219_v32, %v7130_v37  ;;  %v7053_v15 = vpop.f32.mrf.mxu1  ;;  %v7234_v21 = vpop.f32.mrf.mxu0 }
 0x8f6   : > { %7370 = vrot.lane.b32.xlu0 %v7042_v17, %s8616_s13  ;;  %7289 = vst.msk [vmem:[#allocation2 + $0x188] sm:$0xff] %vm14825_vm11, %v7220_v29  ;;  %vm14835_vm11 = vmmov %vm14829_vm1 }
 0x8f8   : > { %v7343_v49 = vpop.permute.xlu1 %7342 }
 0x8f9   : > { %v7390_v54 = vadd.f32 %v7343_v49, %v13508_v10  ;;  %v7410_v49 = vld [vmem:[#allocation2 + $0x108] sm:$0xff] }
 0x8fb   : > { %v6954_v61 = vpop.f32.mrf.mxu2  ;;  %v7132_v41 = vpop.f32.mrf.mxu3  ;;  %v7422_v18 = vadd.f32 %v7406_v30, %v7390_v54 }
 0x8fc   : > { %v7044_v8 = vadd.f32 %v7043_v63, %v6954_v61  ;;  %v7222_v33 = vadd.f32 %v7221_v58, %v7132_v41  ;;  %v7409_v63 = vld [vmem:[#allocation2 + $0xf8] sm:$0xff] }
 0x8fd   : > { %v7440_v34 = vadd.f32 %v13609_v55, %v7422_v18 }
 0x8fe   : > { %7372 = vrot.lane.b32.xlu1 %v7044_v8, %s8616_s13  ;;  %7291 = vst.msk [vmem:[#allocation2 + $0x198] sm:$0xff] %vm14826_vm8, %v7222_v33 }
 0x8ff   : > { %vm7456_vm15 = vcmp.ge.f32.partialorder %v7440_v34, 0.0  ;;  %v7472_v47 = vmul.f32 0.1, %v7440_v34 }
 0x900   : > { %v7351_v26 = vpop.permute.xlu2 %7350 }
 0x901   : > { %v7488_v10 = vsel %vm7456_vm15, %v7440_v34, %v7472_v47  ;;  %v7394_v35 = vadd.f32 %v7351_v26, %v13538_v48  ;;  %v7411_v48 = vld [vmem:[#allocation2 + $0x118] sm:$0xff]  ;;  %v7236_v47 = vpop.f32.mrf.mxu0  ;;  %vm14836_vm15 = vmmov %vm14829_vm1 }
 0x902   : > { %v7504_v59 = vpack.c.bf16 %v7489_v7, %v7488_v10 }
 0x903   : > { %v6957_v11 = vpop.f32.mrf.mxu2  ;;  %v7135_v39 = vpop.f32.mrf.mxu3  ;;  %v7426_v54 = vadd.f32 %v7410_v49, %v7394_v35 }
 0x904   : > { %v7225_v56 = vadd.f32 %v7224_v27, %v7135_v39  ;;  %8418 = vmatmul.msk.bf16.vlgmr.msra.gmra.mxu2 %vm14827_vm12, %v7504_v59  ;;  %vm14837_vm12 = vmmov %vm14829_vm1 }
 0x905   : > { %v7444_v61 = vadd.f32 %v13609_v55, %v7426_v54 }
 0x906   : > { %7293 = vst.msk [vmem:[#allocation2 + $0x1a8] sm:$0xff] %vm14828_vm7, %v7225_v56  ;;  %vm14838_vm7 = vmmov %vm14829_vm1 }
 0x907   : > { %v7476_v34 = vmul.f32 0.1, %v7444_v61  ;;  %vm7460_vm3 = vcmp.ge.f32.partialorder %v7444_v61, 0.0 }
 0x908   : > { %v7347_v44 = vpop.permute.xlu0 %7346 }
 0x909   : > { %v7392_v1 = vadd.f32 %v7347_v44, %v13523_v50  ;;  %v7492_v39 = vsel %vm7460_vm3, %v7444_v61, %v7476_v34  ;;  %v7417_v34 = vld [vmem:[#allocation2 + $0x178] sm:$0xff] }
 0x90b   : > { %v6959_v36 = vpop.f32.mrf.mxu2  ;;  %v7137_v3 = vpop.f32.mrf.mxu3  ;;  %v7424_v20 = vadd.f32 %v7408_v57, %v7392_v1 }
 0x90c   : > { %v7227_v5 = vadd.f32 %v7226_v46, %v7137_v3  ;;  %v7413_v3 = vld [vmem:[#allocation2 + $0x138] sm:$0xff] }
 0x90d   : > { %v7442_v40 = vadd.f32 %v13609_v55, %v7424_v20 }
 0x90e   : > { %7295 = vst.msk [vmem:[#allocation2 + $0x1b8] sm:$0xff] %vm14829_vm1, %v7227_v5 }
 0x90f   : > { %v7474_v50 = vmul.f32 0.1, %v7442_v40  ;;  %vm7458_vm0 = vcmp.ge.f32.partialorder %v7442_v40, 0.0 }
 0x910   : > { %v7349_v32 = vpop.permute.xlu1 %7348 }
 0x911   : > { %v7393_v23 = vadd.f32 %v7349_v32, %v13530_v13  ;;  %v7490_v37 = vsel %vm7458_vm0, %v7442_v40, %v7474_v50  ;;  %v7056_v13 = vpop.f32.mrf.mxu1 }
 0x913   : > { %v6962_v28 = vpop.f32.mrf.mxu2  ;;  %v7140_v52 = vpop.f32.mrf.mxu3  ;;  %v7425_v58 = vadd.f32 %v7409_v63, %v7393_v23 }
 0x914   : > { %v7230_v16 = vadd.f32 %v7229_v0, %v7140_v52 }
 0x915   : > { %v7443_v9 = vadd.f32 %v13609_v55, %v7425_v58 }
 0x916   : > { %7297 = vst.msk [vmem:[#allocation2 + $0x1c8] sm:$0xff] %vm14830_vm6, %v7230_v16  ;;  %vm14839_vm6 = vmmov %vm14832_vm4 }
 0x917   : > { %vm7459_vm2 = vcmp.ge.f32.partialorder %v7443_v9, 0.0  ;;  %v7475_v25 = vmul.f32 0.1, %v7443_v9 }
 0x918   : > { %v7357_v7 = vpop.permute.xlu2 %7356 }
 0x919   : > { %v7491_v27 = vsel %vm7459_vm2, %v7443_v9, %v7475_v25  ;;  %v7058_v60 = vpop.f32.mrf.mxu1  ;;  %v7397_v11 = vadd.f32 %v7357_v7, %v13555_v12  ;;  %v7239_v12 = vpop.f32.mrf.mxu0 }
 0x91a   : > { %v7505_v42 = vpack.c.bf16 %v7491_v27, %v7490_v37  ;;  %v7414_v27 = vld [vmem:[#allocation2 + $0x148] sm:$0xff] }
 0x91b   : > { %v6964_v17 = vpop.f32.mrf.mxu2  ;;  %v7142_v29 = vpop.f32.mrf.mxu3  ;;  %v7429_v57 = vadd.f32 %v7413_v3, %v7397_v11 }
 0x91c   : > { %v7232_v19 = vadd.f32 %v7231_v62, %v7142_v29  ;;  %8419 = vmatmul.msk.bf16.gmra.mxu2 %vm14831_vm13, %v7505_v42 }
 0x91e   : > { %7299 = vst.msk [vmem:[#allocation2 + $0x1d8] sm:$0xff] %vm14832_vm4, %v7232_v19 }
 0x920   : > { %v7353_v30 = vpop.permute.xlu0 %7352 }
 0x921   : > { %v7395_v41 = vadd.f32 %v7353_v30, %v13543_v22  ;;  %v7061_v15 = vpop.f32.mrf.mxu1  ;;  %v7241_v9 = vpop.f32.mrf.mxu0 }
 0x923   : > { %v6967_v18 = vpop.f32.mrf.mxu2  ;;  %v7145_v24 = vpop.f32.mrf.mxu3  ;;  %v7427_v8 = vadd.f32 %v7411_v48, %v7395_v41 }
 0x924   : > { %v7235_v33 = vadd.f32 %v7234_v21, %v7145_v24  ;;  %v7415_v21 = vld [vmem:[#allocation2 + $0x158] sm:$0xff]  ;;  %v7416_v24 = vld [vmem:[#allocation2 + $0x168] sm:$0xff] }
 0x925   : > { %v7445_v46 = vadd.f32 %v13609_v55, %v7427_v8 }
 0x926   : > { %7301 = vst.msk [vmem:[#allocation2 + $0x1e8] sm:$0xff] %vm14833_vm9, %v7235_v33 }
 0x927   : > { %vm7461_vm5 = vcmp.ge.f32.partialorder %v7445_v46, 0.0  ;;  %v7477_v10 = vmul.f32 0.1, %v7445_v46 }
 0x928   : > { %v7355_v59 = vpop.permute.xlu1 %7354 }
 0x929   : > { %v7396_v22 = vadd.f32 %v7355_v59, %v13550_v45  ;;  %v7493_v56 = vsel %vm7461_vm5, %v7445_v46, %v7477_v10  ;;  %v7447_v45 = vadd.f32 %v13609_v55, %v7429_v57  ;;  %v7063_v50 = vpop.f32.mrf.mxu1  ;;  %vm14840_vm5 = vmmov %vm14832_vm4 }
 0x92a   : > { %v7506_v0 = vpack.c.bf16 %v7493_v56, %v7492_v39 }
 0x92b   : > { %v6969_v44 = vpop.f32.mrf.mxu2  ;;  %v7147_v1 = vpop.f32.mrf.mxu3  ;;  %v7428_v36 = vadd.f32 %v7412_v43, %v7396_v22  ;;  %v7479_v63 = vmul.f32 0.1, %v7447_v45  ;;  %vm7463_vm8 = vcmp.ge.f32.partialorder %v7447_v45, 0.0  ;;  %v7418_v43 = vld [vmem:[#allocation2 + $0x188] sm:$0xff] }
 0x92c   : > { %v7237_v5 = vadd.f32 %v7236_v47, %v7147_v1  ;;  %8420 = vmatmul.msk.bf16.gmra.mxu2 %vm14834_vm14, %v7506_v0 }
 0x92d   : > { %v7446_v20 = vadd.f32 %v13609_v55, %v7428_v36  ;;  %v7495_v16 = vsel %vm7463_vm8, %v7447_v45, %v7479_v63  ;;  %v7420_v45 = vld [vmem:[#allocation2 + $0x1a8] sm:$0xff]  ;;  %v7421_v63 = vld [vmem:[#allocation2 + $0x1b8] sm:$0xff]  ;;  %vm7653_vm8 = vcmask 261120  }
 0x92e   : > { %7303 = vst.msk [vmem:[#allocation2 + $0x1f8] sm:$0xff] %vm14835_vm11, %v7237_v5 }
 0x92f   : > { %v7478_v32 = vmul.f32 0.1, %v7446_v20  ;;  %vm7462_vm10 = vcmp.ge.f32.partialorder %v7446_v20, 0.0 }
 0x930   : > { %v7363_v54 = vpop.permute.xlu2 %7362 }
 0x931   : > { %v7494_v28 = vsel %vm7462_vm10, %v7446_v20, %v7478_v32  ;;  %v7400_v61 = vadd.f32 %v7363_v54, %v13575_v2  ;;  %vm14841_vm10 = vmmov %vm14832_vm4 }
 0x932   : > { %v7507_v26 = vpack.c.bf16 %v7495_v16, %v7494_v28 }
 0x933   : > { %v6972_v40 = vpop.f32.mrf.mxu2  ;;  %v7150_v23 = vpop.f32.mrf.mxu3  ;;  %v7432_v8 = vadd.f32 %v7416_v24, %v7400_v61 }
 0x934   : > { %v7240_v62 = vadd.f32 %v7239_v12, %v7150_v23 }
 0x936   : > { %7305 = vst.msk [vmem:[#allocation2 + $0x208] sm:$0xff] %vm14836_vm15, %v7240_v62 }
 0x938   : > { %v7359_v52 = vpop.permute.xlu0 %7358 }
 0x939   : > { %v7398_v58 = vadd.f32 %v7359_v52, %v13562_v14 }
 0x93b   : > { %v6974_v25 = vpop.f32.mrf.mxu2  ;;  %v7152_v35 = vpop.f32.mrf.mxu3  ;;  %v7430_v13 = vadd.f32 %v7414_v27, %v7398_v58 }
 0x93c   : > { %v7242_v37 = vadd.f32 %v7241_v9, %v7152_v35  ;;  %8421 = vmatmul.msk.bf16.gmra.mxu2 %vm14837_vm12, %v7507_v26  ;;  %v13665_v26 = vld [vmem:[%s13731_s6] ss:$0 sm:$0xff] }
 0x93d   : > { %v7448_v17 = vadd.f32 %v13609_v55, %v7430_v13 }
 0x93e   : > { %7307 = vst.msk [vmem:[#allocation2 + $0x218] sm:$0xff] %vm14838_vm7, %v7242_v37 }
 0x93f   : > { %v7480_v49 = vmul.f32 0.1, %v7448_v17  ;;  %vm7464_vm1 = vcmp.ge.f32.partialorder %v7448_v17, 0.0 }
 0x940   : > { %v7361_v42 = vpop.permute.xlu1 %7360 }
 0x941   : > { %v7399_v29 = vadd.f32 %v7361_v42, %v13570_v6  ;;  %v7496_v41 = vsel %vm7464_vm1, %v7448_v17, %v7480_v49  ;;  %v7450_v6 = vadd.f32 %v13609_v55, %v7432_v8 }
 0x943   : > { %v7431_v14 = vadd.f32 %v7415_v21, %v7399_v29  ;;  %v7482_v47 = vmul.f32 0.1, %v7450_v6  ;;  %vm7466_vm2 = vcmp.ge.f32.partialorder %v7450_v6, 0.0 }
 0x945   : > { %v7449_v19 = vadd.f32 %v13609_v55, %v7431_v14  ;;  %v7498_v39 = vsel %vm7466_vm2, %v7450_v6, %v7482_v47 }
 0x947   : > { %vm7465_vm0 = vcmp.ge.f32.partialorder %v7449_v19, 0.0  ;;  %v7481_v30 = vmul.f32 0.1, %v7449_v19 }
 0x948   : > { %v7369_v10 = vpop.permute.xlu2 %7368 }
 0x949   : > { %v7497_v48 = vsel %vm7465_vm0, %v7449_v19, %v7481_v30  ;;  %v7403_v11 = vadd.f32 %v7369_v10, %v13590_v31 }
 0x94a   : > { %v7508_v18 = vpack.c.bf16 %v7497_v48, %v7496_v41 }
 0x94c   : > { %8422 = vmatmul.msk.bf16.gmra.mxu2 %vm14839_vm6, %v7508_v18 }
 0x950   : > { %v7365_v33 = vpop.permute.xlu0 %7364 }
 0x951   : > { %v7401_v60 = vadd.f32 %v7365_v33, %v13580_v4  ;;  %v7419_v4 = vld [vmem:[#allocation2 + $0x198] sm:$0xff] }
 0x952   : > { %v7435_v1 = vadd.f32 %v7419_v4, %v7403_v11 }
 0x953   : > { %v7433_v46 = vadd.f32 %v7417_v34, %v7401_v60 }
 0x954   : > { %v7453_v3 = vadd.f32 %v13609_v55, %v7435_v1 }
 0x955   : > { %v7451_v7 = vadd.f32 %v13609_v55, %v7433_v46 }
 0x956   : > { %v7485_v57 = vmul.f32 0.1, %v7453_v3  ;;  %vm7469_vm9 = vcmp.ge.f32.partialorder %v7453_v3, 0.0 }
 0x957   : > { %vm7467_vm13 = vcmp.ge.f32.partialorder %v7451_v7, 0.0  ;;  %v7483_v2 = vmul.f32 0.1, %v7451_v7 }
 0x958   : > { %v7367_v59 = vpop.permute.xlu1 %7366  ;;  %v7501_v15 = vsel %vm7469_vm9, %v7453_v3, %v7485_v57 }
 0x959   : > { %v7402_v22 = vadd.f32 %v7367_v59, %v13585_v53  ;;  %v7499_v56 = vsel %vm7467_vm13, %v7451_v7, %v7483_v2 }
 0x95a   : > { %v7509_v0 = vpack.c.bf16 %v7499_v56, %v7498_v39 }
 0x95b   : > { %v7434_v44 = vadd.f32 %v7418_v43, %v7402_v22 }
 0x95c   : > { %8423 = vmatmul.msk.bf16.gmra.mxu2 %vm14832_vm4, %v7509_v0 }
 0x95d   : > { %v7452_v36 = vadd.f32 %v13609_v55, %v7434_v44 }
 0x95f   : > { %v7484_v5 = vmul.f32 0.1, %v7452_v36  ;;  %vm7468_vm3 = vcmp.ge.f32.partialorder %v7452_v36, 0.0 }
 0x961   : > { %v7500_v31 = vsel %vm7468_vm3, %v7452_v36, %v7484_v5 }
 0x962   : > { %v7510_v12 = vpack.c.bf16 %v7501_v15, %v7500_v31 }
 0x968   : > { %v7371_v20 = vpop.permute.xlu0 %7370 }
 0x969   : > { %v7404_v53 = vadd.f32 %v7371_v20, %v13595_v51 }
 0x96b   : > { %v7436_v32 = vadd.f32 %v7420_v45, %v7404_v53 }
 0x96c   : > { %8424 = vmatmul.msk.bf16.gmra.mxu2 %vm14840_vm5, %v7510_v12 }
 0x96d   : > { %v7454_v23 = vadd.f32 %v13609_v55, %v7436_v32 }
 0x96f   : > { %v7486_v52 = vmul.f32 0.1, %v7454_v23  ;;  %vm7470_vm14 = vcmp.ge.f32.partialorder %v7454_v23, 0.0 }
 0x970   : > { %v7373_v40 = vpop.permute.xlu1 %7372 }
 0x971   : > { %v7405_v62 = vadd.f32 %v7373_v40, %v13600_v38  ;;  %v7502_v16 = vsel %vm7470_vm14, %v7454_v23, %v7486_v52 }
 0x973   : > { %v7437_v28 = vadd.f32 %v7421_v63, %v7405_v62 }
 0x975   : > { %v7455_v58 = vadd.f32 %v13609_v55, %v7437_v28 }
 0x977   : > { %vm7471_vm11 = vcmp.ge.f32.partialorder %v7455_v58, 0.0  ;;  %v7487_v51 = vmul.f32 0.1, %v7455_v58 }
 0x979   : > { %v7503_v50 = vsel %vm7471_vm11, %v7455_v58, %v7487_v51 }
 0x97a   : > { %v7511_v9 = vpack.c.bf16 %v7503_v50, %v7502_v16 }
 0x97c   : > { %8425 = vmatmul.msk.bf16.gmra.mxu2 %vm14841_vm10, %v7511_v9 }
 0x987   : > { %v7581_v38 = vpop.f32.mrf.mxu2 }
 0x988   : > { %v7582_v25 = vadd.f32 %v13665_v26, %v7581_v38 }
 0x98a   : > { %8570 = vtanh.f32 %v7582_v25 }
 0x98f   : > { %v7583_v35 = vpop.f32.mrf.mxu2 }
 0x990   : > { %v8571_v37 = vpop.eup %8570  ;;  %v7584_v55 = vadd.f32 %v13665_v26, %v7583_v35 }
 0x991   : > { %v7637_v27 = vmul.f32 0.01, %v8571_v37 }
 0x992   : > { %8572 = vtanh.f32 %v7584_v55 }
 0x993   : > { %7654 = vst.msk [vmem:[%s13673_s27] sm:$0xff] %vm7653_vm8, %v7637_v27 }
 0x998   : > { %v8573_v13 = vpop.eup %8572 }
 0x999   : > { %v7638_v42 = vmul.f32 0.01, %v8573_v13 }
 0x99b   : > { %7655 = vst.msk [vmem:[%s13673_s27 + $0x8] sm:$0xff] %vm7653_vm8, %v7638_v42 }
 0x99f   : > { %v7586_v17 = vpop.f32.mrf.mxu2 }
 0x9a0   : > { %v7587_v29 = vadd.f32 %v13665_v26, %v7586_v17 }
 0x9a2   : > { %8574 = vtanh.f32 %v7587_v29 }
 0x9a7   : > { %v7588_v21 = vpop.f32.mrf.mxu2 }
 0x9a8   : > { %v8575_v14 = vpop.eup %8574  ;;  %v7589_v49 = vadd.f32 %v13665_v26, %v7588_v21 }
 0x9a9   : > { %v7639_v19 = vmul.f32 0.01, %v8575_v14 }
 0x9aa   : > { %8576 = vtanh.f32 %v7589_v49 }
 0x9ab   : > { %7656 = vst.msk [vmem:[%s13673_s27 + $0x10] sm:$0xff] %vm7653_vm8, %v7639_v19 }
 0x9af   : > { %v7591_v54 = vpop.f32.mrf.mxu2 }
 0x9b0   : > { %v8577_v30 = vpop.eup %8576  ;;  %v7592_v61 = vadd.f32 %v13665_v26, %v7591_v54 }
 0x9b1   : > { %v7640_v41 = vmul.f32 0.01, %v8577_v30 }
 0x9b2   : > { %8578 = vtanh.f32 %v7592_v61 }
 0x9b3   : > { %7657 = vst.msk [vmem:[%s13673_s27 + $0x18] sm:$0xff] %vm7653_vm8, %v7640_v41 }
 0x9b7   : > { %v7593_v48 = vpop.f32.mrf.mxu2 }
 0x9b8   : > { %v8579_v18 = vpop.eup %8578  ;;  %v7594_v24 = vadd.f32 %v13665_v26, %v7593_v48 }
 0x9b9   : > { %v7641_v8 = vmul.f32 0.01, %v8579_v18 }
 0x9ba   : > { %8580 = vtanh.f32 %v7594_v24 }
 0x9bb   : > { %7658 = vst.msk [vmem:[%s13673_s27 + $0x20] sm:$0xff] %vm7653_vm8, %v7641_v8 }
 0x9bf   : > { %v7596_v33 = vpop.f32.mrf.mxu2 }
 0x9c0   : > { %v8581_v6 = vpop.eup %8580  ;;  %v7597_v60 = vadd.f32 %v13665_v26, %v7596_v33 }
 0x9c1   : > { %v7642_v34 = vmul.f32 0.01, %v8581_v6 }
 0x9c2   : > { %8582 = vtanh.f32 %v7597_v60 }
 0x9c3   : > { %7659 = vst.msk [vmem:[%s13673_s27 + $0x28] sm:$0xff] %vm7653_vm8, %v7642_v34 }
 0x9c7   : > { %v7598_v46 = vpop.f32.mrf.mxu2 }
 0x9c8   : > { %v8583_v47 = vpop.eup %8582  ;;  %v7599_v7 = vadd.f32 %v13665_v26, %v7598_v46 }
 0x9c9   : > { %v7643_v10 = vmul.f32 0.01, %v8583_v47 }
 0x9ca   : > { %8584 = vtanh.f32 %v7599_v7 }
 0x9cb   : > { %7660 = vst.msk [vmem:[%s13673_s27 + $0x30] sm:$0xff] %vm7653_vm8, %v7643_v10 }
 0x9cf   : > { %v7601_v2 = vpop.f32.mrf.mxu2 }
 0x9d0   : > { %v8585_v59 = vpop.eup %8584  ;;  %v7602_v11 = vadd.f32 %v13665_v26, %v7601_v2 }
 0x9d1   : > { %v7644_v22 = vmul.f32 0.01, %v8585_v59 }
 0x9d2   : > { %8586 = vtanh.f32 %v7602_v11 }
 0x9d3   : > { %7661 = vst.msk [vmem:[%s13673_s27 + $0x38] sm:$0xff] %vm7653_vm8, %v7644_v22 }
 0x9d7   : > { %v7603_v39 = vpop.f32.mrf.mxu2 }
 0x9d8   : > { %v8587_v56 = vpop.eup %8586  ;;  %v7604_v43 = vadd.f32 %v13665_v26, %v7603_v39 }
 0x9d9   : > { %v7645_v0 = vmul.f32 0.01, %v8587_v56 }
 0x9da   : > { %8588 = vtanh.f32 %v7604_v43 }
 0x9db   : > { %7662 = vst.msk [vmem:[%s13673_s27 + $0x40] sm:$0xff] %vm7653_vm8, %v7645_v0 }
 0x9df   : > { %v7606_v44 = vpop.f32.mrf.mxu2 }
 0x9e0   : > { %v8589_v4 = vpop.eup %8588  ;;  %v7607_v1 = vadd.f32 %v13665_v26, %v7606_v44 }
 0x9e1   : > { %v7646_v36 = vmul.f32 0.01, %v8589_v4 }
 0x9e2   : > { %8590 = vtanh.f32 %v7607_v1 }
 0x9e3   : > { %7663 = vst.msk [vmem:[%s13673_s27 + $0x48] sm:$0xff] %vm7653_vm8, %v7646_v36 }
 0x9e7   : > { %v7608_v3 = vpop.f32.mrf.mxu2 }
 0x9e8   : > { %v8591_v5 = vpop.eup %8590  ;;  %v7609_v57 = vadd.f32 %v13665_v26, %v7608_v3 }
 0x9e9   : > { %v7647_v31 = vmul.f32 0.01, %v8591_v5 }
 0x9ea   : > { %8592 = vtanh.f32 %v7609_v57 }
 0x9eb   : > { %7664 = vst.msk [vmem:[%s13673_s27 + $0x50] sm:$0xff] %vm7653_vm8, %v7647_v31 }
 0x9ef   : > { %v7611_v20 = vpop.f32.mrf.mxu2 }
 0x9f0   : > { %v8593_v53 = vpop.eup %8592  ;;  %v7612_v15 = vadd.f32 %v13665_v26, %v7611_v20 }
 0x9f1   : > { %v7648_v12 = vmul.f32 0.01, %v8593_v53 }
 0x9f2   : > { %8594 = vtanh.f32 %v7612_v15 }
 0x9f3   : > { %7665 = vst.msk [vmem:[%s13673_s27 + $0x58] sm:$0xff] %vm7653_vm8, %v7648_v12 }
 0x9f7   : > { %v7613_v45 = vpop.f32.mrf.mxu2 }
 0x9f8   : > { %v8595_v32 = vpop.eup %8594  ;;  %v7614_v40 = vadd.f32 %v13665_v26, %v7613_v45 }
 0x9f9   : > { %v7649_v23 = vmul.f32 0.01, %v8595_v32 }
 0x9fa   : > { %8596 = vtanh.f32 %v7614_v40 }
 0x9fb   : > { %7666 = vst.msk [vmem:[%s13673_s27 + $0x60] sm:$0xff] %vm7653_vm8, %v7649_v23 }
 0x9ff   : > { %v7616_v62 = vpop.f32.mrf.mxu2 }
 0xa00   : > { %v8597_v63 = vpop.eup %8596  ;;  %v7617_v28 = vadd.f32 %v13665_v26, %v7616_v62 }
 0xa01   : > { %v7650_v52 = vmul.f32 0.01, %v8597_v63 }
 0xa02   : > { %8598 = vtanh.f32 %v7617_v28 }
 0xa03   : > { %7667 = vst.msk [vmem:[%s13673_s27 + $0x68] sm:$0xff] %vm7653_vm8, %v7650_v52 }
 0xa07   : > { %v7618_v58 = vpop.f32.mrf.mxu2 }
 0xa08   : > { %v8599_v51 = vpop.eup %8598  ;;  %v7619_v16 = vadd.f32 %v13665_v26, %v7618_v58 }
 0xa09   : > { %v7651_v50 = vmul.f32 0.01, %v8599_v51 }
 0xa0a   : > { %8600 = vtanh.f32 %v7619_v16 }
 0xa0b   : > { %7668 = vst.msk [vmem:[%s13673_s27 + $0x70] sm:$0xff] %vm7653_vm8, %v7651_v50 }
 0xa10   : > { %v8601_v9 = vpop.eup %8600 }
 0xa11   : > { %v7652_v38 = vmul.f32 0.01, %v8601_v9 }
 0xa13   : > { %7669 = vst.msk [vmem:[%s13673_s27 + $0x78] sm:$0xff] %vm7653_vm8, %v7652_v38 }
 0xa14 PF: > { %s17_s24 = sadd.s32 1, %s8614_s24  }
 0xa15   : > { %p14_p4 = scmp.ge.s32.totalorder %s17_s24, 6  }
 0xa17   :  { %16 = sbr.rel (!%p14_p4) target bundleno = 1 (0x1), region = 81 }

</bundles_post_ra>
